<compile_context>
chip_gen: v5e
topology: v5e:2x2
jax: 0.10.0
libtpu: 0.0.40
codegen_flags: <defaults>
</compile_context>

<pallas_src>
import functools

import numpy as np
import jax
import jax.numpy as jnp
from jax.experimental import pallas as pl
from jax.experimental.pallas import tpu as pltpu

NEG_INF = -1e30
BF16 = jnp.bfloat16


def _vmem():
    return pl.BlockSpec(memory_space=pltpu.MemorySpace.VMEM)


def _mm(spec, a, b):
    """MXU matmul: bf16 operands (no-op cast if already bf16), f32 accumulation."""
    return jnp.einsum(spec, a.astype(BF16), b.astype(BF16),
                      preferred_element_type=jnp.float32)


def _softmax(s, axis=-1):
    s = s - jnp.max(s, axis=axis, keepdims=True)
    p = jnp.exp(s)
    return p * pl.reciprocal(jnp.sum(p, axis=axis, keepdims=True), approx=True)


def _sigmoid(x):
    return pl.reciprocal(1.0 + jnp.exp(-x), approx=True)


# ----------------------------------------------------------------------------
# Kernel 1: the whole trunk (query + SCDM x2 + CQ x2 + resize + TGCM)
# ----------------------------------------------------------------------------
def _trunk_kernel(*refs, treedef, n_data, n_param, D, nse, scale):
    (wq_ref, cq_ref, qm_ref, vfeat_ref, afeat_ref, vm_ref, am_ref,
     pev_ref, pea_ref, rmat_ref) = refs[:n_data]
    p = jax.tree_util.tree_unflatten(treedef, refs[n_data:n_data + n_param])
    bin_ref, attw_ref, sef_scr = refs[n_data + n_param:]

    pq = p['query']
    pt = p['tgcm']

    # ---------------- Embedding projection + WeightedPool + SQAN ------------
    # TODO(synk): char Conv2d of the reference Embedding approximated by max
    # over chars (done in the wrapper before the gather result is passed in).
    qm = qm_ref[...]
    negq = (1.0 - qm)[:, :, None] * NEG_INF                      # [B,L,1]
    we = jnp.maximum(_mm('blk,kd->bld', wq_ref[...], pq['eww'][...])
                     + _mm('blk,kd->bld', cq_ref[...], pq['ewc'][...])
                     + pq['eb'][...], 0.0)                       # [B,L,D]
    we16 = we.astype(BF16)

    # WeightedPool -> sentence embedding (N=1 head as lane reduction)
    wsc = (jnp.sum(we * pq['wpw'][...], axis=-1, keepdims=True)
           + pq['wpb'][...] + negq)
    wp = _softmax(wsc, axis=1)
    sent = jnp.sum(wp * we, axis=1)                              # [B,D]
    sent16 = sent.astype(BF16)

    # SequentialQueryAttention (additive attention, nse entities)
    kh = _mm('bld,dh->blh', we16, pq['akcw'][0]) + pq['akcb'][0]  # hoisted
    prev = jnp.zeros_like(sent)
    for n in range(nse):                                          # static unroll
        q_n = _mm('bd,de->be', sent16, pq['gw'][n]) + pq['gb'][n]
        g_n = jnp.maximum(_mm('bd,de->be', q_n, pq['gupw'][0])
                          + _mm('bd,de->be', prev, pq['gupw'][1])
                          + pq['gub'][...], 0.0)
        c_h = _mm('bd,dh->bh', g_n, pq['akcw'][1]) + pq['akcb'][1]
        sc = (jnp.sum(jnp.tanh(kh + c_h[:, None, :]) * pq['aow'][...],
                      axis=-1, keepdims=True)
              + pq['aob'][...] + negq)                            # [B,L,1]
        aw = _softmax(sc, axis=1)
        att_f = jnp.sum(aw * we, axis=1)                          # [B,D]
        prev = att_f
        sef_scr[:, n, :] = att_f
        attw_ref[:, n, :] = aw[..., 0]                            # lane-dense out

    se = sef_scr[...]                                             # [B,nse,D]
    se16 = se.astype(BF16)

    vm = vm_ref[...]
    am = am_ref[...]

    # ---------------- VisualProjection + PE + SCDM ---------------------------
    # TODO(synk): SCDM reference modulates batch-norm statistics; implemented
    # as semantic-attention conditioned (gamma, beta) gating of a layer-norm.
    def scdm(xfeat_ref, pe_ref, mask, prm):
        x = (_mm('btf,fd->btd', xfeat_ref[...], prm['aw'][...])
             + prm['ab'][...] + pe_ref[...])
        x16 = x.astype(BF16)
        q = _mm('btd,de->bte', x16, prm['qkw'][0]) + prm['qkb'][0]
        k = _mm('bnd,de->bne', se16, prm['qkw'][1]) + prm['qkb'][1]
        pr = _softmax(_mm('bte,bne->btn', q, k) * scale, axis=-1)
        ctx = _mm('btn,bnd->btd', pr, se16)
        gbv = jnp.tanh(_mm('btd,de->bte', ctx, prm['gbw'][...]) + prm['gbb'][...])
        gamma = gbv[:, :, :D]
        beta = gbv[:, :, D:]
        mu = jnp.mean(x, axis=-1, keepdims=True)
        var = jnp.mean(jnp.square(x - mu), axis=-1, keepdims=True)
        ln = (x - mu) * jax.lax.rsqrt(var + 1e-6)
        return (gamma * ln + beta) * mask[:, :, None]

    vf = scdm(vfeat_ref, pev_ref, vm, p['scdm_v'])                # [B,T,D]
    af = scdm(afeat_ref, pea_ref, am, p['scdm_a'])                # [B,Ta,D]

    # ---------------- CQAttention + projection + VideoTextConcatenate --------
    def cq_cat(c, cmask, prm):
        c16 = c.astype(BF16)
        # trilinear similarity  S[b,t,l] = w4c.c_t + w4q.q_l + (c_t*w4mlu).q_l
        part1 = jnp.sum(c * prm['w4'][0], axis=-1, keepdims=True)       # [B,T,1]
        part2 = jnp.sum(se * prm['w4'][1], axis=-1)[:, None, :]         # [B,1,L]
        part3 = _mm('btd,bld->btl', c * prm['w4'][2], se16)             # [B,T,L]
        s = part1 + part2 + part3
        s1 = _softmax(s, axis=-1)                   # query axis (q_mask is None)
        s2 = _softmax(s + (1.0 - cmask)[:, :, None] * NEG_INF, axis=1)
        c2q = _mm('btl,bld->btd', s1, se16)
        tt = _mm('btl,bsl->bts', s1, s2)
        q2c = _mm('bts,bsd->btd', tt, c16)
        # projection of [c, c2q, c*c2q, c*q2c] without materializing the concat
        h = (_mm('btd,de->bte', c16, prm['pw'][0])
             + _mm('btd,de->bte', c2q, prm['pw'][1])
             + _mm('btd,de->bte', c * c2q, prm['pw'][2])
             + _mm('btd,de->bte', c * q2c, prm['pw'][3])
             + prm['pb'][...])
        # VideoTextConcatenate: cat(h, tiled sentence) @ W + b  (split weight)
        return (_mm('btd,de->bte', h, prm['ccw'][0])
                + (_mm('bd,de->be', sent16, prm['ccw'][1])
                   + prm['ccb'][...])[:, None, :])

    vf = cq_cat(vf, vm, p['cq_v'])                                # [B,T,D]
    af = cq_cat(af, am, p['cq_a'])                                # [B,Ta,D]
    old_vf = vf

    # ---------------- audio rescale (folded jax.image.resize) ----------------
    # af_r[b,t,d] = sum_s R[b,t,s] * af[b,s,d]  with R the linear-interp matrix.
    af_r = _mm('bts,bsd->btd', rmat_ref[...], af)                 # [B,T,D]

    # ---------------- TGCM fusion --------------------------------------------
    # TODO(synk): TextGuidedCluesMiner source unavailable; implemented as
    # text-gated bidirectional cross-modal attention fusion.
    # TODO(synk): both attention directions are key-masked with v_mask (the
    # reference rescales a_mask but never passes it to tgcm).
    neg = (1.0 - vm)[:, None, :] * NEG_INF
    mcol = vm[:, :, None]
    text = jnp.mean(se, axis=1)                                   # [B,D]
    gate = _sigmoid(_mm('bd,de->be', text, pt['gw'][...]) + pt['gb'][...])
    g = gate[:, None, :]
    vf16 = vf.astype(BF16)
    ar16 = af_r.astype(BF16)
    qkv_v = _mm('btd,de->bte', vf16, pt['vw'][...]) + pt['vb'][...]   # [B,T,2D]
    qka_a = _mm('btd,de->bte', ar16, pt['aw'][...]) + pt['ab'][...]   # [B,T,2D]
    qv, kv = qkv_v[:, :, :D], qkv_v[:, :, D:]
    qa, ka = qka_a[:, :, :D], qka_a[:, :, D:]
    p1 = _softmax(_mm('bte,bse->bts', qv, ka) * scale + neg, axis=-1)
    v2a = _mm('bts,bsd->btd', p1, ar16)
    p2 = _softmax(_mm('bte,bse->bts', qa, kv) * scale + neg, axis=-1)
    a2v = _mm('bts,bsd->btd', p2, vf16)
    features = (vf + g * v2a) * mcol + (af_r + g * a2v) * mcol

    bin_ref[0] = features                                         # AV branch in
    bin_ref[1] = old_vf                                           # V branch in


def trunk_pallas(params, w_emb, c_emb, q_mask, vfeat, afeat, v_mask, a_mask,
                 pe_v, pe_a, rmat):
    B, T, _ = vfeat.shape
    L = w_emb.shape[1]
    nse = params['query']['gw'].shape[0]
    D = params['query']['gupw'].shape[-1]
    scale = 1.0 / float(np.sqrt(D))

    p_trunk = {'query': params['query'],
               'scdm_v': params['scdm_v'], 'scdm_a': params['scdm_a'],
               'cq_v': params['cq_v'], 'cq_a': params['cq_a'],
               'tgcm': params['tgcm']}
    flat, treedef = jax.tree_util.tree_flatten(p_trunk)
    data = (w_emb, c_emb, q_mask, vfeat, afeat, v_mask, a_mask, pe_v, pe_a, rmat)
    n_data, n_param = len(data), len(flat)

    kern = functools.partial(_trunk_kernel, treedef=treedef, n_data=n_data,
                             n_param=n_param, D=D, nse=nse, scale=scale)
    branch_in, se_attw = pl.pallas_call(
        kern,
        out_shape=(jax.ShapeDtypeStruct((2, B, T, D), jnp.float32),
                   jax.ShapeDtypeStruct((B, nse, L), jnp.float32)),
        in_specs=[_vmem()] * (n_data + n_param),
        out_specs=(_vmem(), _vmem()),
        scratch_shapes=[pltpu.VMEM((B, nse, D), jnp.float32)],
        compiler_params=pltpu.CompilerParams(vmem_limit_bytes=32 * 1024 * 1024),
    )(*data, *flat)
    return branch_in, se_attw


# ----------------------------------------------------------------------------
# Kernel 2: GlobalAttention + ConditionedPredictor, grid=(2 branches,) parallel
# ----------------------------------------------------------------------------
def _branch_kernel(x_ref, m_ref, qkvw_ref, qkvb_ref, ow_ref, ob_ref,
                   h1w_ref, h1b_ref, h2w_ref, h2b_ref, o_ref, *, D, scale):
    m = m_ref[...]
    neg = (1.0 - m)[:, None, :] * NEG_INF
    mcol = m[:, :, None]
    neglog = (1.0 - m) * NEG_INF

    def gattn(x16, blk):
        qkv = _mm('btd,de->bte', x16, qkvw_ref[blk]) + qkvb_ref[blk]   # [B,T,3D]
        q, k, v = qkv[:, :, :D], qkv[:, :, D:2 * D], qkv[:, :, 2 * D:]
        pr = _softmax(_mm('bte,bse->bts', q, k) * scale + neg, axis=-1)
        o = _mm('bts,bsd->btd', pr, v)
        return (_mm('btd,de->bte', o, ow_ref[blk]) + ob_ref[blk]) * mcol

    feat = gattn(x_ref[...].astype(BF16), 0)      # GlobalAttention (1 head here)
    feat16 = feat.astype(BF16)
    # TODO(synk): ConditionedPredictor's BiLSTM encoders replaced by masked
    # self-attention encoders (no clean Pallas LSTM); start/end heads kept.
    s_feat = gattn(feat16, 1)
    s_feat16 = s_feat.astype(BF16)
    e_feat = gattn(s_feat16, 2)
    e_feat16 = e_feat.astype(BF16)

    s_hidden = jnp.maximum(_mm('btd,de->bte', s_feat16, h1w_ref[0])
                           + _mm('btd,de->bte', feat16, h1w_ref[1])
                           + h1b_ref[0], 0.0)
    e_hidden = jnp.maximum(_mm('btd,de->bte', e_feat16, h1w_ref[2])
                           + _mm('btd,de->bte', s_feat16, h1w_ref[3])
                           + h1b_ref[1], 0.0)
    # start/end heads as lane reductions; lane-dense (B,T) stores
    o_ref[0] = jnp.sum(s_hidden * h2w_ref[0], axis=-1) + h2b_ref[0] + neglog
    o_ref[1] = jnp.sum(e_hidden * h2w_ref[1], axis=-1) + h2b_ref[1] + neglog


def branch_pallas(p_stacked, x_stacked, v_mask):
    nbr, B, T, D = x_stacked.shape
    scale = 1.0 / float(np.sqrt(D))

    def lead(arr):
        nd = arr.ndim
        return pl.BlockSpec((None,) + arr.shape[1:],
                            lambda i, _nd=nd: (i,) + (0,) * (_nd - 1))

    return pl.pallas_call(
        functools.partial(_branch_kernel, D=D, scale=scale),
        grid=(nbr,),
        out_shape=jax.ShapeDtypeStruct((nbr, 2, B, T), jnp.float32),
        in_specs=[lead(x_stacked),
                  pl.BlockSpec(v_mask.shape, lambda i: (0, 0)),
                  lead(p_stacked['qkvw']), lead(p_stacked['qkvb']),
                  lead(p_stacked['ow']), lead(p_stacked['ob']),
                  lead(p_stacked['h1w']), lead(p_stacked['h1b']),
                  lead(p_stacked['h2w']), lead(p_stacked['h2b'])],
        out_specs=pl.BlockSpec((None, 2, B, T), lambda i: (i, 0, 0, 0)),
        compiler_params=pltpu.CompilerParams(
            dimension_semantics=("parallel",),          # v7x: one TC per branch
            vmem_limit_bytes=32 * 1024 * 1024),
    )(x_stacked, v_mask, p_stacked['qkvw'], p_stacked['qkvb'],
      p_stacked['ow'], p_stacked['ob'], p_stacked['h1w'], p_stacked['h1b'],
      p_stacked['h2w'], p_stacked['h2b'])


# ----------------------------------------------------------------------------
# Plain-JAX glue
# ----------------------------------------------------------------------------
def positional_encoding(T, D):
    pos = np.arange(T)[:, None].astype(np.float32)
    i = np.arange(D)[None, :].astype(np.float32)
    angle_rates = 1.0 / np.power(10000.0, (2.0 * (i // 2)) / float(D))
    angles = pos * angle_rates
    pe = np.zeros((T, D), dtype=np.float32)
    pe[:, 0::2] = np.sin(angles[:, 0::2])
    pe[:, 1::2] = np.cos(angles[:, 1::2])
    return jnp.asarray(pe)


def adpnet_forward(params, word_ids, char_ids, video_features, v_mask,
                   audio_features, a_mask, q_mask):
    B, T, _ = video_features.shape
    Ta = audio_features.shape[1]
    D = params['query']['gupw'].shape[-1]

    # Embedding lookups (XLA gathers).  TODO(synk): char-level Conv2d of the
    # reference Embedding approximated by max over chars.
    w_emb = jnp.take(params['word_vectors'], word_ids, axis=0)
    c_emb = jnp.max(jnp.take(params['char_emb'], char_ids, axis=0), axis=2)

    pe_v = positional_encoding(T, D)[None]                      # [1,T,D]
    pe_a = positional_encoding(Ta, D)[None]                     # [1,Ta,D]
    # Linear-interpolation matrix equivalent to jax.image.resize on axis 1;
    # the resize itself happens inside the trunk kernel as one matmul.
    # TODO(synk): `rescale` source unavailable; linear interpolation assumed.
    rmat = jax.image.resize(jnp.eye(Ta, dtype=jnp.float32), (T, Ta),
                            method='linear')
    rmat = jnp.broadcast_to(rmat, (B, T, Ta))
    # NOTE: the reference also rescales a_mask here but never uses the result
    # afterwards (tgcm takes v_mask); dead work dropped.

    branch_in, se_attw = trunk_pallas(params, w_emb, c_emb, q_mask,
                                      video_features, audio_features,
                                      v_mask, a_mask, pe_v, pe_a, rmat)

    p_br = jax.tree_util.tree_map(lambda a, b: jnp.stack([a, b]),
                                  params['branch_av'], params['branch_v'])
    logits = branch_pallas(p_br, branch_in, v_mask)             # [2,2,B,T]
    start_av, end_av = logits[0, 0], logits[0, 1]
    start_v, end_v = logits[1, 0], logits[1, 1]
    return start_av, end_av, start_v, end_v, se_attw


# ----------------------------------------------------------------------------
# Deterministic parameter init (xavier_uniform weights, zero biases).
# Matmul weights are created in bf16 once; reduction row-vectors / biases
# stay f32 (VPU / accumulator path).
# ----------------------------------------------------------------------------
class Configs:
    def __init__(self):
        self.word_size = 100
        self.char_size = 20
        self.dim = 32
        self.word_dim = 16
        self.char_dim = 8
        self.video_feature_dim = 64
        self.audio_feature_dim = 48
        self.drop_rate = 0.1
        self.nse_num = 3
        self.num_heads = 8
        self.max_pos_len = 16
        self.gpu_idx = 0


def init_params(key, cfg):
    keys = iter(jax.random.split(key, 256))

    def xavier(shape, fan_in, fan_out, dtype=jnp.float32):
        limit = float(np.sqrt(6.0 / (fan_in + fan_out)))
        return jax.random.uniform(next(keys), shape, jnp.float32,
                                  -limit, limit).astype(dtype)

    def w(din, dout):
        return xavier((din, dout), din, dout, BF16)

    def wstack(n, din, dout):
        return jnp.stack([w(din, dout) for _ in range(n)])

    def rowvec(d):
        return xavier((1, d), d, 1)

    def b(*shape):
        return jnp.zeros(shape, jnp.float32)

    D = cfg.dim
    H = D // 2
    nse = cfg.nse_num

    p = {}
    p['word_vectors'] = 0.1 * jax.random.normal(next(keys),
                                                (cfg.word_size, cfg.word_dim))
    p['char_emb'] = 0.1 * jax.random.normal(next(keys),
                                            (cfg.char_size, cfg.char_dim))

    p['query'] = {
        'eww': w(cfg.word_dim, D), 'ewc': w(cfg.char_dim, D), 'eb': b(1, D),
        'wpw': rowvec(D), 'wpb': b(1, 1),
        'gw': wstack(nse, D, D), 'gb': b(nse, 1, D),
        'gupw': wstack(2, D, D), 'gub': b(1, D),
        'akcw': wstack(2, D, H), 'akcb': b(2, 1, H),
        'aow': rowvec(H), 'aob': b(1, 1),
    }

    def scdm_p(fin):
        return {'aw': w(fin, D), 'ab': b(1, D),
                'qkw': wstack(2, D, D), 'qkb': b(2, 1, D),
                'gbw': jnp.concatenate([w(D, D), w(D, D)], axis=1),  # gamma|beta
                'gbb': b(1, 2 * D)}

    p['scdm_v'] = scdm_p(cfg.video_feature_dim)
    p['scdm_a'] = scdm_p(cfg.audio_feature_dim)

    def cq_p():
        return {'w4': jnp.stack([rowvec(D) for _ in range(3)]),     # w4c,w4q,w4mlu
                'pw': jnp.stack([xavier((D, D), 4 * D, D, BF16) for _ in range(4)]),
                'pb': b(1, D),
                'ccw': jnp.stack([xavier((D, D), 2 * D, D, BF16) for _ in range(2)]),
                'ccb': b(1, D)}

    p['cq_v'] = cq_p()
    p['cq_a'] = cq_p()

    p['tgcm'] = {'gw': w(D, D), 'gb': b(1, D),
                 'vw': jnp.concatenate([w(D, D), w(D, D)], axis=1), 'vb': b(1, 2 * D),
                 'aw': jnp.concatenate([w(D, D), w(D, D)], axis=1), 'ab': b(1, 2 * D)}

    def branch_p():
        return {
            # 3 attention blocks: packed q|k|v (D,3D) + output proj (D,D)
            'qkvw': jnp.stack([jnp.concatenate([w(D, D) for _ in range(3)], axis=1)
                               for _ in range(3)]),
            'qkvb': b(3, 1, 3 * D),
            'ow': wstack(3, D, D), 'ob': b(3, 1, D),
            # start/end hidden heads: 2 heads x 2 input parts
            'h1w': jnp.stack([xavier((D, D), 2 * D, D, BF16) for _ in range(4)]),
            'h1b': b(2, 1, D),
            'h2w': jnp.stack([rowvec(D) for _ in range(2)]),
            'h2b': b(2, 1, 1),
        }

    p['branch_av'] = branch_p()
    p['branch_v'] = branch_p()
    return p


# ----------------------------------------------------------------------------
if __name__ == "__main__":
    cfg = Configs()
    key = jax.random.PRNGKey(0)
    pkey, dkey = jax.random.split(key)
    params = init_params(pkey, cfg)

    B, T, Ta, L, C = 2, 16, 8, 8, 6
    ks = jax.random.split(dkey, 8)
    word_ids = jax.random.randint(ks[0], (B, L), 0, cfg.word_size)
    char_ids = jax.random.randint(ks[1], (B, L, C), 0, cfg.char_size)
    video_features = jax.random.normal(ks[2], (B, T, cfg.video_feature_dim), jnp.float32)
    audio_features = jax.random.normal(ks[3], (B, Ta, cfg.audio_feature_dim), jnp.float32)
    v_mask = jnp.concatenate([jnp.ones((B, T - 2)), jnp.zeros((B, 2))], axis=1)
    a_mask = jnp.ones((B, Ta), jnp.float32)
    q_mask = jnp.concatenate([jnp.ones((B, L - 1)), jnp.zeros((B, 1))], axis=1)

    fwd = jax.jit(adpnet_forward)
    outs = fwd(params, word_ids, char_ids, video_features, v_mask,
               audio_features, a_mask, q_mask)
    outs = jax.block_until_ready(outs)

    start_av, end_av, start_v, end_v, se_attw = outs
    assert start_av.shape == (B, T) and end_av.shape == (B, T)
    assert start_v.shape == (B, T) and end_v.shape == (B, T)
    assert se_attw.shape == (B, cfg.nse_num, L)
    assert all(bool(jnp.all(jnp.isfinite(o))) for o in outs)
    print("KERNEL_OK")
</pallas_src>

<mosaic_0001>
module attributes {stable_mosaic.version = 11 : i64} {
  func.func @_trunk_kernel(%arg0: memref<2x8x16xf32, #tpu.memory_space<vmem>>, %arg1: memref<2x8x8xf32, #tpu.memory_space<vmem>>, %arg2: memref<2x8xf32, #tpu.memory_space<vmem>>, %arg3: memref<2x16x64xf32, #tpu.memory_space<vmem>>, %arg4: memref<2x8x48xf32, #tpu.memory_space<vmem>>, %arg5: memref<2x16xf32, #tpu.memory_space<vmem>>, %arg6: memref<2x8xf32, #tpu.memory_space<vmem>>, %arg7: memref<1x16x32xf32, #tpu.memory_space<vmem>>, %arg8: memref<1x8x32xf32, #tpu.memory_space<vmem>>, %arg9: memref<2x16x8xf32, #tpu.memory_space<vmem>>, %arg10: memref<1x32xf32, #tpu.memory_space<vmem>>, %arg11: memref<2x32x32xbf16, #tpu.memory_space<vmem>>, %arg12: memref<1x32xf32, #tpu.memory_space<vmem>>, %arg13: memref<4x32x32xbf16, #tpu.memory_space<vmem>>, %arg14: memref<3x1x32xf32, #tpu.memory_space<vmem>>, %arg15: memref<1x32xf32, #tpu.memory_space<vmem>>, %arg16: memref<2x32x32xbf16, #tpu.memory_space<vmem>>, %arg17: memref<1x32xf32, #tpu.memory_space<vmem>>, %arg18: memref<4x32x32xbf16, #tpu.memory_space<vmem>>, %arg19: memref<3x1x32xf32, #tpu.memory_space<vmem>>, %arg20: memref<2x1x16xf32, #tpu.memory_space<vmem>>, %arg21: memref<2x32x16xbf16, #tpu.memory_space<vmem>>, %arg22: memref<1x1xf32, #tpu.memory_space<vmem>>, %arg23: memref<1x16xf32, #tpu.memory_space<vmem>>, %arg24: memref<1x32xf32, #tpu.memory_space<vmem>>, %arg25: memref<8x32xbf16, #tpu.memory_space<vmem>>, %arg26: memref<16x32xbf16, #tpu.memory_space<vmem>>, %arg27: memref<3x1x32xf32, #tpu.memory_space<vmem>>, %arg28: memref<1x32xf32, #tpu.memory_space<vmem>>, %arg29: memref<2x32x32xbf16, #tpu.memory_space<vmem>>, %arg30: memref<3x32x32xbf16, #tpu.memory_space<vmem>>, %arg31: memref<1x1xf32, #tpu.memory_space<vmem>>, %arg32: memref<1x32xf32, #tpu.memory_space<vmem>>, %arg33: memref<1x32xf32, #tpu.memory_space<vmem>>, %arg34: memref<48x32xbf16, #tpu.memory_space<vmem>>, %arg35: memref<1x64xf32, #tpu.memory_space<vmem>>, %arg36: memref<32x64xbf16, #tpu.memory_space<vmem>>, %arg37: memref<2x1x32xf32, #tpu.memory_space<vmem>>, %arg38: memref<2x32x32xbf16, #tpu.memory_space<vmem>>, %arg39: memref<1x32xf32, #tpu.memory_space<vmem>>, %arg40: memref<64x32xbf16, #tpu.memory_space<vmem>>, %arg41: memref<1x64xf32, #tpu.memory_space<vmem>>, %arg42: memref<32x64xbf16, #tpu.memory_space<vmem>>, %arg43: memref<2x1x32xf32, #tpu.memory_space<vmem>>, %arg44: memref<2x32x32xbf16, #tpu.memory_space<vmem>>, %arg45: memref<1x64xf32, #tpu.memory_space<vmem>>, %arg46: memref<32x64xbf16, #tpu.memory_space<vmem>>, %arg47: memref<1x32xf32, #tpu.memory_space<vmem>>, %arg48: memref<32x32xbf16, #tpu.memory_space<vmem>>, %arg49: memref<1x64xf32, #tpu.memory_space<vmem>>, %arg50: memref<32x64xbf16, #tpu.memory_space<vmem>>, %arg51: memref<2x2x16x32xf32, #tpu.memory_space<vmem>>, %arg52: memref<2x3x8xf32, #tpu.memory_space<vmem>>, %arg53: memref<2x3x32xf32, #tpu.memory_space<vmem>>) attributes {dimension_semantics = [], scalar_prefetch = 0 : i64, scratch_operands = 1 : i64, tpu.core_type = #tpu.core_type<tc>} {
    %c0 = arith.constant 0 : index
    %c0_0 = arith.constant 0 : index
    %0 = vector.load %arg2[%c0, %c0_0] : memref<2x8xf32, #tpu.memory_space<vmem>>, vector<2x8xf32>
    %cst = arith.constant 1.000000e+00 : f32
    %1 = vector.broadcast %cst : f32 to vector<2x8xf32>
    %2 = arith.subf %1, %0 : vector<2x8xf32>
    %3 = vector.shape_cast %2 : vector<2x8xf32> to vector<2x8x1xf32>
    %cst_1 = arith.constant -1.000000e+30 : f32
    %4 = vector.broadcast %cst_1 : f32 to vector<2x8x1xf32>
    %5 = arith.mulf %3, %4 : vector<2x8x1xf32>
    %c0_2 = arith.constant 0 : index
    %c0_3 = arith.constant 0 : index
    %c0_4 = arith.constant 0 : index
    %6 = vector.load %arg0[%c0_2, %c0_3, %c0_4] : memref<2x8x16xf32, #tpu.memory_space<vmem>>, vector<2x8x16xf32>
    %c0_5 = arith.constant 0 : index
    %c0_6 = arith.constant 0 : index
    %7 = vector.load %arg26[%c0_5, %c0_6] : memref<16x32xbf16, #tpu.memory_space<vmem>>, vector<16x32xbf16>
    %8 = arith.truncf %6 : vector<2x8x16xf32> to vector<2x8x16xbf16>
    "tpu.trace_start"() <{level = 10 : i32, message = "blk,kd->bld"}> : () -> ()
    %cst_7 = arith.constant dense<0.000000e+00> : vector<2x8x32xf32>
    %9 = tpu.matmul %8, %7, %cst_7 {dimension_numbers = #tpu.dot_dimension_numbers<[2], [0], [0, 1], [1], [0, 0, 0, 1, 1, 1], [], []>} : vector<2x8x16xbf16>, vector<16x32xbf16>, vector<2x8x32xf32> -> vector<2x8x32xf32>
    "tpu.trace_stop"() : () -> ()
    %c0_8 = arith.constant 0 : index
    %c0_9 = arith.constant 0 : index
    %c0_10 = arith.constant 0 : index
    %10 = vector.load %arg1[%c0_8, %c0_9, %c0_10] : memref<2x8x8xf32, #tpu.memory_space<vmem>>, vector<2x8x8xf32>
    %c0_11 = arith.constant 0 : index
    %c0_12 = arith.constant 0 : index
    %11 = vector.load %arg25[%c0_11, %c0_12] : memref<8x32xbf16, #tpu.memory_space<vmem>>, vector<8x32xbf16>
    %12 = arith.truncf %10 : vector<2x8x8xf32> to vector<2x8x8xbf16>
    "tpu.trace_start"() <{level = 10 : i32, message = "blk,kd->bld"}> : () -> ()
    %cst_13 = arith.constant dense<0.000000e+00> : vector<2x8x32xf32>
    %13 = tpu.matmul %12, %11, %cst_13 {dimension_numbers = #tpu.dot_dimension_numbers<[2], [0], [0, 1], [1], [0, 0, 0, 1, 1, 1], [], []>} : vector<2x8x8xbf16>, vector<8x32xbf16>, vector<2x8x32xf32> -> vector<2x8x32xf32>
    "tpu.trace_stop"() : () -> ()
    %14 = arith.addf %9, %13 : vector<2x8x32xf32>
    %c0_14 = arith.constant 0 : index
    %c0_15 = arith.constant 0 : index
    %15 = vector.load %arg24[%c0_14, %c0_15] : memref<1x32xf32, #tpu.memory_space<vmem>>, vector<1x32xf32>
    %16 = vector.shape_cast %15 : vector<1x32xf32> to vector<1x1x32xf32>
    %17 = vector.broadcast %16 : vector<1x1x32xf32> to vector<2x8x32xf32>
    %18 = arith.addf %14, %17 : vector<2x8x32xf32>
    %cst_16 = arith.constant 0.000000e+00 : f32
    %19 = vector.broadcast %cst_16 : f32 to vector<2x8x32xf32>
    %20 = arith.maximumf %18, %19 : vector<2x8x32xf32>
    %21 = arith.truncf %20 : vector<2x8x32xf32> to vector<2x8x32xbf16>
    %c0_17 = arith.constant 0 : index
    %c0_18 = arith.constant 0 : index
    %22 = vector.load %arg32[%c0_17, %c0_18] : memref<1x32xf32, #tpu.memory_space<vmem>>, vector<1x32xf32>
    %23 = vector.shape_cast %22 : vector<1x32xf32> to vector<1x1x32xf32>
    %24 = vector.broadcast %23 : vector<1x1x32xf32> to vector<2x8x32xf32>
    %25 = arith.mulf %20, %24 : vector<2x8x32xf32>
    %cst_19 = arith.constant dense<0.000000e+00> : vector<2x8xf32>
    %26 = vector.multi_reduction <add>, %25, %cst_19 [2] : vector<2x8x32xf32> to vector<2x8xf32>
    %27 = vector.shape_cast %26 : vector<2x8xf32> to vector<2x8x1xf32>
    %c0_20 = arith.constant 0 : index
    %c0_21 = arith.constant 0 : index
    %28 = vector.load %arg31[%c0_20, %c0_21] : memref<1x1xf32, #tpu.memory_space<vmem>>, vector<1x1xf32>
    %29 = vector.shape_cast %28 : vector<1x1xf32> to vector<1x1x1xf32>
    %30 = vector.broadcast %29 : vector<1x1x1xf32> to vector<2x8x1xf32>
    %31 = arith.addf %27, %30 : vector<2x8x1xf32>
    %32 = arith.addf %31, %5 : vector<2x8x1xf32>
    %cst_22 = arith.constant dense<0xFF800000> : vector<2x1xf32>
    %33 = vector.multi_reduction <maximumf>, %32, %cst_22 [1] : vector<2x8x1xf32> to vector<2x1xf32>
    %34 = vector.shape_cast %33 : vector<2x1xf32> to vector<2x1x1xf32>
    %35 = vector.broadcast %34 : vector<2x1x1xf32> to vector<2x8x1xf32>
    %36 = arith.subf %32, %35 : vector<2x8x1xf32>
    %37 = math.exp %36 : vector<2x8x1xf32>
    %cst_23 = arith.constant dense<0.000000e+00> : vector<2x1xf32>
    %38 = vector.multi_reduction <add>, %37, %cst_23 [1] : vector<2x8x1xf32> to vector<2x1xf32>
    %39 = vector.shape_cast %38 : vector<2x1xf32> to vector<2x1x1xf32>
    %40 = tpu.reciprocal %39 {approx = true} : vector<2x1x1xf32> -> vector<2x1x1xf32>
    %41 = vector.broadcast %40 : vector<2x1x1xf32> to vector<2x8x1xf32>
    %42 = arith.mulf %37, %41 : vector<2x8x1xf32>
    %43 = vector.broadcast %42 : vector<2x8x1xf32> to vector<2x8x32xf32>
    %44 = arith.mulf %43, %20 : vector<2x8x32xf32>
    %cst_24 = arith.constant dense<0.000000e+00> : vector<2x32xf32>
    %45 = vector.multi_reduction <add>, %44, %cst_24 [1] : vector<2x8x32xf32> to vector<2x32xf32>
    %46 = arith.truncf %45 : vector<2x32xf32> to vector<2x32xbf16>
    %c0_25 = arith.constant 0 : index
    %c0_26 = arith.constant 0 : index
    %c0_27 = arith.constant 0 : index
    %47 = vector.load %arg21[%c0_25, %c0_26, %c0_27] : memref<2x32x16xbf16, #tpu.memory_space<vmem>>, vector<1x32x16xbf16>
    %48 = vector.shape_cast %47 : vector<1x32x16xbf16> to vector<32x16xbf16>
    "tpu.trace_start"() <{level = 10 : i32, message = "bld,dh->blh"}> : () -> ()
    %cst_28 = arith.constant dense<0.000000e+00> : vector<2x8x16xf32>
    %49 = tpu.matmul %21, %48, %cst_28 {dimension_numbers = #tpu.dot_dimension_numbers<[2], [0], [0, 1], [1], [0, 0, 0, 1, 1, 1], [], []>} : vector<2x8x32xbf16>, vector<32x16xbf16>, vector<2x8x16xf32> -> vector<2x8x16xf32>
    "tpu.trace_stop"() : () -> ()
    %c0_29 = arith.constant 0 : index
    %c0_30 = arith.constant 0 : index
    %c0_31 = arith.constant 0 : index
    %50 = vector.load %arg20[%c0_29, %c0_30, %c0_31] : memref<2x1x16xf32, #tpu.memory_space<vmem>>, vector<1x1x16xf32>
    %51 = vector.shape_cast %50 : vector<1x1x16xf32> to vector<1x16xf32>
    %52 = vector.shape_cast %51 : vector<1x16xf32> to vector<1x1x16xf32>
    %53 = vector.broadcast %52 : vector<1x1x16xf32> to vector<2x8x16xf32>
    %54 = arith.addf %49, %53 : vector<2x8x16xf32>
    %cst_32 = arith.constant 0.000000e+00 : f32
    %55 = vector.broadcast %cst_32 : f32 to vector<2x32xf32>
    %c0_33 = arith.constant 0 : index
    %c0_34 = arith.constant 0 : index
    %c0_35 = arith.constant 0 : index
    %56 = vector.load %arg30[%c0_33, %c0_34, %c0_35] : memref<3x32x32xbf16, #tpu.memory_space<vmem>>, vector<1x32x32xbf16>
    %57 = vector.shape_cast %56 : vector<1x32x32xbf16> to vector<32x32xbf16>
    "tpu.trace_start"() <{level = 10 : i32, message = "bd,de->be"}> : () -> ()
    %cst_36 = arith.constant dense<0.000000e+00> : vector<2x32xf32>
    %58 = tpu.matmul %46, %57, %cst_36 {dimension_numbers = #tpu.dot_dimension_numbers<[1], [0], [0], [1], [0, 0, 1, 1], [], []>} : vector<2x32xbf16>, vector<32x32xbf16>, vector<2x32xf32> -> vector<2x32xf32>
    "tpu.trace_stop"() : () -> ()
    %c0_37 = arith.constant 0 : index
    %c0_38 = arith.constant 0 : index
    %c0_39 = arith.constant 0 : index
    %59 = vector.load %arg27[%c0_37, %c0_38, %c0_39] : memref<3x1x32xf32, #tpu.memory_space<vmem>>, vector<1x1x32xf32>
    %60 = vector.shape_cast %59 : vector<1x1x32xf32> to vector<1x32xf32>
    %61 = vector.broadcast %60 : vector<1x32xf32> to vector<2x32xf32>
    %62 = arith.addf %58, %61 : vector<2x32xf32>
    %c0_40 = arith.constant 0 : index
    %c0_41 = arith.constant 0 : index
    %c0_42 = arith.constant 0 : index
    %63 = vector.load %arg29[%c0_40, %c0_41, %c0_42] : memref<2x32x32xbf16, #tpu.memory_space<vmem>>, vector<1x32x32xbf16>
    %64 = vector.shape_cast %63 : vector<1x32x32xbf16> to vector<32x32xbf16>
    %65 = arith.truncf %62 : vector<2x32xf32> to vector<2x32xbf16>
    "tpu.trace_start"() <{level = 10 : i32, message = "bd,de->be"}> : () -> ()
    %cst_43 = arith.constant dense<0.000000e+00> : vector<2x32xf32>
    %66 = tpu.matmul %65, %64, %cst_43 {dimension_numbers = #tpu.dot_dimension_numbers<[1], [0], [0], [1], [0, 0, 1, 1], [], []>} : vector<2x32xbf16>, vector<32x32xbf16>, vector<2x32xf32> -> vector<2x32xf32>
    "tpu.trace_stop"() : () -> ()
    %c1 = arith.constant 1 : index
    %c0_44 = arith.constant 0 : index
    %c0_45 = arith.constant 0 : index
    %67 = vector.load %arg29[%c1, %c0_44, %c0_45] : memref<2x32x32xbf16, #tpu.memory_space<vmem>>, vector<1x32x32xbf16>
    %68 = vector.shape_cast %67 : vector<1x32x32xbf16> to vector<32x32xbf16>
    %69 = arith.truncf %55 : vector<2x32xf32> to vector<2x32xbf16>
    "tpu.trace_start"() <{level = 10 : i32, message = "bd,de->be"}> : () -> ()
    %cst_46 = arith.constant dense<0.000000e+00> : vector<2x32xf32>
    %70 = tpu.matmul %69, %68, %cst_46 {dimension_numbers = #tpu.dot_dimension_numbers<[1], [0], [0], [1], [0, 0, 1, 1], [], []>} : vector<2x32xbf16>, vector<32x32xbf16>, vector<2x32xf32> -> vector<2x32xf32>
    "tpu.trace_stop"() : () -> ()
    %71 = arith.addf %66, %70 : vector<2x32xf32>
    %c0_47 = arith.constant 0 : index
    %c0_48 = arith.constant 0 : index
    %72 = vector.load %arg28[%c0_47, %c0_48] : memref<1x32xf32, #tpu.memory_space<vmem>>, vector<1x32xf32>
    %73 = vector.broadcast %72 : vector<1x32xf32> to vector<2x32xf32>
    %74 = arith.addf %71, %73 : vector<2x32xf32>
    %cst_49 = arith.constant 0.000000e+00 : f32
    %75 = vector.broadcast %cst_49 : f32 to vector<2x32xf32>
    %76 = arith.maximumf %74, %75 : vector<2x32xf32>
    %c1_50 = arith.constant 1 : index
    %c0_51 = arith.constant 0 : index
    %c0_52 = arith.constant 0 : index
    %77 = vector.load %arg21[%c1_50, %c0_51, %c0_52] : memref<2x32x16xbf16, #tpu.memory_space<vmem>>, vector<1x32x16xbf16>
    %78 = vector.shape_cast %77 : vector<1x32x16xbf16> to vector<32x16xbf16>
    %79 = arith.truncf %76 : vector<2x32xf32> to vector<2x32xbf16>
    "tpu.trace_start"() <{level = 10 : i32, message = "bd,dh->bh"}> : () -> ()
    %cst_53 = arith.constant dense<0.000000e+00> : vector<2x16xf32>
    %80 = tpu.matmul %79, %78, %cst_53 {dimension_numbers = #tpu.dot_dimension_numbers<[1], [0], [0], [1], [0, 0, 1, 1], [], []>} : vector<2x32xbf16>, vector<32x16xbf16>, vector<2x16xf32> -> vector<2x16xf32>
    "tpu.trace_stop"() : () -> ()
    %c1_54 = arith.constant 1 : index
    %c0_55 = arith.constant 0 : index
    %c0_56 = arith.constant 0 : index
    %81 = vector.load %arg20[%c1_54, %c0_55, %c0_56] : memref<2x1x16xf32, #tpu.memory_space<vmem>>, vector<1x1x16xf32>
    %82 = vector.shape_cast %81 : vector<1x1x16xf32> to vector<1x16xf32>
    %83 = vector.broadcast %82 : vector<1x16xf32> to vector<2x16xf32>
    %84 = arith.addf %80, %83 : vector<2x16xf32>
    %85 = vector.shape_cast %84 : vector<2x16xf32> to vector<2x1x16xf32>
    %86 = vector.broadcast %85 : vector<2x1x16xf32> to vector<2x8x16xf32>
    %87 = arith.addf %54, %86 : vector<2x8x16xf32>
    %88 = math.tanh %87 : vector<2x8x16xf32>
    %c0_57 = arith.constant 0 : index
    %c0_58 = arith.constant 0 : index
    %89 = vector.load %arg23[%c0_57, %c0_58] : memref<1x16xf32, #tpu.memory_space<vmem>>, vector<1x16xf32>
    %90 = vector.shape_cast %89 : vector<1x16xf32> to vector<1x1x16xf32>
    %91 = vector.broadcast %90 : vector<1x1x16xf32> to vector<2x8x16xf32>
    %92 = arith.mulf %88, %91 : vector<2x8x16xf32>
    %cst_59 = arith.constant dense<0.000000e+00> : vector<2x8xf32>
    %93 = vector.multi_reduction <add>, %92, %cst_59 [2] : vector<2x8x16xf32> to vector<2x8xf32>
    %94 = vector.shape_cast %93 : vector<2x8xf32> to vector<2x8x1xf32>
    %c0_60 = arith.constant 0 : index
    %c0_61 = arith.constant 0 : index
    %95 = vector.load %arg22[%c0_60, %c0_61] : memref<1x1xf32, #tpu.memory_space<vmem>>, vector<1x1xf32>
    %96 = vector.shape_cast %95 : vector<1x1xf32> to vector<1x1x1xf32>
    %97 = vector.broadcast %96 : vector<1x1x1xf32> to vector<2x8x1xf32>
    %98 = arith.addf %94, %97 : vector<2x8x1xf32>
    %99 = arith.addf %98, %5 : vector<2x8x1xf32>
    %cst_62 = arith.constant dense<0xFF800000> : vector<2x1xf32>
    %100 = vector.multi_reduction <maximumf>, %99, %cst_62 [1] : vector<2x8x1xf32> to vector<2x1xf32>
    %101 = vector.shape_cast %100 : vector<2x1xf32> to vector<2x1x1xf32>
    %102 = vector.broadcast %101 : vector<2x1x1xf32> to vector<2x8x1xf32>
    %103 = arith.subf %99, %102 : vector<2x8x1xf32>
    %104 = math.exp %103 : vector<2x8x1xf32>
    %cst_63 = arith.constant dense<0.000000e+00> : vector<2x1xf32>
    %105 = vector.multi_reduction <add>, %104, %cst_63 [1] : vector<2x8x1xf32> to vector<2x1xf32>
    %106 = vector.shape_cast %105 : vector<2x1xf32> to vector<2x1x1xf32>
    %107 = tpu.reciprocal %106 {approx = true} : vector<2x1x1xf32> -> vector<2x1x1xf32>
    %108 = vector.broadcast %107 : vector<2x1x1xf32> to vector<2x8x1xf32>
    %109 = arith.mulf %104, %108 : vector<2x8x1xf32>
    %110 = vector.broadcast %109 : vector<2x8x1xf32> to vector<2x8x32xf32>
    %111 = arith.mulf %110, %20 : vector<2x8x32xf32>
    %cst_64 = arith.constant dense<0.000000e+00> : vector<2x32xf32>
    %112 = vector.multi_reduction <add>, %111, %cst_64 [1] : vector<2x8x32xf32> to vector<2x32xf32>
    %c0_65 = arith.constant 0 : index
    %c0_66 = arith.constant 0 : index
    %c0_67 = arith.constant 0 : index
    %113 = vector.load %arg53[%c0_65, %c0_66, %c0_67] : memref<2x3x32xf32, #tpu.memory_space<vmem>>, vector<2x1x32xf32>
    %114 = vector.shape_cast %113 : vector<2x1x32xf32> to vector<2x32xf32>
    %115 = vector.shape_cast %112 : vector<2x32xf32> to vector<2x1x32xf32>
    tpu.vector_store %arg53[%c0_65, %c0_66, %c0_67], %115 {strides = array<i32>} : memref<2x3x32xf32, #tpu.memory_space<vmem>>, vector<2x1x32xf32>,
    %116 = vector.shape_cast %109 : vector<2x8x1xf32> to vector<2x8xf32>
    %c0_68 = arith.constant 0 : index
    %c0_69 = arith.constant 0 : index
    %c0_70 = arith.constant 0 : index
    %117 = vector.load %arg52[%c0_68, %c0_69, %c0_70] : memref<2x3x8xf32, #tpu.memory_space<vmem>>, vector<2x1x8xf32>
    %118 = vector.shape_cast %117 : vector<2x1x8xf32> to vector<2x8xf32>
    %119 = vector.shape_cast %116 : vector<2x8xf32> to vector<2x1x8xf32>
    tpu.vector_store %arg52[%c0_68, %c0_69, %c0_70], %119 {strides = array<i32>} : memref<2x3x8xf32, #tpu.memory_space<vmem>>, vector<2x1x8xf32>,
    %c1_71 = arith.constant 1 : index
    %c0_72 = arith.constant 0 : index
    %c0_73 = arith.constant 0 : index
    %120 = vector.load %arg30[%c1_71, %c0_72, %c0_73] : memref<3x32x32xbf16, #tpu.memory_space<vmem>>, vector<1x32x32xbf16>
    %121 = vector.shape_cast %120 : vector<1x32x32xbf16> to vector<32x32xbf16>
    "tpu.trace_start"() <{level = 10 : i32, message = "bd,de->be"}> : () -> ()
    %cst_74 = arith.constant dense<0.000000e+00> : vector<2x32xf32>
    %122 = tpu.matmul %46, %121, %cst_74 {dimension_numbers = #tpu.dot_dimension_numbers<[1], [0], [0], [1], [0, 0, 1, 1], [], []>} : vector<2x32xbf16>, vector<32x32xbf16>, vector<2x32xf32> -> vector<2x32xf32>
    "tpu.trace_stop"() : () -> ()
    %c1_75 = arith.constant 1 : index
    %c0_76 = arith.constant 0 : index
    %c0_77 = arith.constant 0 : index
    %123 = vector.load %arg27[%c1_75, %c0_76, %c0_77] : memref<3x1x32xf32, #tpu.memory_space<vmem>>, vector<1x1x32xf32>
    %124 = vector.shape_cast %123 : vector<1x1x32xf32> to vector<1x32xf32>
    %125 = vector.broadcast %124 : vector<1x32xf32> to vector<2x32xf32>
    %126 = arith.addf %122, %125 : vector<2x32xf32>
    %c0_78 = arith.constant 0 : index
    %c0_79 = arith.constant 0 : index
    %c0_80 = arith.constant 0 : index
    %127 = vector.load %arg29[%c0_78, %c0_79, %c0_80] : memref<2x32x32xbf16, #tpu.memory_space<vmem>>, vector<1x32x32xbf16>
    %128 = vector.shape_cast %127 : vector<1x32x32xbf16> to vector<32x32xbf16>
    %129 = arith.truncf %126 : vector<2x32xf32> to vector<2x32xbf16>
    "tpu.trace_start"() <{level = 10 : i32, message = "bd,de->be"}> : () -> ()
    %cst_81 = arith.constant dense<0.000000e+00> : vector<2x32xf32>
    %130 = tpu.matmul %129, %128, %cst_81 {dimension_numbers = #tpu.dot_dimension_numbers<[1], [0], [0], [1], [0, 0, 1, 1], [], []>} : vector<2x32xbf16>, vector<32x32xbf16>, vector<2x32xf32> -> vector<2x32xf32>
    "tpu.trace_stop"() : () -> ()
    %c1_82 = arith.constant 1 : index
    %c0_83 = arith.constant 0 : index
    %c0_84 = arith.constant 0 : index
    %131 = vector.load %arg29[%c1_82, %c0_83, %c0_84] : memref<2x32x32xbf16, #tpu.memory_space<vmem>>, vector<1x32x32xbf16>
    %132 = vector.shape_cast %131 : vector<1x32x32xbf16> to vector<32x32xbf16>
    %133 = arith.truncf %112 : vector<2x32xf32> to vector<2x32xbf16>
    "tpu.trace_start"() <{level = 10 : i32, message = "bd,de->be"}> : () -> ()
    %cst_85 = arith.constant dense<0.000000e+00> : vector<2x32xf32>
    %134 = tpu.matmul %133, %132, %cst_85 {dimension_numbers = #tpu.dot_dimension_numbers<[1], [0], [0], [1], [0, 0, 1, 1], [], []>} : vector<2x32xbf16>, vector<32x32xbf16>, vector<2x32xf32> -> vector<2x32xf32>
    "tpu.trace_stop"() : () -> ()
    %135 = arith.addf %130, %134 : vector<2x32xf32>
    %c0_86 = arith.constant 0 : index
    %c0_87 = arith.constant 0 : index
    %136 = vector.load %arg28[%c0_86, %c0_87] : memref<1x32xf32, #tpu.memory_space<vmem>>, vector<1x32xf32>
    %137 = vector.broadcast %136 : vector<1x32xf32> to vector<2x32xf32>
    %138 = arith.addf %135, %137 : vector<2x32xf32>
    %cst_88 = arith.constant 0.000000e+00 : f32
    %139 = vector.broadcast %cst_88 : f32 to vector<2x32xf32>
    %140 = arith.maximumf %138, %139 : vector<2x32xf32>
    %c1_89 = arith.constant 1 : index
    %c0_90 = arith.constant 0 : index
    %c0_91 = arith.constant 0 : index
    %141 = vector.load %arg21[%c1_89, %c0_90, %c0_91] : memref<2x32x16xbf16, #tpu.memory_space<vmem>>, vector<1x32x16xbf16>
    %142 = vector.shape_cast %141 : vector<1x32x16xbf16> to vector<32x16xbf16>
    %143 = arith.truncf %140 : vector<2x32xf32> to vector<2x32xbf16>
    "tpu.trace_start"() <{level = 10 : i32, message = "bd,dh->bh"}> : () -> ()
    %cst_92 = arith.constant dense<0.000000e+00> : vector<2x16xf32>
    %144 = tpu.matmul %143, %142, %cst_92 {dimension_numbers = #tpu.dot_dimension_numbers<[1], [0], [0], [1], [0, 0, 1, 1], [], []>} : vector<2x32xbf16>, vector<32x16xbf16>, vector<2x16xf32> -> vector<2x16xf32>
    "tpu.trace_stop"() : () -> ()
    %c1_93 = arith.constant 1 : index
    %c0_94 = arith.constant 0 : index
    %c0_95 = arith.constant 0 : index
    %145 = vector.load %arg20[%c1_93, %c0_94, %c0_95] : memref<2x1x16xf32, #tpu.memory_space<vmem>>, vector<1x1x16xf32>
    %146 = vector.shape_cast %145 : vector<1x1x16xf32> to vector<1x16xf32>
    %147 = vector.broadcast %146 : vector<1x16xf32> to vector<2x16xf32>
    %148 = arith.addf %144, %147 : vector<2x16xf32>
    %149 = vector.shape_cast %148 : vector<2x16xf32> to vector<2x1x16xf32>
    %150 = vector.broadcast %149 : vector<2x1x16xf32> to vector<2x8x16xf32>
    %151 = arith.addf %54, %150 : vector<2x8x16xf32>
    %152 = math.tanh %151 : vector<2x8x16xf32>
    %c0_96 = arith.constant 0 : index
    %c0_97 = arith.constant 0 : index
    %153 = vector.load %arg23[%c0_96, %c0_97] : memref<1x16xf32, #tpu.memory_space<vmem>>, vector<1x16xf32>
    %154 = vector.shape_cast %153 : vector<1x16xf32> to vector<1x1x16xf32>
    %155 = vector.broadcast %154 : vector<1x1x16xf32> to vector<2x8x16xf32>
    %156 = arith.mulf %152, %155 : vector<2x8x16xf32>
    %cst_98 = arith.constant dense<0.000000e+00> : vector<2x8xf32>
    %157 = vector.multi_reduction <add>, %156, %cst_98 [2] : vector<2x8x16xf32> to vector<2x8xf32>
    %158 = vector.shape_cast %157 : vector<2x8xf32> to vector<2x8x1xf32>
    %c0_99 = arith.constant 0 : index
    %c0_100 = arith.constant 0 : index
    %159 = vector.load %arg22[%c0_99, %c0_100] : memref<1x1xf32, #tpu.memory_space<vmem>>, vector<1x1xf32>
    %160 = vector.shape_cast %159 : vector<1x1xf32> to vector<1x1x1xf32>
    %161 = vector.broadcast %160 : vector<1x1x1xf32> to vector<2x8x1xf32>
    %162 = arith.addf %158, %161 : vector<2x8x1xf32>
    %163 = arith.addf %162, %5 : vector<2x8x1xf32>
    %cst_101 = arith.constant dense<0xFF800000> : vector<2x1xf32>
    %164 = vector.multi_reduction <maximumf>, %163, %cst_101 [1] : vector<2x8x1xf32> to vector<2x1xf32>
    %165 = vector.shape_cast %164 : vector<2x1xf32> to vector<2x1x1xf32>
    %166 = vector.broadcast %165 : vector<2x1x1xf32> to vector<2x8x1xf32>
    %167 = arith.subf %163, %166 : vector<2x8x1xf32>
    %168 = math.exp %167 : vector<2x8x1xf32>
    %cst_102 = arith.constant dense<0.000000e+00> : vector<2x1xf32>
    %169 = vector.multi_reduction <add>, %168, %cst_102 [1] : vector<2x8x1xf32> to vector<2x1xf32>
    %170 = vector.shape_cast %169 : vector<2x1xf32> to vector<2x1x1xf32>
    %171 = tpu.reciprocal %170 {approx = true} : vector<2x1x1xf32> -> vector<2x1x1xf32>
    %172 = vector.broadcast %171 : vector<2x1x1xf32> to vector<2x8x1xf32>
    %173 = arith.mulf %168, %172 : vector<2x8x1xf32>
    %174 = vector.broadcast %173 : vector<2x8x1xf32> to vector<2x8x32xf32>
    %175 = arith.mulf %174, %20 : vector<2x8x32xf32>
    %cst_103 = arith.constant dense<0.000000e+00> : vector<2x32xf32>
    %176 = vector.multi_reduction <add>, %175, %cst_103 [1] : vector<2x8x32xf32> to vector<2x32xf32>
    %c0_104 = arith.constant 0 : index
    %c1_105 = arith.constant 1 : index
    %c0_106 = arith.constant 0 : index
    %177 = vector.load %arg53[%c0_104, %c1_105, %c0_106] : memref<2x3x32xf32, #tpu.memory_space<vmem>>, vector<2x1x32xf32>
    %178 = vector.shape_cast %177 : vector<2x1x32xf32> to vector<2x32xf32>
    %179 = vector.shape_cast %176 : vector<2x32xf32> to vector<2x1x32xf32>
    tpu.vector_store %arg53[%c0_104, %c1_105, %c0_106], %179 {strides = array<i32>} : memref<2x3x32xf32, #tpu.memory_space<vmem>>, vector<2x1x32xf32>,
    %180 = vector.shape_cast %173 : vector<2x8x1xf32> to vector<2x8xf32>
    %c0_107 = arith.constant 0 : index
    %c1_108 = arith.constant 1 : index
    %c0_109 = arith.constant 0 : index
    %181 = vector.load %arg52[%c0_107, %c1_108, %c0_109] : memref<2x3x8xf32, #tpu.memory_space<vmem>>, vector<2x1x8xf32>
    %182 = vector.shape_cast %181 : vector<2x1x8xf32> to vector<2x8xf32>
    %183 = vector.shape_cast %180 : vector<2x8xf32> to vector<2x1x8xf32>
    tpu.vector_store %arg52[%c0_107, %c1_108, %c0_109], %183 {strides = array<i32>} : memref<2x3x8xf32, #tpu.memory_space<vmem>>, vector<2x1x8xf32>,
    %c2 = arith.constant 2 : index
    %c0_110 = arith.constant 0 : index
    %c0_111 = arith.constant 0 : index
    %184 = vector.load %arg30[%c2, %c0_110, %c0_111] : memref<3x32x32xbf16, #tpu.memory_space<vmem>>, vector<1x32x32xbf16>
    %185 = vector.shape_cast %184 : vector<1x32x32xbf16> to vector<32x32xbf16>
    "tpu.trace_start"() <{level = 10 : i32, message = "bd,de->be"}> : () -> ()
    %cst_112 = arith.constant dense<0.000000e+00> : vector<2x32xf32>
    %186 = tpu.matmul %46, %185, %cst_112 {dimension_numbers = #tpu.dot_dimension_numbers<[1], [0], [0], [1], [0, 0, 1, 1], [], []>} : vector<2x32xbf16>, vector<32x32xbf16>, vector<2x32xf32> -> vector<2x32xf32>
    "tpu.trace_stop"() : () -> ()
    %c2_113 = arith.constant 2 : index
    %c0_114 = arith.constant 0 : index
    %c0_115 = arith.constant 0 : index
    %187 = vector.load %arg27[%c2_113, %c0_114, %c0_115] : memref<3x1x32xf32, #tpu.memory_space<vmem>>, vector<1x1x32xf32>
    %188 = vector.shape_cast %187 : vector<1x1x32xf32> to vector<1x32xf32>
    %189 = vector.broadcast %188 : vector<1x32xf32> to vector<2x32xf32>
    %190 = arith.addf %186, %189 : vector<2x32xf32>
    %c0_116 = arith.constant 0 : index
    %c0_117 = arith.constant 0 : index
    %c0_118 = arith.constant 0 : index
    %191 = vector.load %arg29[%c0_116, %c0_117, %c0_118] : memref<2x32x32xbf16, #tpu.memory_space<vmem>>, vector<1x32x32xbf16>
    %192 = vector.shape_cast %191 : vector<1x32x32xbf16> to vector<32x32xbf16>
    %193 = arith.truncf %190 : vector<2x32xf32> to vector<2x32xbf16>
    "tpu.trace_start"() <{level = 10 : i32, message = "bd,de->be"}> : () -> ()
    %cst_119 = arith.constant dense<0.000000e+00> : vector<2x32xf32>
    %194 = tpu.matmul %193, %192, %cst_119 {dimension_numbers = #tpu.dot_dimension_numbers<[1], [0], [0], [1], [0, 0, 1, 1], [], []>} : vector<2x32xbf16>, vector<32x32xbf16>, vector<2x32xf32> -> vector<2x32xf32>
    "tpu.trace_stop"() : () -> ()
    %c1_120 = arith.constant 1 : index
    %c0_121 = arith.constant 0 : index
    %c0_122 = arith.constant 0 : index
    %195 = vector.load %arg29[%c1_120, %c0_121, %c0_122] : memref<2x32x32xbf16, #tpu.memory_space<vmem>>, vector<1x32x32xbf16>
    %196 = vector.shape_cast %195 : vector<1x32x32xbf16> to vector<32x32xbf16>
    %197 = arith.truncf %176 : vector<2x32xf32> to vector<2x32xbf16>
    "tpu.trace_start"() <{level = 10 : i32, message = "bd,de->be"}> : () -> ()
    %cst_123 = arith.constant dense<0.000000e+00> : vector<2x32xf32>
    %198 = tpu.matmul %197, %196, %cst_123 {dimension_numbers = #tpu.dot_dimension_numbers<[1], [0], [0], [1], [0, 0, 1, 1], [], []>} : vector<2x32xbf16>, vector<32x32xbf16>, vector<2x32xf32> -> vector<2x32xf32>
    "tpu.trace_stop"() : () -> ()
    %199 = arith.addf %194, %198 : vector<2x32xf32>
    %c0_124 = arith.constant 0 : index
    %c0_125 = arith.constant 0 : index
    %200 = vector.load %arg28[%c0_124, %c0_125] : memref<1x32xf32, #tpu.memory_space<vmem>>, vector<1x32xf32>
    %201 = vector.broadcast %200 : vector<1x32xf32> to vector<2x32xf32>
    %202 = arith.addf %199, %201 : vector<2x32xf32>
    %cst_126 = arith.constant 0.000000e+00 : f32
    %203 = vector.broadcast %cst_126 : f32 to vector<2x32xf32>
    %204 = arith.maximumf %202, %203 : vector<2x32xf32>
    %c1_127 = arith.constant 1 : index
    %c0_128 = arith.constant 0 : index
    %c0_129 = arith.constant 0 : index
    %205 = vector.load %arg21[%c1_127, %c0_128, %c0_129] : memref<2x32x16xbf16, #tpu.memory_space<vmem>>, vector<1x32x16xbf16>
    %206 = vector.shape_cast %205 : vector<1x32x16xbf16> to vector<32x16xbf16>
    %207 = arith.truncf %204 : vector<2x32xf32> to vector<2x32xbf16>
    "tpu.trace_start"() <{level = 10 : i32, message = "bd,dh->bh"}> : () -> ()
    %cst_130 = arith.constant dense<0.000000e+00> : vector<2x16xf32>
    %208 = tpu.matmul %207, %206, %cst_130 {dimension_numbers = #tpu.dot_dimension_numbers<[1], [0], [0], [1], [0, 0, 1, 1], [], []>} : vector<2x32xbf16>, vector<32x16xbf16>, vector<2x16xf32> -> vector<2x16xf32>
    "tpu.trace_stop"() : () -> ()
    %c1_131 = arith.constant 1 : index
    %c0_132 = arith.constant 0 : index
    %c0_133 = arith.constant 0 : index
    %209 = vector.load %arg20[%c1_131, %c0_132, %c0_133] : memref<2x1x16xf32, #tpu.memory_space<vmem>>, vector<1x1x16xf32>
    %210 = vector.shape_cast %209 : vector<1x1x16xf32> to vector<1x16xf32>
    %211 = vector.broadcast %210 : vector<1x16xf32> to vector<2x16xf32>
    %212 = arith.addf %208, %211 : vector<2x16xf32>
    %213 = vector.shape_cast %212 : vector<2x16xf32> to vector<2x1x16xf32>
    %214 = vector.broadcast %213 : vector<2x1x16xf32> to vector<2x8x16xf32>
    %215 = arith.addf %54, %214 : vector<2x8x16xf32>
    %216 = math.tanh %215 : vector<2x8x16xf32>
    %c0_134 = arith.constant 0 : index
    %c0_135 = arith.constant 0 : index
    %217 = vector.load %arg23[%c0_134, %c0_135] : memref<1x16xf32, #tpu.memory_space<vmem>>, vector<1x16xf32>
    %218 = vector.shape_cast %217 : vector<1x16xf32> to vector<1x1x16xf32>
    %219 = vector.broadcast %218 : vector<1x1x16xf32> to vector<2x8x16xf32>
    %220 = arith.mulf %216, %219 : vector<2x8x16xf32>
    %cst_136 = arith.constant dense<0.000000e+00> : vector<2x8xf32>
    %221 = vector.multi_reduction <add>, %220, %cst_136 [2] : vector<2x8x16xf32> to vector<2x8xf32>
    %222 = vector.shape_cast %221 : vector<2x8xf32> to vector<2x8x1xf32>
    %c0_137 = arith.constant 0 : index
    %c0_138 = arith.constant 0 : index
    %223 = vector.load %arg22[%c0_137, %c0_138] : memref<1x1xf32, #tpu.memory_space<vmem>>, vector<1x1xf32>
    %224 = vector.shape_cast %223 : vector<1x1xf32> to vector<1x1x1xf32>
    %225 = vector.broadcast %224 : vector<1x1x1xf32> to vector<2x8x1xf32>
    %226 = arith.addf %222, %225 : vector<2x8x1xf32>
    %227 = arith.addf %226, %5 : vector<2x8x1xf32>
    %cst_139 = arith.constant dense<0xFF800000> : vector<2x1xf32>
    %228 = vector.multi_reduction <maximumf>, %227, %cst_139 [1] : vector<2x8x1xf32> to vector<2x1xf32>
    %229 = vector.shape_cast %228 : vector<2x1xf32> to vector<2x1x1xf32>
    %230 = vector.broadcast %229 : vector<2x1x1xf32> to vector<2x8x1xf32>
    %231 = arith.subf %227, %230 : vector<2x8x1xf32>
    %232 = math.exp %231 : vector<2x8x1xf32>
    %cst_140 = arith.constant dense<0.000000e+00> : vector<2x1xf32>
    %233 = vector.multi_reduction <add>, %232, %cst_140 [1] : vector<2x8x1xf32> to vector<2x1xf32>
    %234 = vector.shape_cast %233 : vector<2x1xf32> to vector<2x1x1xf32>
    %235 = tpu.reciprocal %234 {approx = true} : vector<2x1x1xf32> -> vector<2x1x1xf32>
    %236 = vector.broadcast %235 : vector<2x1x1xf32> to vector<2x8x1xf32>
    %237 = arith.mulf %232, %236 : vector<2x8x1xf32>
    %238 = vector.broadcast %237 : vector<2x8x1xf32> to vector<2x8x32xf32>
    %239 = arith.mulf %238, %20 : vector<2x8x32xf32>
    %cst_141 = arith.constant dense<0.000000e+00> : vector<2x32xf32>
    %240 = vector.multi_reduction <add>, %239, %cst_141 [1] : vector<2x8x32xf32> to vector<2x32xf32>
    %c0_142 = arith.constant 0 : index
    %c2_143 = arith.constant 2 : index
    %c0_144 = arith.constant 0 : index
    %241 = vector.load %arg53[%c0_142, %c2_143, %c0_144] : memref<2x3x32xf32, #tpu.memory_space<vmem>>, vector<2x1x32xf32>
    %242 = vector.shape_cast %241 : vector<2x1x32xf32> to vector<2x32xf32>
    %243 = vector.shape_cast %240 : vector<2x32xf32> to vector<2x1x32xf32>
    tpu.vector_store %arg53[%c0_142, %c2_143, %c0_144], %243 {strides = array<i32>} : memref<2x3x32xf32, #tpu.memory_space<vmem>>, vector<2x1x32xf32>,
    %244 = vector.shape_cast %237 : vector<2x8x1xf32> to vector<2x8xf32>
    %c0_145 = arith.constant 0 : index
    %c2_146 = arith.constant 2 : index
    %c0_147 = arith.constant 0 : index
    %245 = vector.load %arg52[%c0_145, %c2_146, %c0_147] : memref<2x3x8xf32, #tpu.memory_space<vmem>>, vector<2x1x8xf32>
    %246 = vector.shape_cast %245 : vector<2x1x8xf32> to vector<2x8xf32>
    %247 = vector.shape_cast %244 : vector<2x8xf32> to vector<2x1x8xf32>
    tpu.vector_store %arg52[%c0_145, %c2_146, %c0_147], %247 {strides = array<i32>} : memref<2x3x8xf32, #tpu.memory_space<vmem>>, vector<2x1x8xf32>,
    %c0_148 = arith.constant 0 : index
    %c0_149 = arith.constant 0 : index
    %c0_150 = arith.constant 0 : index
    %248 = vector.load %arg53[%c0_148, %c0_149, %c0_150] : memref<2x3x32xf32, #tpu.memory_space<vmem>>, vector<2x3x32xf32>
    %249 = arith.truncf %248 : vector<2x3x32xf32> to vector<2x3x32xbf16>
    %c0_151 = arith.constant 0 : index
    %c0_152 = arith.constant 0 : index
    %250 = vector.load %arg5[%c0_151, %c0_152] : memref<2x16xf32, #tpu.memory_space<vmem>>, vector<2x16xf32>
    %c0_153 = arith.constant 0 : index
    %c0_154 = arith.constant 0 : index
    %251 = vector.load %arg6[%c0_153, %c0_154] : memref<2x8xf32, #tpu.memory_space<vmem>>, vector<2x8xf32>
    %c0_155 = arith.constant 0 : index
    %c0_156 = arith.constant 0 : index
    %c0_157 = arith.constant 0 : index
    %252 = vector.load %arg3[%c0_155, %c0_156, %c0_157] : memref<2x16x64xf32, #tpu.memory_space<vmem>>, vector<2x16x64xf32>
    %c0_158 = arith.constant 0 : index
    %c0_159 = arith.constant 0 : index
    %253 = vector.load %arg40[%c0_158, %c0_159] : memref<64x32xbf16, #tpu.memory_space<vmem>>, vector<64x32xbf16>
    %254 = arith.truncf %252 : vector<2x16x64xf32> to vector<2x16x64xbf16>
    "tpu.trace_start"() <{level = 10 : i32, message = "btf,fd->btd"}> : () -> ()
    %cst_160 = arith.constant dense<0.000000e+00> : vector<2x16x32xf32>
    %255 = tpu.matmul %254, %253, %cst_160 {dimension_numbers = #tpu.dot_dimension_numbers<[2], [0], [0, 1], [1], [0, 0, 0, 1, 1, 1], [], []>} : vector<2x16x64xbf16>, vector<64x32xbf16>, vector<2x16x32xf32> -> vector<2x16x32xf32>
    "tpu.trace_stop"() : () -> ()
    %c0_161 = arith.constant 0 : index
    %c0_162 = arith.constant 0 : index
    %256 = vector.load %arg39[%c0_161, %c0_162] : memref<1x32xf32, #tpu.memory_space<vmem>>, vector<1x32xf32>
    %257 = vector.shape_cast %256 : vector<1x32xf32> to vector<1x1x32xf32>
    %258 = vector.broadcast %257 : vector<1x1x32xf32> to vector<2x16x32xf32>
    %259 = arith.addf %255, %258 : vector<2x16x32xf32>
    %c0_163 = arith.constant 0 : index
    %c0_164 = arith.constant 0 : index
    %c0_165 = arith.constant 0 : index
    %260 = vector.load %arg7[%c0_163, %c0_164, %c0_165] : memref<1x16x32xf32, #tpu.memory_space<vmem>>, vector<1x16x32xf32>
    %261 = vector.broadcast %260 : vector<1x16x32xf32> to vector<2x16x32xf32>
    %262 = arith.addf %259, %261 : vector<2x16x32xf32>
    %263 = arith.truncf %262 : vector<2x16x32xf32> to vector<2x16x32xbf16>
    %c0_166 = arith.constant 0 : index
    %c0_167 = arith.constant 0 : index
    %c0_168 = arith.constant 0 : index
    %264 = vector.load %arg44[%c0_166, %c0_167, %c0_168] : memref<2x32x32xbf16, #tpu.memory_space<vmem>>, vector<1x32x32xbf16>
    %265 = vector.shape_cast %264 : vector<1x32x32xbf16> to vector<32x32xbf16>
    "tpu.trace_start"() <{level = 10 : i32, message = "btd,de->bte"}> : () -> ()
    %cst_169 = arith.constant dense<0.000000e+00> : vector<2x16x32xf32>
    %266 = tpu.matmul %263, %265, %cst_169 {dimension_numbers = #tpu.dot_dimension_numbers<[2], [0], [0, 1], [1], [0, 0, 0, 1, 1, 1], [], []>} : vector<2x16x32xbf16>, vector<32x32xbf16>, vector<2x16x32xf32> -> vector<2x16x32xf32>
    "tpu.trace_stop"() : () -> ()
    %c0_170 = arith.constant 0 : index
    %c0_171 = arith.constant 0 : index
    %c0_172 = arith.constant 0 : index
    %267 = vector.load %arg43[%c0_170, %c0_171, %c0_172] : memref<2x1x32xf32, #tpu.memory_space<vmem>>, vector<1x1x32xf32>
    %268 = vector.shape_cast %267 : vector<1x1x32xf32> to vector<1x32xf32>
    %269 = vector.shape_cast %268 : vector<1x32xf32> to vector<1x1x32xf32>
    %270 = vector.broadcast %269 : vector<1x1x32xf32> to vector<2x16x32xf32>
    %271 = arith.addf %266, %270 : vector<2x16x32xf32>
    %c1_173 = arith.constant 1 : index
    %c0_174 = arith.constant 0 : index
    %c0_175 = arith.constant 0 : index
    %272 = vector.load %arg44[%c1_173, %c0_174, %c0_175] : memref<2x32x32xbf16, #tpu.memory_space<vmem>>, vector<1x32x32xbf16>
    %273 = vector.shape_cast %272 : vector<1x32x32xbf16> to vector<32x32xbf16>
    "tpu.trace_start"() <{level = 10 : i32, message = "bnd,de->bne"}> : () -> ()
    %cst_176 = arith.constant dense<0.000000e+00> : vector<2x3x32xf32>
    %274 = tpu.matmul %249, %273, %cst_176 {dimension_numbers = #tpu.dot_dimension_numbers<[2], [0], [0, 1], [1], [0, 0, 0, 1, 1, 1], [], []>} : vector<2x3x32xbf16>, vector<32x32xbf16>, vector<2x3x32xf32> -> vector<2x3x32xf32>
    "tpu.trace_stop"() : () -> ()
    %c1_177 = arith.constant 1 : index
    %c0_178 = arith.constant 0 : index
    %c0_179 = arith.constant 0 : index
    %275 = vector.load %arg43[%c1_177, %c0_178, %c0_179] : memref<2x1x32xf32, #tpu.memory_space<vmem>>, vector<1x1x32xf32>
    %276 = vector.shape_cast %275 : vector<1x1x32xf32> to vector<1x32xf32>
    %277 = vector.shape_cast %276 : vector<1x32xf32> to vector<1x1x32xf32>
    %278 = vector.broadcast %277 : vector<1x1x32xf32> to vector<2x3x32xf32>
    %279 = arith.addf %274, %278 : vector<2x3x32xf32>
    %280 = arith.truncf %271 : vector<2x16x32xf32> to vector<2x16x32xbf16>
    %281 = arith.truncf %279 : vector<2x3x32xf32> to vector<2x3x32xbf16>
    "tpu.trace_start"() <{level = 10 : i32, message = "bte,bne->btn"}> : () -> ()
    %cst_180 = arith.constant dense<0.000000e+00> : vector<2x16x3xf32>
    %282 = tpu.matmul %280, %281, %cst_180 {dimension_numbers = #tpu.dot_dimension_numbers<[2], [2], [1], [1], [0, 0, 0, 1, 1, 1], [0], [0]>} : vector<2x16x32xbf16>, vector<2x3x32xbf16>, vector<2x16x3xf32> -> vector<2x16x3xf32>
    "tpu.trace_stop"() : () -> ()
    %cst_181 = arith.constant 0.176776692 : f32
    %283 = vector.broadcast %cst_181 : f32 to vector<2x16x3xf32>
    %284 = arith.mulf %282, %283 : vector<2x16x3xf32>
    %cst_182 = arith.constant dense<0xFF800000> : vector<2x16xf32>
    %285 = vector.multi_reduction <maximumf>, %284, %cst_182 [2] : vector<2x16x3xf32> to vector<2x16xf32>
    %286 = vector.shape_cast %285 : vector<2x16xf32> to vector<2x16x1xf32>
    %287 = vector.broadcast %286 : vector<2x16x1xf32> to vector<2x16x3xf32>
    %288 = arith.subf %284, %287 : vector<2x16x3xf32>
    %289 = math.exp %288 : vector<2x16x3xf32>
    %cst_183 = arith.constant dense<0.000000e+00> : vector<2x16xf32>
    %290 = vector.multi_reduction <add>, %289, %cst_183 [2] : vector<2x16x3xf32> to vector<2x16xf32>
    %291 = vector.shape_cast %290 : vector<2x16xf32> to vector<2x16x1xf32>
    %292 = tpu.reciprocal %291 {approx = true} : vector<2x16x1xf32> -> vector<2x16x1xf32>
    %293 = vector.broadcast %292 : vector<2x16x1xf32> to vector<2x16x3xf32>
    %294 = arith.mulf %289, %293 : vector<2x16x3xf32>
    %295 = arith.truncf %294 : vector<2x16x3xf32> to vector<2x16x3xbf16>
    "tpu.trace_start"() <{level = 10 : i32, message = "btn,bnd->btd"}> : () -> ()
    %cst_184 = arith.constant dense<0.000000e+00> : vector<2x16x32xf32>
    %296 = tpu.matmul %295, %249, %cst_184 {dimension_numbers = #tpu.dot_dimension_numbers<[2], [1], [1], [2], [0, 0, 0, 1, 1, 2], [0], [0]>} : vector<2x16x3xbf16>, vector<2x3x32xbf16>, vector<2x16x32xf32> -> vector<2x16x32xf32>
    "tpu.trace_stop"() : () -> ()
    %c0_185 = arith.constant 0 : index
    %c0_186 = arith.constant 0 : index
    %297 = vector.load %arg42[%c0_185, %c0_186] : memref<32x64xbf16, #tpu.memory_space<vmem>>, vector<32x64xbf16>
    %298 = arith.truncf %296 : vector<2x16x32xf32> to vector<2x16x32xbf16>
    "tpu.trace_start"() <{level = 10 : i32, message = "btd,de->bte"}> : () -> ()
    %cst_187 = arith.constant dense<0.000000e+00> : vector<2x16x64xf32>
    %299 = tpu.matmul %298, %297, %cst_187 {dimension_numbers = #tpu.dot_dimension_numbers<[2], [0], [0, 1], [1], [0, 0, 0, 1, 1, 1], [], []>} : vector<2x16x32xbf16>, vector<32x64xbf16>, vector<2x16x64xf32> -> vector<2x16x64xf32>
    "tpu.trace_stop"() : () -> ()
    %c0_188 = arith.constant 0 : index
    %c0_189 = arith.constant 0 : index
    %300 = vector.load %arg41[%c0_188, %c0_189] : memref<1x64xf32, #tpu.memory_space<vmem>>, vector<1x64xf32>
    %301 = vector.shape_cast %300 : vector<1x64xf32> to vector<1x1x64xf32>
    %302 = vector.broadcast %301 : vector<1x1x64xf32> to vector<2x16x64xf32>
    %303 = arith.addf %299, %302 : vector<2x16x64xf32>
    %304 = math.tanh %303 : vector<2x16x64xf32>
    %305 = vector.extract_strided_slice %304 {offsets = [0, 0, 0], sizes = [2, 16, 32], strides = [1, 1, 1]} : vector<2x16x64xf32> to vector<2x16x32xf32>
    %306 = vector.extract_strided_slice %304 {offsets = [0, 0, 32], sizes = [2, 16, 32], strides = [1, 1, 1]} : vector<2x16x64xf32> to vector<2x16x32xf32>
    %cst_190 = arith.constant dense<0.000000e+00> : vector<2x16xf32>
    %307 = vector.multi_reduction <add>, %262, %cst_190 [2] : vector<2x16x32xf32> to vector<2x16xf32>
    %308 = vector.shape_cast %307 : vector<2x16xf32> to vector<2x16x1xf32>
    %cst_191 = arith.constant 3.200000e+01 : f32
    %309 = vector.broadcast %cst_191 : f32 to vector<2x16x1xf32>
    %310 = arith.divf %308, %309 : vector<2x16x1xf32>
    %311 = vector.broadcast %310 : vector<2x16x1xf32> to vector<2x16x32xf32>
    %312 = arith.subf %262, %311 : vector<2x16x32xf32>
    %313 = arith.mulf %312, %312 : vector<2x16x32xf32>
    %cst_192 = arith.constant dense<0.000000e+00> : vector<2x16xf32>
    %314 = vector.multi_reduction <add>, %313, %cst_192 [2] : vector<2x16x32xf32> to vector<2x16xf32>
    %315 = vector.shape_cast %314 : vector<2x16xf32> to vector<2x16x1xf32>
    %cst_193 = arith.constant 3.200000e+01 : f32
    %316 = vector.broadcast %cst_193 : f32 to vector<2x16x1xf32>
    %317 = arith.divf %315, %316 : vector<2x16x1xf32>
    %318 = vector.broadcast %310 : vector<2x16x1xf32> to vector<2x16x32xf32>
    %319 = arith.subf %262, %318 : vector<2x16x32xf32>
    %cst_194 = arith.constant 9.99999997E-7 : f32
    %320 = vector.broadcast %cst_194 : f32 to vector<2x16x1xf32>
    %321 = arith.addf %317, %320 : vector<2x16x1xf32>
    %322 = math.rsqrt %321 : vector<2x16x1xf32>
    %323 = vector.broadcast %322 : vector<2x16x1xf32> to vector<2x16x32xf32>
    %324 = arith.mulf %319, %323 : vector<2x16x32xf32>
    %325 = arith.mulf %305, %324 : vector<2x16x32xf32>
    %326 = arith.addf %325, %306 : vector<2x16x32xf32>
    %327 = vector.shape_cast %250 : vector<2x16xf32> to vector<2x16x1xf32>
    %328 = vector.broadcast %327 : vector<2x16x1xf32> to vector<2x16x32xf32>
    %329 = arith.mulf %326, %328 : vector<2x16x32xf32>
    %c0_195 = arith.constant 0 : index
    %c0_196 = arith.constant 0 : index
    %c0_197 = arith.constant 0 : index
    %330 = vector.load %arg4[%c0_195, %c0_196, %c0_197] : memref<2x8x48xf32, #tpu.memory_space<vmem>>, vector<2x8x48xf32>
    %c0_198 = arith.constant 0 : index
    %c0_199 = arith.constant 0 : index
    %331 = vector.load %arg34[%c0_198, %c0_199] : memref<48x32xbf16, #tpu.memory_space<vmem>>, vector<48x32xbf16>
    %332 = arith.truncf %330 : vector<2x8x48xf32> to vector<2x8x48xbf16>
    "tpu.trace_start"() <{level = 10 : i32, message = "btf,fd->btd"}> : () -> ()
    %cst_200 = arith.constant dense<0.000000e+00> : vector<2x8x32xf32>
    %333 = tpu.matmul %332, %331, %cst_200 {dimension_numbers = #tpu.dot_dimension_numbers<[2], [0], [0, 1], [1], [0, 0, 0, 1, 1, 1], [], []>} : vector<2x8x48xbf16>, vector<48x32xbf16>, vector<2x8x32xf32> -> vector<2x8x32xf32>
    "tpu.trace_stop"() : () -> ()
    %c0_201 = arith.constant 0 : index
    %c0_202 = arith.constant 0 : index
    %334 = vector.load %arg33[%c0_201, %c0_202] : memref<1x32xf32, #tpu.memory_space<vmem>>, vector<1x32xf32>
    %335 = vector.shape_cast %334 : vector<1x32xf32> to vector<1x1x32xf32>
    %336 = vector.broadcast %335 : vector<1x1x32xf32> to vector<2x8x32xf32>
    %337 = arith.addf %333, %336 : vector<2x8x32xf32>
    %c0_203 = arith.constant 0 : index
    %c0_204 = arith.constant 0 : index
    %c0_205 = arith.constant 0 : index
    %338 = vector.load %arg8[%c0_203, %c0_204, %c0_205] : memref<1x8x32xf32, #tpu.memory_space<vmem>>, vector<1x8x32xf32>
    %339 = vector.broadcast %338 : vector<1x8x32xf32> to vector<2x8x32xf32>
    %340 = arith.addf %337, %339 : vector<2x8x32xf32>
    %341 = arith.truncf %340 : vector<2x8x32xf32> to vector<2x8x32xbf16>
    %c0_206 = arith.constant 0 : index
    %c0_207 = arith.constant 0 : index
    %c0_208 = arith.constant 0 : index
    %342 = vector.load %arg38[%c0_206, %c0_207, %c0_208] : memref<2x32x32xbf16, #tpu.memory_space<vmem>>, vector<1x32x32xbf16>
    %343 = vector.shape_cast %342 : vector<1x32x32xbf16> to vector<32x32xbf16>
    "tpu.trace_start"() <{level = 10 : i32, message = "btd,de->bte"}> : () -> ()
    %cst_209 = arith.constant dense<0.000000e+00> : vector<2x8x32xf32>
    %344 = tpu.matmul %341, %343, %cst_209 {dimension_numbers = #tpu.dot_dimension_numbers<[2], [0], [0, 1], [1], [0, 0, 0, 1, 1, 1], [], []>} : vector<2x8x32xbf16>, vector<32x32xbf16>, vector<2x8x32xf32> -> vector<2x8x32xf32>
    "tpu.trace_stop"() : () -> ()
    %c0_210 = arith.constant 0 : index
    %c0_211 = arith.constant 0 : index
    %c0_212 = arith.constant 0 : index
    %345 = vector.load %arg37[%c0_210, %c0_211, %c0_212] : memref<2x1x32xf32, #tpu.memory_space<vmem>>, vector<1x1x32xf32>
    %346 = vector.shape_cast %345 : vector<1x1x32xf32> to vector<1x32xf32>
    %347 = vector.shape_cast %346 : vector<1x32xf32> to vector<1x1x32xf32>
    %348 = vector.broadcast %347 : vector<1x1x32xf32> to vector<2x8x32xf32>
    %349 = arith.addf %344, %348 : vector<2x8x32xf32>
    %c1_213 = arith.constant 1 : index
    %c0_214 = arith.constant 0 : index
    %c0_215 = arith.constant 0 : index
    %350 = vector.load %arg38[%c1_213, %c0_214, %c0_215] : memref<2x32x32xbf16, #tpu.memory_space<vmem>>, vector<1x32x32xbf16>
    %351 = vector.shape_cast %350 : vector<1x32x32xbf16> to vector<32x32xbf16>
    "tpu.trace_start"() <{level = 10 : i32, message = "bnd,de->bne"}> : () -> ()
    %cst_216 = arith.constant dense<0.000000e+00> : vector<2x3x32xf32>
    %352 = tpu.matmul %249, %351, %cst_216 {dimension_numbers = #tpu.dot_dimension_numbers<[2], [0], [0, 1], [1], [0, 0, 0, 1, 1, 1], [], []>} : vector<2x3x32xbf16>, vector<32x32xbf16>, vector<2x3x32xf32> -> vector<2x3x32xf32>
    "tpu.trace_stop"() : () -> ()
    %c1_217 = arith.constant 1 : index
    %c0_218 = arith.constant 0 : index
    %c0_219 = arith.constant 0 : index
    %353 = vector.load %arg37[%c1_217, %c0_218, %c0_219] : memref<2x1x32xf32, #tpu.memory_space<vmem>>, vector<1x1x32xf32>
    %354 = vector.shape_cast %353 : vector<1x1x32xf32> to vector<1x32xf32>
    %355 = vector.shape_cast %354 : vector<1x32xf32> to vector<1x1x32xf32>
    %356 = vector.broadcast %355 : vector<1x1x32xf32> to vector<2x3x32xf32>
    %357 = arith.addf %352, %356 : vector<2x3x32xf32>
    %358 = arith.truncf %349 : vector<2x8x32xf32> to vector<2x8x32xbf16>
    %359 = arith.truncf %357 : vector<2x3x32xf32> to vector<2x3x32xbf16>
    "tpu.trace_start"() <{level = 10 : i32, message = "bte,bne->btn"}> : () -> ()
    %cst_220 = arith.constant dense<0.000000e+00> : vector<2x8x3xf32>
    %360 = tpu.matmul %358, %359, %cst_220 {dimension_numbers = #tpu.dot_dimension_numbers<[2], [2], [1], [1], [0, 0, 0, 1, 1, 1], [0], [0]>} : vector<2x8x32xbf16>, vector<2x3x32xbf16>, vector<2x8x3xf32> -> vector<2x8x3xf32>
    "tpu.trace_stop"() : () -> ()
    %cst_221 = arith.constant 0.176776692 : f32
    %361 = vector.broadcast %cst_221 : f32 to vector<2x8x3xf32>
    %362 = arith.mulf %360, %361 : vector<2x8x3xf32>
    %cst_222 = arith.constant dense<0xFF800000> : vector<2x8xf32>
    %363 = vector.multi_reduction <maximumf>, %362, %cst_222 [2] : vector<2x8x3xf32> to vector<2x8xf32>
    %364 = vector.shape_cast %363 : vector<2x8xf32> to vector<2x8x1xf32>
    %365 = vector.broadcast %364 : vector<2x8x1xf32> to vector<2x8x3xf32>
    %366 = arith.subf %362, %365 : vector<2x8x3xf32>
    %367 = math.exp %366 : vector<2x8x3xf32>
    %cst_223 = arith.constant dense<0.000000e+00> : vector<2x8xf32>
    %368 = vector.multi_reduction <add>, %367, %cst_223 [2] : vector<2x8x3xf32> to vector<2x8xf32>
    %369 = vector.shape_cast %368 : vector<2x8xf32> to vector<2x8x1xf32>
    %370 = tpu.reciprocal %369 {approx = true} : vector<2x8x1xf32> -> vector<2x8x1xf32>
    %371 = vector.broadcast %370 : vector<2x8x1xf32> to vector<2x8x3xf32>
    %372 = arith.mulf %367, %371 : vector<2x8x3xf32>
    %373 = arith.truncf %372 : vector<2x8x3xf32> to vector<2x8x3xbf16>
    "tpu.trace_start"() <{level = 10 : i32, message = "btn,bnd->btd"}> : () -> ()
    %cst_224 = arith.constant dense<0.000000e+00> : vector<2x8x32xf32>
    %374 = tpu.matmul %373, %249, %cst_224 {dimension_numbers = #tpu.dot_dimension_numbers<[2], [1], [1], [2], [0, 0, 0, 1, 1, 2], [0], [0]>} : vector<2x8x3xbf16>, vector<2x3x32xbf16>, vector<2x8x32xf32> -> vector<2x8x32xf32>
    "tpu.trace_stop"() : () -> ()
    %c0_225 = arith.constant 0 : index
    %c0_226 = arith.constant 0 : index
    %375 = vector.load %arg36[%c0_225, %c0_226] : memref<32x64xbf16, #tpu.memory_space<vmem>>, vector<32x64xbf16>
    %376 = arith.truncf %374 : vector<2x8x32xf32> to vector<2x8x32xbf16>
    "tpu.trace_start"() <{level = 10 : i32, message = "btd,de->bte"}> : () -> ()
    %cst_227 = arith.constant dense<0.000000e+00> : vector<2x8x64xf32>
    %377 = tpu.matmul %376, %375, %cst_227 {dimension_numbers = #tpu.dot_dimension_numbers<[2], [0], [0, 1], [1], [0, 0, 0, 1, 1, 1], [], []>} : vector<2x8x32xbf16>, vector<32x64xbf16>, vector<2x8x64xf32> -> vector<2x8x64xf32>
    "tpu.trace_stop"() : () -> ()
    %c0_228 = arith.constant 0 : index
    %c0_229 = arith.constant 0 : index
    %378 = vector.load %arg35[%c0_228, %c0_229] : memref<1x64xf32, #tpu.memory_space<vmem>>, vector<1x64xf32>
    %379 = vector.shape_cast %378 : vector<1x64xf32> to vector<1x1x64xf32>
    %380 = vector.broadcast %379 : vector<1x1x64xf32> to vector<2x8x64xf32>
    %381 = arith.addf %377, %380 : vector<2x8x64xf32>
    %382 = math.tanh %381 : vector<2x8x64xf32>
    %383 = vector.extract_strided_slice %382 {offsets = [0, 0, 0], sizes = [2, 8, 32], strides = [1, 1, 1]} : vector<2x8x64xf32> to vector<2x8x32xf32>
    %384 = vector.extract_strided_slice %382 {offsets = [0, 0, 32], sizes = [2, 8, 32], strides = [1, 1, 1]} : vector<2x8x64xf32> to vector<2x8x32xf32>
    %cst_230 = arith.constant dense<0.000000e+00> : vector<2x8xf32>
    %385 = vector.multi_reduction <add>, %340, %cst_230 [2] : vector<2x8x32xf32> to vector<2x8xf32>
    %386 = vector.shape_cast %385 : vector<2x8xf32> to vector<2x8x1xf32>
    %cst_231 = arith.constant 3.200000e+01 : f32
    %387 = vector.broadcast %cst_231 : f32 to vector<2x8x1xf32>
    %388 = arith.divf %386, %387 : vector<2x8x1xf32>
    %389 = vector.broadcast %388 : vector<2x8x1xf32> to vector<2x8x32xf32>
    %390 = arith.subf %340, %389 : vector<2x8x32xf32>
    %391 = arith.mulf %390, %390 : vector<2x8x32xf32>
    %cst_232 = arith.constant dense<0.000000e+00> : vector<2x8xf32>
    %392 = vector.multi_reduction <add>, %391, %cst_232 [2] : vector<2x8x32xf32> to vector<2x8xf32>
    %393 = vector.shape_cast %392 : vector<2x8xf32> to vector<2x8x1xf32>
    %cst_233 = arith.constant 3.200000e+01 : f32
    %394 = vector.broadcast %cst_233 : f32 to vector<2x8x1xf32>
    %395 = arith.divf %393, %394 : vector<2x8x1xf32>
    %396 = vector.broadcast %388 : vector<2x8x1xf32> to vector<2x8x32xf32>
    %397 = arith.subf %340, %396 : vector<2x8x32xf32>
    %cst_234 = arith.constant 9.99999997E-7 : f32
    %398 = vector.broadcast %cst_234 : f32 to vector<2x8x1xf32>
    %399 = arith.addf %395, %398 : vector<2x8x1xf32>
    %400 = math.rsqrt %399 : vector<2x8x1xf32>
    %401 = vector.broadcast %400 : vector<2x8x1xf32> to vector<2x8x32xf32>
    %402 = arith.mulf %397, %401 : vector<2x8x32xf32>
    %403 = arith.mulf %383, %402 : vector<2x8x32xf32>
    %404 = arith.addf %403, %384 : vector<2x8x32xf32>
    %405 = vector.shape_cast %251 : vector<2x8xf32> to vector<2x8x1xf32>
    %406 = vector.broadcast %405 : vector<2x8x1xf32> to vector<2x8x32xf32>
    %407 = arith.mulf %404, %406 : vector<2x8x32xf32>
    %408 = arith.truncf %329 : vector<2x16x32xf32> to vector<2x16x32xbf16>
    %c0_235 = arith.constant 0 : index
    %c0_236 = arith.constant 0 : index
    %c0_237 = arith.constant 0 : index
    %409 = vector.load %arg19[%c0_235, %c0_236, %c0_237] : memref<3x1x32xf32, #tpu.memory_space<vmem>>, vector<1x1x32xf32>
    %410 = vector.shape_cast %409 : vector<1x1x32xf32> to vector<1x32xf32>
    %411 = vector.shape_cast %410 : vector<1x32xf32> to vector<1x1x32xf32>
    %412 = vector.broadcast %411 : vector<1x1x32xf32> to vector<2x16x32xf32>
    %413 = arith.mulf %329, %412 : vector<2x16x32xf32>
    %cst_238 = arith.constant dense<0.000000e+00> : vector<2x16xf32>
    %414 = vector.multi_reduction <add>, %413, %cst_238 [2] : vector<2x16x32xf32> to vector<2x16xf32>
    %415 = vector.shape_cast %414 : vector<2x16xf32> to vector<2x16x1xf32>
    %c1_239 = arith.constant 1 : index
    %c0_240 = arith.constant 0 : index
    %c0_241 = arith.constant 0 : index
    %416 = vector.load %arg19[%c1_239, %c0_240, %c0_241] : memref<3x1x32xf32, #tpu.memory_space<vmem>>, vector<1x1x32xf32>
    %417 = vector.shape_cast %416 : vector<1x1x32xf32> to vector<1x32xf32>
    %418 = vector.shape_cast %417 : vector<1x32xf32> to vector<1x1x32xf32>
    %419 = vector.broadcast %418 : vector<1x1x32xf32> to vector<2x3x32xf32>
    %420 = arith.mulf %248, %419 : vector<2x3x32xf32>
    %cst_242 = arith.constant dense<0.000000e+00> : vector<2x3xf32>
    %421 = vector.multi_reduction <add>, %420, %cst_242 [2] : vector<2x3x32xf32> to vector<2x3xf32>
    %422 = vector.shape_cast %421 : vector<2x3xf32> to vector<2x1x3xf32>
    %c2_243 = arith.constant 2 : index
    %c0_244 = arith.constant 0 : index
    %c0_245 = arith.constant 0 : index
    %423 = vector.load %arg19[%c2_243, %c0_244, %c0_245] : memref<3x1x32xf32, #tpu.memory_space<vmem>>, vector<1x1x32xf32>
    %424 = vector.shape_cast %423 : vector<1x1x32xf32> to vector<1x32xf32>
    %425 = vector.shape_cast %424 : vector<1x32xf32> to vector<1x1x32xf32>
    %426 = vector.broadcast %425 : vector<1x1x32xf32> to vector<2x16x32xf32>
    %427 = arith.mulf %329, %426 : vector<2x16x32xf32>
    %428 = arith.truncf %427 : vector<2x16x32xf32> to vector<2x16x32xbf16>
    "tpu.trace_start"() <{level = 10 : i32, message = "btd,bld->btl"}> : () -> ()
    %cst_246 = arith.constant dense<0.000000e+00> : vector<2x16x3xf32>
    %429 = tpu.matmul %428, %249, %cst_246 {dimension_numbers = #tpu.dot_dimension_numbers<[2], [2], [1], [1], [0, 0, 0, 1, 1, 1], [0], [0]>} : vector<2x16x32xbf16>, vector<2x3x32xbf16>, vector<2x16x3xf32> -> vector<2x16x3xf32>
    "tpu.trace_stop"() : () -> ()
    %430 = vector.broadcast %415 : vector<2x16x1xf32> to vector<2x16x3xf32>
    %431 = vector.broadcast %422 : vector<2x1x3xf32> to vector<2x16x3xf32>
    %432 = arith.addf %430, %431 : vector<2x16x3xf32>
    %433 = arith.addf %432, %429 : vector<2x16x3xf32>
    %cst_247 = arith.constant dense<0xFF800000> : vector<2x16xf32>
    %434 = vector.multi_reduction <maximumf>, %433, %cst_247 [2] : vector<2x16x3xf32> to vector<2x16xf32>
    %435 = vector.shape_cast %434 : vector<2x16xf32> to vector<2x16x1xf32>
    %436 = vector.broadcast %435 : vector<2x16x1xf32> to vector<2x16x3xf32>
    %437 = arith.subf %433, %436 : vector<2x16x3xf32>
    %438 = math.exp %437 : vector<2x16x3xf32>
    %cst_248 = arith.constant dense<0.000000e+00> : vector<2x16xf32>
    %439 = vector.multi_reduction <add>, %438, %cst_248 [2] : vector<2x16x3xf32> to vector<2x16xf32>
    %440 = vector.shape_cast %439 : vector<2x16xf32> to vector<2x16x1xf32>
    %441 = tpu.reciprocal %440 {approx = true} : vector<2x16x1xf32> -> vector<2x16x1xf32>
    %442 = vector.broadcast %441 : vector<2x16x1xf32> to vector<2x16x3xf32>
    %443 = arith.mulf %438, %442 : vector<2x16x3xf32>
    %cst_249 = arith.constant 1.000000e+00 : f32
    %444 = vector.broadcast %cst_249 : f32 to vector<2x16xf32>
    %445 = arith.subf %444, %250 : vector<2x16xf32>
    %446 = vector.shape_cast %445 : vector<2x16xf32> to vector<2x16x1xf32>
    %cst_250 = arith.constant -1.000000e+30 : f32
    %447 = vector.broadcast %cst_250 : f32 to vector<2x16x1xf32>
    %448 = arith.mulf %446, %447 : vector<2x16x1xf32>
    %449 = vector.broadcast %448 : vector<2x16x1xf32> to vector<2x16x3xf32>
    %450 = arith.addf %433, %449 : vector<2x16x3xf32>
    %cst_251 = arith.constant dense<0xFF800000> : vector<2x3xf32>
    %451 = vector.multi_reduction <maximumf>, %450, %cst_251 [1] : vector<2x16x3xf32> to vector<2x3xf32>
    %452 = vector.shape_cast %451 : vector<2x3xf32> to vector<2x1x3xf32>
    %453 = vector.broadcast %452 : vector<2x1x3xf32> to vector<2x16x3xf32>
    %454 = arith.subf %450, %453 : vector<2x16x3xf32>
    %455 = math.exp %454 : vector<2x16x3xf32>
    %cst_252 = arith.constant dense<0.000000e+00> : vector<2x3xf32>
    %456 = vector.multi_reduction <add>, %455, %cst_252 [1] : vector<2x16x3xf32> to vector<2x3xf32>
    %457 = vector.shape_cast %456 : vector<2x3xf32> to vector<2x1x3xf32>
    %458 = tpu.reciprocal %457 {approx = true} : vector<2x1x3xf32> -> vector<2x1x3xf32>
    %459 = vector.broadcast %458 : vector<2x1x3xf32> to vector<2x16x3xf32>
    %460 = arith.mulf %455, %459 : vector<2x16x3xf32>
    %461 = arith.truncf %443 : vector<2x16x3xf32> to vector<2x16x3xbf16>
    "tpu.trace_start"() <{level = 10 : i32, message = "btl,bld->btd"}> : () -> ()
    %cst_253 = arith.constant dense<0.000000e+00> : vector<2x16x32xf32>
    %462 = tpu.matmul %461, %249, %cst_253 {dimension_numbers = #tpu.dot_dimension_numbers<[2], [1], [1], [2], [0, 0, 0, 1, 1, 2], [0], [0]>} : vector<2x16x3xbf16>, vector<2x3x32xbf16>, vector<2x16x32xf32> -> vector<2x16x32xf32>
    "tpu.trace_stop"() : () -> ()
    %463 = arith.truncf %443 : vector<2x16x3xf32> to vector<2x16x3xbf16>
    %464 = arith.truncf %460 : vector<2x16x3xf32> to vector<2x16x3xbf16>
    "tpu.trace_start"() <{level = 10 : i32, message = "btl,bsl->bts"}> : () -> ()
    %cst_254 = arith.constant dense<0.000000e+00> : vector<2x16x16xf32>
    %465 = tpu.matmul %463, %464, %cst_254 {dimension_numbers = #tpu.dot_dimension_numbers<[2], [2], [1], [1], [0, 0, 0, 1, 1, 1], [0], [0]>} : vector<2x16x3xbf16>, vector<2x16x3xbf16>, vector<2x16x16xf32> -> vector<2x16x16xf32>
    "tpu.trace_stop"() : () -> ()
    %466 = arith.truncf %465 : vector<2x16x16xf32> to vector<2x16x16xbf16>
    "tpu.trace_start"() <{level = 10 : i32, message = "bts,bsd->btd"}> : () -> ()
    %cst_255 = arith.constant dense<0.000000e+00> : vector<2x16x32xf32>
    %467 = tpu.matmul %466, %408, %cst_255 {dimension_numbers = #tpu.dot_dimension_numbers<[2], [1], [1], [2], [0, 0, 0, 1, 1, 2], [0], [0]>} : vector<2x16x16xbf16>, vector<2x16x32xbf16>, vector<2x16x32xf32> -> vector<2x16x32xf32>
    "tpu.trace_stop"() : () -> ()
    %c0_256 = arith.constant 0 : index
    %c0_257 = arith.constant 0 : index
    %c0_258 = arith.constant 0 : index
    %468 = vector.load %arg18[%c0_256, %c0_257, %c0_258] : memref<4x32x32xbf16, #tpu.memory_space<vmem>>, vector<1x32x32xbf16>
    %469 = vector.shape_cast %468 : vector<1x32x32xbf16> to vector<32x32xbf16>
    "tpu.trace_start"() <{level = 10 : i32, message = "btd,de->bte"}> : () -> ()
    %cst_259 = arith.constant dense<0.000000e+00> : vector<2x16x32xf32>
    %470 = tpu.matmul %408, %469, %cst_259 {dimension_numbers = #tpu.dot_dimension_numbers<[2], [0], [0, 1], [1], [0, 0, 0, 1, 1, 1], [], []>} : vector<2x16x32xbf16>, vector<32x32xbf16>, vector<2x16x32xf32> -> vector<2x16x32xf32>
    "tpu.trace_stop"() : () -> ()
    %c1_260 = arith.constant 1 : index
    %c0_261 = arith.constant 0 : index
    %c0_262 = arith.constant 0 : index
    %471 = vector.load %arg18[%c1_260, %c0_261, %c0_262] : memref<4x32x32xbf16, #tpu.memory_space<vmem>>, vector<1x32x32xbf16>
    %472 = vector.shape_cast %471 : vector<1x32x32xbf16> to vector<32x32xbf16>
    %473 = arith.truncf %462 : vector<2x16x32xf32> to vector<2x16x32xbf16>
    "tpu.trace_start"() <{level = 10 : i32, message = "btd,de->bte"}> : () -> ()
    %cst_263 = arith.constant dense<0.000000e+00> : vector<2x16x32xf32>
    %474 = tpu.matmul %473, %472, %cst_263 {dimension_numbers = #tpu.dot_dimension_numbers<[2], [0], [0, 1], [1], [0, 0, 0, 1, 1, 1], [], []>} : vector<2x16x32xbf16>, vector<32x32xbf16>, vector<2x16x32xf32> -> vector<2x16x32xf32>
    "tpu.trace_stop"() : () -> ()
    %475 = arith.addf %470, %474 : vector<2x16x32xf32>
    %476 = arith.mulf %329, %462 : vector<2x16x32xf32>
    %c2_264 = arith.constant 2 : index
    %c0_265 = arith.constant 0 : index
    %c0_266 = arith.constant 0 : index
    %477 = vector.load %arg18[%c2_264, %c0_265, %c0_266] : memref<4x32x32xbf16, #tpu.memory_space<vmem>>, vector<1x32x32xbf16>
    %478 = vector.shape_cast %477 : vector<1x32x32xbf16> to vector<32x32xbf16>
    %479 = arith.truncf %476 : vector<2x16x32xf32> to vector<2x16x32xbf16>
    "tpu.trace_start"() <{level = 10 : i32, message = "btd,de->bte"}> : () -> ()
    %cst_267 = arith.constant dense<0.000000e+00> : vector<2x16x32xf32>
    %480 = tpu.matmul %479, %478, %cst_267 {dimension_numbers = #tpu.dot_dimension_numbers<[2], [0], [0, 1], [1], [0, 0, 0, 1, 1, 1], [], []>} : vector<2x16x32xbf16>, vector<32x32xbf16>, vector<2x16x32xf32> -> vector<2x16x32xf32>
    "tpu.trace_stop"() : () -> ()
    %481 = arith.addf %475, %480 : vector<2x16x32xf32>
    %482 = arith.mulf %329, %467 : vector<2x16x32xf32>
    %c3 = arith.constant 3 : index
    %c0_268 = arith.constant 0 : index
    %c0_269 = arith.constant 0 : index
    %483 = vector.load %arg18[%c3, %c0_268, %c0_269] : memref<4x32x32xbf16, #tpu.memory_space<vmem>>, vector<1x32x32xbf16>
    %484 = vector.shape_cast %483 : vector<1x32x32xbf16> to vector<32x32xbf16>
    %485 = arith.truncf %482 : vector<2x16x32xf32> to vector<2x16x32xbf16>
    "tpu.trace_start"() <{level = 10 : i32, message = "btd,de->bte"}> : () -> ()
    %cst_270 = arith.constant dense<0.000000e+00> : vector<2x16x32xf32>
    %486 = tpu.matmul %485, %484, %cst_270 {dimension_numbers = #tpu.dot_dimension_numbers<[2], [0], [0, 1], [1], [0, 0, 0, 1, 1, 1], [], []>} : vector<2x16x32xbf16>, vector<32x32xbf16>, vector<2x16x32xf32> -> vector<2x16x32xf32>
    "tpu.trace_stop"() : () -> ()
    %487 = arith.addf %481, %486 : vector<2x16x32xf32>
    %c0_271 = arith.constant 0 : index
    %c0_272 = arith.constant 0 : index
    %488 = vector.load %arg17[%c0_271, %c0_272] : memref<1x32xf32, #tpu.memory_space<vmem>>, vector<1x32xf32>
    %489 = vector.shape_cast %488 : vector<1x32xf32> to vector<1x1x32xf32>
    %490 = vector.broadcast %489 : vector<1x1x32xf32> to vector<2x16x32xf32>
    %491 = arith.addf %487, %490 : vector<2x16x32xf32>
    %c0_273 = arith.constant 0 : index
    %c0_274 = arith.constant 0 : index
    %c0_275 = arith.constant 0 : index
    %492 = vector.load %arg16[%c0_273, %c0_274, %c0_275] : memref<2x32x32xbf16, #tpu.memory_space<vmem>>, vector<1x32x32xbf16>
    %493 = vector.shape_cast %492 : vector<1x32x32xbf16> to vector<32x32xbf16>
    %494 = arith.truncf %491 : vector<2x16x32xf32> to vector<2x16x32xbf16>
    "tpu.trace_start"() <{level = 10 : i32, message = "btd,de->bte"}> : () -> ()
    %cst_276 = arith.constant dense<0.000000e+00> : vector<2x16x32xf32>
    %495 = tpu.matmul %494, %493, %cst_276 {dimension_numbers = #tpu.dot_dimension_numbers<[2], [0], [0, 1], [1], [0, 0, 0, 1, 1, 1], [], []>} : vector<2x16x32xbf16>, vector<32x32xbf16>, vector<2x16x32xf32> -> vector<2x16x32xf32>
    "tpu.trace_stop"() : () -> ()
    %c1_277 = arith.constant 1 : index
    %c0_278 = arith.constant 0 : index
    %c0_279 = arith.constant 0 : index
    %496 = vector.load %arg16[%c1_277, %c0_278, %c0_279] : memref<2x32x32xbf16, #tpu.memory_space<vmem>>, vector<1x32x32xbf16>
    %497 = vector.shape_cast %496 : vector<1x32x32xbf16> to vector<32x32xbf16>
    "tpu.trace_start"() <{level = 10 : i32, message = "bd,de->be"}> : () -> ()
    %cst_280 = arith.constant dense<0.000000e+00> : vector<2x32xf32>
    %498 = tpu.matmul %46, %497, %cst_280 {dimension_numbers = #tpu.dot_dimension_numbers<[1], [0], [0], [1], [0, 0, 1, 1], [], []>} : vector<2x32xbf16>, vector<32x32xbf16>, vector<2x32xf32> -> vector<2x32xf32>
    "tpu.trace_stop"() : () -> ()
    %c0_281 = arith.constant 0 : index
    %c0_282 = arith.constant 0 : index
    %499 = vector.load %arg15[%c0_281, %c0_282] : memref<1x32xf32, #tpu.memory_space<vmem>>, vector<1x32xf32>
    %500 = vector.broadcast %499 : vector<1x32xf32> to vector<2x32xf32>
    %501 = arith.addf %498, %500 : vector<2x32xf32>
    %502 = vector.shape_cast %501 : vector<2x32xf32> to vector<2x1x32xf32>
    %503 = vector.broadcast %502 : vector<2x1x32xf32> to vector<2x16x32xf32>
    %504 = arith.addf %495, %503 : vector<2x16x32xf32>
    %505 = arith.truncf %407 : vector<2x8x32xf32> to vector<2x8x32xbf16>
    %c0_283 = arith.constant 0 : index
    %c0_284 = arith.constant 0 : index
    %c0_285 = arith.constant 0 : index
    %506 = vector.load %arg14[%c0_283, %c0_284, %c0_285] : memref<3x1x32xf32, #tpu.memory_space<vmem>>, vector<1x1x32xf32>
    %507 = vector.shape_cast %506 : vector<1x1x32xf32> to vector<1x32xf32>
    %508 = vector.shape_cast %507 : vector<1x32xf32> to vector<1x1x32xf32>
    %509 = vector.broadcast %508 : vector<1x1x32xf32> to vector<2x8x32xf32>
    %510 = arith.mulf %407, %509 : vector<2x8x32xf32>
    %cst_286 = arith.constant dense<0.000000e+00> : vector<2x8xf32>
    %511 = vector.multi_reduction <add>, %510, %cst_286 [2] : vector<2x8x32xf32> to vector<2x8xf32>
    %512 = vector.shape_cast %511 : vector<2x8xf32> to vector<2x8x1xf32>
    %c1_287 = arith.constant 1 : index
    %c0_288 = arith.constant 0 : index
    %c0_289 = arith.constant 0 : index
    %513 = vector.load %arg14[%c1_287, %c0_288, %c0_289] : memref<3x1x32xf32, #tpu.memory_space<vmem>>, vector<1x1x32xf32>
    %514 = vector.shape_cast %513 : vector<1x1x32xf32> to vector<1x32xf32>
    %515 = vector.shape_cast %514 : vector<1x32xf32> to vector<1x1x32xf32>
    %516 = vector.broadcast %515 : vector<1x1x32xf32> to vector<2x3x32xf32>
    %517 = arith.mulf %248, %516 : vector<2x3x32xf32>
    %cst_290 = arith.constant dense<0.000000e+00> : vector<2x3xf32>
    %518 = vector.multi_reduction <add>, %517, %cst_290 [2] : vector<2x3x32xf32> to vector<2x3xf32>
    %519 = vector.shape_cast %518 : vector<2x3xf32> to vector<2x1x3xf32>
    %c2_291 = arith.constant 2 : index
    %c0_292 = arith.constant 0 : index
    %c0_293 = arith.constant 0 : index
    %520 = vector.load %arg14[%c2_291, %c0_292, %c0_293] : memref<3x1x32xf32, #tpu.memory_space<vmem>>, vector<1x1x32xf32>
    %521 = vector.shape_cast %520 : vector<1x1x32xf32> to vector<1x32xf32>
    %522 = vector.shape_cast %521 : vector<1x32xf32> to vector<1x1x32xf32>
    %523 = vector.broadcast %522 : vector<1x1x32xf32> to vector<2x8x32xf32>
    %524 = arith.mulf %407, %523 : vector<2x8x32xf32>
    %525 = arith.truncf %524 : vector<2x8x32xf32> to vector<2x8x32xbf16>
    "tpu.trace_start"() <{level = 10 : i32, message = "btd,bld->btl"}> : () -> ()
    %cst_294 = arith.constant dense<0.000000e+00> : vector<2x8x3xf32>
    %526 = tpu.matmul %525, %249, %cst_294 {dimension_numbers = #tpu.dot_dimension_numbers<[2], [2], [1], [1], [0, 0, 0, 1, 1, 1], [0], [0]>} : vector<2x8x32xbf16>, vector<2x3x32xbf16>, vector<2x8x3xf32> -> vector<2x8x3xf32>
    "tpu.trace_stop"() : () -> ()
    %527 = vector.broadcast %512 : vector<2x8x1xf32> to vector<2x8x3xf32>
    %528 = vector.broadcast %519 : vector<2x1x3xf32> to vector<2x8x3xf32>
    %529 = arith.addf %527, %528 : vector<2x8x3xf32>
    %530 = arith.addf %529, %526 : vector<2x8x3xf32>
    %cst_295 = arith.constant dense<0xFF800000> : vector<2x8xf32>
    %531 = vector.multi_reduction <maximumf>, %530, %cst_295 [2] : vector<2x8x3xf32> to vector<2x8xf32>
    %532 = vector.shape_cast %531 : vector<2x8xf32> to vector<2x8x1xf32>
    %533 = vector.broadcast %532 : vector<2x8x1xf32> to vector<2x8x3xf32>
    %534 = arith.subf %530, %533 : vector<2x8x3xf32>
    %535 = math.exp %534 : vector<2x8x3xf32>
    %cst_296 = arith.constant dense<0.000000e+00> : vector<2x8xf32>
    %536 = vector.multi_reduction <add>, %535, %cst_296 [2] : vector<2x8x3xf32> to vector<2x8xf32>
    %537 = vector.shape_cast %536 : vector<2x8xf32> to vector<2x8x1xf32>
    %538 = tpu.reciprocal %537 {approx = true} : vector<2x8x1xf32> -> vector<2x8x1xf32>
    %539 = vector.broadcast %538 : vector<2x8x1xf32> to vector<2x8x3xf32>
    %540 = arith.mulf %535, %539 : vector<2x8x3xf32>
    %cst_297 = arith.constant 1.000000e+00 : f32
    %541 = vector.broadcast %cst_297 : f32 to vector<2x8xf32>
    %542 = arith.subf %541, %251 : vector<2x8xf32>
    %543 = vector.shape_cast %542 : vector<2x8xf32> to vector<2x8x1xf32>
    %cst_298 = arith.constant -1.000000e+30 : f32
    %544 = vector.broadcast %cst_298 : f32 to vector<2x8x1xf32>
    %545 = arith.mulf %543, %544 : vector<2x8x1xf32>
    %546 = vector.broadcast %545 : vector<2x8x1xf32> to vector<2x8x3xf32>
    %547 = arith.addf %530, %546 : vector<2x8x3xf32>
    %cst_299 = arith.constant dense<0xFF800000> : vector<2x3xf32>
    %548 = vector.multi_reduction <maximumf>, %547, %cst_299 [1] : vector<2x8x3xf32> to vector<2x3xf32>
    %549 = vector.shape_cast %548 : vector<2x3xf32> to vector<2x1x3xf32>
    %550 = vector.broadcast %549 : vector<2x1x3xf32> to vector<2x8x3xf32>
    %551 = arith.subf %547, %550 : vector<2x8x3xf32>
    %552 = math.exp %551 : vector<2x8x3xf32>
    %cst_300 = arith.constant dense<0.000000e+00> : vector<2x3xf32>
    %553 = vector.multi_reduction <add>, %552, %cst_300 [1] : vector<2x8x3xf32> to vector<2x3xf32>
    %554 = vector.shape_cast %553 : vector<2x3xf32> to vector<2x1x3xf32>
    %555 = tpu.reciprocal %554 {approx = true} : vector<2x1x3xf32> -> vector<2x1x3xf32>
    %556 = vector.broadcast %555 : vector<2x1x3xf32> to vector<2x8x3xf32>
    %557 = arith.mulf %552, %556 : vector<2x8x3xf32>
    %558 = arith.truncf %540 : vector<2x8x3xf32> to vector<2x8x3xbf16>
    "tpu.trace_start"() <{level = 10 : i32, message = "btl,bld->btd"}> : () -> ()
    %cst_301 = arith.constant dense<0.000000e+00> : vector<2x8x32xf32>
    %559 = tpu.matmul %558, %249, %cst_301 {dimension_numbers = #tpu.dot_dimension_numbers<[2], [1], [1], [2], [0, 0, 0, 1, 1, 2], [0], [0]>} : vector<2x8x3xbf16>, vector<2x3x32xbf16>, vector<2x8x32xf32> -> vector<2x8x32xf32>
    "tpu.trace_stop"() : () -> ()
    %560 = arith.truncf %540 : vector<2x8x3xf32> to vector<2x8x3xbf16>
    %561 = arith.truncf %557 : vector<2x8x3xf32> to vector<2x8x3xbf16>
    "tpu.trace_start"() <{level = 10 : i32, message = "btl,bsl->bts"}> : () -> ()
    %cst_302 = arith.constant dense<0.000000e+00> : vector<2x8x8xf32>
    %562 = tpu.matmul %560, %561, %cst_302 {dimension_numbers = #tpu.dot_dimension_numbers<[2], [2], [1], [1], [0, 0, 0, 1, 1, 1], [0], [0]>} : vector<2x8x3xbf16>, vector<2x8x3xbf16>, vector<2x8x8xf32> -> vector<2x8x8xf32>
    "tpu.trace_stop"() : () -> ()
    %563 = arith.truncf %562 : vector<2x8x8xf32> to vector<2x8x8xbf16>
    "tpu.trace_start"() <{level = 10 : i32, message = "bts,bsd->btd"}> : () -> ()
    %cst_303 = arith.constant dense<0.000000e+00> : vector<2x8x32xf32>
    %564 = tpu.matmul %563, %505, %cst_303 {dimension_numbers = #tpu.dot_dimension_numbers<[2], [1], [1], [2], [0, 0, 0, 1, 1, 2], [0], [0]>} : vector<2x8x8xbf16>, vector<2x8x32xbf16>, vector<2x8x32xf32> -> vector<2x8x32xf32>
    "tpu.trace_stop"() : () -> ()
    %c0_304 = arith.constant 0 : index
    %c0_305 = arith.constant 0 : index
    %c0_306 = arith.constant 0 : index
    %565 = vector.load %arg13[%c0_304, %c0_305, %c0_306] : memref<4x32x32xbf16, #tpu.memory_space<vmem>>, vector<1x32x32xbf16>
    %566 = vector.shape_cast %565 : vector<1x32x32xbf16> to vector<32x32xbf16>
    "tpu.trace_start"() <{level = 10 : i32, message = "btd,de->bte"}> : () -> ()
    %cst_307 = arith.constant dense<0.000000e+00> : vector<2x8x32xf32>
    %567 = tpu.matmul %505, %566, %cst_307 {dimension_numbers = #tpu.dot_dimension_numbers<[2], [0], [0, 1], [1], [0, 0, 0, 1, 1, 1], [], []>} : vector<2x8x32xbf16>, vector<32x32xbf16>, vector<2x8x32xf32> -> vector<2x8x32xf32>
    "tpu.trace_stop"() : () -> ()
    %c1_308 = arith.constant 1 : index
    %c0_309 = arith.constant 0 : index
    %c0_310 = arith.constant 0 : index
    %568 = vector.load %arg13[%c1_308, %c0_309, %c0_310] : memref<4x32x32xbf16, #tpu.memory_space<vmem>>, vector<1x32x32xbf16>
    %569 = vector.shape_cast %568 : vector<1x32x32xbf16> to vector<32x32xbf16>
    %570 = arith.truncf %559 : vector<2x8x32xf32> to vector<2x8x32xbf16>
    "tpu.trace_start"() <{level = 10 : i32, message = "btd,de->bte"}> : () -> ()
    %cst_311 = arith.constant dense<0.000000e+00> : vector<2x8x32xf32>
    %571 = tpu.matmul %570, %569, %cst_311 {dimension_numbers = #tpu.dot_dimension_numbers<[2], [0], [0, 1], [1], [0, 0, 0, 1, 1, 1], [], []>} : vector<2x8x32xbf16>, vector<32x32xbf16>, vector<2x8x32xf32> -> vector<2x8x32xf32>
    "tpu.trace_stop"() : () -> ()
    %572 = arith.addf %567, %571 : vector<2x8x32xf32>
    %573 = arith.mulf %407, %559 : vector<2x8x32xf32>
    %c2_312 = arith.constant 2 : index
    %c0_313 = arith.constant 0 : index
    %c0_314 = arith.constant 0 : index
    %574 = vector.load %arg13[%c2_312, %c0_313, %c0_314] : memref<4x32x32xbf16, #tpu.memory_space<vmem>>, vector<1x32x32xbf16>
    %575 = vector.shape_cast %574 : vector<1x32x32xbf16> to vector<32x32xbf16>
    %576 = arith.truncf %573 : vector<2x8x32xf32> to vector<2x8x32xbf16>
    "tpu.trace_start"() <{level = 10 : i32, message = "btd,de->bte"}> : () -> ()
    %cst_315 = arith.constant dense<0.000000e+00> : vector<2x8x32xf32>
    %577 = tpu.matmul %576, %575, %cst_315 {dimension_numbers = #tpu.dot_dimension_numbers<[2], [0], [0, 1], [1], [0, 0, 0, 1, 1, 1], [], []>} : vector<2x8x32xbf16>, vector<32x32xbf16>, vector<2x8x32xf32> -> vector<2x8x32xf32>
    "tpu.trace_stop"() : () -> ()
    %578 = arith.addf %572, %577 : vector<2x8x32xf32>
    %579 = arith.mulf %407, %564 : vector<2x8x32xf32>
    %c3_316 = arith.constant 3 : index
    %c0_317 = arith.constant 0 : index
    %c0_318 = arith.constant 0 : index
    %580 = vector.load %arg13[%c3_316, %c0_317, %c0_318] : memref<4x32x32xbf16, #tpu.memory_space<vmem>>, vector<1x32x32xbf16>
    %581 = vector.shape_cast %580 : vector<1x32x32xbf16> to vector<32x32xbf16>
    %582 = arith.truncf %579 : vector<2x8x32xf32> to vector<2x8x32xbf16>
    "tpu.trace_start"() <{level = 10 : i32, message = "btd,de->bte"}> : () -> ()
    %cst_319 = arith.constant dense<0.000000e+00> : vector<2x8x32xf32>
    %583 = tpu.matmul %582, %581, %cst_319 {dimension_numbers = #tpu.dot_dimension_numbers<[2], [0], [0, 1], [1], [0, 0, 0, 1, 1, 1], [], []>} : vector<2x8x32xbf16>, vector<32x32xbf16>, vector<2x8x32xf32> -> vector<2x8x32xf32>
    "tpu.trace_stop"() : () -> ()
    %584 = arith.addf %578, %583 : vector<2x8x32xf32>
    %c0_320 = arith.constant 0 : index
    %c0_321 = arith.constant 0 : index
    %585 = vector.load %arg12[%c0_320, %c0_321] : memref<1x32xf32, #tpu.memory_space<vmem>>, vector<1x32xf32>
    %586 = vector.shape_cast %585 : vector<1x32xf32> to vector<1x1x32xf32>
    %587 = vector.broadcast %586 : vector<1x1x32xf32> to vector<2x8x32xf32>
    %588 = arith.addf %584, %587 : vector<2x8x32xf32>
    %c0_322 = arith.constant 0 : index
    %c0_323 = arith.constant 0 : index
    %c0_324 = arith.constant 0 : index
    %589 = vector.load %arg11[%c0_322, %c0_323, %c0_324] : memref<2x32x32xbf16, #tpu.memory_space<vmem>>, vector<1x32x32xbf16>
    %590 = vector.shape_cast %589 : vector<1x32x32xbf16> to vector<32x32xbf16>
    %591 = arith.truncf %588 : vector<2x8x32xf32> to vector<2x8x32xbf16>
    "tpu.trace_start"() <{level = 10 : i32, message = "btd,de->bte"}> : () -> ()
    %cst_325 = arith.constant dense<0.000000e+00> : vector<2x8x32xf32>
    %592 = tpu.matmul %591, %590, %cst_325 {dimension_numbers = #tpu.dot_dimension_numbers<[2], [0], [0, 1], [1], [0, 0, 0, 1, 1, 1], [], []>} : vector<2x8x32xbf16>, vector<32x32xbf16>, vector<2x8x32xf32> -> vector<2x8x32xf32>
    "tpu.trace_stop"() : () -> ()
    %c1_326 = arith.constant 1 : index
    %c0_327 = arith.constant 0 : index
    %c0_328 = arith.constant 0 : index
    %593 = vector.load %arg11[%c1_326, %c0_327, %c0_328] : memref<2x32x32xbf16, #tpu.memory_space<vmem>>, vector<1x32x32xbf16>
    %594 = vector.shape_cast %593 : vector<1x32x32xbf16> to vector<32x32xbf16>
    "tpu.trace_start"() <{level = 10 : i32, message = "bd,de->be"}> : () -> ()
    %cst_329 = arith.constant dense<0.000000e+00> : vector<2x32xf32>
    %595 = tpu.matmul %46, %594, %cst_329 {dimension_numbers = #tpu.dot_dimension_numbers<[1], [0], [0], [1], [0, 0, 1, 1], [], []>} : vector<2x32xbf16>, vector<32x32xbf16>, vector<2x32xf32> -> vector<2x32xf32>
    "tpu.trace_stop"() : () -> ()
    %c0_330 = arith.constant 0 : index
    %c0_331 = arith.constant 0 : index
    %596 = vector.load %arg10[%c0_330, %c0_331] : memref<1x32xf32, #tpu.memory_space<vmem>>, vector<1x32xf32>
    %597 = vector.broadcast %596 : vector<1x32xf32> to vector<2x32xf32>
    %598 = arith.addf %595, %597 : vector<2x32xf32>
    %599 = vector.shape_cast %598 : vector<2x32xf32> to vector<2x1x32xf32>
    %600 = vector.broadcast %599 : vector<2x1x32xf32> to vector<2x8x32xf32>
    %601 = arith.addf %592, %600 : vector<2x8x32xf32>
    %c0_332 = arith.constant 0 : index
    %c0_333 = arith.constant 0 : index
    %c0_334 = arith.constant 0 : index
    %602 = vector.load %arg9[%c0_332, %c0_333, %c0_334] : memref<2x16x8xf32, #tpu.memory_space<vmem>>, vector<2x16x8xf32>
    %603 = arith.truncf %602 : vector<2x16x8xf32> to vector<2x16x8xbf16>
    %604 = arith.truncf %601 : vector<2x8x32xf32> to vector<2x8x32xbf16>
    "tpu.trace_start"() <{level = 10 : i32, message = "bts,bsd->btd"}> : () -> ()
    %cst_335 = arith.constant dense<0.000000e+00> : vector<2x16x32xf32>
    %605 = tpu.matmul %603, %604, %cst_335 {dimension_numbers = #tpu.dot_dimension_numbers<[2], [1], [1], [2], [0, 0, 0, 1, 1, 2], [0], [0]>} : vector<2x16x8xbf16>, vector<2x8x32xbf16>, vector<2x16x32xf32> -> vector<2x16x32xf32>
    "tpu.trace_stop"() : () -> ()
    %cst_336 = arith.constant 1.000000e+00 : f32
    %606 = vector.broadcast %cst_336 : f32 to vector<2x16xf32>
    %607 = arith.subf %606, %250 : vector<2x16xf32>
    %608 = vector.shape_cast %607 : vector<2x16xf32> to vector<2x1x16xf32>
    %cst_337 = arith.constant -1.000000e+30 : f32
    %609 = vector.broadcast %cst_337 : f32 to vector<2x1x16xf32>
    %610 = arith.mulf %608, %609 : vector<2x1x16xf32>
    %611 = vector.shape_cast %250 : vector<2x16xf32> to vector<2x16x1xf32>
    %cst_338 = arith.constant dense<0.000000e+00> : vector<2x32xf32>
    %612 = vector.multi_reduction <add>, %248, %cst_338 [1] : vector<2x3x32xf32> to vector<2x32xf32>
    %cst_339 = arith.constant 3.000000e+00 : f32
    %613 = vector.broadcast %cst_339 : f32 to vector<2x32xf32>
    %614 = arith.divf %612, %613 : vector<2x32xf32>
    %c0_340 = arith.constant 0 : index
    %c0_341 = arith.constant 0 : index
    %615 = vector.load %arg48[%c0_340, %c0_341] : memref<32x32xbf16, #tpu.memory_space<vmem>>, vector<32x32xbf16>
    %616 = arith.truncf %614 : vector<2x32xf32> to vector<2x32xbf16>
    "tpu.trace_start"() <{level = 10 : i32, message = "bd,de->be"}> : () -> ()
    %cst_342 = arith.constant dense<0.000000e+00> : vector<2x32xf32>
    %617 = tpu.matmul %616, %615, %cst_342 {dimension_numbers = #tpu.dot_dimension_numbers<[1], [0], [0], [1], [0, 0, 1, 1], [], []>} : vector<2x32xbf16>, vector<32x32xbf16>, vector<2x32xf32> -> vector<2x32xf32>
    "tpu.trace_stop"() : () -> ()
    %c0_343 = arith.constant 0 : index
    %c0_344 = arith.constant 0 : index
    %618 = vector.load %arg47[%c0_343, %c0_344] : memref<1x32xf32, #tpu.memory_space<vmem>>, vector<1x32xf32>
    %619 = vector.broadcast %618 : vector<1x32xf32> to vector<2x32xf32>
    %620 = arith.addf %617, %619 : vector<2x32xf32>
    %cst_345 = arith.constant 0.000000e+00 : f32
    %621 = vector.broadcast %cst_345 : f32 to vector<2x32xf32>
    %622 = arith.subf %621, %620 : vector<2x32xf32>
    %623 = math.exp %622 : vector<2x32xf32>
    %cst_346 = arith.constant 1.000000e+00 : f32
    %624 = vector.broadcast %cst_346 : f32 to vector<2x32xf32>
    %625 = arith.addf %624, %623 : vector<2x32xf32>
    %626 = tpu.reciprocal %625 {approx = true} : vector<2x32xf32> -> vector<2x32xf32>
    %627 = vector.shape_cast %626 : vector<2x32xf32> to vector<2x1x32xf32>
    %628 = arith.truncf %504 : vector<2x16x32xf32> to vector<2x16x32xbf16>
    %629 = arith.truncf %605 : vector<2x16x32xf32> to vector<2x16x32xbf16>
    %c0_347 = arith.constant 0 : index
    %c0_348 = arith.constant 0 : index
    %630 = vector.load %arg50[%c0_347, %c0_348] : memref<32x64xbf16, #tpu.memory_space<vmem>>, vector<32x64xbf16>
    "tpu.trace_start"() <{level = 10 : i32, message = "btd,de->bte"}> : () -> ()
    %cst_349 = arith.constant dense<0.000000e+00> : vector<2x16x64xf32>
    %631 = tpu.matmul %628, %630, %cst_349 {dimension_numbers = #tpu.dot_dimension_numbers<[2], [0], [0, 1], [1], [0, 0, 0, 1, 1, 1], [], []>} : vector<2x16x32xbf16>, vector<32x64xbf16>, vector<2x16x64xf32> -> vector<2x16x64xf32>
    "tpu.trace_stop"() : () -> ()
    %c0_350 = arith.constant 0 : index
    %c0_351 = arith.constant 0 : index
    %632 = vector.load %arg49[%c0_350, %c0_351] : memref<1x64xf32, #tpu.memory_space<vmem>>, vector<1x64xf32>
    %633 = vector.shape_cast %632 : vector<1x64xf32> to vector<1x1x64xf32>
    %634 = vector.broadcast %633 : vector<1x1x64xf32> to vector<2x16x64xf32>
    %635 = arith.addf %631, %634 : vector<2x16x64xf32>
    %c0_352 = arith.constant 0 : index
    %c0_353 = arith.constant 0 : index
    %636 = vector.load %arg46[%c0_352, %c0_353] : memref<32x64xbf16, #tpu.memory_space<vmem>>, vector<32x64xbf16>
    "tpu.trace_start"() <{level = 10 : i32, message = "btd,de->bte"}> : () -> ()
    %cst_354 = arith.constant dense<0.000000e+00> : vector<2x16x64xf32>
    %637 = tpu.matmul %629, %636, %cst_354 {dimension_numbers = #tpu.dot_dimension_numbers<[2], [0], [0, 1], [1], [0, 0, 0, 1, 1, 1], [], []>} : vector<2x16x32xbf16>, vector<32x64xbf16>, vector<2x16x64xf32> -> vector<2x16x64xf32>
    "tpu.trace_stop"() : () -> ()
    %c0_355 = arith.constant 0 : index
    %c0_356 = arith.constant 0 : index
    %638 = vector.load %arg45[%c0_355, %c0_356] : memref<1x64xf32, #tpu.memory_space<vmem>>, vector<1x64xf32>
    %639 = vector.shape_cast %638 : vector<1x64xf32> to vector<1x1x64xf32>
    %640 = vector.broadcast %639 : vector<1x1x64xf32> to vector<2x16x64xf32>
    %641 = arith.addf %637, %640 : vector<2x16x64xf32>
    %642 = vector.extract_strided_slice %635 {offsets = [0, 0, 0], sizes = [2, 16, 32], strides = [1, 1, 1]} : vector<2x16x64xf32> to vector<2x16x32xf32>
    %643 = vector.extract_strided_slice %635 {offsets = [0, 0, 32], sizes = [2, 16, 32], strides = [1, 1, 1]} : vector<2x16x64xf32> to vector<2x16x32xf32>
    %644 = vector.extract_strided_slice %641 {offsets = [0, 0, 0], sizes = [2, 16, 32], strides = [1, 1, 1]} : vector<2x16x64xf32> to vector<2x16x32xf32>
    %645 = vector.extract_strided_slice %641 {offsets = [0, 0, 32], sizes = [2, 16, 32], strides = [1, 1, 1]} : vector<2x16x64xf32> to vector<2x16x32xf32>
    %646 = arith.truncf %642 : vector<2x16x32xf32> to vector<2x16x32xbf16>
    %647 = arith.truncf %645 : vector<2x16x32xf32> to vector<2x16x32xbf16>
    "tpu.trace_start"() <{level = 10 : i32, message = "bte,bse->bts"}> : () -> ()
    %cst_357 = arith.constant dense<0.000000e+00> : vector<2x16x16xf32>
    %648 = tpu.matmul %646, %647, %cst_357 {dimension_numbers = #tpu.dot_dimension_numbers<[2], [2], [1], [1], [0, 0, 0, 1, 1, 1], [0], [0]>} : vector<2x16x32xbf16>, vector<2x16x32xbf16>, vector<2x16x16xf32> -> vector<2x16x16xf32>
    "tpu.trace_stop"() : () -> ()
    %cst_358 = arith.constant 0.176776692 : f32
    %649 = vector.broadcast %cst_358 : f32 to vector<2x16x16xf32>
    %650 = arith.mulf %648, %649 : vector<2x16x16xf32>
    %651 = vector.broadcast %610 : vector<2x1x16xf32> to vector<2x16x16xf32>
    %652 = arith.addf %650, %651 : vector<2x16x16xf32>
    %cst_359 = arith.constant dense<0xFF800000> : vector<2x16xf32>
    %653 = vector.multi_reduction <maximumf>, %652, %cst_359 [2] : vector<2x16x16xf32> to vector<2x16xf32>
    %654 = vector.shape_cast %653 : vector<2x16xf32> to vector<2x16x1xf32>
    %655 = vector.broadcast %654 : vector<2x16x1xf32> to vector<2x16x16xf32>
    %656 = arith.subf %652, %655 : vector<2x16x16xf32>
    %657 = math.exp %656 : vector<2x16x16xf32>
    %cst_360 = arith.constant dense<0.000000e+00> : vector<2x16xf32>
    %658 = vector.multi_reduction <add>, %657, %cst_360 [2] : vector<2x16x16xf32> to vector<2x16xf32>
    %659 = vector.shape_cast %658 : vector<2x16xf32> to vector<2x16x1xf32>
    %660 = tpu.reciprocal %659 {approx = true} : vector<2x16x1xf32> -> vector<2x16x1xf32>
    %661 = vector.broadcast %660 : vector<2x16x1xf32> to vector<2x16x16xf32>
    %662 = arith.mulf %657, %661 : vector<2x16x16xf32>
    %663 = arith.truncf %662 : vector<2x16x16xf32> to vector<2x16x16xbf16>
    "tpu.trace_start"() <{level = 10 : i32, message = "bts,bsd->btd"}> : () -> ()
    %cst_361 = arith.constant dense<0.000000e+00> : vector<2x16x32xf32>
    %664 = tpu.matmul %663, %629, %cst_361 {dimension_numbers = #tpu.dot_dimension_numbers<[2], [1], [1], [2], [0, 0, 0, 1, 1, 2], [0], [0]>} : vector<2x16x16xbf16>, vector<2x16x32xbf16>, vector<2x16x32xf32> -> vector<2x16x32xf32>
    "tpu.trace_stop"() : () -> ()
    %665 = arith.truncf %644 : vector<2x16x32xf32> to vector<2x16x32xbf16>
    %666 = arith.truncf %643 : vector<2x16x32xf32> to vector<2x16x32xbf16>
    "tpu.trace_start"() <{level = 10 : i32, message = "bte,bse->bts"}> : () -> ()
    %cst_362 = arith.constant dense<0.000000e+00> : vector<2x16x16xf32>
    %667 = tpu.matmul %665, %666, %cst_362 {dimension_numbers = #tpu.dot_dimension_numbers<[2], [2], [1], [1], [0, 0, 0, 1, 1, 1], [0], [0]>} : vector<2x16x32xbf16>, vector<2x16x32xbf16>, vector<2x16x16xf32> -> vector<2x16x16xf32>
    "tpu.trace_stop"() : () -> ()
    %cst_363 = arith.constant 0.176776692 : f32
    %668 = vector.broadcast %cst_363 : f32 to vector<2x16x16xf32>
    %669 = arith.mulf %667, %668 : vector<2x16x16xf32>
    %670 = vector.broadcast %610 : vector<2x1x16xf32> to vector<2x16x16xf32>
    %671 = arith.addf %669, %670 : vector<2x16x16xf32>
    %cst_364 = arith.constant dense<0xFF800000> : vector<2x16xf32>
    %672 = vector.multi_reduction <maximumf>, %671, %cst_364 [2] : vector<2x16x16xf32> to vector<2x16xf32>
    %673 = vector.shape_cast %672 : vector<2x16xf32> to vector<2x16x1xf32>
    %674 = vector.broadcast %673 : vector<2x16x1xf32> to vector<2x16x16xf32>
    %675 = arith.subf %671, %674 : vector<2x16x16xf32>
    %676 = math.exp %675 : vector<2x16x16xf32>
    %cst_365 = arith.constant dense<0.000000e+00> : vector<2x16xf32>
    %677 = vector.multi_reduction <add>, %676, %cst_365 [2] : vector<2x16x16xf32> to vector<2x16xf32>
    %678 = vector.shape_cast %677 : vector<2x16xf32> to vector<2x16x1xf32>
    %679 = tpu.reciprocal %678 {approx = true} : vector<2x16x1xf32> -> vector<2x16x1xf32>
    %680 = vector.broadcast %679 : vector<2x16x1xf32> to vector<2x16x16xf32>
    %681 = arith.mulf %676, %680 : vector<2x16x16xf32>
    %682 = arith.truncf %681 : vector<2x16x16xf32> to vector<2x16x16xbf16>
    "tpu.trace_start"() <{level = 10 : i32, message = "bts,bsd->btd"}> : () -> ()
    %cst_366 = arith.constant dense<0.000000e+00> : vector<2x16x32xf32>
    %683 = tpu.matmul %682, %628, %cst_366 {dimension_numbers = #tpu.dot_dimension_numbers<[2], [1], [1], [2], [0, 0, 0, 1, 1, 2], [0], [0]>} : vector<2x16x16xbf16>, vector<2x16x32xbf16>, vector<2x16x32xf32> -> vector<2x16x32xf32>
    "tpu.trace_stop"() : () -> ()
    %684 = vector.broadcast %627 : vector<2x1x32xf32> to vector<2x16x32xf32>
    %685 = arith.mulf %684, %664 : vector<2x16x32xf32>
    %686 = arith.addf %504, %685 : vector<2x16x32xf32>
    %687 = vector.broadcast %611 : vector<2x16x1xf32> to vector<2x16x32xf32>
    %688 = arith.mulf %686, %687 : vector<2x16x32xf32>
    %689 = vector.broadcast %627 : vector<2x1x32xf32> to vector<2x16x32xf32>
    %690 = arith.mulf %689, %683 : vector<2x16x32xf32>
    %691 = arith.addf %605, %690 : vector<2x16x32xf32>
    %692 = vector.broadcast %611 : vector<2x16x1xf32> to vector<2x16x32xf32>
    %693 = arith.mulf %691, %692 : vector<2x16x32xf32>
    %694 = arith.addf %688, %693 : vector<2x16x32xf32>
    %c0_367 = arith.constant 0 : index
    %c0_368 = arith.constant 0 : index
    %c0_369 = arith.constant 0 : index
    %c0_370 = arith.constant 0 : index
    %695 = vector.load %arg51[%c0_367, %c0_368, %c0_369, %c0_370] : memref<2x2x16x32xf32, #tpu.memory_space<vmem>>, vector<1x2x16x32xf32>
    %696 = vector.shape_cast %695 : vector<1x2x16x32xf32> to vector<2x16x32xf32>
    %697 = vector.shape_cast %694 : vector<2x16x32xf32> to vector<1x2x16x32xf32>
    tpu.vector_store %arg51[%c0_367, %c0_368, %c0_369, %c0_370], %697 {strides = array<i32>} : memref<2x2x16x32xf32, #tpu.memory_space<vmem>>, vector<1x2x16x32xf32>,
    %c1_371 = arith.constant 1 : index
    %c0_372 = arith.constant 0 : index
    %c0_373 = arith.constant 0 : index
    %c0_374 = arith.constant 0 : index
    %698 = vector.load %arg51[%c1_371, %c0_372, %c0_373, %c0_374] : memref<2x2x16x32xf32, #tpu.memory_space<vmem>>, vector<1x2x16x32xf32>
    %699 = vector.shape_cast %698 : vector<1x2x16x32xf32> to vector<2x16x32xf32>
    %700 = vector.shape_cast %504 : vector<2x16x32xf32> to vector<1x2x16x32xf32>
    tpu.vector_store %arg51[%c1_371, %c0_372, %c0_373, %c0_374], %700 {strides = array<i32>} : memref<2x2x16x32xf32, #tpu.memory_space<vmem>>, vector<1x2x16x32xf32>,
    return
  }
}

module attributes {stable_mosaic.version = 11 : i64} {
  func.func @_branch_kernel(%arg0: i32, %arg1: memref<1x2x16x32xf32, #tpu.memory_space<vmem>>, %arg2: memref<2x16xf32, #tpu.memory_space<vmem>>, %arg3: memref<1x3x32x96xbf16, #tpu.memory_space<vmem>>, %arg4: memref<1x3x1x96xf32, #tpu.memory_space<vmem>>, %arg5: memref<1x3x32x32xbf16, #tpu.memory_space<vmem>>, %arg6: memref<1x3x1x32xf32, #tpu.memory_space<vmem>>, %arg7: memref<1x4x32x32xbf16, #tpu.memory_space<vmem>>, %arg8: memref<1x2x1x32xf32, #tpu.memory_space<vmem>>, %arg9: memref<1x2x1x32xf32, #tpu.memory_space<vmem>>, %arg10: memref<1x2x1x1xf32, #tpu.memory_space<vmem>>, %arg11: memref<1x2x2x16xf32, #tpu.memory_space<vmem>>) attributes {dimension_semantics = [#tpu.dimension_semantics<parallel>], iteration_bounds = array<i64: 2>, scalar_prefetch = 0 : i64, scratch_operands = 0 : i64, tpu.core_type = #tpu.core_type<tc>, window_params = [{transform_indices = @transform_0, window_bounds = array<i64: 1, 2, 16, 32>}, {pipeline_mode = #tpu.pipeline_mode<synchronous>, transform_indices = @transform_1, window_bounds = array<i64: 2, 16>}, {transform_indices = @transform_2, window_bounds = array<i64: 1, 3, 32, 96>}, {transform_indices = @transform_3, window_bounds = array<i64: 1, 3, 1, 96>}, {transform_indices = @transform_4, window_bounds = array<i64: 1, 3, 32, 32>}, {transform_indices = @transform_5, window_bounds = array<i64: 1, 3, 1, 32>}, {transform_indices = @transform_6, window_bounds = array<i64: 1, 4, 32, 32>}, {transform_indices = @transform_7, window_bounds = array<i64: 1, 2, 1, 32>}, {transform_indices = @transform_8, window_bounds = array<i64: 1, 2, 1, 32>}, {transform_indices = @transform_9, window_bounds = array<i64: 1, 2, 1, 1>}, {transform_indices = @transform_10, window_bounds = array<i64: 1, 2, 2, 16>}]} {
    %c0 = arith.constant 0 : index
    %c0_0 = arith.constant 0 : index
    %0 = vector.load %arg2[%c0, %c0_0] : memref<2x16xf32, #tpu.memory_space<vmem>>, vector<2x16xf32>
    %cst = arith.constant 1.000000e+00 : f32
    %1 = vector.broadcast %cst : f32 to vector<2x16xf32>
    %2 = arith.subf %1, %0 : vector<2x16xf32>
    %3 = vector.shape_cast %2 : vector<2x16xf32> to vector<2x1x16xf32>
    %cst_1 = arith.constant -1.000000e+30 : f32
    %4 = vector.broadcast %cst_1 : f32 to vector<2x1x16xf32>
    %5 = arith.mulf %3, %4 : vector<2x1x16xf32>
    %6 = vector.shape_cast %0 : vector<2x16xf32> to vector<2x16x1xf32>
    %cst_2 = arith.constant 1.000000e+00 : f32
    %7 = vector.broadcast %cst_2 : f32 to vector<2x16xf32>
    %8 = arith.subf %7, %0 : vector<2x16xf32>
    %cst_3 = arith.constant -1.000000e+30 : f32
    %9 = vector.broadcast %cst_3 : f32 to vector<2x16xf32>
    %10 = arith.mulf %8, %9 : vector<2x16xf32>
    %c0_4 = arith.constant 0 : index
    %c0_5 = arith.constant 0 : index
    %c0_6 = arith.constant 0 : index
    %c0_7 = arith.constant 0 : index
    %11 = vector.load %arg1[%c0_4, %c0_5, %c0_6, %c0_7] : memref<1x2x16x32xf32, #tpu.memory_space<vmem>>, vector<1x2x16x32xf32>
    %12 = vector.shape_cast %11 : vector<1x2x16x32xf32> to vector<2x16x32xf32>
    %13 = arith.truncf %12 : vector<2x16x32xf32> to vector<2x16x32xbf16>
    %c0_8 = arith.constant 0 : index
    %c0_9 = arith.constant 0 : index
    %c0_10 = arith.constant 0 : index
    %c0_11 = arith.constant 0 : index
    %14 = vector.load %arg3[%c0_8, %c0_9, %c0_10, %c0_11] : memref<1x3x32x96xbf16, #tpu.memory_space<vmem>>, vector<1x1x32x96xbf16>
    %15 = vector.shape_cast %14 : vector<1x1x32x96xbf16> to vector<32x96xbf16>
    "tpu.trace_start"() <{level = 10 : i32, message = "btd,de->bte"}> : () -> ()
    %cst_12 = arith.constant dense<0.000000e+00> : vector<2x16x96xf32>
    %16 = tpu.matmul %13, %15, %cst_12 {dimension_numbers = #tpu.dot_dimension_numbers<[2], [0], [0, 1], [1], [0, 0, 0, 1, 1, 1], [], []>} : vector<2x16x32xbf16>, vector<32x96xbf16>, vector<2x16x96xf32> -> vector<2x16x96xf32>
    "tpu.trace_stop"() : () -> ()
    %c0_13 = arith.constant 0 : index
    %c0_14 = arith.constant 0 : index
    %c0_15 = arith.constant 0 : index
    %c0_16 = arith.constant 0 : index
    %17 = vector.load %arg4[%c0_13, %c0_14, %c0_15, %c0_16] : memref<1x3x1x96xf32, #tpu.memory_space<vmem>>, vector<1x1x1x96xf32>
    %18 = vector.shape_cast %17 : vector<1x1x1x96xf32> to vector<1x96xf32>
    %19 = vector.shape_cast %18 : vector<1x96xf32> to vector<1x1x96xf32>
    %20 = vector.broadcast %19 : vector<1x1x96xf32> to vector<2x16x96xf32>
    %21 = arith.addf %16, %20 : vector<2x16x96xf32>
    %22 = vector.extract_strided_slice %21 {offsets = [0, 0, 0], sizes = [2, 16, 32], strides = [1, 1, 1]} : vector<2x16x96xf32> to vector<2x16x32xf32>
    %23 = vector.extract_strided_slice %21 {offsets = [0, 0, 32], sizes = [2, 16, 32], strides = [1, 1, 1]} : vector<2x16x96xf32> to vector<2x16x32xf32>
    %24 = vector.extract_strided_slice %21 {offsets = [0, 0, 64], sizes = [2, 16, 32], strides = [1, 1, 1]} : vector<2x16x96xf32> to vector<2x16x32xf32>
    %25 = arith.truncf %22 : vector<2x16x32xf32> to vector<2x16x32xbf16>
    %26 = arith.truncf %23 : vector<2x16x32xf32> to vector<2x16x32xbf16>
    "tpu.trace_start"() <{level = 10 : i32, message = "bte,bse->bts"}> : () -> ()
    %cst_17 = arith.constant dense<0.000000e+00> : vector<2x16x16xf32>
    %27 = tpu.matmul %25, %26, %cst_17 {dimension_numbers = #tpu.dot_dimension_numbers<[2], [2], [1], [1], [0, 0, 0, 1, 1, 1], [0], [0]>} : vector<2x16x32xbf16>, vector<2x16x32xbf16>, vector<2x16x16xf32> -> vector<2x16x16xf32>
    "tpu.trace_stop"() : () -> ()
    %cst_18 = arith.constant 0.176776692 : f32
    %28 = vector.broadcast %cst_18 : f32 to vector<2x16x16xf32>
    %29 = arith.mulf %27, %28 : vector<2x16x16xf32>
    %30 = vector.broadcast %5 : vector<2x1x16xf32> to vector<2x16x16xf32>
    %31 = arith.addf %29, %30 : vector<2x16x16xf32>
    %cst_19 = arith.constant dense<0xFF800000> : vector<2x16xf32>
    %32 = vector.multi_reduction <maximumf>, %31, %cst_19 [2] : vector<2x16x16xf32> to vector<2x16xf32>
    %33 = vector.shape_cast %32 : vector<2x16xf32> to vector<2x16x1xf32>
    %34 = vector.broadcast %33 : vector<2x16x1xf32> to vector<2x16x16xf32>
    %35 = arith.subf %31, %34 : vector<2x16x16xf32>
    %36 = math.exp %35 : vector<2x16x16xf32>
    %cst_20 = arith.constant dense<0.000000e+00> : vector<2x16xf32>
    %37 = vector.multi_reduction <add>, %36, %cst_20 [2] : vector<2x16x16xf32> to vector<2x16xf32>
    %38 = vector.shape_cast %37 : vector<2x16xf32> to vector<2x16x1xf32>
    %39 = tpu.reciprocal %38 {approx = true} : vector<2x16x1xf32> -> vector<2x16x1xf32>
    %40 = vector.broadcast %39 : vector<2x16x1xf32> to vector<2x16x16xf32>
    %41 = arith.mulf %36, %40 : vector<2x16x16xf32>
    %42 = arith.truncf %41 : vector<2x16x16xf32> to vector<2x16x16xbf16>
    %43 = arith.truncf %24 : vector<2x16x32xf32> to vector<2x16x32xbf16>
    "tpu.trace_start"() <{level = 10 : i32, message = "bts,bsd->btd"}> : () -> ()
    %cst_21 = arith.constant dense<0.000000e+00> : vector<2x16x32xf32>
    %44 = tpu.matmul %42, %43, %cst_21 {dimension_numbers = #tpu.dot_dimension_numbers<[2], [1], [1], [2], [0, 0, 0, 1, 1, 2], [0], [0]>} : vector<2x16x16xbf16>, vector<2x16x32xbf16>, vector<2x16x32xf32> -> vector<2x16x32xf32>
    "tpu.trace_stop"() : () -> ()
    %c0_22 = arith.constant 0 : index
    %c0_23 = arith.constant 0 : index
    %c0_24 = arith.constant 0 : index
    %c0_25 = arith.constant 0 : index
    %45 = vector.load %arg5[%c0_22, %c0_23, %c0_24, %c0_25] : memref<1x3x32x32xbf16, #tpu.memory_space<vmem>>, vector<1x1x32x32xbf16>
    %46 = vector.shape_cast %45 : vector<1x1x32x32xbf16> to vector<32x32xbf16>
    %47 = arith.truncf %44 : vector<2x16x32xf32> to vector<2x16x32xbf16>
    "tpu.trace_start"() <{level = 10 : i32, message = "btd,de->bte"}> : () -> ()
    %cst_26 = arith.constant dense<0.000000e+00> : vector<2x16x32xf32>
    %48 = tpu.matmul %47, %46, %cst_26 {dimension_numbers = #tpu.dot_dimension_numbers<[2], [0], [0, 1], [1], [0, 0, 0, 1, 1, 1], [], []>} : vector<2x16x32xbf16>, vector<32x32xbf16>, vector<2x16x32xf32> -> vector<2x16x32xf32>
    "tpu.trace_stop"() : () -> ()
    %c0_27 = arith.constant 0 : index
    %c0_28 = arith.constant 0 : index
    %c0_29 = arith.constant 0 : index
    %c0_30 = arith.constant 0 : index
    %49 = vector.load %arg6[%c0_27, %c0_28, %c0_29, %c0_30] : memref<1x3x1x32xf32, #tpu.memory_space<vmem>>, vector<1x1x1x32xf32>
    %50 = vector.shape_cast %49 : vector<1x1x1x32xf32> to vector<1x32xf32>
    %51 = vector.shape_cast %50 : vector<1x32xf32> to vector<1x1x32xf32>
    %52 = vector.broadcast %51 : vector<1x1x32xf32> to vector<2x16x32xf32>
    %53 = arith.addf %48, %52 : vector<2x16x32xf32>
    %54 = vector.broadcast %6 : vector<2x16x1xf32> to vector<2x16x32xf32>
    %55 = arith.mulf %53, %54 : vector<2x16x32xf32>
    %56 = arith.truncf %55 : vector<2x16x32xf32> to vector<2x16x32xbf16>
    %c0_31 = arith.constant 0 : index
    %c1 = arith.constant 1 : index
    %c0_32 = arith.constant 0 : index
    %c0_33 = arith.constant 0 : index
    %57 = vector.load %arg3[%c0_31, %c1, %c0_32, %c0_33] : memref<1x3x32x96xbf16, #tpu.memory_space<vmem>>, vector<1x1x32x96xbf16>
    %58 = vector.shape_cast %57 : vector<1x1x32x96xbf16> to vector<32x96xbf16>
    "tpu.trace_start"() <{level = 10 : i32, message = "btd,de->bte"}> : () -> ()
    %cst_34 = arith.constant dense<0.000000e+00> : vector<2x16x96xf32>
    %59 = tpu.matmul %56, %58, %cst_34 {dimension_numbers = #tpu.dot_dimension_numbers<[2], [0], [0, 1], [1], [0, 0, 0, 1, 1, 1], [], []>} : vector<2x16x32xbf16>, vector<32x96xbf16>, vector<2x16x96xf32> -> vector<2x16x96xf32>
    "tpu.trace_stop"() : () -> ()
    %c0_35 = arith.constant 0 : index
    %c1_36 = arith.constant 1 : index
    %c0_37 = arith.constant 0 : index
    %c0_38 = arith.constant 0 : index
    %60 = vector.load %arg4[%c0_35, %c1_36, %c0_37, %c0_38] : memref<1x3x1x96xf32, #tpu.memory_space<vmem>>, vector<1x1x1x96xf32>
    %61 = vector.shape_cast %60 : vector<1x1x1x96xf32> to vector<1x96xf32>
    %62 = vector.shape_cast %61 : vector<1x96xf32> to vector<1x1x96xf32>
    %63 = vector.broadcast %62 : vector<1x1x96xf32> to vector<2x16x96xf32>
    %64 = arith.addf %59, %63 : vector<2x16x96xf32>
    %65 = vector.extract_strided_slice %64 {offsets = [0, 0, 0], sizes = [2, 16, 32], strides = [1, 1, 1]} : vector<2x16x96xf32> to vector<2x16x32xf32>
    %66 = vector.extract_strided_slice %64 {offsets = [0, 0, 32], sizes = [2, 16, 32], strides = [1, 1, 1]} : vector<2x16x96xf32> to vector<2x16x32xf32>
    %67 = vector.extract_strided_slice %64 {offsets = [0, 0, 64], sizes = [2, 16, 32], strides = [1, 1, 1]} : vector<2x16x96xf32> to vector<2x16x32xf32>
    %68 = arith.truncf %65 : vector<2x16x32xf32> to vector<2x16x32xbf16>
    %69 = arith.truncf %66 : vector<2x16x32xf32> to vector<2x16x32xbf16>
    "tpu.trace_start"() <{level = 10 : i32, message = "bte,bse->bts"}> : () -> ()
    %cst_39 = arith.constant dense<0.000000e+00> : vector<2x16x16xf32>
    %70 = tpu.matmul %68, %69, %cst_39 {dimension_numbers = #tpu.dot_dimension_numbers<[2], [2], [1], [1], [0, 0, 0, 1, 1, 1], [0], [0]>} : vector<2x16x32xbf16>, vector<2x16x32xbf16>, vector<2x16x16xf32> -> vector<2x16x16xf32>
    "tpu.trace_stop"() : () -> ()
    %cst_40 = arith.constant 0.176776692 : f32
    %71 = vector.broadcast %cst_40 : f32 to vector<2x16x16xf32>
    %72 = arith.mulf %70, %71 : vector<2x16x16xf32>
    %73 = vector.broadcast %5 : vector<2x1x16xf32> to vector<2x16x16xf32>
    %74 = arith.addf %72, %73 : vector<2x16x16xf32>
    %cst_41 = arith.constant dense<0xFF800000> : vector<2x16xf32>
    %75 = vector.multi_reduction <maximumf>, %74, %cst_41 [2] : vector<2x16x16xf32> to vector<2x16xf32>
    %76 = vector.shape_cast %75 : vector<2x16xf32> to vector<2x16x1xf32>
    %77 = vector.broadcast %76 : vector<2x16x1xf32> to vector<2x16x16xf32>
    %78 = arith.subf %74, %77 : vector<2x16x16xf32>
    %79 = math.exp %78 : vector<2x16x16xf32>
    %cst_42 = arith.constant dense<0.000000e+00> : vector<2x16xf32>
    %80 = vector.multi_reduction <add>, %79, %cst_42 [2] : vector<2x16x16xf32> to vector<2x16xf32>
    %81 = vector.shape_cast %80 : vector<2x16xf32> to vector<2x16x1xf32>
    %82 = tpu.reciprocal %81 {approx = true} : vector<2x16x1xf32> -> vector<2x16x1xf32>
    %83 = vector.broadcast %82 : vector<2x16x1xf32> to vector<2x16x16xf32>
    %84 = arith.mulf %79, %83 : vector<2x16x16xf32>
    %85 = arith.truncf %84 : vector<2x16x16xf32> to vector<2x16x16xbf16>
    %86 = arith.truncf %67 : vector<2x16x32xf32> to vector<2x16x32xbf16>
    "tpu.trace_start"() <{level = 10 : i32, message = "bts,bsd->btd"}> : () -> ()
    %cst_43 = arith.constant dense<0.000000e+00> : vector<2x16x32xf32>
    %87 = tpu.matmul %85, %86, %cst_43 {dimension_numbers = #tpu.dot_dimension_numbers<[2], [1], [1], [2], [0, 0, 0, 1, 1, 2], [0], [0]>} : vector<2x16x16xbf16>, vector<2x16x32xbf16>, vector<2x16x32xf32> -> vector<2x16x32xf32>
    "tpu.trace_stop"() : () -> ()
    %c0_44 = arith.constant 0 : index
    %c1_45 = arith.constant 1 : index
    %c0_46 = arith.constant 0 : index
    %c0_47 = arith.constant 0 : index
    %88 = vector.load %arg5[%c0_44, %c1_45, %c0_46, %c0_47] : memref<1x3x32x32xbf16, #tpu.memory_space<vmem>>, vector<1x1x32x32xbf16>
    %89 = vector.shape_cast %88 : vector<1x1x32x32xbf16> to vector<32x32xbf16>
    %90 = arith.truncf %87 : vector<2x16x32xf32> to vector<2x16x32xbf16>
    "tpu.trace_start"() <{level = 10 : i32, message = "btd,de->bte"}> : () -> ()
    %cst_48 = arith.constant dense<0.000000e+00> : vector<2x16x32xf32>
    %91 = tpu.matmul %90, %89, %cst_48 {dimension_numbers = #tpu.dot_dimension_numbers<[2], [0], [0, 1], [1], [0, 0, 0, 1, 1, 1], [], []>} : vector<2x16x32xbf16>, vector<32x32xbf16>, vector<2x16x32xf32> -> vector<2x16x32xf32>
    "tpu.trace_stop"() : () -> ()
    %c0_49 = arith.constant 0 : index
    %c1_50 = arith.constant 1 : index
    %c0_51 = arith.constant 0 : index
    %c0_52 = arith.constant 0 : index
    %92 = vector.load %arg6[%c0_49, %c1_50, %c0_51, %c0_52] : memref<1x3x1x32xf32, #tpu.memory_space<vmem>>, vector<1x1x1x32xf32>
    %93 = vector.shape_cast %92 : vector<1x1x1x32xf32> to vector<1x32xf32>
    %94 = vector.shape_cast %93 : vector<1x32xf32> to vector<1x1x32xf32>
    %95 = vector.broadcast %94 : vector<1x1x32xf32> to vector<2x16x32xf32>
    %96 = arith.addf %91, %95 : vector<2x16x32xf32>
    %97 = vector.broadcast %6 : vector<2x16x1xf32> to vector<2x16x32xf32>
    %98 = arith.mulf %96, %97 : vector<2x16x32xf32>
    %99 = arith.truncf %98 : vector<2x16x32xf32> to vector<2x16x32xbf16>
    %c0_53 = arith.constant 0 : index
    %c2 = arith.constant 2 : index
    %c0_54 = arith.constant 0 : index
    %c0_55 = arith.constant 0 : index
    %100 = vector.load %arg3[%c0_53, %c2, %c0_54, %c0_55] : memref<1x3x32x96xbf16, #tpu.memory_space<vmem>>, vector<1x1x32x96xbf16>
    %101 = vector.shape_cast %100 : vector<1x1x32x96xbf16> to vector<32x96xbf16>
    "tpu.trace_start"() <{level = 10 : i32, message = "btd,de->bte"}> : () -> ()
    %cst_56 = arith.constant dense<0.000000e+00> : vector<2x16x96xf32>
    %102 = tpu.matmul %99, %101, %cst_56 {dimension_numbers = #tpu.dot_dimension_numbers<[2], [0], [0, 1], [1], [0, 0, 0, 1, 1, 1], [], []>} : vector<2x16x32xbf16>, vector<32x96xbf16>, vector<2x16x96xf32> -> vector<2x16x96xf32>
    "tpu.trace_stop"() : () -> ()
    %c0_57 = arith.constant 0 : index
    %c2_58 = arith.constant 2 : index
    %c0_59 = arith.constant 0 : index
    %c0_60 = arith.constant 0 : index
    %103 = vector.load %arg4[%c0_57, %c2_58, %c0_59, %c0_60] : memref<1x3x1x96xf32, #tpu.memory_space<vmem>>, vector<1x1x1x96xf32>
    %104 = vector.shape_cast %103 : vector<1x1x1x96xf32> to vector<1x96xf32>
    %105 = vector.shape_cast %104 : vector<1x96xf32> to vector<1x1x96xf32>
    %106 = vector.broadcast %105 : vector<1x1x96xf32> to vector<2x16x96xf32>
    %107 = arith.addf %102, %106 : vector<2x16x96xf32>
    %108 = vector.extract_strided_slice %107 {offsets = [0, 0, 0], sizes = [2, 16, 32], strides = [1, 1, 1]} : vector<2x16x96xf32> to vector<2x16x32xf32>
    %109 = vector.extract_strided_slice %107 {offsets = [0, 0, 32], sizes = [2, 16, 32], strides = [1, 1, 1]} : vector<2x16x96xf32> to vector<2x16x32xf32>
    %110 = vector.extract_strided_slice %107 {offsets = [0, 0, 64], sizes = [2, 16, 32], strides = [1, 1, 1]} : vector<2x16x96xf32> to vector<2x16x32xf32>
    %111 = arith.truncf %108 : vector<2x16x32xf32> to vector<2x16x32xbf16>
    %112 = arith.truncf %109 : vector<2x16x32xf32> to vector<2x16x32xbf16>
    "tpu.trace_start"() <{level = 10 : i32, message = "bte,bse->bts"}> : () -> ()
    %cst_61 = arith.constant dense<0.000000e+00> : vector<2x16x16xf32>
    %113 = tpu.matmul %111, %112, %cst_61 {dimension_numbers = #tpu.dot_dimension_numbers<[2], [2], [1], [1], [0, 0, 0, 1, 1, 1], [0], [0]>} : vector<2x16x32xbf16>, vector<2x16x32xbf16>, vector<2x16x16xf32> -> vector<2x16x16xf32>
    "tpu.trace_stop"() : () -> ()
    %cst_62 = arith.constant 0.176776692 : f32
    %114 = vector.broadcast %cst_62 : f32 to vector<2x16x16xf32>
    %115 = arith.mulf %113, %114 : vector<2x16x16xf32>
    %116 = vector.broadcast %5 : vector<2x1x16xf32> to vector<2x16x16xf32>
    %117 = arith.addf %115, %116 : vector<2x16x16xf32>
    %cst_63 = arith.constant dense<0xFF800000> : vector<2x16xf32>
    %118 = vector.multi_reduction <maximumf>, %117, %cst_63 [2] : vector<2x16x16xf32> to vector<2x16xf32>
    %119 = vector.shape_cast %118 : vector<2x16xf32> to vector<2x16x1xf32>
    %120 = vector.broadcast %119 : vector<2x16x1xf32> to vector<2x16x16xf32>
    %121 = arith.subf %117, %120 : vector<2x16x16xf32>
    %122 = math.exp %121 : vector<2x16x16xf32>
    %cst_64 = arith.constant dense<0.000000e+00> : vector<2x16xf32>
    %123 = vector.multi_reduction <add>, %122, %cst_64 [2] : vector<2x16x16xf32> to vector<2x16xf32>
    %124 = vector.shape_cast %123 : vector<2x16xf32> to vector<2x16x1xf32>
    %125 = tpu.reciprocal %124 {approx = true} : vector<2x16x1xf32> -> vector<2x16x1xf32>
    %126 = vector.broadcast %125 : vector<2x16x1xf32> to vector<2x16x16xf32>
    %127 = arith.mulf %122, %126 : vector<2x16x16xf32>
    %128 = arith.truncf %127 : vector<2x16x16xf32> to vector<2x16x16xbf16>
    %129 = arith.truncf %110 : vector<2x16x32xf32> to vector<2x16x32xbf16>
    "tpu.trace_start"() <{level = 10 : i32, message = "bts,bsd->btd"}> : () -> ()
    %cst_65 = arith.constant dense<0.000000e+00> : vector<2x16x32xf32>
    %130 = tpu.matmul %128, %129, %cst_65 {dimension_numbers = #tpu.dot_dimension_numbers<[2], [1], [1], [2], [0, 0, 0, 1, 1, 2], [0], [0]>} : vector<2x16x16xbf16>, vector<2x16x32xbf16>, vector<2x16x32xf32> -> vector<2x16x32xf32>
    "tpu.trace_stop"() : () -> ()
    %c0_66 = arith.constant 0 : index
    %c2_67 = arith.constant 2 : index
    %c0_68 = arith.constant 0 : index
    %c0_69 = arith.constant 0 : index
    %131 = vector.load %arg5[%c0_66, %c2_67, %c0_68, %c0_69] : memref<1x3x32x32xbf16, #tpu.memory_space<vmem>>, vector<1x1x32x32xbf16>
    %132 = vector.shape_cast %131 : vector<1x1x32x32xbf16> to vector<32x32xbf16>
    %133 = arith.truncf %130 : vector<2x16x32xf32> to vector<2x16x32xbf16>
    "tpu.trace_start"() <{level = 10 : i32, message = "btd,de->bte"}> : () -> ()
    %cst_70 = arith.constant dense<0.000000e+00> : vector<2x16x32xf32>
    %134 = tpu.matmul %133, %132, %cst_70 {dimension_numbers = #tpu.dot_dimension_numbers<[2], [0], [0, 1], [1], [0, 0, 0, 1, 1, 1], [], []>} : vector<2x16x32xbf16>, vector<32x32xbf16>, vector<2x16x32xf32> -> vector<2x16x32xf32>
    "tpu.trace_stop"() : () -> ()
    %c0_71 = arith.constant 0 : index
    %c2_72 = arith.constant 2 : index
    %c0_73 = arith.constant 0 : index
    %c0_74 = arith.constant 0 : index
    %135 = vector.load %arg6[%c0_71, %c2_72, %c0_73, %c0_74] : memref<1x3x1x32xf32, #tpu.memory_space<vmem>>, vector<1x1x1x32xf32>
    %136 = vector.shape_cast %135 : vector<1x1x1x32xf32> to vector<1x32xf32>
    %137 = vector.shape_cast %136 : vector<1x32xf32> to vector<1x1x32xf32>
    %138 = vector.broadcast %137 : vector<1x1x32xf32> to vector<2x16x32xf32>
    %139 = arith.addf %134, %138 : vector<2x16x32xf32>
    %140 = vector.broadcast %6 : vector<2x16x1xf32> to vector<2x16x32xf32>
    %141 = arith.mulf %139, %140 : vector<2x16x32xf32>
    %142 = arith.truncf %141 : vector<2x16x32xf32> to vector<2x16x32xbf16>
    %c0_75 = arith.constant 0 : index
    %c0_76 = arith.constant 0 : index
    %c0_77 = arith.constant 0 : index
    %c0_78 = arith.constant 0 : index
    %143 = vector.load %arg7[%c0_75, %c0_76, %c0_77, %c0_78] : memref<1x4x32x32xbf16, #tpu.memory_space<vmem>>, vector<1x1x32x32xbf16>
    %144 = vector.shape_cast %143 : vector<1x1x32x32xbf16> to vector<32x32xbf16>
    "tpu.trace_start"() <{level = 10 : i32, message = "btd,de->bte"}> : () -> ()
    %cst_79 = arith.constant dense<0.000000e+00> : vector<2x16x32xf32>
    %145 = tpu.matmul %99, %144, %cst_79 {dimension_numbers = #tpu.dot_dimension_numbers<[2], [0], [0, 1], [1], [0, 0, 0, 1, 1, 1], [], []>} : vector<2x16x32xbf16>, vector<32x32xbf16>, vector<2x16x32xf32> -> vector<2x16x32xf32>
    "tpu.trace_stop"() : () -> ()
    %c0_80 = arith.constant 0 : index
    %c1_81 = arith.constant 1 : index
    %c0_82 = arith.constant 0 : index
    %c0_83 = arith.constant 0 : index
    %146 = vector.load %arg7[%c0_80, %c1_81, %c0_82, %c0_83] : memref<1x4x32x32xbf16, #tpu.memory_space<vmem>>, vector<1x1x32x32xbf16>
    %147 = vector.shape_cast %146 : vector<1x1x32x32xbf16> to vector<32x32xbf16>
    "tpu.trace_start"() <{level = 10 : i32, message = "btd,de->bte"}> : () -> ()
    %cst_84 = arith.constant dense<0.000000e+00> : vector<2x16x32xf32>
    %148 = tpu.matmul %56, %147, %cst_84 {dimension_numbers = #tpu.dot_dimension_numbers<[2], [0], [0, 1], [1], [0, 0, 0, 1, 1, 1], [], []>} : vector<2x16x32xbf16>, vector<32x32xbf16>, vector<2x16x32xf32> -> vector<2x16x32xf32>
    "tpu.trace_stop"() : () -> ()
    %149 = arith.addf %145, %148 : vector<2x16x32xf32>
    %c0_85 = arith.constant 0 : index
    %c0_86 = arith.constant 0 : index
    %c0_87 = arith.constant 0 : index
    %c0_88 = arith.constant 0 : index
    %150 = vector.load %arg8[%c0_85, %c0_86, %c0_87, %c0_88] : memref<1x2x1x32xf32, #tpu.memory_space<vmem>>, vector<1x1x1x32xf32>
    %151 = vector.shape_cast %150 : vector<1x1x1x32xf32> to vector<1x32xf32>
    %152 = vector.shape_cast %151 : vector<1x32xf32> to vector<1x1x32xf32>
    %153 = vector.broadcast %152 : vector<1x1x32xf32> to vector<2x16x32xf32>
    %154 = arith.addf %149, %153 : vector<2x16x32xf32>
    %cst_89 = arith.constant 0.000000e+00 : f32
    %155 = vector.broadcast %cst_89 : f32 to vector<2x16x32xf32>
    %156 = arith.maximumf %154, %155 : vector<2x16x32xf32>
    %c0_90 = arith.constant 0 : index
    %c2_91 = arith.constant 2 : index
    %c0_92 = arith.constant 0 : index
    %c0_93 = arith.constant 0 : index
    %157 = vector.load %arg7[%c0_90, %c2_91, %c0_92, %c0_93] : memref<1x4x32x32xbf16, #tpu.memory_space<vmem>>, vector<1x1x32x32xbf16>
    %158 = vector.shape_cast %157 : vector<1x1x32x32xbf16> to vector<32x32xbf16>
    "tpu.trace_start"() <{level = 10 : i32, message = "btd,de->bte"}> : () -> ()
    %cst_94 = arith.constant dense<0.000000e+00> : vector<2x16x32xf32>
    %159 = tpu.matmul %142, %158, %cst_94 {dimension_numbers = #tpu.dot_dimension_numbers<[2], [0], [0, 1], [1], [0, 0, 0, 1, 1, 1], [], []>} : vector<2x16x32xbf16>, vector<32x32xbf16>, vector<2x16x32xf32> -> vector<2x16x32xf32>
    "tpu.trace_stop"() : () -> ()
    %c0_95 = arith.constant 0 : index
    %c3 = arith.constant 3 : index
    %c0_96 = arith.constant 0 : index
    %c0_97 = arith.constant 0 : index
    %160 = vector.load %arg7[%c0_95, %c3, %c0_96, %c0_97] : memref<1x4x32x32xbf16, #tpu.memory_space<vmem>>, vector<1x1x32x32xbf16>
    %161 = vector.shape_cast %160 : vector<1x1x32x32xbf16> to vector<32x32xbf16>
    "tpu.trace_start"() <{level = 10 : i32, message = "btd,de->bte"}> : () -> ()
    %cst_98 = arith.constant dense<0.000000e+00> : vector<2x16x32xf32>
    %162 = tpu.matmul %99, %161, %cst_98 {dimension_numbers = #tpu.dot_dimension_numbers<[2], [0], [0, 1], [1], [0, 0, 0, 1, 1, 1], [], []>} : vector<2x16x32xbf16>, vector<32x32xbf16>, vector<2x16x32xf32> -> vector<2x16x32xf32>
    "tpu.trace_stop"() : () -> ()
    %163 = arith.addf %159, %162 : vector<2x16x32xf32>
    %c0_99 = arith.constant 0 : index
    %c1_100 = arith.constant 1 : index
    %c0_101 = arith.constant 0 : index
    %c0_102 = arith.constant 0 : index
    %164 = vector.load %arg8[%c0_99, %c1_100, %c0_101, %c0_102] : memref<1x2x1x32xf32, #tpu.memory_space<vmem>>, vector<1x1x1x32xf32>
    %165 = vector.shape_cast %164 : vector<1x1x1x32xf32> to vector<1x32xf32>
    %166 = vector.shape_cast %165 : vector<1x32xf32> to vector<1x1x32xf32>
    %167 = vector.broadcast %166 : vector<1x1x32xf32> to vector<2x16x32xf32>
    %168 = arith.addf %163, %167 : vector<2x16x32xf32>
    %cst_103 = arith.constant 0.000000e+00 : f32
    %169 = vector.broadcast %cst_103 : f32 to vector<2x16x32xf32>
    %170 = arith.maximumf %168, %169 : vector<2x16x32xf32>
    %c0_104 = arith.constant 0 : index
    %c0_105 = arith.constant 0 : index
    %c0_106 = arith.constant 0 : index
    %c0_107 = arith.constant 0 : index
    %171 = vector.load %arg9[%c0_104, %c0_105, %c0_106, %c0_107] : memref<1x2x1x32xf32, #tpu.memory_space<vmem>>, vector<1x1x1x32xf32>
    %172 = vector.shape_cast %171 : vector<1x1x1x32xf32> to vector<1x32xf32>
    %173 = vector.shape_cast %172 : vector<1x32xf32> to vector<1x1x32xf32>
    %174 = vector.broadcast %173 : vector<1x1x32xf32> to vector<2x16x32xf32>
    %175 = arith.mulf %156, %174 : vector<2x16x32xf32>
    %cst_108 = arith.constant dense<0.000000e+00> : vector<2x16xf32>
    %176 = vector.multi_reduction <add>, %175, %cst_108 [2] : vector<2x16x32xf32> to vector<2x16xf32>
    %c0_109 = arith.constant 0 : index
    %c0_110 = arith.constant 0 : index
    %c0_111 = arith.constant 0 : index
    %c0_112 = arith.constant 0 : index
    %177 = vector.load %arg10[%c0_109, %c0_110, %c0_111, %c0_112] : memref<1x2x1x1xf32, #tpu.memory_space<vmem>>, vector<1x1x1x1xf32>
    %178 = vector.shape_cast %177 : vector<1x1x1x1xf32> to vector<1x1xf32>
    %179 = vector.broadcast %178 : vector<1x1xf32> to vector<2x16xf32>
    %180 = arith.addf %176, %179 : vector<2x16xf32>
    %181 = arith.addf %180, %10 : vector<2x16xf32>
    %c0_113 = arith.constant 0 : index
    %c0_114 = arith.constant 0 : index
    %c0_115 = arith.constant 0 : index
    %c0_116 = arith.constant 0 : index
    %182 = vector.load %arg11[%c0_113, %c0_114, %c0_115, %c0_116] : memref<1x2x2x16xf32, #tpu.memory_space<vmem>>, vector<1x1x2x16xf32>
    %183 = vector.shape_cast %182 : vector<1x1x2x16xf32> to vector<2x16xf32>
    %184 = vector.shape_cast %181 : vector<2x16xf32> to vector<1x1x2x16xf32>
    tpu.vector_store %arg11[%c0_113, %c0_114, %c0_115, %c0_116], %184 {strides = array<i32>} : memref<1x2x2x16xf32, #tpu.memory_space<vmem>>, vector<1x1x2x16xf32>,
    %c0_117 = arith.constant 0 : index
    %c1_118 = arith.constant 1 : index
    %c0_119 = arith.constant 0 : index
    %c0_120 = arith.constant 0 : index
    %185 = vector.load %arg9[%c0_117, %c1_118, %c0_119, %c0_120] : memref<1x2x1x32xf32, #tpu.memory_space<vmem>>, vector<1x1x1x32xf32>
    %186 = vector.shape_cast %185 : vector<1x1x1x32xf32> to vector<1x32xf32>
    %187 = vector.shape_cast %186 : vector<1x32xf32> to vector<1x1x32xf32>
    %188 = vector.broadcast %187 : vector<1x1x32xf32> to vector<2x16x32xf32>
    %189 = arith.mulf %170, %188 : vector<2x16x32xf32>
    %cst_121 = arith.constant dense<0.000000e+00> : vector<2x16xf32>
    %190 = vector.multi_reduction <add>, %189, %cst_121 [2] : vector<2x16x32xf32> to vector<2x16xf32>
    %c0_122 = arith.constant 0 : index
    %c1_123 = arith.constant 1 : index
    %c0_124 = arith.constant 0 : index
    %c0_125 = arith.constant 0 : index
    %191 = vector.load %arg10[%c0_122, %c1_123, %c0_124, %c0_125] : memref<1x2x1x1xf32, #tpu.memory_space<vmem>>, vector<1x1x1x1xf32>
    %192 = vector.shape_cast %191 : vector<1x1x1x1xf32> to vector<1x1xf32>
    %193 = vector.broadcast %192 : vector<1x1xf32> to vector<2x16xf32>
    %194 = arith.addf %190, %193 : vector<2x16xf32>
    %195 = arith.addf %194, %10 : vector<2x16xf32>
    %c0_126 = arith.constant 0 : index
    %c1_127 = arith.constant 1 : index
    %c0_128 = arith.constant 0 : index
    %c0_129 = arith.constant 0 : index
    %196 = vector.load %arg11[%c0_126, %c1_127, %c0_128, %c0_129] : memref<1x2x2x16xf32, #tpu.memory_space<vmem>>, vector<1x1x2x16xf32>
    %197 = vector.shape_cast %196 : vector<1x1x2x16xf32> to vector<2x16xf32>
    %198 = vector.shape_cast %195 : vector<2x16xf32> to vector<1x1x2x16xf32>
    tpu.vector_store %arg11[%c0_126, %c1_127, %c0_128, %c0_129], %198 {strides = array<i32>} : memref<1x2x2x16xf32, #tpu.memory_space<vmem>>, vector<1x1x2x16xf32>,
    return
  }
  func.func @transform_0(%arg0: i32) -> (i32, i32, i32, i32) {
    %c0_i32 = arith.constant 0 : i32
    %c0_i32_0 = arith.constant 0 : i32
    %c0_i32_1 = arith.constant 0 : i32
    %c0_i32_2 = arith.constant 0 : i32
    return %arg0, %c0_i32, %c0_i32_0, %c0_i32_1 : i32, i32, i32, i32
  }
  func.func @transform_1(%arg0: i32) -> (i32, i32) {
    %c0_i32 = arith.constant 0 : i32
    %c0_i32_0 = arith.constant 0 : i32
    %c0_i32_1 = arith.constant 0 : i32
    return %c0_i32, %c0_i32_0 : i32, i32
  }
  func.func @transform_2(%arg0: i32) -> (i32, i32, i32, i32) {
    %c0_i32 = arith.constant 0 : i32
    %c0_i32_0 = arith.constant 0 : i32
    %c0_i32_1 = arith.constant 0 : i32
    %c0_i32_2 = arith.constant 0 : i32
    return %arg0, %c0_i32, %c0_i32_0, %c0_i32_1 : i32, i32, i32, i32
  }
  func.func @transform_3(%arg0: i32) -> (i32, i32, i32, i32) {
    %c0_i32 = arith.constant 0 : i32
    %c0_i32_0 = arith.constant 0 : i32
    %c0_i32_1 = arith.constant 0 : i32
    %c0_i32_2 = arith.constant 0 : i32
    return %arg0, %c0_i32, %c0_i32_0, %c0_i32_1 : i32, i32, i32, i32
  }
  func.func @transform_4(%arg0: i32) -> (i32, i32, i32, i32) {
    %c0_i32 = arith.constant 0 : i32
    %c0_i32_0 = arith.constant 0 : i32
    %c0_i32_1 = arith.constant 0 : i32
    %c0_i32_2 = arith.constant 0 : i32
    return %arg0, %c0_i32, %c0_i32_0, %c0_i32_1 : i32, i32, i32, i32
  }
  func.func @transform_5(%arg0: i32) -> (i32, i32, i32, i32) {
    %c0_i32 = arith.constant 0 : i32
    %c0_i32_0 = arith.constant 0 : i32
    %c0_i32_1 = arith.constant 0 : i32
    %c0_i32_2 = arith.constant 0 : i32
    return %arg0, %c0_i32, %c0_i32_0, %c0_i32_1 : i32, i32, i32, i32
  }
  func.func @transform_6(%arg0: i32) -> (i32, i32, i32, i32) {
    %c0_i32 = arith.constant 0 : i32
    %c0_i32_0 = arith.constant 0 : i32
    %c0_i32_1 = arith.constant 0 : i32
    %c0_i32_2 = arith.constant 0 : i32
    return %arg0, %c0_i32, %c0_i32_0, %c0_i32_1 : i32, i32, i32, i32
  }
  func.func @transform_7(%arg0: i32) -> (i32, i32, i32, i32) {
    %c0_i32 = arith.constant 0 : i32
    %c0_i32_0 = arith.constant 0 : i32
    %c0_i32_1 = arith.constant 0 : i32
    %c0_i32_2 = arith.constant 0 : i32
    return %arg0, %c0_i32, %c0_i32_0, %c0_i32_1 : i32, i32, i32, i32
  }
  func.func @transform_8(%arg0: i32) -> (i32, i32, i32, i32) {
    %c0_i32 = arith.constant 0 : i32
    %c0_i32_0 = arith.constant 0 : i32
    %c0_i32_1 = arith.constant 0 : i32
    %c0_i32_2 = arith.constant 0 : i32
    return %arg0, %c0_i32, %c0_i32_0, %c0_i32_1 : i32, i32, i32, i32
  }
  func.func @transform_9(%arg0: i32) -> (i32, i32, i32, i32) {
    %c0_i32 = arith.constant 0 : i32
    %c0_i32_0 = arith.constant 0 : i32
    %c0_i32_1 = arith.constant 0 : i32
    %c0_i32_2 = arith.constant 0 : i32
    return %arg0, %c0_i32, %c0_i32_0, %c0_i32_1 : i32, i32, i32, i32
  }
  func.func @transform_10(%arg0: i32) -> (i32, i32, i32, i32) {
    %c0_i32 = arith.constant 0 : i32
    %c0_i32_0 = arith.constant 0 : i32
    %c0_i32_1 = arith.constant 0 : i32
    %c0_i32_2 = arith.constant 0 : i32
    return %arg0, %c0_i32, %c0_i32_0, %c0_i32_1 : i32, i32, i32, i32
  }
}

</mosaic_0001>

<bundles_post_ra>
// kernel: adpnet_forward.3
= control target key start
LH: loop header
LB: loop body
LE: loop exit
PB: predicated region body
PF: predicated region fallthrough
CT: control target
= control target key end

     0   :  { %s2253_s13 = smov 0   ;;  %s2559_s0 = inlined_call_operand.vmem [shape: f32[2,2,16,32], index: 0, kind: input, shape index: {}]   ;;  %s2560_s1 = inlined_call_operand.vmem [shape: f32[2,16], index: 1, kind: input, shape index: {}]   ;;  %s2561_s2 = inlined_call_operand.vmem [shape: bf16[2,3,32,96], index: 2, kind: input, shape index: {}]   ;;  %s2562_s3 = inlined_call_operand.vmem [shape: f32[2,3,1,96], index: 3, kind: input, shape index: {}]   ;;  %s2563_s4 = inlined_call_operand.vmem [shape: bf16[2,3,32,32], index: 4, kind: input, shape index: {}]   ;;  %s2564_s5 = inlined_call_operand.vmem [shape: f32[2,3,1,32], index: 5, kind: input, shape index: {}]   ;;  %s2565_s6 = inlined_call_operand.vmem [shape: bf16[2,4,32,32], index: 6, kind: input, shape index: {}]   ;;  %s2566_s7 = inlined_call_operand.vmem [shape: f32[2,2,1,32], index: 7, kind: input, shape index: {}]   ;;  %s2567_s8 = inlined_call_operand.vmem [shape: f32[2,2,1,32], index: 8, kind: input, shape index: {}]   ;;  %s2568_s9 = inlined_call_operand.vmem [shape: f32[2,2,1,1], index: 9, kind: input, shape index: {}]   ;;  %s2569_s10 = inlined_call_operand.vmem [shape: f32[2,2,2,16], index: 10, kind: output, shape index: {}]  }
   0x1 LB: > { %s1914_s14 = sadd.s32 4294967295, %s2193_s13   ;;  %p1918_p0 = scmp.ge.s32.totalorder %s2193_s13, 1  ;;  %s2193_s13 = sphi %s2253_s13, %s20_s13  }
   0x2   : > { %p387_p1 = scmp.lt.s32.totalorder %s2193_s13, 3 }
   0x4   : > { %p388_p2 = pnand %p1918_p0, %p387_p1 }
   0x5   : > { %p460_p3 = scmp.lt.s32.totalorder (!%p388_p2), %s1914_s14, 1  ;;  %s2195_s27 = smov (!%p388_p2), 96  }
   0x6   : > { %391 = sbr.rel (%p388_p2) target bundleno = 3299 (0xce3), region = 60  ;;  %s2196_s30 = smov (!%p388_p2), 64  }
   0xb   : > { %s2571_s14 = smov (!%p460_p3, %s1914_s14), 1  ;;  %vm577_vm0 = vcmask 261120   ;;  %v2301_v39 = vld [vmem:[%s2560_s1] sm:$0x3]  ;;  %vm675_vm1 = vcmask 130048   ;;  %vm1690_vm2 = vcmask 130112  }
   0xc   : > { %s2103_s15 = smul.u32 48, %s2571_s14  ;;  %s2080_s16 = sshll.u32 %s2571_s14, 5  ;;  %v507_v40 = vsub.f32 1.0, %v2301_v39  ;;  %vm1695_vm3 = vcmask 1041409   ;;  %vm1698_vm4 = vcmask 123904  }
   0xd   : > { %s464_s19 = scalar_lea.vmem %s2559_s0, %s2080_s16  ;;  %s2104_s20 = smul.u32 3, %s2571_s14 }
   0xe   : > { %s2274_s23 = scalar_lea.vmem %s2561_s2, %s2103_s15  ;;  %v539_v0 = vld [vmem:[%s464_s19] sm:$0xff]  ;;  %v540_v1 = vld [vmem:[%s464_s19 + $0x8] sm:$0xff]  ;;  %v541_v9 = vld [vmem:[%s464_s19 + $0x10] sm:$0xff]  ;;  %v2304_v41 = vmul.f32 -1e+30, %v507_v40  ;;  %v509_v47 = vrot.slane %v507_v40, 1 }
   0xf   : > { %v2084_v2 = vld [vmem:[%s2274_s23 + $0x8] sm:$0xff]  ;;  %v543_v3 = vpack.c.bf16 %v539_v0, %v539_v0  ;;  %v544_v4 = vpack.c.bf16 %v540_v1, %v540_v1  ;;  %s2282_s26 = scalar_lea.vmem %s2562_s3, %s2104_s20  ;;  %v2083_v5 = vld [vmem:[%s2274_s23] sm:$0xff]  ;;  %v542_v10 = vld [vmem:[%s464_s19 + $0x18] sm:$0xff]  ;;  %v545_v11 = vpack.c.bf16 %v541_v9, %v541_v9  ;;  %s2333_s16 = scalar_lea.vmem %s2564_s5, %s2104_s20 }
  0x10   : > { %590 = vmatpush.bf16.msra.mxu0 %v2084_v2  ;;  %v546_v12 = vpack.c.bf16 %v542_v10, %v542_v10  ;;  %v2127_v17 = vld [vmem:[%s2282_s26] ss:$0 sm:$0xff]  ;;  %v2307_v42 = vperm.slane %v2304_v41, 0  ;;  %v512_v51 = vmul.f32 -1e+30, %v509_v47  ;;  %s2340_s19 = scalar_lea.vmem %s2563_s4, %s2103_s15  ;;  %v514_v47 = vlaneseq  ;;  %s2081_s15 = sshll.u32 %s2571_s14, 6 }
  0x11   : > { %v559_v6 = vunpack.c.l.b16 %v543_v3  ;;  %v560_v7 = vunpack.c.l.b16 %v544_v4  ;;  %v561_v13 = vunpack.c.l.b16 %v545_v11  ;;  %s2421_s22 = scalar_lea.vmem %s2565_s6, %s2081_s15 }
  0x12   : > { %v562_v14 = vunpack.c.l.b16 %v546_v12  ;;  %v2313_v53 = vperm.slane %v512_v51, 0 }
  0x13   : > { %v563_v8 = vpack.c.b16 %v560_v7, %v559_v6 }
  0x14   : > { %591 = vmatpush.bf16.msra.mxu0 %v2083_v5  ;;  %v564_v15 = vpack.c.b16 %v562_v14, %v561_v13 }
  0x17   : > { %1938 = vmatmul.msk.bf16.vlgmr.msra.gmra.mxu0 %vm577_vm0, %v563_v8 }
  0x27   : > { %1939 = vmatmul.msk.bf16.gmra.mxu0 %vm577_vm0, %v564_v15 }
  0x94   : > { %v593_v16 = vpop.f32.mrf.mxu0 }
  0x95   : > { %v594_v18 = vadd.f32 %v2127_v17, %v593_v16 }
  0x97   : > { %v603_v20 = vpack.c.bf16 %v594_v18, %v594_v18 }
  0x99   : > { %v609_v23 = vunpack.c.l.b16 %v603_v20 }
  0x9c   : > { %v595_v19 = vpop.f32.mrf.mxu0 }
  0x9d   : > { %v596_v21 = vadd.f32 %v2127_v17, %v595_v19 }
  0x9f   : > { %v604_v22 = vpack.c.bf16 %v596_v21, %v596_v21 }
  0xa1   : > { %v610_v24 = vunpack.c.l.b16 %v604_v22 }
  0xa3   : > { %v611_v25 = vpack.c.b16 %v610_v24, %v609_v23 }
  0xa4   : > { %v598_v26 = vpop.f32.mrf.mxu0 }
  0xa5   : > { %612 = vrot.lane.b32.xlu0 %v611_v25, %s2195_s27  ;;  %v599_v27 = vadd.f32 %v2127_v17, %v598_v26 }
  0xa7   : > { %v605_v29 = vpack.c.bf16 %v599_v27, %v599_v27 }
  0xa9   : > { %v636_v32 = vunpack.c.l.b16 %v605_v29 }
  0xac   : > { %v600_v28 = vpop.f32.mrf.mxu0 }
  0xad   : > { %v601_v30 = vadd.f32 %v2127_v17, %v600_v28 }
  0xaf   : > { %v606_v31 = vpack.c.bf16 %v601_v30, %v601_v30 }
  0xb1   : > { %v637_v33 = vunpack.c.l.b16 %v606_v31 }
  0xb3   : > { %v2289_v34 = vpack.c.b16 %v637_v33, %v636_v32 }
  0xb5   : > { %639 = vrot.lane.b32.xlu0 %v2289_v34, %s2195_s27 }
 0x117   : > { %v613_v35 = vpop.permute.xlu0 %612 }
 0x118   : > { %v618_v36 = vsel %vm577_vm0, %v613_v35, 0 }
 0x119   : > { %627 = vmatpush.bf16.xpose.msra.mxu2 %v618_v36 }
 0x120   : > { %1940 = vmatmul.msk.bf16.vlgmr.msra.gmra.mxu2 %vm577_vm0, %v611_v25 }
 0x127   : > { %v640_v37 = vpop.permute.xlu0 %639 }
 0x128   : > { %v645_v38 = vsel %vm577_vm0, %v640_v37, 0 }
 0x129   : > { %654 = vmatpush.bf16.xpose.msrb.mxu2 %v645_v38 }
 0x130   : > { %1941 = vmatmul.msk.bf16.vlgmr.msrb.gmra.mxu2 %vm577_vm0, %v2289_v34 }
 0x1a3   : > { %v629_v43 = vpop.f32.mrf.mxu2 }
 0x1a4   : > { %v661_v44 = vmul.f32 0.17677669, %v629_v43 }
 0x1a6   : > { %v671_v45 = vadd.f32 %v2307_v42, %v661_v44 }
 0x1a8   : > { %v676_v46 = vsel %vm675_vm1, %v671_v45, -inf }
 0x1a9   : > { %677 = vmax.xlane.f32.xlu1 %v676_v46  ;;  %v2085_v46 = vld [vmem:[%s2340_s19] sm:$0xff] }
 0x1ab   : > { %v631_v48 = vpop.f32.mrf.mxu2 }
 0x1ac   : > { %v662_v49 = vmul.f32 0.17677669, %v631_v48 }
 0x1ae   : > { %v672_v50 = vadd.f32 %v2307_v42, %v662_v49  ;;  %v2345_v49 = vshrl.u32 %v514_v47, 7 }
 0x1b0   : > { %v679_v52 = vsel %vm675_vm1, %v672_v50, -inf  ;;  %2116 = vset.pattern.permute.xlu2 %v2345_v49 }
 0x1b1   : > { %680 = vmax.xlane.f32.xlu1 %v679_v52 }
 0x1b3   : > { %v656_v54 = vpop.f32.mrf.mxu2 }
 0x1b4   : > { %v663_v55 = vmul.f32 0.17677669, %v656_v54  ;;  %v513_v54 = vperm.slane %v2301_v39, 0 }
 0x1b6   : > { %v673_v56 = vadd.f32 %v2313_v53, %v663_v55 }
 0x1b8   : > { %v682_v57 = vsel %vm675_vm1, %v673_v56, -inf }
 0x1b9   : > { %683 = vmax.xlane.f32.xlu2 %v682_v57  ;;  %v2350_v57 = vadd.s32 8, %v2345_v49 }
 0x1bb   : > { %v658_v58 = vpop.f32.mrf.mxu2  ;;  %2119 = vset.pattern.permute.xlu0 %v2350_v57 }
 0x1bc   : > { %v664_v59 = vmul.f32 0.17677669, %v658_v58 }
 0x1be   : > { %v674_v60 = vadd.f32 %v2313_v53, %v664_v59  ;;  %v526_v59 = vperm.slane %v2301_v39, 1  ;;  %v2087_v39 = vld [vmem:[%s2274_s23 + $0x10] sm:$0xff] }
 0x1c0   : > { %v685_v61 = vsel %vm675_vm1, %v674_v60, -inf }
 0x1c1   : > { %686 = vmax.xlane.f32.xlu2 %v685_v61 }
 0x1d9   : > { %729 = vrot.lane.b32.xlu2 %v611_v25, %s2196_s30 }
 0x1e1   : > { %518 = vperm.xlu2 %2116, %v513_v54  }
 0x1e9   : > { %2117 = vset.pattern.permute.xlu2 %v2350_v57 }
 0x1f1   : > { %524 = vperm.xlu2 %2117, %v513_v54  }
 0x1f9   : > { %2118 = vset.pattern.permute.xlu2 %v2345_v49 }
 0x201   : > { %531 = vperm.xlu2 %2118, %v526_v59  }
 0x21c   : > { %v678_v62 = vpop.xlane.xlu1 %677 }
 0x21d   : > { %v688_v63 = vsub.f32 %v671_v45, %v678_v62  ;;  %v2086_v45 = vld [vmem:[%s2340_s19 + $0x8] sm:$0xff] }
 0x21e   : > { %820 = vmatpush.bf16.msra.mxu1 %v2086_v45 }
 0x21f   : > { %v692_v0 = vmul.f32 1.442695, %v688_v63 }
 0x221   : > { %2139 = vpow2.f32 %v692_v0 }
 0x222   : > { %821 = vmatpush.bf16.msra.mxu1 %v2085_v46 }
 0x224   : > { %v681_v1 = vpop.xlane.xlu1 %680 }
 0x225   : > { %v689_v2 = vsub.f32 %v672_v50, %v681_v1 }
 0x227   : > { %v2140_v3 = vpop.eup %2139  ;;  %v694_v4 = vmul.f32 1.442695, %v689_v2 }
 0x228   : > { %v700_v5 = vsel %vm675_vm1, %v2140_v3, 0.0 }
 0x229   : > { %2141 = vpow2.f32 %v694_v4  ;;  %701 = vadd.xlane.f32.xlu0 %v700_v5  ;;  %v2128_v5 = vld [vmem:[%s2333_s16] ss:$0 sm:$0xff] }
 0x22c   : > { %v684_v6 = vpop.xlane.xlu2 %683 }
 0x22d   : > { %v690_v7 = vsub.f32 %v673_v56, %v684_v6 }
 0x22f   : > { %v2142_v8 = vpop.eup %2141  ;;  %v696_v9 = vmul.f32 1.442695, %v690_v7 }
 0x230   : > { %v703_v10 = vsel %vm675_vm1, %v2142_v8, 0.0 }
 0x231   : > { %2143 = vpow2.f32 %v696_v9  ;;  %704 = vadd.xlane.f32.xlu1 %v703_v10 }
 0x234   : > { %v687_v11 = vpop.xlane.xlu2 %686 }
 0x235   : > { %v691_v12 = vsub.f32 %v674_v60, %v687_v11 }
 0x237   : > { %v2144_v13 = vpop.eup %2143  ;;  %v698_v14 = vmul.f32 1.442695, %v691_v12 }
 0x238   : > { %v706_v15 = vsel %vm675_vm1, %v2144_v13, 0.0 }
 0x239   : > { %2145 = vpow2.f32 %v698_v14  ;;  %707 = vadd.xlane.f32.xlu1 %v706_v15 }
 0x23c   : > { %v730_v16 = vpop.permute.xlu2 %729 }
 0x23d   : > { %742 = vmatpush.bf16.msra.mxu3 %v730_v16  ;;  %537 = vperm.xlu0 %2119, %v526_v59  }
 0x23f   : > { %v2146_v17 = vpop.eup %2145 }
 0x240   : > { %v709_v18 = vsel %vm675_vm1, %v2146_v17, 0.0 }
 0x241   : > { %710 = vadd.xlane.f32.xlu1 %v709_v18 }
 0x244   : > { %v2360_v4 = vpop.permute.xlu2 %518 }
 0x24c   : > { %v2364_v10 = vpop.permute.xlu2 %524 }
 0x25a   : > { %754 = vrot.lane.b32.xlu1 %v2289_v34, %s2196_s30 }
 0x29c   : > { %v702_v19 = vpop.xlane.xlu0 %701 }
 0x29d   : > { %2147 = vrcp.f32 %v702_v19 }
 0x2a3   : > { %v2148_v21 = vpop.eup %2147 }
 0x2a4   : > { %v705_v20 = vpop.xlane.xlu1 %704  ;;  %v716_v22 = vmul.f32 %v2148_v21, %v2140_v3  ;;  %v2088_v3 = vld [vmem:[%s2274_s23 + $0x18] sm:$0xff] }
 0x2a5   : > { %2149 = vrcp.f32 %v705_v20  ;;  %885 = vmatpush.bf16.msra.mxu2 %v2088_v3  ;;  %v2371_v20 = vpop.permute.xlu2 %531 }
 0x2a6   : > { %v720_v26 = vpack.c.bf16 %v716_v22, %v716_v22 }
 0x2a8   : > { %v726_v28 = vunpack.c.l.b16 %v720_v26 }
 0x2a9   : > { %886 = vmatpush.bf16.msra.mxu2 %v2087_v39 }
 0x2ab   : > { %v2150_v23 = vpop.eup %2149 }
 0x2ac   : > { %v708_v24 = vpop.xlane.xlu1 %707  ;;  %v717_v25 = vmul.f32 %v2150_v23, %v2142_v8 }
 0x2ae   : > { %v721_v27 = vpack.c.bf16 %v717_v25, %v717_v25 }
 0x2af   : > { %v2374_v23 = vpop.permute.xlu0 %537 }
 0x2b0   : > { %v727_v29 = vunpack.c.l.b16 %v721_v27 }
 0x2b2   : > { %v728_v30 = vpack.c.b16 %v727_v29, %v726_v28 }
 0x2b4   : > { %1942 = vmatmul.msk.bf16.vlgmr.msra.gmra.mxu3 %vm675_vm1, %v728_v30  ;;  %v711_v31 = vpop.xlane.xlu1 %710 }
 0x2b5   : > { %2151 = vrcp.f32 %v711_v31 }
 0x2b6   : > { %2153 = vrcp.f32 %v708_v24 }
 0x2bb   : > { %v2152_v32 = vpop.eup %2151 }
 0x2bc   : > { %v2154_v33 = vpop.eup %2153  ;;  %v719_v34 = vmul.f32 %v2152_v32, %v2146_v17  ;;  %v2129_v32 = vld [vmem:[%s2282_s26 + $0x1] ss:$0 sm:$0xff] }
 0x2bd   : > { %v718_v35 = vmul.f32 %v2154_v33, %v2144_v13 }
 0x2be   : > { %v723_v36 = vpack.c.bf16 %v719_v34, %v719_v34 }
 0x2bf   : > { %v722_v37 = vpack.c.bf16 %v718_v35, %v718_v35 }
 0x2c0   : > { %v752_v38 = vunpack.c.l.b16 %v723_v36 }
 0x2c1   : > { %v751_v40 = vunpack.c.l.b16 %v722_v37 }
 0x2c3   : > { %v753_v44 = vpack.c.b16 %v752_v38, %v751_v40 }
 0x2cc   : > { %v755_v43 = vpop.permute.xlu1 %754 }
 0x2cd   : > { %767 = vmatpush.bf16.msrb.mxu3 %v755_v43 }
 0x2d0   : > { %1943 = vmatmul.msk.bf16.vlgmr.msrb.gmra.mxu3 %vm675_vm1, %v753_v44 }
 0x337   : > { %v744_v48 = vpop.f32.mrf.mxu3 }
 0x338   : > { %v778_v50 = vpack.c.bf16 %v744_v48, %v744_v48 }
 0x33a   : > { %v790_v55 = vunpack.c.l.b16 %v778_v50 }
 0x33f   : > { %v746_v51 = vpop.f32.mrf.mxu3 }
 0x340   : > { %v779_v52 = vpack.c.bf16 %v746_v51, %v746_v51 }
 0x342   : > { %v791_v56 = vunpack.c.l.b16 %v779_v52 }
 0x344   : > { %v794_v58 = vpack.c.b16 %v791_v56, %v790_v55 }
 0x346   : > { %1952 = vmatmul.msk.bf16.vlgmr.msra.gmra.mxu1 %vm577_vm0, %v794_v58 }
 0x353   : > { %v769_v60 = vpop.f32.mrf.mxu3 }
 0x354   : > { %v780_v61 = vpack.c.bf16 %v769_v60, %v769_v60 }
 0x356   : > { %v792_v0 = vunpack.c.l.b16 %v780_v61 }
 0x35b   : > { %v771_v62 = vpop.f32.mrf.mxu3 }
 0x35c   : > { %v781_v63 = vpack.c.bf16 %v771_v62, %v771_v62 }
 0x35e   : > { %v793_v1 = vunpack.c.l.b16 %v781_v63 }
 0x360   : > { %v795_v2 = vpack.c.b16 %v793_v1, %v792_v0 }
 0x362   : > { %1953 = vmatmul.msk.bf16.gmra.mxu1 %vm577_vm0, %v795_v2 }
 0x3c3   : > { %v823_v6 = vpop.f32.mrf.mxu1 }
 0x3c4   : > { %v824_v7 = vadd.f32 %v2128_v5, %v823_v6 }
 0x3c6   : > { %v833_v8 = vmul.f32 %v824_v7, %v2360_v4 }
 0x3c8   : > { %v837_v12 = vpack.c.bf16 %v833_v8, %v833_v8 }
 0x3ca   : > { %v855_v15 = vunpack.c.l.b16 %v837_v12 }
 0x3cb   : > { %v825_v9 = vpop.f32.mrf.mxu1 }
 0x3cc   : > { %v826_v11 = vadd.f32 %v2128_v5, %v825_v9 }
 0x3ce   : > { %v834_v13 = vmul.f32 %v826_v11, %v2364_v10 }
 0x3d0   : > { %v838_v14 = vpack.c.bf16 %v834_v13, %v834_v13 }
 0x3d2   : > { %v856_v16 = vunpack.c.l.b16 %v838_v14 }
 0x3d4   : > { %v2367_v17 = vpack.c.b16 %v856_v16, %v855_v15 }
 0x3d6   : > { %1967 = vmatmul.msk.bf16.vlgmr.msra.gmra.mxu2 %vm577_vm0, %v2367_v17 }
 0x3df   : > { %v828_v18 = vpop.f32.mrf.mxu1 }
 0x3e0   : > { %v829_v19 = vadd.f32 %v2128_v5, %v828_v18 }
 0x3e2   : > { %v835_v21 = vmul.f32 %v829_v19, %v2371_v20 }
 0x3e4   : > { %v839_v25 = vpack.c.bf16 %v835_v21, %v835_v21 }
 0x3e6   : > { %v857_v28 = vunpack.c.l.b16 %v839_v25 }
 0x3e7   : > { %v830_v22 = vpop.f32.mrf.mxu1 }
 0x3e8   : > { %v831_v24 = vadd.f32 %v2128_v5, %v830_v22 }
 0x3ea   : > { %v836_v26 = vmul.f32 %v831_v24, %v2374_v23 }
 0x3ec   : > { %v840_v27 = vpack.c.bf16 %v836_v26, %v836_v26 }
 0x3ee   : > { %v858_v29 = vunpack.c.l.b16 %v840_v27 }
 0x3f0   : > { %v2377_v30 = vpack.c.b16 %v858_v29, %v857_v28 }
 0x3f2   : > { %1968 = vmatmul.msk.bf16.gmra.mxu2 %vm577_vm0, %v2377_v30 }
 0x459   : > { %v888_v31 = vpop.f32.mrf.mxu2 }
 0x45a   : > { %v889_v33 = vadd.f32 %v2129_v32, %v888_v31 }
 0x45c   : > { %v898_v35 = vpack.c.bf16 %v889_v33, %v889_v33 }
 0x45e   : > { %v904_v38 = vunpack.c.l.b16 %v898_v35 }
 0x461   : > { %v890_v34 = vpop.f32.mrf.mxu2 }
 0x462   : > { %v891_v36 = vadd.f32 %v2129_v32, %v890_v34 }
 0x464   : > { %v899_v37 = vpack.c.bf16 %v891_v36, %v891_v36 }
 0x466   : > { %v905_v40 = vunpack.c.l.b16 %v899_v37 }
 0x468   : > { %v906_v43 = vpack.c.b16 %v905_v40, %v904_v38 }
 0x46a   : > { %907 = vrot.lane.b32.xlu2 %v906_v43, %s2195_s27 }
 0x475   : > { %v893_v44 = vpop.f32.mrf.mxu2 }
 0x476   : > { %v894_v45 = vadd.f32 %v2129_v32, %v893_v44 }
 0x478   : > { %v900_v48 = vpack.c.bf16 %v894_v45, %v894_v45 }
 0x47a   : > { %v931_v52 = vunpack.c.l.b16 %v900_v48 }
 0x47d   : > { %v895_v46 = vpop.f32.mrf.mxu2 }
 0x47e   : > { %v896_v50 = vadd.f32 %v2129_v32, %v895_v46 }
 0x480   : > { %v901_v51 = vpack.c.bf16 %v896_v50, %v896_v50 }
 0x482   : > { %v932_v54 = vunpack.c.l.b16 %v901_v51 }
 0x484   : > { %v933_v55 = vpack.c.b16 %v932_v54, %v931_v52 }
 0x486   : > { %934 = vrot.lane.b32.xlu1 %v933_v55, %s2195_s27 }
 0x4c4   : > { %v908_v56 = vpop.permute.xlu2 %907 }
 0x4c5   : > { %v913_v58 = vsel %vm577_vm0, %v908_v56, 0 }
 0x4c6   : > { %922 = vmatpush.bf16.xpose.msra.mxu3 %v913_v58 }
 0x4cd   : > { %1969 = vmatmul.msk.bf16.vlgmr.msra.gmra.mxu3 %vm577_vm0, %v906_v43 }
 0x4f8   : > { %v935_v59 = vpop.permute.xlu1 %934 }
 0x4f9   : > { %v940_v60 = vsel %vm577_vm0, %v935_v59, 0 }
 0x4fa   : > { %949 = vmatpush.bf16.xpose.msrb.mxu0 %v940_v60 }
 0x501   : > { %1970 = vmatmul.msk.bf16.vlgmr.msrb.gmra.mxu0 %vm577_vm0, %v933_v55 }
 0x550   : > { %v924_v61 = vpop.f32.mrf.mxu3 }
 0x551   : > { %v956_v62 = vmul.f32 0.17677669, %v924_v61 }
 0x553   : > { %v960_v63 = vadd.f32 %v956_v62, %v2307_v42 }
 0x555   : > { %v964_v0 = vsel %vm675_vm1, %v960_v63, -inf }
 0x556   : > { %965 = vmax.xlane.f32.xlu2 %v964_v0 }
 0x558   : > { %v926_v1 = vpop.f32.mrf.mxu3 }
 0x559   : > { %v957_v2 = vmul.f32 0.17677669, %v926_v1 }
 0x55b   : > { %v961_v3 = vadd.f32 %v957_v2, %v2307_v42 }
 0x55d   : > { %v967_v39 = vsel %vm675_vm1, %v961_v3, -inf }
 0x55e   : > { %968 = vmax.xlane.f32.xlu1 %v967_v39 }
 0x57e   : > { %v951_v5 = vpop.f32.mrf.mxu0 }
 0x57f   : > { %v958_v6 = vmul.f32 0.17677669, %v951_v5  ;;  %v2090_v5 = vld [vmem:[%s2340_s19 + $0x18] sm:$0xff] }
 0x580   : > { %1110 = vmatpush.bf16.msrb.mxu1 %v2090_v5 }
 0x581   : > { %v962_v7 = vadd.f32 %v958_v6, %v2313_v53  ;;  %v2089_v6 = vld [vmem:[%s2340_s19 + $0x10] sm:$0xff] }
 0x583   : > { %v970_v8 = vsel %vm675_vm1, %v962_v7, -inf }
 0x584   : > { %971 = vmax.xlane.f32.xlu0 %v970_v8  ;;  %1111 = vmatpush.bf16.msrb.mxu1 %v2089_v6 }
 0x586   : > { %v953_v9 = vpop.f32.mrf.mxu0 }
 0x587   : > { %v959_v11 = vmul.f32 0.17677669, %v953_v9 }
 0x589   : > { %v963_v12 = vadd.f32 %v959_v11, %v2313_v53 }
 0x58b   : > { %v973_v13 = vsel %vm675_vm1, %v963_v12, -inf }
 0x58c   : > { %974 = vmax.xlane.f32.xlu2 %v973_v13 }
 0x598   : > { %1042 = vrot.lane.b32.xlu0 %v933_v55, %s2196_s30 }
 0x5c9   : > { %v966_v14 = vpop.xlane.xlu2 %965 }
 0x5ca   : > { %v976_v15 = vsub.f32 %v960_v63, %v966_v14 }
 0x5cc   : > { %v980_v16 = vmul.f32 1.442695, %v976_v15 }
 0x5ce   : > { %2155 = vpow2.f32 %v980_v16 }
 0x5d1   : > { %v969_v18 = vpop.xlane.xlu1 %968 }
 0x5d2   : > { %v977_v19 = vsub.f32 %v961_v3, %v969_v18 }
 0x5d4   : > { %v2156_v21 = vpop.eup %2155  ;;  %v982_v22 = vmul.f32 1.442695, %v977_v19 }
 0x5d5   : > { %v988_v24 = vsel %vm675_vm1, %v2156_v21, 0.0 }
 0x5d6   : > { %2157 = vpow2.f32 %v982_v22  ;;  %989 = vadd.xlane.f32.xlu1 %v988_v24 }
 0x5dc   : > { %v2158_v25 = vpop.eup %2157 }
 0x5dd   : > { %v991_v26 = vsel %vm675_vm1, %v2158_v25, 0.0 }
 0x5de   : > { %992 = vadd.xlane.f32.xlu2 %v991_v26  ;;  %v2091_v26 = vld [vmem:[%s2274_s23 + $0x20] sm:$0xff] }
 0x5ef   : > { %1017 = vrot.lane.b32.xlu1 %v906_v43, %s2196_s30 }
 0x5f7   : > { %v972_v27 = vpop.xlane.xlu0 %971 }
 0x5f8   : > { %v978_v28 = vsub.f32 %v962_v7, %v972_v27  ;;  %v2130_v27 = vld [vmem:[%s2333_s16 + $0x1] ss:$0 sm:$0xff] }
 0x5fa   : > { %v984_v29 = vmul.f32 1.442695, %v978_v28 }
 0x5fc   : > { %2159 = vpow2.f32 %v984_v29 }
 0x5ff   : > { %v975_v31 = vpop.xlane.xlu2 %974 }
 0x600   : > { %v979_v32 = vsub.f32 %v963_v12, %v975_v31 }
 0x602   : > { %v2160_v33 = vpop.eup %2159  ;;  %v986_v34 = vmul.f32 1.442695, %v979_v32 }
 0x603   : > { %v994_v35 = vsel %vm675_vm1, %v2160_v33, 0.0 }
 0x604   : > { %2161 = vpow2.f32 %v986_v34  ;;  %995 = vadd.xlane.f32.xlu2 %v994_v35 }
 0x60a   : > { %v2162_v36 = vpop.eup %2161  ;;  %v1043_v37 = vpop.permute.xlu0 %1042 }
 0x60b   : > { %1055 = vmatpush.bf16.msra.mxu0 %v1043_v37  ;;  %v997_v38 = vsel %vm675_vm1, %v2162_v36, 0.0 }
 0x60c   : > { %998 = vadd.xlane.f32.xlu2 %v997_v38 }
 0x649   : > { %v990_v40 = vpop.xlane.xlu1 %989 }
 0x64a   : > { %2163 = vrcp.f32 %v990_v40 }
 0x650   : > { %v2164_v44 = vpop.eup %2163 }
 0x651   : > { %v993_v43 = vpop.xlane.xlu2 %992  ;;  %v1004_v46 = vmul.f32 %v2164_v44, %v2156_v21  ;;  %v2097_v44 = vld [vmem:[%s2421_s22 + $0x10] sm:$0xff] }
 0x652   : > { %2165 = vrcp.f32 %v993_v43  ;;  %v2098_v43 = vld [vmem:[%s2421_s22 + $0x18] sm:$0xff] }
 0x653   : > { %v1008_v51 = vpack.c.bf16 %v1004_v46, %v1004_v46 }
 0x655   : > { %v1014_v54 = vunpack.c.l.b16 %v1008_v51 }
 0x658   : > { %v2166_v45 = vpop.eup %2165 }
 0x659   : > { %v1005_v48 = vmul.f32 %v2166_v45, %v2158_v25  ;;  %v2092_v25 = vld [vmem:[%s2274_s23 + $0x28] sm:$0xff]  ;;  %s1925_s23 = sshll.u32 %s2571_s14, 1 }
 0x65a   : > { %1175 = vmatpush.bf16.msrb.mxu2 %v2092_v25  ;;  %s2465_s29 = scalar_lea.vmem %s2567_s8, %s1925_s23  ;;  %s2470_s17 = scalar_lea.vmem %s2568_s9, %s1925_s23 }
 0x65b   : > { %v1009_v50 = vpack.c.bf16 %v1005_v48, %v1005_v48 }
 0x65d   : > { %v1015_v52 = vunpack.c.l.b16 %v1009_v50 }
 0x65e   : > { %1176 = vmatpush.bf16.msrb.mxu2 %v2091_v26 }
 0x65f   : > { %v1016_v56 = vpack.c.b16 %v1015_v52, %v1014_v54 }
 0x661   : > { %v1018_v55 = vpop.permute.xlu1 %1017 }
 0x662   : > { %1030 = vmatpush.bf16.msrb.mxu3 %v1018_v55  ;;  %1448 = vmatpush.bf16.msra.mxu2 %v2098_v43 }
 0x665   : > { %1971 = vmatmul.msk.bf16.vlgmr.msrb.gmra.mxu3 %vm675_vm1, %v1016_v56 }
 0x666   : > { %1449 = vmatpush.bf16.msra.mxu2 %v2097_v44 }
 0x677   : > { %v996_v58 = vpop.xlane.xlu2 %995 }
 0x678   : > { %2167 = vrcp.f32 %v996_v58 }
 0x67e   : > { %v2168_v60 = vpop.eup %2167 }
 0x67f   : > { %v999_v59 = vpop.xlane.xlu2 %998  ;;  %v1006_v61 = vmul.f32 %v2168_v60, %v2160_v33 }
 0x680   : > { %2169 = vrcp.f32 %v999_v59 }
 0x681   : > { %v1010_v63 = vpack.c.bf16 %v1006_v61, %v1006_v61  ;;  %v2131_v61 = vld [vmem:[%s2282_s26 + $0x2] ss:$0 sm:$0xff]  ;;  %s2460_s26 = scalar_lea.vmem %s2566_s7, %s1925_s23 }
 0x683   : > { %v1039_v2 = vunpack.c.l.b16 %v1010_v63 }
 0x686   : > { %v2170_v62 = vpop.eup %2169 }
 0x687   : > { %v1007_v0 = vmul.f32 %v2170_v62, %v2162_v36 }
 0x689   : > { %v1011_v1 = vpack.c.bf16 %v1007_v0, %v1007_v0 }
 0x68b   : > { %v1040_v3 = vunpack.c.l.b16 %v1011_v1 }
 0x68d   : > { %v1041_v39 = vpack.c.b16 %v1040_v3, %v1039_v2 }
 0x68f   : > { %1972 = vmatmul.msk.bf16.vlgmr.msra.gmra.mxu0 %vm675_vm1, %v1041_v39 }
 0x6e8   : > { %v1032_v7 = vpop.f32.mrf.mxu3 }
 0x6e9   : > { %v1067_v8 = vpack.c.bf16 %v1032_v7, %v1032_v7 }
 0x6eb   : > { %v1080_v12 = vunpack.c.l.b16 %v1067_v8 }
 0x6f0   : > { %v1034_v9 = vpop.f32.mrf.mxu3 }
 0x6f1   : > { %v1068_v11 = vpack.c.bf16 %v1034_v9, %v1034_v9 }
 0x6f3   : > { %v1081_v13 = vunpack.c.l.b16 %v1068_v11 }
 0x6f5   : > { %v1084_v14 = vpack.c.b16 %v1081_v13, %v1080_v12 }
 0x6f7   : > { %1986 = vmatmul.msk.bf16.vlgmr.msrb.gmra.mxu1 %vm577_vm0, %v1084_v14 }
 0x70c   : > { %v1057_v15 = vpop.f32.mrf.mxu0 }
 0x70d   : > { %v1069_v16 = vpack.c.bf16 %v1057_v15, %v1057_v15 }
 0x70f   : > { %v1082_v21 = vunpack.c.l.b16 %v1069_v16 }
 0x714   : > { %v1059_v18 = vpop.f32.mrf.mxu0 }
 0x715   : > { %v1070_v19 = vpack.c.bf16 %v1059_v18, %v1059_v18 }
 0x717   : > { %v1083_v22 = vunpack.c.l.b16 %v1070_v19 }
 0x719   : > { %v1085_v24 = vpack.c.b16 %v1083_v22, %v1082_v21 }
 0x71b   : > { %1987 = vmatmul.msk.bf16.gmra.mxu1 %vm577_vm0, %v1085_v24 }
 0x774   : > { %v1113_v28 = vpop.f32.mrf.mxu1 }
 0x775   : > { %v1114_v29 = vadd.f32 %v2130_v27, %v1113_v28 }
 0x777   : > { %v1123_v31 = vmul.f32 %v1114_v29, %v2360_v4 }
 0x779   : > { %v1127_v34 = vpack.c.bf16 %v1123_v31, %v1123_v31 }
 0x77b   : > { %v1145_v37 = vunpack.c.l.b16 %v1127_v34 }
 0x77c   : > { %v1115_v32 = vpop.f32.mrf.mxu1 }
 0x77d   : > { %v1116_v33 = vadd.f32 %v2130_v27, %v1115_v32 }
 0x77f   : > { %v1124_v35 = vmul.f32 %v1116_v33, %v2364_v10 }
 0x781   : > { %v1128_v36 = vpack.c.bf16 %v1124_v35, %v1124_v35 }
 0x783   : > { %v1146_v38 = vunpack.c.l.b16 %v1128_v36 }
 0x785   : > { %v2413_v40 = vpack.c.b16 %v1146_v38, %v1145_v37 }
 0x787   : > { %2001 = vmatmul.msk.bf16.vlgmr.msrb.gmra.mxu2 %vm577_vm0, %v2413_v40 }
 0x798   : > { %v1118_v45 = vpop.f32.mrf.mxu1 }
 0x799   : > { %v1119_v46 = vadd.f32 %v2130_v27, %v1118_v45 }
 0x79b   : > { %v1125_v48 = vmul.f32 %v1119_v46, %v2371_v20 }
 0x79d   : > { %v1129_v52 = vpack.c.bf16 %v1125_v48, %v1125_v48 }
 0x79f   : > { %v1147_v56 = vunpack.c.l.b16 %v1129_v52 }
 0x7a0   : > { %v1120_v50 = vpop.f32.mrf.mxu1 }
 0x7a1   : > { %v1121_v51 = vadd.f32 %v2130_v27, %v1120_v50 }
 0x7a3   : > { %v1126_v54 = vmul.f32 %v1121_v51, %v2374_v23 }
 0x7a5   : > { %v1130_v55 = vpack.c.bf16 %v1126_v54, %v1126_v54 }
 0x7a7   : > { %v1148_v58 = vunpack.c.l.b16 %v1130_v55 }
 0x7a9   : > { %v2427_v59 = vpack.c.b16 %v1148_v58, %v1147_v56 }
 0x7ab   : > { %2002 = vmatmul.msk.bf16.gmra.mxu2 %vm577_vm0, %v2427_v59 }
 0x7bb   : > { %2034 = vmatmul.msk.bf16.vlgmr.msra.gmra.mxu2 %vm577_vm0, %v2367_v17 }
 0x7cb   : > { %2035 = vmatmul.msk.bf16.gmra.mxu2 %vm577_vm0, %v2377_v30 }
 0x80a   : > { %v1178_v60 = vpop.f32.mrf.mxu2 }
 0x80b   : > { %v1179_v62 = vadd.f32 %v2131_v61, %v1178_v60 }
 0x80d   : > { %v1188_v0 = vpack.c.bf16 %v1179_v62, %v1179_v62 }
 0x80f   : > { %v1194_v3 = vunpack.c.l.b16 %v1188_v0 }
 0x812   : > { %v1180_v63 = vpop.f32.mrf.mxu2 }
 0x813   : > { %v1181_v1 = vadd.f32 %v2131_v61, %v1180_v63 }
 0x815   : > { %v1189_v2 = vpack.c.bf16 %v1181_v1, %v1181_v1 }
 0x817   : > { %v1195_v39 = vunpack.c.l.b16 %v1189_v2 }
 0x819   : > { %v1196_v5 = vpack.c.b16 %v1195_v39, %v1194_v3 }
 0x81b   : > { %1197 = vrot.lane.b32.xlu2 %v1196_v5, %s2195_s27 }
 0x82e   : > { %v1183_v6 = vpop.f32.mrf.mxu2 }
 0x82f   : > { %v1184_v7 = vadd.f32 %v2131_v61, %v1183_v6 }
 0x831   : > { %v1190_v9 = vpack.c.bf16 %v1184_v7, %v1184_v7 }
 0x833   : > { %v1221_v12 = vunpack.c.l.b16 %v1190_v9  ;;  %v2096_v9 = vld [vmem:[%s2421_s22 + $0x8] sm:$0xff] }
 0x836   : > { %v1185_v8 = vpop.f32.mrf.mxu2 }
 0x837   : > { %v1186_v17 = vadd.f32 %v2131_v61, %v1185_v8 }
 0x839   : > { %v1191_v11 = vpack.c.bf16 %v1186_v17, %v1186_v17 }
 0x83b   : > { %v1222_v30 = vunpack.c.l.b16 %v1191_v11 }
 0x83d   : > { %v1223_v13 = vpack.c.b16 %v1222_v30, %v1221_v12 }
 0x83f   : > { %1224 = vrot.lane.b32.xlu1 %v1223_v13, %s2195_s27 }
 0x875   : > { %v1198_v14 = vpop.permute.xlu2 %1197 }
 0x876   : > { %v1203_v15 = vsel %vm577_vm0, %v1198_v14, 0 }
 0x877   : > { %1212 = vmatpush.bf16.xpose.msra.mxu3 %v1203_v15 }
 0x87e   : > { %2003 = vmatmul.msk.bf16.vlgmr.msra.gmra.mxu3 %vm577_vm0, %v1196_v5 }
 0x8b1   : > { %v1225_v16 = vpop.permute.xlu1 %1224 }
 0x8b2   : > { %v1230_v18 = vsel %vm577_vm0, %v1225_v16, 0  ;;  %v2102_v16 = vld [vmem:[%s2421_s22 + $0x38] sm:$0xff] }
 0x8b3   : > { %1239 = vmatpush.bf16.xpose.msrb.mxu0 %v1230_v18 }
 0x8ba   : > { %2004 = vmatmul.msk.bf16.vlgmr.msrb.gmra.mxu0 %vm577_vm0, %v1223_v13 }
 0x901   : > { %v1214_v19 = vpop.f32.mrf.mxu3 }
 0x902   : > { %v1246_v21 = vmul.f32 0.17677669, %v1214_v19 }
 0x904   : > { %v1250_v22 = vadd.f32 %v1246_v21, %v2307_v42  ;;  %v2132_v21 = vld [vmem:[%s2470_s17] ss:$0 sm:$0xff] }
 0x906   : > { %v1254_v24 = vsel %vm675_vm1, %v1250_v22, -inf }
 0x907   : > { %1255 = vmax.xlane.f32.xlu1 %v1254_v24  ;;  %v2197_v24 = vmov 0  }
 0x908   : > { %2120 = vset.pattern.permute.xlu1 %v2197_v24  ;;  %2121 = vset.pattern.permute.xlu0 %v2197_v24 }
 0x909   : > { %v1216_v25 = vpop.f32.mrf.mxu3 }
 0x90a   : > { %v1247_v26 = vmul.f32 0.17677669, %v1216_v25  ;;  %v2101_v25 = vld [vmem:[%s2421_s22 + $0x30] sm:$0xff] }
 0x90c   : > { %v1251_v27 = vadd.f32 %v1247_v26, %v2307_v42 }
 0x90e   : > { %v1257_v28 = vsel %vm675_vm1, %v1251_v27, -inf }
 0x90f   : > { %1258 = vmax.xlane.f32.xlu0 %v1257_v28 }
 0x937   : > { %v1241_v29 = vpop.f32.mrf.mxu0 }
 0x938   : > { %v1248_v31 = vmul.f32 0.17677669, %v1241_v29 }
 0x93a   : > { %v1252_v32 = vadd.f32 %v1248_v31, %v2313_v53 }
 0x93c   : > { %v1260_v33 = vsel %vm675_vm1, %v1252_v32, -inf }
 0x93d   : > { %1261 = vmax.xlane.f32.xlu2 %v1260_v33 }
 0x93f   : > { %v1243_v34 = vpop.f32.mrf.mxu0 }
 0x940   : > { %v1249_v35 = vmul.f32 0.17677669, %v1243_v34 }
 0x942   : > { %v1253_v36 = vadd.f32 %v1249_v35, %v2313_v53  ;;  %v2133_v35 = vld [vmem:[%s2470_s17 + $0x1] ss:$0 sm:$0xff] }
 0x944   : > { %v1263_v37 = vsel %vm675_vm1, %v1253_v36, -inf }
 0x945   : > { %1264 = vmax.xlane.f32.xlu1 %v1263_v37 }
 0x97a   : > { %v1256_v38 = vpop.xlane.xlu1 %1255 }
 0x97b   : > { %v1266_v43 = vsub.f32 %v1250_v22, %v1256_v38 }
 0x97d   : > { %v1270_v44 = vmul.f32 1.442695, %v1266_v43 }
 0x97f   : > { %2171 = vpow2.f32 %v1270_v44 }
 0x982   : > { %v1259_v45 = vpop.xlane.xlu0 %1258 }
 0x983   : > { %v1267_v46 = vsub.f32 %v1251_v27, %v1259_v45 }
 0x985   : > { %v2172_v48 = vpop.eup %2171  ;;  %v1272_v50 = vmul.f32 1.442695, %v1267_v46 }
 0x986   : > { %v1278_v51 = vsel %vm675_vm1, %v2172_v48, 0.0 }
 0x987   : > { %2173 = vpow2.f32 %v1272_v50  ;;  %1279 = vadd.xlane.f32.xlu0 %v1278_v51 }
 0x98d   : > { %v2174_v52 = vpop.eup %2173 }
 0x98e   : > { %v1281_v54 = vsel %vm675_vm1, %v2174_v52, 0.0 }
 0x98f   : > { %1282 = vadd.xlane.f32.xlu1 %v1281_v54 }
 0x99b   : > { %1307 = vrot.lane.b32.xlu0 %v1196_v5, %s2196_s30 }
 0x9a3   : > { %1726 = vperm.xlu0 %2121, %v2133_v35  }
 0x9b0   : > { %v1262_v53 = vpop.xlane.xlu2 %1261 }
 0x9b1   : > { %v1268_v55 = vsub.f32 %v1252_v32, %v1262_v53 }
 0x9b3   : > { %v1274_v56 = vmul.f32 1.442695, %v1268_v55 }
 0x9b5   : > { %2175 = vpow2.f32 %v1274_v56 }
 0x9b8   : > { %v1265_v58 = vpop.xlane.xlu1 %1264 }
 0x9b9   : > { %v1269_v60 = vsub.f32 %v1253_v36, %v1265_v58  ;;  %v1648_v36 = vperm.slane %v2304_v41, 1  ;;  %v2093_v41 = vld [vmem:[%s2340_s19 + $0x20] sm:$0xff] }
 0x9bb   : > { %v2176_v61 = vpop.eup %2175  ;;  %v1276_v62 = vmul.f32 1.442695, %v1269_v60 }
 0x9bc   : > { %v1284_v63 = vsel %vm675_vm1, %v2176_v61, 0.0 }
 0x9bd   : > { %2177 = vpow2.f32 %v1276_v62  ;;  %1285 = vadd.xlane.f32.xlu2 %v1284_v63 }
 0x9c3   : > { %v2178_v0 = vpop.eup %2177 }
 0x9c4   : > { %v1287_v1 = vsel %vm675_vm1, %v2178_v0, 0.0 }
 0x9c5   : > { %1288 = vadd.xlane.f32.xlu1 %v1287_v1 }
 0x9d5   : > { %1332 = vrot.lane.b32.xlu2 %v1223_v13, %s2196_s30  ;;  %v2095_v13 = vld [vmem:[%s2421_s22] sm:$0xff]  ;;  %s2082_s30 = sshll.u32 %s2571_s14, 2 }
 0x9dd   : > { %1640 = vperm.xlu2 %2118, %v2307_v42  }
 0x9de   : > { %1629 = vperm.xlu1 %2120, %v2132_v21  }
 0x9e5   : > { %2124 = vset.pattern.permute.xlu2 %v2350_v57 }
 0x9e6   : > { %2122 = vset.pattern.permute.xlu1 %v2350_v57  ;;  %v2094_v57 = vld [vmem:[%s2340_s19 + $0x28] sm:$0xff]  ;;  %s504_s19 = scalar_lea.vmem %s2569_s10, %s2082_s30 }
 0x9e7   : > { %1400 = vmatpush.bf16.msra.mxu1 %v2094_v57 }
 0x9eb   : > { %1401 = vmatpush.bf16.msra.mxu1 %v2093_v41 }
 0x9ed   : > { %1659 = vperm.xlu2 %2124, %v1648_v36  }
 0x9ee   : > { %1646 = vperm.xlu1 %2122, %v2307_v42  }
 0x9f5   : > { %2126 = vset.pattern.permute.xlu2 %v2197_v24 }
 0x9f6   : > { %2123 = vset.pattern.permute.xlu1 %v2345_v49  ;;  %v1451_v49 = vpop.f32.mrf.mxu2 }
 0x9fa   : > { %v1280_v2 = vpop.xlane.xlu0 %1279 }
 0x9fb   : > { %2179 = vrcp.f32 %v1280_v2 }
 0x9fe   : > { %1653 = vperm.xlu1 %2123, %v1648_v36  }
 0xa01   : > { %v2180_v39 = vpop.eup %2179 }
 0xa02   : > { %v1283_v3 = vpop.xlane.xlu1 %1282  ;;  %v1294_v5 = vmul.f32 %v2180_v39, %v2172_v48 }
 0xa03   : > { %2181 = vrcp.f32 %v1283_v3 }
 0xa04   : > { %v1298_v7 = vpack.c.bf16 %v1294_v5, %v1294_v5 }
 0xa06   : > { %v1304_v12 = vunpack.c.l.b16 %v1298_v7  ;;  %2125 = vset.pattern.permute.xlu1 %v2197_v24  ;;  %v2100_v24 = vld [vmem:[%s2421_s22 + $0x28] sm:$0xff] }
 0xa07   : > { %1579 = vmatpush.bf16.msrb.mxu1 %v2100_v24 }
 0xa09   : > { %v2182_v6 = vpop.eup %2181 }
 0xa0a   : > { %v1295_v8 = vmul.f32 %v2182_v6, %v2174_v52  ;;  %v1453_v52 = vpop.f32.mrf.mxu2 }
 0xa0c   : > { %v1299_v17 = vpack.c.bf16 %v1295_v8, %v1295_v8 }
 0xa0d   : > { %v1308_v11 = vpop.permute.xlu0 %1307 }
 0xa0e   : > { %v1305_v30 = vunpack.c.l.b16 %v1299_v17  ;;  %1320 = vmatpush.bf16.msrb.mxu3 %v1308_v11 }
 0xa10   : > { %v1306_v14 = vpack.c.b16 %v1305_v30, %v1304_v12 }
 0xa12   : > { %1479 = vmatpush.bf16.msra.mxu3 %v2096_v9  ;;  %v1456_v62 = vpop.f32.mrf.mxu2 }
 0xa13   : > { %2005 = vmatmul.msk.bf16.vlgmr.msrb.gmra.mxu3 %vm675_vm1, %v1306_v14 }
 0xa16   : > { %1480 = vmatpush.bf16.msra.mxu3 %v2095_v13 }
 0xa1a   : > { %v1458_v6 = vpop.f32.mrf.mxu2 }
 0xa23   : > { %2044 = vmatmul.msk.bf16.vlgmr.msra.gmra.mxu3 %vm577_vm0, %v2413_v40 }
 0xa30   : > { %v1286_v15 = vpop.xlane.xlu2 %1285 }
 0xa31   : > { %2183 = vrcp.f32 %v1286_v15 }
 0xa33   : > { %2045 = vmatmul.msk.bf16.gmra.mxu3 %vm577_vm0, %v2427_v59 }
 0xa37   : > { %v2184_v22 = vpop.eup %2183 }
 0xa38   : > { %v1289_v18 = vpop.xlane.xlu1 %1288  ;;  %v1333_v19 = vpop.permute.xlu2 %1332  ;;  %v1296_v26 = vmul.f32 %v2184_v22, %v2176_v61 }
 0xa39   : > { %2185 = vrcp.f32 %v1289_v18  ;;  %1345 = vmatpush.bf16.msra.mxu0 %v1333_v19 }
 0xa3a   : > { %v1300_v28 = vpack.c.bf16 %v1296_v26, %v1296_v26  ;;  %v2099_v26 = vld [vmem:[%s2421_s22 + $0x20] sm:$0xff] }
 0xa3b   : > { %1580 = vmatpush.bf16.msrb.mxu1 %v2099_v26 }
 0xa3c   : > { %v1329_v32 = vunpack.c.l.b16 %v1300_v28  ;;  %v2136_v28 = vld [vmem:[%s2333_s16 + $0x2] ss:$0 sm:$0xff] }
 0xa3d   : > { %1532 = vmatpush.bf16.msrb.mxu0 %v2102_v16 }
 0xa3f   : > { %v2186_v27 = vpop.eup %2185 }
 0xa40   : > { %v1297_v29 = vmul.f32 %v2186_v27, %v2178_v0 }
 0xa41   : > { %1533 = vmatpush.bf16.msrb.mxu0 %v2101_v25 }
 0xa42   : > { %v1301_v31 = vpack.c.bf16 %v1297_v29, %v1297_v29  ;;  %v2513_v29 = vpop.permute.xlu0 %1726 }
 0xa44   : > { %v1330_v33 = vunpack.c.l.b16 %v1301_v31 }
 0xa46   : > { %v1331_v34 = vpack.c.b16 %v1330_v33, %v1329_v32 }
 0xa48   : > { %2006 = vmatmul.msk.bf16.vlgmr.msra.gmra.mxu0 %vm675_vm1, %v1331_v34  ;;  %v2516_v34 = vpop.permute.xlu2 %1640 }
 0xa50   : > { %v2504_v22 = vpop.permute.xlu1 %1629 }
 0xa58   : > { %2062 = vmatmul.msk.bf16.vlgmr.msrb.gmra.mxu0 %vm577_vm0, %v2413_v40  ;;  %v2134_v40 = vld [vmem:[%s2460_s26] ss:$0 sm:$0xff] }
 0xa60   : > { %v2507_v25 = vpop.permute.xlu1 %1646 }
 0xa68   : > { %2063 = vmatmul.msk.bf16.gmra.mxu0 %vm577_vm0, %v2427_v59  ;;  %v2135_v59 = vld [vmem:[%s2465_s29] ss:$0 sm:$0xff] }
 0xa70   : > { %v2510_v27 = vpop.permute.xlu1 %1653 }
 0xa96   : > { %v1322_v42 = vpop.f32.mrf.mxu3 }
 0xa97   : > { %v1357_v37 = vpack.c.bf16 %v1322_v42, %v1322_v42 }
 0xa99   : > { %v1370_v44 = vunpack.c.l.b16 %v1357_v37 }
 0xa9e   : > { %v1324_v38 = vpop.f32.mrf.mxu3 }
 0xa9f   : > { %v1358_v43 = vpack.c.bf16 %v1324_v38, %v1324_v38 }
 0xaa1   : > { %v1371_v45 = vunpack.c.l.b16 %v1358_v43 }
 0xaa3   : > { %v1374_v46 = vpack.c.b16 %v1371_v45, %v1370_v44 }
 0xaa5   : > { %2020 = vmatmul.msk.bf16.vlgmr.msra.gmra.mxu1 %vm577_vm0, %v1374_v46 }
 0xaa6   : > { %v1482_v48 = vpop.f32.mrf.mxu3 }
 0xaa7   : > { %v1483_v50 = vadd.f32 %v1482_v48, %v1451_v49 }
 0xaa9   : > { %v1496_v51 = vadd.f32 %v2134_v40, %v1483_v50 }
 0xaab   : > { %v1500_v54 = vmax.f32 %v1496_v51, 0.0 }
 0xaad   : > { %v1609_v53 = vmul.f32 %v2135_v59, %v1500_v54 }
 0xaae   : > { %v1484_v55 = vpop.f32.mrf.mxu3 }
 0xaaf   : > { %v1485_v56 = vadd.f32 %v1484_v55, %v1453_v52  ;;  %v1613_v58 = vsel %vm577_vm0, %v1609_v53, 0.0 }
 0xab0   : > { %1614 = vadd.xlane.f32.xlu1 %v1613_v58 }
 0xab1   : > { %v1497_v60 = vadd.f32 %v2134_v40, %v1485_v56 }
 0xab3   : > { %v1501_v61 = vmax.f32 %v1497_v60, 0.0 }
 0xab5   : > { %v1610_v63 = vmul.f32 %v2135_v59, %v1501_v61  ;;  %v2137_v61 = vld [vmem:[%s2460_s26 + $0x1] ss:$0 sm:$0xff] }
 0xab6   : > { %v1487_v0 = vpop.f32.mrf.mxu3 }
 0xab7   : > { %v1488_v1 = vadd.f32 %v1487_v0, %v1456_v62  ;;  %v1616_v2 = vsel %vm577_vm0, %v1610_v63, 0.0 }
 0xab8   : > { %1617 = vadd.xlane.f32.xlu0 %v1616_v2 }
 0xab9   : > { %v1498_v3 = vadd.f32 %v2134_v40, %v1488_v1  ;;  %v2138_v1 = vld [vmem:[%s2465_s29 + $0x1] ss:$0 sm:$0xff] }
 0xabb   : > { %v1502_v39 = vmax.f32 %v1498_v3, 0.0 }
 0xabd   : > { %v1611_v5 = vmul.f32 %v2135_v59, %v1502_v39 }
 0xabe   : > { %v1489_v7 = vpop.f32.mrf.mxu3 }
 0xabf   : > { %v1490_v8 = vadd.f32 %v1489_v7, %v1458_v6  ;;  %v1619_v9 = vsel %vm577_vm0, %v1611_v5, 0.0 }
 0xac0   : > { %1620 = vadd.xlane.f32.xlu1 %v1619_v9 }
 0xac1   : > { %v1499_v17 = vadd.f32 %v2134_v40, %v1490_v8 }
 0xac3   : > { %v1503_v11 = vmax.f32 %v1499_v17, 0.0 }
 0xac5   : > { %v1612_v12 = vmul.f32 %v2135_v59, %v1503_v11  ;;  %v1347_v30 = vpop.f32.mrf.mxu0 }
 0xac6   : > { %v1359_v14 = vpack.c.bf16 %v1347_v30, %v1347_v30 }
 0xac7   : > { %v1622_v13 = vsel %vm577_vm0, %v1612_v12, 0.0 }
 0xac8   : > { %1623 = vadd.xlane.f32.xlu1 %v1622_v13  ;;  %v1372_v18 = vunpack.c.l.b16 %v1359_v14 }
 0xacd   : > { %v1349_v15 = vpop.f32.mrf.mxu0 }
 0xace   : > { %v1360_v16 = vpack.c.bf16 %v1349_v15, %v1349_v15 }
 0xad0   : > { %v1373_v19 = vunpack.c.l.b16 %v1360_v16 }
 0xad2   : > { %v1375_v21 = vpack.c.b16 %v1373_v19, %v1372_v18 }
 0xad4   : > { %2021 = vmatmul.msk.bf16.gmra.mxu1 %vm577_vm0, %v1375_v21 }
 0xad5   : > { %v1535_v60 = vpop.f32.mrf.mxu0 }
 0xb22   : > { %v1403_v31 = vpop.f32.mrf.mxu1 }
 0xb23   : > { %v1615_v32 = vpop.xlane.xlu1 %1614  ;;  %v1404_v35 = vadd.f32 %v2136_v28, %v1403_v31 }
 0xb24   : > { %v1632_v33 = vadd.f32 %v2504_v22, %v1615_v32 }
 0xb25   : > { %v1413_v57 = vmul.f32 %v1404_v35, %v2360_v4 }
 0xb26   : > { %v1665_v36 = vadd.f32 %v2516_v34, %v1632_v33 }
 0xb27   : > { %v1417_v43 = vpack.c.bf16 %v1413_v57, %v1413_v57  ;;  %v1660_v57 = vpop.permute.xlu2 %1659 }
 0xb28   : > { %1674 = vperm.xlu1 %2125, %v1665_v36  }
 0xb29   : > { %v1549_v46 = vunpack.c.l.b16 %v1417_v43 }
 0xb2a   : > { %v1405_v41 = vpop.f32.mrf.mxu1 }
 0xb2b   : > { %v1406_v42 = vadd.f32 %v2136_v28, %v1405_v41  ;;  %v1618_v37 = vpop.xlane.xlu0 %1617 }
 0xb2c   : > { %v1633_v38 = vadd.f32 %v2504_v22, %v1618_v37 }
 0xb2d   : > { %v1414_v49 = vmul.f32 %v1406_v42, %v2364_v10 }
 0xb2e   : > { %v1666_v44 = vadd.f32 %v2507_v25, %v1633_v38 }
 0xb2f   : > { %v1418_v45 = vpack.c.bf16 %v1414_v49, %v1414_v49 }
 0xb30   : > { %1677 = vperm.xlu0 %2121, %v1666_v44  }
 0xb31   : > { %v1550_v40 = vunpack.c.l.b16 %v1418_v45 }
 0xb33   : > { %v1553_v48 = vpack.c.b16 %v1550_v40, %v1549_v46  ;;  %v1621_v17 = vpop.xlane.xlu1 %1620 }
 0xb34   : > { %v1634_v11 = vadd.f32 %v2504_v22, %v1621_v17 }
 0xb35   : > { %2072 = vmatmul.msk.bf16.vlgmr.msrb.gmra.mxu1 %vm577_vm0, %v1553_v48 }
 0xb36   : > { %v1667_v12 = vadd.f32 %v2510_v27, %v1634_v11 }
 0xb3b   : > { %v1624_v35 = vpop.xlane.xlu1 %1623 }
 0xb3c   : > { %v1635_v36 = vadd.f32 %v2504_v22, %v1624_v35 }
 0xb3e   : > { %v1668_v41 = vadd.f32 %v1660_v57, %v1635_v36 }
 0xb51   : > { %v1408_v50 = vpop.f32.mrf.mxu1 }
 0xb52   : > { %v1409_v4 = vadd.f32 %v2136_v28, %v1408_v50 }
 0xb54   : > { %v1415_v51 = vmul.f32 %v1409_v4, %v2371_v20  ;;  %v1537_v20 = vpop.f32.mrf.mxu0 }
 0xb56   : > { %v1419_v54 = vpack.c.bf16 %v1415_v51, %v1415_v51 }
 0xb58   : > { %v1551_v55 = vunpack.c.l.b16 %v1419_v54 }
 0xb59   : > { %v1410_v59 = vpop.f32.mrf.mxu1 }
 0xb5a   : > { %v1411_v52 = vadd.f32 %v2136_v28, %v1410_v59 }
 0xb5c   : > { %v1416_v10 = vmul.f32 %v1411_v52, %v2374_v23  ;;  %v1540_v30 = vpop.f32.mrf.mxu0 }
 0xb5e   : > { %v1420_v53 = vpack.c.bf16 %v1416_v10, %v1416_v10 }
 0xb60   : > { %v1552_v56 = vunpack.c.l.b16 %v1420_v53 }
 0xb62   : > { %v1554_v58 = vpack.c.b16 %v1552_v56, %v1551_v55 }
 0xb64   : > { %2073 = vmatmul.msk.bf16.gmra.mxu1 %vm577_vm0, %v1554_v58  ;;  %v1542_v19 = vpop.f32.mrf.mxu0 }
 0xb9a   : > { %v1675_v42 = vpop.permute.xlu1 %1674 }
 0xba2   : > { %v1678_v59 = vpop.permute.xlu0 %1677 }
 0xbb2   : > { %v1582_v62 = vpop.f32.mrf.mxu1 }
 0xbb3   : > { %v1583_v63 = vadd.f32 %v1582_v62, %v1535_v60 }
 0xbb5   : > { %v1597_v0 = vadd.f32 %v2137_v61, %v1583_v63 }
 0xbb7   : > { %v1601_v2 = vmax.f32 %v1597_v0, 0.0 }
 0xbb9   : > { %v1705_v3 = vmul.f32 %v2138_v1, %v1601_v2 }
 0xbba   : > { %v1584_v39 = vpop.f32.mrf.mxu1 }
 0xbbb   : > { %v1585_v5 = vadd.f32 %v1584_v39, %v1537_v20  ;;  %v1709_v6 = vsel %vm577_vm0, %v1705_v3, 0.0 }
 0xbbc   : > { %1710 = vadd.xlane.f32.xlu2 %v1709_v6 }
 0xbbd   : > { %v1598_v23 = vadd.f32 %v2137_v61, %v1585_v5 }
 0xbbf   : > { %v1602_v7 = vmax.f32 %v1598_v23, 0.0 }
 0xbc1   : > { %v1706_v8 = vmul.f32 %v2138_v1, %v1602_v7 }
 0xbc3   : > { %v1712_v9 = vsel %vm577_vm0, %v1706_v8, 0.0 }
 0xbc4   : > { %1713 = vadd.xlane.f32.xlu1 %v1712_v9 }
 0xbd4   : > { %1680 = vperm.xlu2 %2126, %v1667_v12  }
 0xbe1   : > { %v1587_v13 = vpop.f32.mrf.mxu1 }
 0xbe2   : > { %v1588_v14 = vadd.f32 %v1587_v13, %v1540_v30 }
 0xbe4   : > { %v1599_v15 = vadd.f32 %v2137_v61, %v1588_v14 }
 0xbe6   : > { %v1603_v16 = vmax.f32 %v1599_v15, 0.0 }
 0xbe8   : > { %v1707_v18 = vmul.f32 %v2138_v1, %v1603_v16 }
 0xbe9   : > { %v1589_v21 = vpop.f32.mrf.mxu1 }
 0xbea   : > { %v1590_v24 = vadd.f32 %v1589_v21, %v1542_v19  ;;  %v1715_v26 = vsel %vm577_vm0, %v1707_v18, 0.0 }
 0xbeb   : > { %1716 = vadd.xlane.f32.xlu1 %v1715_v26 }
 0xbec   : > { %v1600_v28 = vadd.f32 %v2137_v61, %v1590_v24 }
 0xbee   : > { %v1604_v31 = vmax.f32 %v1600_v28, 0.0 }
 0xbf0   : > { %v1708_v32 = vmul.f32 %v2138_v1, %v1604_v31 }
 0xbf2   : > { %v1718_v33 = vsel %vm577_vm0, %v1708_v32, 0.0 }
 0xbf3   : > { %1719 = vadd.xlane.f32.xlu1 %v1718_v33 }
 0xc0c   : > { %1683 = vperm.xlu1 %2125, %v1668_v41  }
 0xc2f   : > { %v1711_v37 = vpop.xlane.xlu2 %1710 }
 0xc30   : > { %v1729_v38 = vadd.f32 %v2513_v29, %v1711_v37 }
 0xc32   : > { %v1733_v43 = vadd.f32 %v1729_v38, %v2516_v34  ;;  %v1686_v34 = vand.u32 127, %v514_v47 }
 0xc34   : > { %1742 = vperm.xlu0 %2121, %v1733_v43   ;;  %v1688_v51 = vadd.s32 4294967288, %v1686_v34  ;;  %v1687_v10 = vperm.slane %v1675_v42, %v1686_v34 }
 0xc36   : > { %v1689_v54 = vperm.slane %v1678_v59, %v1688_v51 }
 0xc37   : > { %v1714_v49 = vpop.xlane.xlu1 %1713  ;;  %v1681_v52 = vpop.permute.xlu2 %1680 }
 0xc38   : > { %v1730_v44 = vadd.f32 %v2513_v29, %v1714_v49  ;;  %v1692_v53 = vperm.slane %v1681_v52, %v1686_v34 }
 0xc3a   : > { %v1734_v45 = vadd.f32 %v1730_v44, %v2507_v25 }
 0xc3c   : > { %1745 = vperm.xlu2 %2126, %v1734_v45  }
 0xc5e   : > { %v1717_v46 = vpop.xlane.xlu1 %1716 }
 0xc5f   : > { %v1731_v22 = vadd.f32 %v2513_v29, %v1717_v46 }
 0xc61   : > { %v1735_v40 = vadd.f32 %v1731_v22, %v2510_v27  ;;  %v1691_v27 = vsel %vm1690_vm2, %v1689_v54, %v1687_v10 }
 0xc63   : > { %1748 = vperm.xlu1 %2125, %v1735_v40  }
 0xc66   : > { %v1720_v48 = vpop.xlane.xlu1 %1719 }
 0xc67   : > { %v1732_v50 = vadd.f32 %v2513_v29, %v1720_v48 }
 0xc69   : > { %v1736_v4 = vadd.f32 %v1732_v50, %v1660_v57 }
 0xc6b   : > { %1751 = vperm.xlu0 %2121, %v1736_v4  }
 0xc7e   : > { %v1684_v25 = vpop.permute.xlu1 %1683 }
 0xc7f   : > { %v1693_v55 = vperm.slane %v1684_v25, %v1688_v51 }
 0xc81   : > { %v1694_v47 = vsel %vm1690_vm2, %v1693_v55, %v1692_v53 }
 0xc82   : > { %v1696_v29 = vsel %vm1695_vm3, %v1694_v47, %v1691_v27 }
 0xc83   : > { %1699 = vst.msk [vmem:[%s504_s19] sm:$0x3] %vm1698_vm4, %v1696_v29 }
 0xc96   : > { %v1746_v58 = vpop.permute.xlu2 %1745 }
 0xc97   : > { %v1754_v63 = vperm.slane %v1746_v58, %v1688_v51 }
 0xca6   : > { %v1743_v56 = vpop.permute.xlu0 %1742 }
 0xca7   : > { %v1753_v61 = vperm.slane %v1743_v56, %v1686_v34 }
 0xca9   : > { %v1755_v2 = vsel %vm1690_vm2, %v1754_v63, %v1753_v61 }
 0xcd5   : > { %v1749_v60 = vpop.permute.xlu1 %1748 }
 0xcd6   : > { %v1756_v0 = vperm.slane %v1749_v60, %v1686_v34 }
 0xcdd   : > { %v1752_v62 = vpop.permute.xlu0 %1751 }
 0xcde   : > { %v1757_v1 = vperm.slane %v1752_v62, %v1688_v51 }
 0xce0   : > { %v1758_v3 = vsel %vm1690_vm2, %v1757_v1, %v1756_v0 }
 0xce1   : > { %v1759_v20 = vsel %vm1695_vm3, %v1758_v3, %v1755_v2 }
 0xce2   : > { %2077 = vst.msk [vmem:[%s504_s19 + $0x2] sm:$0x3] %vm1698_vm4, %v1759_v20 }
 0xce3 PF: > { %s20_s13 = sadd.s32 1, %s2193_s13  }
 0xce4   : > { %p17_p4 = scmp.ge.s32.totalorder %s20_s13, 4  }
 0xce6   :  { %19 = sbr.rel (!%p17_p4) target bundleno = 1 (0x1), region = 129 }

// kernel: adpnet_forward.2
= control target key start
LH: loop header
LB: loop body
LE: loop exit
PB: predicated region body
PF: predicated region fallthrough
CT: control target
= control target key end

     0   :  { %s5436_s6 = smov 1   ;;  %s5437_s10 = smov 2   ;;  %s6678_s0 = inlined_call_operand.smem [shape: u32[53], index: -1, kind: input, shape index: {}] }
   0x1   :  { %s5511_s5 = sld [smem:[%s6678_s0]]   ;;  %s5438_s14 = smov 3  }
   0x2   :  { %s5516_s9 = sld [smem:[%s6678_s0 + %s5436_s6]]   ;;  %s5439_s18 = smov 4  }
   0x3   :  { %s5521_s13 = sld [smem:[%s6678_s0 + %s5437_s10]]   ;;  %s5440_s22 = smov 5  }
   0x4   :  { %s5526_s17 = sld [smem:[%s6678_s0 + %s5438_s14]]   ;;  %s5441_s26 = smov 6  }
   0x5   :  { %s5531_s21 = sld [smem:[%s6678_s0 + %s5439_s18]]   ;;  %s5442_s30 = smov 7  }
   0x6   :  { %s5536_s25 = sld [smem:[%s6678_s0 + %s5440_s22]]   ;;  %s5443_s4 = smov 8  }
   0x7   :  { %s5541_s29 = sld [smem:[%s6678_s0 + %s5441_s26]]   ;;  %s5444_s10 = smov 9  }
   0x8   :  { %s5546_s3 = sld [smem:[%s6678_s0 + %s5442_s30]]   ;;  %s5445_s15 = smov 10  }
   0x9   :  { %6705 = sst [smem:[#allocation27_spill]] %s5521_s13  ;;  %s5446_s20 = smov 11  }
   0xa   :  { %6706 = sst [smem:[#allocation28_spill]] %s5526_s17  ;;  %s5447_s26 = smov 12  }
   0xb   :  { %6707 = sst [smem:[#allocation29_spill]] %s5531_s21  ;;  %s5448_s1 = smov 13  }
   0xc   :  { %6708 = sst [smem:[#allocation30_spill]] %s5536_s25  ;;  %s5449_s7 = smov 14  }
   0xd   :  { %6709 = sst [smem:[#allocation31_spill]] %s5541_s29  ;;  %s5451_s22 = smov 16  }
   0xe   :  { %6710 = sst [smem:[#allocation32_spill]] %s5546_s3  ;;  %s5452_s28 = smov 17  }
   0xf   :  { %s5551_s8 = sld [smem:[%s6678_s0 + %s5443_s4]]   ;;  %s5458_s16 = smov 23  }
  0x10   :  { %s5556_s14 = sld [smem:[%s6678_s0 + %s5444_s10]]   ;;  %s5459_s23 = smov 24  }
  0x11   :  { %s5561_s19 = sld [smem:[%s6678_s0 + %s5445_s15]]   ;;  %s5450_s15 = smov 15  }
  0x12   :  { %s5566_s24 = sld [smem:[%s6678_s0 + %s5446_s20]]   ;;  %s5461_s10 = smov 26  }
  0x13   :  { %s5571_s30 = sld [smem:[%s6678_s0 + %s5447_s26]]   ;;  %s5469_s25 = smov 35  }
  0x14   :  { %s5576_s6 = sld [smem:[%s6678_s0 + %s5448_s1]]   ;;  %s5460_s1 = smov 25  }
  0x15   :  { %6711 = sst [smem:[#allocation33_spill]] %s5551_s8  ;;  %s5470_s8 = smov 36  }
  0x16   :  { %6712 = sst [smem:[#allocation34_spill]] %s5556_s14  ;;  %s5472_s21 = smov 38  }
  0x17   :  { %6713 = sst [smem:[#allocation35_spill]] %s5561_s19 }
  0x18   :  { %6714 = sst [smem:[#allocation36_spill]] %s5566_s24 }
  0x19   :  { %6715 = sst [smem:[#allocation37_spill]] %s5571_s30 }
  0x1a   :  { %6716 = sst [smem:[#allocation38_spill]] %s5576_s6 }
  0x1b   :  { %s5581_s12 = sld [smem:[%s6678_s0 + %s5449_s7]]   ;;  %s5453_s7 = smov 18  }
  0x1c   :  { %s5586_s20 = sld [smem:[%s6678_s0 + %s5450_s15]]   ;;  %s5454_s15 = smov 19  }
  0x1d   :  { %s5591_s27 = sld [smem:[%s6678_s0 + %s5451_s22]]   ;;  %s5455_s22 = smov 20  }
  0x1e   :  { %s5596_s4 = sld [smem:[%s6678_s0 + %s5452_s28]]   ;;  %s5456_s28 = smov 21  }
  0x1f   :  { %s5601_s14 = sld [smem:[%s6678_s0 + %s5453_s7]]   ;;  %s5457_s7 = smov 22  }
  0x20   :  { %s5606_s19 = sld [smem:[%s6678_s0 + %s5454_s15]]   ;;  %s5466_s15 = smov 32  }
  0x21   :  { %6717 = sst [smem:[#allocation39_spill]] %s5581_s12 }
  0x22   :  { %6718 = sst [smem:[#allocation40_spill]] %s5586_s20 }
  0x23   :  { %6719 = sst [smem:[#allocation41_spill]] %s5591_s27 }
  0x24   :  { %6720 = sst [smem:[#allocation42_spill]] %s5596_s4 }
  0x25   :  { %6721 = sst [smem:[#allocation43_spill]] %s5601_s14 }
  0x26   :  { %6722 = sst [smem:[#allocation44_spill]] %s5606_s19 }
  0x27   :  { %s5611_s30 = sld [smem:[%s6678_s0 + %s5455_s22]]  }
  0x28   :  { %s5616_s24 = sld [smem:[%s6678_s0 + %s5456_s28]]  }
  0x29   :  { %s4308_s6 = sld [smem:[%s6678_s0 + %s5457_s7]]  }
  0x2a   :  { %s5624_s20 = sld [smem:[%s6678_s0 + %s5458_s16]]   ;;  %s5462_s16 = smov 27  }
  0x2b   :  { %s5629_s4 = sld [smem:[%s6678_s0 + %s5459_s23]]   ;;  %s5463_s23 = smov 28  }
  0x2c   :  { %s5634_s27 = sld [smem:[%s6678_s0 + %s5460_s1]]   ;;  %s5464_s1 = smov 29  }
  0x2d   :  { %6723 = sst [smem:[#allocation45_spill]] %s5611_s30 }
  0x2e   :  { %6724 = sst [smem:[#allocation46_spill]] %s5616_s24 }
  0x2f   :  { %s5639_s14 = sld [smem:[%s6678_s0 + %s5461_s10]]   ;;  %v111_v0 = vstv %s4308_s6  ;;  %s5465_s10 = smov 30  }
  0x30   :  { %6725 = sst [smem:[#allocation47_spill]] %s5624_s20  ;;  %112 = vst [vmem:[#allocation3] sm:$0x1] %v111_v0  ;;  %s5467_s6 = smov 33  }
  0x31   :  { %s5644_s29 = sld [smem:[%s6678_s0 + %s5462_s16]]  }
  0x32   :  { %s5649_s19 = sld [smem:[%s6678_s0 + %s5463_s23]]  }
  0x33   :  { %s5654_s7 = sld [smem:[%s6678_s0 + %s5464_s1]]   ;;  %s5468_s1 = smov 34  }
  0x34   :  { %s5659_s16 = sld [smem:[%s6678_s0 + %s5465_s10]]  }
  0x35   :  { %s5664_s23 = sld [smem:[%s6678_s0 + %s5466_s15]]  }
  0x36   :  { %s5669_s28 = sld [smem:[%s6678_s0 + %s5467_s6]]   ;;  %s5471_s6 = smov 37  }
  0x37   :  { %6726 = sst [smem:[#allocation48_spill]] %s5644_s29 }
  0x38   :  { %s5674_s12 = sld [smem:[%s6678_s0 + %s5468_s1]]  }
  0x39   :  { %6727 = sst [smem:[#allocation49_spill]] %s5654_s7 }
  0x3a   :  { %6728 = sst [smem:[#allocation50_spill]] %s5659_s16 }
  0x3b   :  { %s5679_s3 = sld [smem:[%s6678_s0 + %s5469_s25]]   ;;  %s5473_s25 = smov 39  }
  0x3c   :  { %s5684_s17 = sld [smem:[%s6678_s0 + %s5470_s8]]   ;;  %s5474_s8 = smov 40  }
  0x3d   :  { %s5689_s20 = sld [smem:[%s6678_s0 + %s5471_s6]]   ;;  %s5475_s6 = smov 41  }
  0x3e   :  { %6729 = sst [smem:[#allocation51_spill]] %s5674_s12 }
  0x3f   :  { %s5694_s12 = sld [smem:[%s6678_s0 + %s5472_s21]]   ;;  %s5476_s21 = smov 42  }
  0x40   :  { %s5699_s30 = sld [smem:[%s6678_s0 + %s5473_s25]]   ;;  %s5477_s25 = smov 43  }
  0x41   :  { %s5719_s29 = sld [smem:[%s6678_s0 + %s5477_s25]]   ;;  %s5481_s25 = smov 47  }
  0x42   :  { %6730 = sst [smem:[#allocation52_spill]] %s5684_s17 }
  0x43   :  { %6731 = sst [smem:[#allocation53_spill]] %s5689_s20 }
  0x44   :  { %s5704_s17 = sld [smem:[%s6678_s0 + %s5474_s8]]   ;;  %s5478_s8 = smov 44  }
  0x45   :  { %6732 = sst [smem:[#allocation54_spill]] %s5694_s12 }
  0x46   :  { %s5709_s20 = sld [smem:[%s6678_s0 + %s5475_s6]]   ;;  %s5479_s6 = smov 45  }
  0x47   :  { %s5714_s12 = sld [smem:[%s6678_s0 + %s5476_s21]]   ;;  %s5480_s21 = smov 46  }
  0x48   :  { %6735 = sst [smem:[#allocation57_spill]] %s5719_s29 }
  0x49   :  { %s5729_s7 = sld [smem:[%s6678_s0 + %s5479_s6]]   ;;  %s5483_s6 = smov 49  }
  0x4a   :  { %6733 = sst [smem:[#allocation55_spill]] %s5704_s17 }
  0x4b   :  { %s5724_s17 = sld [smem:[%s6678_s0 + %s5478_s8]]   ;;  %s5482_s8 = smov 48  }
  0x4c   :  { %s5739_s29 = sld [smem:[%s6678_s0 + %s5481_s25]]   ;;  %s5485_s25 = smov 51  }
  0x4d   :  { %6734 = sst [smem:[#allocation56_spill]] %s5714_s12 }
  0x4e   :  { %s5734_s12 = sld [smem:[%s6678_s0 + %s5480_s21]]   ;;  %s5484_s21 = smov 50  }
  0x4f   :  { %s5749_s16 = sld [smem:[%s6678_s0 + %s5483_s6]]   ;;  %s5487_s6 = smov 31  }
  0x50   :  { %s5759_s24 = sld [smem:[%s6678_s0 + %s5485_s25]]  }
  0x51   :  { %6736 = sst [smem:[#allocation58_spill]] %s5724_s17 }
  0x52   :  { %s5744_s17 = sld [smem:[%s6678_s0 + %s5482_s8]]   ;;  %s5486_s8 = smov 52  }
  0x53   :  { %s4317_s13 = sld [smem:[%s6678_s0 + %s5487_s6]]  }
  0x54   :  { %6737 = sst [smem:[#allocation59_spill]] %s5734_s12 }
  0x55   :  { %s5754_s12 = sld [smem:[%s6678_s0 + %s5484_s21]]  }
  0x58   :  { %6738 = sst [smem:[#allocation60_spill]] %s5744_s17 }
  0x59   :  { %s5764_s17 = sld [smem:[%s6678_s0 + %s5486_s8]]   ;;  %v113_v1 = vstv %s4317_s13 }
  0x5a   :  { %114 = vst [vmem:[#allocation4] sm:$0x1] %v113_v1 }
  0x5b   :  { %115 = vsyncpa [#allocation6], 0 }
  0x5c   :  { %116 = vsyncpa [#allocation8], 0 }
  0x5d   :  { %117 = vsyncpa [#allocation11], 0 }
  0x5e   :  { %118 = vsyncpa [#allocation14], 0 }
  0x5f   :  { %119 = vsyncpa [#allocation17], 0  ;;  %s191_s21 = sshll.u32 %s5649_s19, 4  ;;  %s192_s21 = int_to_ptr.hbm [resolvable:$true] %s191_s21 }
  0x60   :  { %120 = vsyncpa [#allocation20], 0  ;;  %s5488_s1 = smov [#allocation7]   ;;  %s219_s25 = sshll.u32 %s5669_s28, 4  ;;  %s220_s25 = int_to_ptr.hbm [resolvable:$true] %s219_s25 }
  0x61   :  { %s193_s2 = sshll.u32 %s5488_s1, 4  ;;  %s5184_s10 = sshra.s32 %s192_s21, 4  ;;  %s194_s2 = int_to_ptr.vmem [resolvable:$true] %s193_s2  ;;  %s5185_s10 = int_to_ptr.hbm [resolvable:$true] %s5184_s10 }
  0x62   :  { %s5186_s0 = scalar_lea.hbm %s5185_s10, 1  ;;  %s5188_s13 = scalar_lea.hbm %s5649_s19, 1 }
  0x63   :  { %p5187_p0 = scmp.ne.s32.totalorder %s5185_s10, %s5186_s0  ;;  %p5189_p1 = scmp.lt.s32.totalorder %s5185_s10, %s5649_s19 }
  0x64   :  { %p5190_p2 = scmp.lt.s32.totalorder %s5188_s13, %s5186_s0 }
  0x66   :  { %p5191_p3 = por %p5190_p2, %p5189_p1 }
  0x68   :  { %p5192_p4 = pnand %p5191_p3, %p5187_p0 }
  0x6a   :  { %5195 = shalt.err (!%p5192_p4)
}
  0x6b   :  { %196 = dma.hbm_to_vmem [thread:$0]  %s192_s21, 16, %s194_s2, [#allocation8]  }
  0x6c   :  { %s5489_s11 = smov [#allocation10]   ;;  %s249_s15 = sshll.u32 %s5699_s30, 4  ;;  %s250_s15 = int_to_ptr.hbm [resolvable:$true] %s249_s15 }
  0x6d   :  { %s221_s8 = sshll.u32 %s5489_s11, 4  ;;  %s5208_s18 = sshra.s32 %s220_s25, 4  ;;  %s222_s8 = int_to_ptr.vmem [resolvable:$true] %s221_s8  ;;  %s5209_s18 = int_to_ptr.hbm [resolvable:$true] %s5208_s18 }
  0x6e   :  { %s5210_s6 = scalar_lea.hbm %s5209_s18, 1  ;;  %s5212_s22 = scalar_lea.hbm %s5669_s28, 1 }
  0x6f   :  { %p5211_p5 = scmp.ne.s32.totalorder %s5209_s18, %s5210_s6  ;;  %p5213_p6 = scmp.lt.s32.totalorder %s5209_s18, %s5669_s28 }
  0x70   :  { %p5214_p7 = scmp.lt.s32.totalorder %s5212_s22, %s5210_s6 }
  0x72   :  { %p5215_p8 = por %p5214_p7, %p5213_p6 }
  0x74   :  { %p5216_p9 = pnand %p5215_p8, %p5211_p5 }
  0x76   :  { %5219 = shalt.err (!%p5216_p9)
}
  0x77   :  { %224 = dma.hbm_to_vmem [thread:$0]  %s220_s25, 16, %s222_s8, [#allocation11]  }
  0x78   :  { %s279_s19 = sshll.u32 %s5729_s7, 4  ;;  %s5490_s26 = smov [#allocation13]   ;;  %s280_s19 = int_to_ptr.hbm [resolvable:$true] %s279_s19 }
  0x79   :  { %s251_s21 = sshll.u32 %s5490_s26, 4  ;;  %s5232_s1 = sshra.s32 %s250_s15, 4  ;;  %s252_s21 = int_to_ptr.vmem [resolvable:$true] %s251_s21  ;;  %s5233_s1 = int_to_ptr.hbm [resolvable:$true] %s5232_s1 }
  0x7a   :  { %s5234_s2 = scalar_lea.hbm %s5233_s1, 1  ;;  %s5236_s10 = scalar_lea.hbm %s5699_s30, 1 }
  0x7b   :  { %p5235_p10 = scmp.ne.s32.totalorder %s5233_s1, %s5234_s2  ;;  %p5237_p11 = scmp.lt.s32.totalorder %s5233_s1, %s5699_s30 }
  0x7c   :  { %p5238_p12 = scmp.lt.s32.totalorder %s5236_s10, %s5234_s2 }
  0x7e   :  { %p5239_p13 = por %p5238_p12, %p5237_p11 }
  0x80   :  { %p5240_p0 = pnand %p5239_p13, %p5235_p10 }
  0x82   :  { %5243 = shalt.err (!%p5240_p0)
}
  0x83   :  { %254 = dma.hbm_to_vmem [thread:$0]  %s250_s15, 16, %s252_s21, [#allocation14]  }
  0x84   :  { %s5491_s28 = smov [#allocation16]   ;;  %s174_s0 = sshll.u32 %s5629_s4, 4  ;;  %s175_s0 = int_to_ptr.hbm [resolvable:$true] %s174_s0 }
  0x85   :  { %s281_s25 = sshll.u32 %s5491_s28, 4  ;;  %s5256_s13 = sshra.s32 %s280_s19, 4  ;;  %s282_s25 = int_to_ptr.vmem [resolvable:$true] %s281_s25  ;;  %s5257_s13 = int_to_ptr.hbm [resolvable:$true] %s5256_s13 }
  0x86   :  { %s5258_s11 = scalar_lea.hbm %s5257_s13, 1  ;;  %s5260_s8 = scalar_lea.hbm %s5729_s7, 1 }
  0x87   :  { %p5259_p1 = scmp.ne.s32.totalorder %s5257_s13, %s5258_s11  ;;  %p5261_p2 = scmp.lt.s32.totalorder %s5257_s13, %s5729_s7 }
  0x88   :  { %p5262_p3 = scmp.lt.s32.totalorder %s5260_s8, %s5258_s11 }
  0x8a   :  { %p5263_p4 = por %p5262_p3, %p5261_p2 }
  0x8c   :  { %p5264_p5 = pnand %p5263_p4, %p5259_p1 }
  0x8e   :  { %5267 = shalt.err (!%p5264_p5)
}
  0x8f   :  { %284 = dma.hbm_to_vmem [thread:$0]  %s280_s19, 16, %s282_s25, [#allocation17]  }
  0x90   :  { %s208_s30 = sshll.u32 %s5664_s23, 4  ;;  %s5492_s15 = smov [#allocation5]   ;;  %s209_s30 = int_to_ptr.hbm [resolvable:$true] %s208_s30 }
  0x91   :  { %s176_s18 = sshll.u32 %s5492_s15, 4  ;;  %s5280_s6 = sshra.s32 %s175_s0, 4  ;;  %s177_s18 = int_to_ptr.vmem [resolvable:$true] %s176_s18  ;;  %s5281_s6 = int_to_ptr.hbm [resolvable:$true] %s5280_s6 }
  0x92   :  { %s5282_s22 = scalar_lea.hbm %s5281_s6, 1  ;;  %s5284_s26 = scalar_lea.hbm %s5629_s4, 1 }
  0x93   :  { %p5283_p6 = scmp.ne.s32.totalorder %s5281_s6, %s5282_s22  ;;  %p5285_p7 = scmp.lt.s32.totalorder %s5281_s6, %s5629_s4 }
  0x94   :  { %p5286_p8 = scmp.lt.s32.totalorder %s5284_s26, %s5282_s22 }
  0x96   :  { %p5287_p9 = por %p5286_p8, %p5285_p7 }
  0x98   :  { %p5288_p10 = pnand %p5287_p9, %p5283_p6 }
  0x9a   :  { %5291 = shalt.err (!%p5288_p10)
}
  0x9b   :  { %179 = dma.hbm_to_vmem [thread:$0]  %s175_s0, 16, %s177_s18, [#allocation6]  }
  0x9c   :  { %s5493_s7 = smov [#allocation9]   ;;  %s232_s21 = sshll.u32 %s5679_s3, 4  ;;  %s233_s21 = int_to_ptr.hbm [resolvable:$true] %s232_s21 }
  0x9d   :  { %s210_s19 = sshll.u32 %s5493_s7, 4  ;;  %s5304_s1 = sshra.s32 %s209_s30, 4  ;;  %s211_s19 = int_to_ptr.vmem [resolvable:$true] %s210_s19  ;;  %s5305_s1 = int_to_ptr.hbm [resolvable:$true] %s5304_s1 }
  0x9e   :  { %s5306_s2 = scalar_lea.hbm %s5305_s1, 1  ;;  %s5308_s10 = scalar_lea.hbm %s5664_s23, 1 }
  0x9f   :  { %p5307_p11 = scmp.ne.s32.totalorder %s5305_s1, %s5306_s2  ;;  %p5309_p12 = scmp.lt.s32.totalorder %s5305_s1, %s5664_s23 }
  0xa0   :  { %p5310_p13 = scmp.lt.s32.totalorder %s5308_s10, %s5306_s2 }
  0xa2   :  { %p5311_p0 = por %p5310_p13, %p5309_p12 }
  0xa4   :  { %p5312_p1 = pnand %p5311_p0, %p5307_p11 }
  0xa6   :  { %5315 = shalt.err (!%p5312_p1)
}
  0xa7   :  { %213 = dma.hbm_to_vmem [thread:$0]  %s209_s30, 16, %s211_s19, [#allocation8]  }
  0xa8   :  { %s262_s4 = sshll.u32 %s5709_s20, 4  ;;  %s5494_s28 = smov [#allocation12]   ;;  %s263_s4 = int_to_ptr.hbm [resolvable:$true] %s262_s4 }
  0xa9   :  { %s234_s25 = sshll.u32 %s5494_s28, 4  ;;  %s5328_s0 = sshra.s32 %s233_s21, 4  ;;  %s235_s25 = int_to_ptr.vmem [resolvable:$true] %s234_s25  ;;  %s5329_s0 = int_to_ptr.hbm [resolvable:$true] %s5328_s0 }
  0xaa   :  { %s5330_s13 = scalar_lea.hbm %s5329_s0, 1  ;;  %s5332_s11 = scalar_lea.hbm %s5679_s3, 1 }
  0xab   :  { %p5331_p2 = scmp.ne.s32.totalorder %s5329_s0, %s5330_s13  ;;  %p5333_p3 = scmp.lt.s32.totalorder %s5329_s0, %s5679_s3 }
  0xac   :  { %p5334_p4 = scmp.lt.s32.totalorder %s5332_s11, %s5330_s13 }
  0xae   :  { %p5335_p5 = por %p5334_p4, %p5333_p3 }
  0xb0   :  { %p5336_p6 = pnand %p5335_p5, %p5331_p2 }
  0xb2   :  { %5339 = shalt.err (!%p5336_p6)
}
  0xb3   :  { %237 = dma.hbm_to_vmem [thread:$0]  %s233_s21, 16, %s235_s25, [#allocation11]  }
  0xb4   :  { %s5495_s23 = smov [#allocation15]   ;;  %s292_s30 = sshll.u32 %s5739_s29, 4  ;;  %s293_s30 = int_to_ptr.hbm [resolvable:$true] %s292_s30 }
  0xb5   :  { %s264_s8 = sshll.u32 %s5495_s23, 4  ;;  %s5352_s15 = sshra.s32 %s263_s4, 4  ;;  %s265_s8 = int_to_ptr.vmem [resolvable:$true] %s264_s8  ;;  %s5353_s15 = int_to_ptr.hbm [resolvable:$true] %s5352_s15 }
  0xb6   :  { %s5354_s18 = scalar_lea.hbm %s5353_s15, 1  ;;  %s5356_s6 = scalar_lea.hbm %s5709_s20, 1 }
  0xb7   :  { %p5355_p7 = scmp.ne.s32.totalorder %s5353_s15, %s5354_s18  ;;  %p5357_p8 = scmp.lt.s32.totalorder %s5353_s15, %s5709_s20 }
  0xb8   :  { %p5358_p9 = scmp.lt.s32.totalorder %s5356_s6, %s5354_s18 }
  0xba   :  { %p5359_p10 = por %p5358_p9, %p5357_p8 }
  0xbc   :  { %p5360_p11 = pnand %p5359_p10, %p5355_p7 }
  0xbe   :  { %5363 = shalt.err (!%p5360_p11)
}
  0xbf   :  { %267 = dma.hbm_to_vmem [thread:$0]  %s263_s4, 16, %s265_s8, [#allocation14]  }
  0xc0   :  { %s305_s3 = sshll.u32 %s5749_s16, 4  ;;  %s5496_s22 = smov [#allocation18]   ;;  %s306_s3 = int_to_ptr.hbm [resolvable:$true] %s305_s3 }
  0xc1   :  { %s294_s26 = sshll.u32 %s5496_s22, 4  ;;  %s5376_s7 = sshra.s32 %s293_s30, 4  ;;  %s295_s26 = int_to_ptr.vmem [resolvable:$true] %s294_s26  ;;  %s5377_s7 = int_to_ptr.hbm [resolvable:$true] %s5376_s7 }
  0xc2   :  { %s5378_s19 = scalar_lea.hbm %s5377_s7, 1  ;;  %s5380_s21 = scalar_lea.hbm %s5739_s29, 1 }
  0xc3   :  { %p5379_p12 = scmp.ne.s32.totalorder %s5377_s7, %s5378_s19  ;;  %p5381_p13 = scmp.lt.s32.totalorder %s5377_s7, %s5739_s29 }
  0xc4   :  { %p5382_p0 = scmp.lt.s32.totalorder %s5380_s21, %s5378_s19 }
  0xc6   :  { %p5383_p1 = por %p5382_p0, %p5381_p13 }
  0xc8   :  { %p5384_p2 = pnand %p5383_p1, %p5379_p12 }
  0xca   :  { %5387 = shalt.err (!%p5384_p2)
}
  0xcb   :  { %297 = dma.hbm_to_vmem [thread:$0]  %s293_s30, 16, %s295_s26, [#allocation17]  }
  0xcc   :  { %s5497_s20 = smov [#allocation19]   ;;  %s5400_s2 = sshra.s32 %s306_s3, 4  ;;  %s5401_s2 = int_to_ptr.hbm [resolvable:$true] %s5400_s2 }
  0xcd   :  { %s307_s1 = sshll.u32 %s5497_s20, 4  ;;  %s5402_s10 = scalar_lea.hbm %s5401_s2, 1  ;;  %s308_s1 = int_to_ptr.vmem [resolvable:$true] %s307_s1 }
  0xce   :  { %p5403_p3 = scmp.ne.s32.totalorder %s5401_s2, %s5402_s10  ;;  %s5404_s4 = scalar_lea.hbm %s5749_s16, 1 }
  0xcf   :  { %p5405_p4 = scmp.lt.s32.totalorder %s5401_s2, %s5749_s16  ;;  %p5406_p5 = scmp.lt.s32.totalorder %s5404_s4, %s5402_s10 }
  0xd1   :  { %p5407_p6 = por %p5406_p5, %p5405_p4 }
  0xd3   :  { %p5408_p7 = pnand %p5407_p6, %p5403_p3 }
  0xd5   :  { %5411 = shalt.err (!%p5408_p7)
}
  0xd6   :  { %310 = dma.hbm_to_vmem [thread:$0]  %s306_s3, 16, %s308_s1, [#allocation20]  }
  0xd7   :  { %5424 = dma.done.wait [#allocation6], 16  }
  0xd8   :  { %5425 = vsyncadd [#allocation6], 4294967280 }
  0xd9   :  { %5426 = dma.done.wait [#allocation8], 32  }
  0xda   :  { %5427 = vsyncadd [#allocation8], 4294967264 }
  0xdb   :  { %5428 = dma.done.wait [#allocation11], 32  }
  0xdc   :  { %5429 = vsyncadd [#allocation11], 4294967264 }
  0xdd   :  { %5430 = dma.done.wait [#allocation14], 32  }
  0xde   :  { %5431 = vsyncadd [#allocation14], 4294967264 }
  0xdf   :  { %5432 = dma.done.wait [#allocation17], 32  }
  0xe0   :  { %5433 = vsyncadd [#allocation17], 4294967264 }
  0xe1   :  { %5434 = dma.done.wait [#allocation20], 16  }
  0xe2   :  { %5435 = vsyncadd [#allocation20], 4294967280  ;;  %v357_v2 = vlaneseq  ;;  %vm392_vm0 = vcmask 1043456   ;;  %v380_v4 = vld [vmem:[%s5634_s27] sm:$0xf]  ;;  %v379_v8 = vld [vmem:[%s5516_s9 + $0x8] sm:$0xff] }
  0xe3   :  { %v4813_v5 = vld [vmem:[%s5639_s14] sm:$0xff]  ;;  %v394_v7 = vsel %vm392_vm0, %v380_v4, 0  ;;  %vm388_vm1 = vcmask 64512   ;;  %s6739_s29 = sld [smem:[#allocation27_spill]]  ;;  %v373_v11 = vld [vmem:[%s5511_s5 + $0x8] sm:$0xff]  ;;  %vm421_vm2 = vcmask 130048   ;;  %v382_v12 = vpack.c.bf16 %v379_v8, %v379_v8 }
  0xe4   :  { %v5800_v3 = vshrl.u32 %v357_v2, 7  ;;  %v378_v6 = vld [vmem:[%s5516_s9] sm:$0xff]  ;;  %403 = vmatpush.bf16.msra.mxu0 %v394_v7  ;;  %432 = vmatpush.bf16.msra.mxu1 %v4813_v5  ;;  %s6740_s16 = sld [smem:[#allocation46_spill]]  ;;  %v377_v14 = vpack.c.bf16 %v373_v11, %v373_v11  ;;  %v4968_v27 = vld [vmem:[#allocation5] ss:$0 sm:$0xff]  ;;  %vm455_vm3 = vcmask 261120  }
  0xe5   :  { %v381_v9 = vpack.c.bf16 %v378_v6, %v378_v6  ;;  %v372_v10 = vld [vmem:[%s5511_s5] sm:$0xff]  ;;  %v386_v16 = vunpack.c.l.b16 %v382_v12  ;;  %v4969_v32 = vld [vmem:[#allocation9] ss:$0 sm:$0xff]  ;;  %v4970_v49 = vld [vmem:[#allocation4] ss:$0 sm:$0xff]  ;;  %vm470_vm4 = vcmask 7168  }
  0xe6   :  { %4956 = vset.pattern.permute.xlu1 %v5800_v3  ;;  %v376_v13 = vpack.c.bf16 %v372_v10, %v372_v10  ;;  %v413_v18 = vunpack.c.l.b16 %v377_v14  ;;  %v5498_v61 = vmov 0   ;;  %s6741_s5 = sld [smem:[#allocation50_spill]]  ;;  %vm591_vm5 = vcmask 1041409   ;;  %s5502_s7 = smov 96  }
  0xe7   :  { %v385_v15 = vunpack.c.l.b16 %v381_v9  ;;  %4957 = vset.pattern.permute.xlu2 %v5498_v61  ;;  %4958 = vset.pattern.permute.xlu0 %v5498_v61  ;;  %s6742_s9 = sld [smem:[#allocation49_spill]]  ;;  %vm836_vm6 = vcmask 57344   ;;  %vm827_vm7 = vcmask 253952   ;;  %vm1405_vm8 = vcmask 523264  }
  0xe8   :  { %v412_v17 = vunpack.c.l.b16 %v376_v13  ;;  %s6743_s14 = sld [smem:[#allocation48_spill]]  ;;  %vm1509_vm9 = vcmask 1040384   ;;  %vm1719_vm10 = vcmask 1041408   ;;  %vm2400_vm11 = vcmask 256000  }
  0xe9   :  { %v387_v19 = vpack.c.b16 %v386_v16, %v385_v15  ;;  %v354_v21 = vld [vmem:[%s6739_s29] sm:$0x3]  ;;  %s6744_s27 = sld [smem:[#allocation45_spill]]  ;;  %vm1662_vm13 = vcmask 23552   ;;  %vm2011_vm14 = vcmask 392192  }
  0xea   :  { %v414_v20 = vpack.c.b16 %v413_v18, %v412_v17  ;;  %v355_v22 = vsub.f32 1.0, %v354_v21  ;;  %v4815_v25 = vld [vmem:[%s6740_s16 + $0x8] sm:$0xff]  ;;  %v4814_v26 = vld [vmem:[%s6740_s16] sm:$0xff]  ;;  %s6745_s28 = sld [smem:[#allocation47_spill]] }
  0xeb   :  { %4339 = vmatmul.msk.bf16.vlgmr.msra.gmra.mxu0 %vm388_vm1, %v387_v19  ;;  %571 = vmatpush.bf16.msra.mxu2 %v4815_v25  ;;  %s6746_s25 = sld [smem:[#allocation55_spill]] }
  0xec   :  { %4344 = vmatmul.msk.bf16.vlgmr.msra.gmra.mxu1 %vm421_vm2, %v414_v20  ;;  %v356_v23 = vperm.slane %v355_v22, 0  ;;  %v363_v24 = vperm.slane %v355_v22, 1  ;;  %s6747_s0 = sld [smem:[#allocation28_spill]] }
  0xed   :  { %s6748_s13 = sld [smem:[#allocation32_spill]] }
  0xee   :  { %361 = vperm.xlu1 %4956, %v356_v23   ;;  %s6749_s11 = sld [smem:[#allocation58_spill]] }
  0xef   :  { %572 = vmatpush.bf16.msra.mxu2 %v4814_v26  ;;  %s6750_s23 = sld [smem:[#allocation56_spill]] }
  0xf0   :  { %s6751_s8 = sld [smem:[#allocation39_spill]] }
  0xf1   :  { %s6753_s30 = sld [smem:[#allocation51_spill]] }
  0xf2   :  { %s6754_s15 = sld [smem:[#allocation29_spill]] }
  0xf3   :  { %s6755_s18 = sld [smem:[#allocation54_spill]] }
  0xf4   :  { %s6756_s6 = sld [smem:[#allocation33_spill]] }
  0xf5   :  { %s6757_s3 = sld [smem:[#allocation53_spill]] }
  0xf6   :  { %368 = vperm.xlu1 %4956, %v363_v24   ;;  %s6758_s22 = sld [smem:[#allocation52_spill]] }
  0xf7   :  { %s6759_s26 = sld [smem:[#allocation30_spill]] }
  0xf8   :  { %s6760_s19 = sld [smem:[#allocation44_spill]] }
  0xf9   :  { %s6761_s21 = sld [smem:[#allocation31_spill]] }
  0xfa   :  { %s6762_s20 = sld [smem:[#allocation43_spill]] }
  0xfb   :  { %s6763_s1 = sld [smem:[#allocation41_spill]] }
  0xfc   :  { %s6764_s2 = sld [smem:[#allocation42_spill]] }
  0xfd   :  { %s6765_s10 = sld [smem:[#allocation40_spill]] }
  0xfe   :  { %4959 = vset.pattern.permute.xlu1 %v5498_v61  ;;  %s6766_s4 = sld [smem:[#allocation38_spill]] }
  0xff   :  { %s6767_s29 = sld [smem:[#allocation36_spill]] }
 0x160   :  { %v362_v48 = vpop.permute.xlu1 %361 }
 0x161   :  { %v5828_v50 = vmul.f32 -1e+30, %v362_v48 }
 0x168   :  { %v405_v28 = vpop.f32.mrf.mxu0  ;;  %v369_v56 = vpop.permute.xlu1 %368 }
 0x169   :  { %v434_v29 = vpop.f32.mrf.mxu1  ;;  %v5832_v59 = vmul.f32 -1e+30, %v369_v56 }
 0x16a   :  { %v435_v30 = vadd.f32 %v434_v29, %v405_v28 }
 0x16c   :  { %v443_v31 = vadd.f32 %v4968_v27, %v435_v30 }
 0x16e   :  { %v5815_v33 = vmax.f32 %v443_v31, 0.0 }
 0x170   :  { %v453_v34 = vmul.f32 %v4969_v32, %v5815_v33  ;;  %v407_v35 = vpop.f32.mrf.mxu0  ;;  %v447_v41 = vpack.c.bf16 %v5815_v33, %v5815_v33 }
 0x171   :  { %v436_v36 = vpop.f32.mrf.mxu1 }
 0x172   :  { %v437_v37 = vadd.f32 %v436_v36, %v407_v35  ;;  %v456_v38 = vsel %vm455_vm3, %v453_v34, 0.0  ;;  %v547_v45 = vunpack.c.l.b16 %v447_v41 }
 0x173   :  { %457 = vadd.xlane.f32.xlu0 %v456_v38  ;;  %v4816_v38 = vld [vmem:[%s6741_s5] sm:$0xff] }
 0x174   :  { %v444_v39 = vadd.f32 %v4968_v27, %v437_v37  ;;  %v4817_v37 = vld [vmem:[%s6741_s5 + $0x8] sm:$0xff] }
 0x175   :  { %615 = vmatpush.bf16.msra.mxu3 %v4817_v37 }
 0x176   :  { %v5819_v40 = vmax.f32 %v444_v39, 0.0  ;;  %v4825_v39 = vld [vmem:[%s6741_s5 + $0x18] sm:$0xff] }
 0x178   :  { %v454_v42 = vmul.f32 %v4969_v32, %v5819_v40  ;;  %v448_v43 = vpack.c.bf16 %v5819_v40, %v5819_v40 }
 0x179   :  { %616 = vmatpush.bf16.msra.mxu3 %v4816_v38 }
 0x17a   :  { %v459_v44 = vsel %vm455_vm3, %v454_v42, 0.0  ;;  %v548_v46 = vunpack.c.l.b16 %v448_v43  ;;  %v4824_v43 = vld [vmem:[%s6741_s5 + $0x10] sm:$0xff] }
 0x17b   :  { %460 = vadd.xlane.f32.xlu0 %v459_v44 }
 0x17c   :  { %v549_v47 = vpack.c.b16 %v548_v46, %v547_v45 }
 0x17d   :  { %867 = vmatpush.bf16.msrb.mxu3 %v4825_v39 }
 0x17e   :  { %4353 = vmatmul.msk.bf16.vlgmr.msra.gmra.mxu2 %vm455_vm3, %v549_v47 }
 0x181   :  { %868 = vmatpush.bf16.msrb.mxu3 %v4824_v43 }
 0x1e6   :  { %v458_v51 = vpop.xlane.xlu0 %457 }
 0x1e7   :  { %v466_v52 = vadd.f32 %v4970_v49, %v458_v51 }
 0x1e9   :  { %v468_v53 = vadd.f32 %v466_v52, %v5828_v50 }
 0x1eb   :  { %v471_v54 = vsel %vm470_vm4, %v468_v53, -inf }
 0x1ec   :  { %v472_v55 = vrot.slane %v471_v54, 4 }
 0x1ee   :  { %v473_v57 = vmax.f32 %v471_v54, %v472_v55  ;;  %v461_v58 = vpop.xlane.xlu0 %460 }
 0x1ef   :  { %v467_v60 = vadd.f32 %v4970_v49, %v461_v58 }
 0x1f0   :  { %v474_v62 = vrot.slane %v473_v57, 2 }
 0x1f1   :  { %v469_v63 = vadd.f32 %v467_v60, %v5832_v59 }
 0x1f2   :  { %v475_v0 = vmax.f32 %v473_v57, %v474_v62 }
 0x1f3   :  { %v478_v1 = vsel %vm470_vm4, %v469_v63, -inf }
 0x1f4   :  { %v476_v4 = vrot.slane %v475_v0, 1  ;;  %v479_v5 = vrot.slane %v478_v1, 4 }
 0x1f6   :  { %v477_v6 = vmax.f32 %v475_v0, %v476_v4  ;;  %v480_v7 = vmax.f32 %v478_v1, %v479_v5 }
 0x1f8   :  { %v485_v8 = vsub.f32 %v468_v53, %v477_v6  ;;  %v481_v9 = vrot.slane %v480_v7, 2  ;;  %v4833_v6 = vld [vmem:[%s6741_s5 + $0x28] sm:$0xff] }
 0x1fa   :  { %v487_v10 = vmul.f32 1.442695, %v485_v8  ;;  %v482_v11 = vmax.f32 %v480_v7, %v481_v9  ;;  %v4821_v8 = vld [vmem:[%s6742_s9 + $0x18] sm:$0xff]  ;;  %v4819_v9 = vld [vmem:[%s6742_s9 + $0x8] sm:$0xff] }
 0x1fb   :  { %653 = vmatpush.bf16.msrb.mxu0 %v4821_v8  ;;  %681 = vmatpush.bf16.msrb.mxu1 %v4819_v9 }
 0x1fc   :  { %5008 = vpow2.f32 %v487_v10  ;;  %v483_v12 = vrot.slane %v482_v11, 1  ;;  %v4832_v10 = vld [vmem:[%s6741_s5 + $0x20] sm:$0xff]  ;;  %s6769_s5 = sld [smem:[#allocation37_spill]] }
 0x1fe   :  { %v484_v13 = vmax.f32 %v482_v11, %v483_v12  ;;  %v4820_v11 = vld [vmem:[%s6742_s9 + $0x10] sm:$0xff]  ;;  %v4818_v12 = vld [vmem:[%s6742_s9] sm:$0xff] }
 0x1ff   :  { %654 = vmatpush.bf16.msrb.mxu0 %v4820_v11  ;;  %682 = vmatpush.bf16.msrb.mxu1 %v4818_v12  ;;  %v4978_v11 = vld [vmem:[#allocation3] ss:$0 sm:$0xff] }
 0x200   :  { %v486_v14 = vsub.f32 %v469_v63, %v484_v13  ;;  %v4827_v13 = vld [vmem:[%s6742_s9 + $0x8] sm:$0xff] }
 0x202   :  { %v5009_v15 = vpop.eup %5008  ;;  %v489_v16 = vmul.f32 1.442695, %v486_v14  ;;  %655 = vmatmul.bf16.vlgmr.msrb.gmra.mxu0 %v5498_v61  ;;  %v4826_v14 = vld [vmem:[%s6742_s9] sm:$0xff] }
 0x203   :  { %v491_v17 = vsel %vm470_vm4, %v5009_v15, 0.0  ;;  %940 = vmatpush.bf16.msra.mxu1 %v4827_v13 }
 0x204   :  { %v492_v18 = vrot.slane %v491_v17, 4  ;;  %5010 = vpow2.f32 %v489_v16 }
 0x206   :  { %v493_v19 = vadd.f32 %v492_v18, %v491_v17  ;;  %v4835_v18 = vld [vmem:[%s6742_s9 + $0x8] sm:$0xff] }
 0x207   :  { %941 = vmatpush.bf16.msra.mxu1 %v4826_v14 }
 0x208   :  { %v494_v20 = vrot.slane %v493_v19, 2 }
 0x20a   :  { %v5011_v21 = vpop.eup %5010  ;;  %v495_v22 = vadd.f32 %v494_v20, %v493_v19  ;;  %v4834_v19 = vld [vmem:[%s6742_s9] sm:$0xff] }
 0x20b   :  { %v498_v23 = vsel %vm470_vm4, %v5011_v21, 0.0 }
 0x20c   :  { %v499_v24 = vrot.slane %v498_v23, 4  ;;  %v496_v25 = vrot.slane %v495_v22, 1 }
 0x20e   :  { %v500_v26 = vadd.f32 %v499_v24, %v498_v23  ;;  %v497_v27 = vadd.f32 %v496_v25, %v495_v22  ;;  %v4973_v22 = vld [vmem:[%s6743_s14 + $0x1] ss:$0 sm:$0xff] }
 0x210   :  { %5012 = vrcp.f32 %v497_v27  ;;  %v501_v28 = vrot.slane %v500_v26, 2 }
 0x212   :  { %v502_v29 = vadd.f32 %v501_v28, %v500_v26  ;;  %v4974_v28 = vld [vmem:[%s6743_s14 + $0x2] ss:$0 sm:$0xff] }
 0x214   :  { %v503_v30 = vrot.slane %v502_v29, 1 }
 0x216   :  { %v5013_v31 = vpop.eup %5012  ;;  %v504_v32 = vadd.f32 %v503_v30, %v502_v29 }
 0x217   :  { %v507_v34 = vmul.f32 %v5013_v31, %v5009_v15  ;;  %v4972_v15 = vld [vmem:[%s6743_s14] ss:$0 sm:$0xff]  ;;  %s6772_s14 = sld [smem:[#allocation59_spill]] }
 0x218   :  { %5014 = vrcp.f32 %v504_v32 }
 0x219   :  { %511 = vperm.xlu2 %4957, %v507_v34   ;;  %v4823_v34 = vld [vmem:[%s6740_s16 + $0x18] sm:$0xff] }
 0x21a   :  { %726 = vmatpush.bf16.msrb.mxu2 %v4823_v34 }
 0x21e   :  { %v5015_v35 = vpop.eup %5014 }
 0x21f   :  { %v508_v36 = vmul.f32 %v5015_v35, %v5011_v21  ;;  %v4822_v35 = vld [vmem:[%s6740_s16 + $0x10] sm:$0xff] }
 0x220   :  { %727 = vmatpush.bf16.msrb.mxu2 %v4822_v35 }
 0x221   :  { %516 = vperm.xlu2 %4957, %v508_v36   ;;  %v4975_v36 = vld [vmem:[#allocation7] ss:$0 sm:$0xff] }
 0x273   :  { %v512_v41 = vpop.permute.xlu2 %511 }
 0x274   :  { %v519_v42 = vmul.f32 %v512_v41, %v5815_v33 }
 0x276   :  { %v521_v44 = vsel %vm455_vm3, %v519_v42, 0.0 }
 0x277   :  { %v522_v45 = vrot.slane %v521_v44, 4 }
 0x279   :  { %v523_v46 = vadd.f32 %v522_v45, %v521_v44 }
 0x27b   :  { %v524_v47 = vrot.slane %v523_v46, 2  ;;  %v517_v48 = vpop.permute.xlu2 %516 }
 0x27c   :  { %v520_v49 = vmul.f32 %v517_v48, %v5819_v40  ;;  %v574_v48 = vpop.f32.mrf.mxu2 }
 0x27d   :  { %v525_v51 = vadd.f32 %v524_v47, %v523_v46 }
 0x27e   :  { %v528_v52 = vsel %vm455_vm3, %v520_v49, 0.0 }
 0x27f   :  { %v529_v53 = vrot.slane %v528_v52, 4  ;;  %v526_v54 = vrot.slane %v525_v51, 1  ;;  %v656_v21 = vpop.f32.mrf.mxu0 }
 0x281   :  { %v530_v55 = vadd.f32 %v529_v53, %v528_v52  ;;  %v527_v57 = vadd.f32 %v526_v54, %v525_v51  ;;  %v4976_v51 = vld [vmem:[%s6744_s27 + $0x1] ss:$0 sm:$0xff]  ;;  %v4971_v52 = vld [vmem:[%s6744_s27] ss:$0 sm:$0xff] }
 0x283   :  { %v531_v56 = vrot.slane %v530_v55, 2  ;;  %v535_v62 = vpack.c.bf16 %v527_v57, %v527_v57 }
 0x284   :  { %v576_v49 = vpop.f32.mrf.mxu2 }
 0x285   :  { %v532_v58 = vadd.f32 %v531_v56, %v530_v55  ;;  %v589_v1 = vunpack.c.l.b16 %v535_v62  ;;  %v5884_v55 = vadd.f32 %v4971_v52, %v574_v48 }
 0x287   :  { %v533_v60 = vrot.slane %v532_v58, 1  ;;  %v658_v24 = vpop.f32.mrf.mxu0 }
 0x289   :  { %v534_v63 = vadd.f32 %v533_v60, %v532_v58  ;;  %v5886_v58 = vadd.f32 %v4971_v52, %v576_v49 }
 0x28b   :  { %v536_v0 = vpack.c.bf16 %v534_v63, %v534_v63 }
 0x28d   :  { %v590_v4 = vunpack.c.l.b16 %v536_v0 }
 0x28f   :  { %v592_v5 = vsel %vm591_vm5, %v590_v4, %v589_v1  ;;  %v4977_v1 = vld [vmem:[%s6745_s28] ss:$0 sm:$0xff] }
 0x290   :  { %v5851_v7 = vpack.c.b16 %v592_v5, %v592_v5 }
 0x292   :  { %4362 = vmatmul.msk.bf16.vlgmr.msra.gmra.mxu3 %vm455_vm3, %v5851_v7 }
 0x293   :  { %1120 = vmatpush.bf16.msra.mxu3 %v4833_v6 }
 0x297   :  { %1121 = vmatpush.bf16.msra.mxu3 %v4832_v10 }
 0x2a2   :  { %4411 = vmatmul.msk.bf16.vlgmr.msrb.gmra.mxu3 %vm455_vm3, %v5851_v7 }
 0x2b2   :  { %4461 = vmatmul.msk.bf16.vlgmr.msra.gmra.mxu3 %vm455_vm3, %v5851_v7 }
 0x315   :  { %v618_v16 = vpop.f32.mrf.mxu3 }
 0x316   :  { %v619_v17 = vadd.f32 %v4972_v15, %v618_v16 }
 0x318   :  { %v626_v61 = vpack.c.bf16 %v619_v17, %v619_v17 }
 0x31a   :  { %4383 = vmatmul.msk.bf16.vlgmr.msrb.gmra.mxu1 %vm455_vm3, %v626_v61 }
 0x31b   :  { %1193 = vmatpush.bf16.msrb.mxu1 %v4835_v18 }
 0x31d   :  { %v620_v20 = vpop.f32.mrf.mxu3 }
 0x31f   :  { %1194 = vmatpush.bf16.msrb.mxu1 %v4834_v19 }
 0x325   :  { %v870_v23 = vpop.f32.mrf.mxu3 }
 0x326   :  { %v871_v25 = vadd.f32 %v4973_v22, %v870_v23 }
 0x328   :  { %v878_v26 = vpack.c.bf16 %v871_v25, %v871_v25 }
 0x32a   :  { %4433 = vmatmul.msk.bf16.vlgmr.msra.gmra.mxu1 %vm455_vm3, %v878_v26 }
 0x32d   :  { %v872_v27 = vpop.f32.mrf.mxu3 }
 0x335   :  { %v1123_v29 = vpop.f32.mrf.mxu3 }
 0x336   :  { %v1124_v30 = vadd.f32 %v4974_v28, %v1123_v29 }
 0x338   :  { %v1131_v31 = vpack.c.bf16 %v1124_v30, %v1124_v30 }
 0x33a   :  { %4483 = vmatmul.msk.bf16.vlgmr.msrb.gmra.mxu1 %vm455_vm3, %v1131_v31 }
 0x33d   :  { %v1125_v32 = vpop.f32.mrf.mxu3 }
 0x397   :  { %v684_v37 = vpop.f32.mrf.mxu1 }
 0x398   :  { %v685_v38 = vadd.f32 %v684_v37, %v656_v21 }
 0x39a   :  { %v692_v39 = vadd.f32 %v4975_v36, %v685_v38 }
 0x39c   :  { %v693_v41 = vmax.f32 %v692_v39, 0.0 }
 0x39e   :  { %v699_v42 = vpack.c.bf16 %v693_v41, %v693_v41 }
 0x39f   :  { %v686_v43 = vpop.f32.mrf.mxu1 }
 0x3a0   :  { %4397 = vmatmul.msk.bf16.vlgmr.msrb.gmra.mxu2 %vm455_vm3, %v699_v42 }
 0x3a7   :  { %v5878_v44 = vpop.f32.mrf.mxu1 }
 0x3af   :  { %v945_v45 = vpop.f32.mrf.mxu1 }
 0x3b7   :  { %v5880_v46 = vpop.f32.mrf.mxu1 }
 0x3bf   :  { %v1198_v47 = vpop.f32.mrf.mxu1 }
 0x423   :  { %v729_v53 = vpop.f32.mrf.mxu2 }
 0x424   :  { %v730_v54 = vadd.f32 %v4976_v51, %v729_v53 }
 0x426   :  { %v734_v56 = vrot.slane %v730_v54, 1  ;;  %v735_v57 = vperm.slane %v730_v54, 0 }
 0x428   :  { %v736_v60 = vperm.slane %v734_v56, 0  ;;  %v739_v62 = vadd.f32 %v735_v57, %v5884_v55 }
 0x42a   :  { %v740_v63 = vadd.f32 %v736_v60, %v5886_v58  ;;  %5016 = vtanh.f32 %v739_v62 }
 0x42b   :  { %v731_v0 = vpop.f32.mrf.mxu2 }
 0x42c   :  { %5018 = vtanh.f32 %v740_v63  ;;  %v5900_v0 = vand.u32 127, %v357_v2  ;;  %v4828_v2 = vld [vmem:[%s6742_s9 + $0x10] sm:$0xff] }
 0x430   :  { %v5017_v4 = vpop.eup %5016 }
 0x431   :  { %v747_v5 = vmul.f32 %v5017_v4, %v4977_v1 }
 0x432   :  { %v5019_v6 = vpop.eup %5018 }
 0x433   :  { %v749_v8 = vsel %vm421_vm2, %v747_v5, 0.0  ;;  %v748_v9 = vmul.f32 %v5019_v6, %v4977_v1 }
 0x434   :  { %750 = vadd.xlane.f32.xlu0 %v749_v8 }
 0x435   :  { %v752_v10 = vsel %vm421_vm2, %v748_v9, 0.0 }
 0x436   :  { %753 = vadd.xlane.f32.xlu1 %v752_v10 }
 0x4a7   :  { %v751_v12 = vpop.xlane.xlu0 %750 }
 0x4a8   :  { %v759_v13 = vadd.f32 %v4978_v11, %v751_v12 }
 0x4a9   :  { %v754_v14 = vpop.xlane.xlu1 %753 }
 0x4aa   :  { %v761_v15 = vadd.f32 %v759_v13, %v5828_v50  ;;  %v760_v16 = vadd.f32 %v4978_v11, %v754_v14  ;;  %v4829_v11 = vld [vmem:[%s6742_s9 + $0x18] sm:$0xff] }
 0x4ab   :  { %912 = vmatpush.bf16.msra.mxu0 %v4829_v11 }
 0x4ac   :  { %v763_v17 = vsel %vm470_vm4, %v761_v15, -inf  ;;  %v762_v18 = vadd.f32 %v760_v16, %v5832_v59 }
 0x4ad   :  { %v764_v61 = vrot.slane %v763_v17, 4 }
 0x4ae   :  { %v770_v19 = vsel %vm470_vm4, %v762_v18, -inf }
 0x4af   :  { %v765_v20 = vmax.f32 %v763_v17, %v764_v61  ;;  %v771_v21 = vrot.slane %v770_v19, 4  ;;  %913 = vmatpush.bf16.msra.mxu0 %v4828_v2 }
 0x4b1   :  { %v766_v22 = vrot.slane %v765_v20, 2  ;;  %v772_v23 = vmax.f32 %v770_v19, %v771_v21 }
 0x4b3   :  { %v767_v24 = vmax.f32 %v765_v20, %v766_v22  ;;  %v773_v25 = vrot.slane %v772_v23, 2 }
 0x4b5   :  { %v768_v26 = vrot.slane %v767_v24, 1  ;;  %v774_v27 = vmax.f32 %v772_v23, %v773_v25 }
 0x4b7   :  { %v769_v28 = vmax.f32 %v767_v24, %v768_v26  ;;  %v775_v29 = vrot.slane %v774_v27, 1 }
 0x4b9   :  { %v777_v30 = vsub.f32 %v761_v15, %v769_v28  ;;  %v776_v31 = vmax.f32 %v774_v27, %v775_v29 }
 0x4bb   :  { %v779_v32 = vmul.f32 1.442695, %v777_v30  ;;  %v778_v34 = vsub.f32 %v762_v18, %v776_v31  ;;  %v4831_v30 = vld [vmem:[%s6740_s16 + $0x18] sm:$0xff]  ;;  %v4830_v31 = vld [vmem:[%s6740_s16 + $0x10] sm:$0xff] }
 0x4bc   :  { %983 = vmatpush.bf16.msra.mxu2 %v4831_v30 }
 0x4bd   :  { %5020 = vpow2.f32 %v779_v32  ;;  %v781_v35 = vmul.f32 1.442695, %v778_v34  ;;  %v4979_v32 = vld [vmem:[#allocation7] ss:$0 sm:$0xff] }
 0x4bf   :  { %5022 = vpow2.f32 %v781_v35 }
 0x4c0   :  { %984 = vmatpush.bf16.msra.mxu2 %v4830_v31 }
 0x4c3   :  { %v5021_v36 = vpop.eup %5020 }
 0x4c4   :  { %v783_v37 = vsel %vm470_vm4, %v5021_v36, 0.0 }
 0x4c5   :  { %v5023_v38 = vpop.eup %5022  ;;  %v784_v39 = vrot.slane %v783_v37, 4 }
 0x4c6   :  { %v790_v41 = vsel %vm470_vm4, %v5023_v38, 0.0 }
 0x4c7   :  { %v785_v42 = vadd.f32 %v784_v39, %v783_v37  ;;  %v791_v43 = vrot.slane %v790_v41, 4 }
 0x4c9   :  { %v792_v45 = vadd.f32 %v791_v43, %v790_v41  ;;  %v786_v47 = vrot.slane %v785_v42, 2  ;;  %v4980_v41 = vld [vmem:[%s6744_s27 + $0x1] ss:$0 sm:$0xff] }
 0x4cb   :  { %v787_v48 = vadd.f32 %v786_v47, %v785_v42  ;;  %v793_v49 = vrot.slane %v792_v45, 2 }
 0x4cd   :  { %v788_v51 = vrot.slane %v787_v48, 1  ;;  %v794_v52 = vadd.f32 %v793_v49, %v792_v45 }
 0x4cf   :  { %v789_v53 = vadd.f32 %v788_v51, %v787_v48  ;;  %v795_v54 = vrot.slane %v794_v52, 1 }
 0x4d1   :  { %5024 = vrcp.f32 %v789_v53  ;;  %v796_v56 = vadd.f32 %v795_v54, %v794_v52 }
 0x4d3   :  { %5026 = vrcp.f32 %v796_v56 }
 0x4d7   :  { %v5025_v57 = vpop.eup %5024 }
 0x4d8   :  { %v799_v60 = vmul.f32 %v5025_v57, %v5021_v36 }
 0x4d9   :  { %v5027_v62 = vpop.eup %5026 }
 0x4da   :  { %803 = vperm.xlu2 %4957, %v799_v60   ;;  %v800_v63 = vmul.f32 %v5027_v62, %v5023_v38 }
 0x4dc   :  { %808 = vperm.xlu0 %4958, %v800_v63   ;;  %v4982_v63 = vld [vmem:[#allocation3] ss:$0 sm:$0xff] }
 0x534   :  { %v804_v1 = vpop.permute.xlu2 %803 }
 0x535   :  { %v811_v4 = vmul.f32 %v804_v1, %v5815_v33  ;;  %v832_v5 = vperm.slane %v804_v1, %v5900_v0 }
 0x537   :  { %v813_v6 = vsel %vm455_vm3, %v811_v4, 0.0  ;;  %837 = vst.msk [vmem:[%s5764_s17] sm:$0x1] %vm836_vm6, %v832_v5 }
 0x538   :  { %v814_v8 = vrot.slane %v813_v6, 4 }
 0x53a   :  { %v815_v9 = vadd.f32 %v814_v8, %v813_v6 }
 0x53c   :  { %v816_v10 = vrot.slane %v815_v9, 2 }
 0x53e   :  { %v817_v12 = vadd.f32 %v816_v10, %v815_v9 }
 0x540   :  { %v818_v13 = vrot.slane %v817_v12, 1 }
 0x542   :  { %v819_v14 = vadd.f32 %v818_v13, %v817_v12 }
 0x544   :  { %828 = vst.msk [vmem:[#allocation2] sm:$0x1] %vm827_vm7, %v819_v14  ;;  %v883_v23 = vpack.c.bf16 %v819_v14, %v819_v14 }
 0x546   :  { %v887_v26 = vunpack.c.l.b16 %v883_v23 }
 0x54e   :  { %v809_v15 = vpop.permute.xlu0 %808 }
 0x54f   :  { %v812_v16 = vmul.f32 %v809_v15, %v5819_v40  ;;  %v833_v17 = vperm.slane %v809_v15, %v5900_v0 }
 0x551   :  { %v820_v18 = vsel %vm455_vm3, %v812_v16, 0.0  ;;  %838 = vst.msk [vmem:[%s5764_s17 + $0x4] sm:$0x1] %vm836_vm6, %v833_v17 }
 0x552   :  { %v821_v61 = vrot.slane %v820_v18, 4 }
 0x554   :  { %v822_v19 = vadd.f32 %v821_v61, %v820_v18 }
 0x556   :  { %v823_v20 = vrot.slane %v822_v19, 2 }
 0x558   :  { %v824_v21 = vadd.f32 %v823_v20, %v822_v19 }
 0x55a   :  { %v825_v22 = vrot.slane %v824_v21, 1 }
 0x55c   :  { %v826_v24 = vadd.f32 %v825_v22, %v824_v21 }
 0x55e   :  { %829 = vst.msk [vmem:[#allocation2 + $0x4] sm:$0x1] %vm827_vm7, %v826_v24  ;;  %v884_v25 = vpack.c.bf16 %v826_v24, %v826_v24 }
 0x560   :  { %v888_v27 = vunpack.c.l.b16 %v884_v25 }
 0x562   :  { %v889_v28 = vsel %vm591_vm5, %v888_v27, %v887_v26 }
 0x563   :  { %v890_v29 = vpack.c.b16 %v889_v28, %v889_v28 }
 0x565   :  { %4424 = vmatmul.msk.bf16.vlgmr.msra.gmra.mxu0 %vm455_vm3, %v890_v29 }
 0x5e2   :  { %v915_v34 = vpop.f32.mrf.mxu0 }
 0x5e3   :  { %v944_v35 = vadd.f32 %v5878_v44, %v915_v34  ;;  %v4981_v44 = vld [vmem:[%s6745_s28] ss:$0 sm:$0xff] }
 0x5e5   :  { %v951_v36 = vadd.f32 %v4979_v32, %v944_v35 }
 0x5e7   :  { %v952_v37 = vmax.f32 %v951_v36, 0.0 }
 0x5e9   :  { %v957_v38 = vpack.c.bf16 %v952_v37, %v952_v37 }
 0x5ea   :  { %v917_v39 = vpop.f32.mrf.mxu0 }
 0x5eb   :  { %4447 = vmatmul.msk.bf16.vlgmr.msra.gmra.mxu2 %vm455_vm3, %v957_v38 }
 0x66e   :  { %v986_v42 = vpop.f32.mrf.mxu2 }
 0x66f   :  { %v987_v43 = vadd.f32 %v4980_v41, %v986_v42 }
 0x671   :  { %v991_v45 = vrot.slane %v987_v43, 1  ;;  %v992_v47 = vperm.slane %v987_v43, 0 }
 0x673   :  { %v993_v48 = vperm.slane %v991_v45, 0  ;;  %v996_v49 = vadd.f32 %v992_v47, %v5884_v55 }
 0x675   :  { %v997_v51 = vadd.f32 %v993_v48, %v5886_v58  ;;  %5028 = vtanh.f32 %v996_v49 }
 0x676   :  { %v988_v52 = vpop.f32.mrf.mxu2 }
 0x677   :  { %5030 = vtanh.f32 %v997_v51 }
 0x67b   :  { %v5029_v53 = vpop.eup %5028 }
 0x67c   :  { %v1004_v54 = vmul.f32 %v5029_v53, %v4981_v44 }
 0x67d   :  { %v5031_v56 = vpop.eup %5030 }
 0x67e   :  { %v1006_v57 = vsel %vm421_vm2, %v1004_v54, 0.0  ;;  %v1005_v60 = vmul.f32 %v5031_v56, %v4981_v44  ;;  %v4837_v56 = vld [vmem:[%s6742_s9 + $0x18] sm:$0xff] }
 0x67f   :  { %1007 = vadd.xlane.f32.xlu2 %v1006_v57  ;;  %1165 = vmatpush.bf16.msrb.mxu0 %v4837_v56 }
 0x680   :  { %v1009_v62 = vsel %vm421_vm2, %v1005_v60, 0.0 }
 0x681   :  { %1010 = vadd.xlane.f32.xlu1 %v1009_v62  ;;  %v4836_v62 = vld [vmem:[%s6742_s9 + $0x10] sm:$0xff]  ;;  %s6771_s9 = sld [smem:[#allocation34_spill]] }
 0x683   :  { %1166 = vmatpush.bf16.msrb.mxu0 %v4836_v62 }
 0x6f2   :  { %v1008_v1 = vpop.xlane.xlu2 %1007 }
 0x6f3   :  { %v1016_v4 = vadd.f32 %v4982_v63, %v1008_v1 }
 0x6f4   :  { %v1011_v5 = vpop.xlane.xlu1 %1010 }
 0x6f5   :  { %v1018_v6 = vadd.f32 %v1016_v4, %v5828_v50  ;;  %v1017_v8 = vadd.f32 %v4982_v63, %v1011_v5 }
 0x6f7   :  { %v1020_v9 = vsel %vm470_vm4, %v1018_v6, -inf  ;;  %v1019_v10 = vadd.f32 %v1017_v8, %v5832_v59 }
 0x6f8   :  { %v1021_v11 = vrot.slane %v1020_v9, 4 }
 0x6f9   :  { %v1027_v12 = vsel %vm470_vm4, %v1019_v10, -inf }
 0x6fa   :  { %v1022_v13 = vmax.f32 %v1020_v9, %v1021_v11  ;;  %v1028_v2 = vrot.slane %v1027_v12, 4 }
 0x6fc   :  { %v1023_v14 = vrot.slane %v1022_v13, 2  ;;  %v1029_v15 = vmax.f32 %v1027_v12, %v1028_v2 }
 0x6fe   :  { %v1024_v16 = vmax.f32 %v1022_v13, %v1023_v14  ;;  %v1030_v17 = vrot.slane %v1029_v15, 2 }
 0x700   :  { %v1025_v18 = vrot.slane %v1024_v16, 1  ;;  %v1031_v61 = vmax.f32 %v1029_v15, %v1030_v17 }
 0x702   :  { %v1026_v19 = vmax.f32 %v1024_v16, %v1025_v18  ;;  %v1032_v20 = vrot.slane %v1031_v61, 1 }
 0x704   :  { %v1034_v21 = vsub.f32 %v1018_v6, %v1026_v19  ;;  %v1033_v22 = vmax.f32 %v1031_v61, %v1032_v20  ;;  %v4839_v20 = vld [vmem:[%s6740_s16 + $0x18] sm:$0xff] }
 0x705   :  { %1236 = vmatpush.bf16.msrb.mxu2 %v4839_v20 }
 0x706   :  { %v1036_v23 = vmul.f32 1.442695, %v1034_v21  ;;  %v1035_v24 = vsub.f32 %v1019_v10, %v1033_v22  ;;  %v4838_v21 = vld [vmem:[%s6740_s16 + $0x10] sm:$0xff]  ;;  %s6768_s16 = sld [smem:[#allocation60_spill]] }
 0x707   :  { %v4983_v22 = vld [vmem:[#allocation7] ss:$0 sm:$0xff] }
 0x708   :  { %5032 = vpow2.f32 %v1036_v23  ;;  %v1038_v25 = vmul.f32 1.442695, %v1035_v24 }
 0x709   :  { %1237 = vmatpush.bf16.msrb.mxu2 %v4838_v21 }
 0x70a   :  { %5034 = vpow2.f32 %v1038_v25 }
 0x70e   :  { %v5033_v26 = vpop.eup %5032 }
 0x70f   :  { %v1040_v27 = vsel %vm470_vm4, %v5033_v26, 0.0 }
 0x710   :  { %v5035_v28 = vpop.eup %5034  ;;  %v1041_v29 = vrot.slane %v1040_v27, 4 }
 0x711   :  { %v1047_v30 = vsel %vm470_vm4, %v5035_v28, 0.0 }
 0x712   :  { %v1042_v31 = vadd.f32 %v1041_v29, %v1040_v27  ;;  %v1048_v32 = vrot.slane %v1047_v30, 4  ;;  %v4984_v29 = vld [vmem:[%s6744_s27 + $0x1] ss:$0 sm:$0xff] }
 0x714   :  { %v1049_v34 = vadd.f32 %v1048_v32, %v1047_v30  ;;  %v1043_v35 = vrot.slane %v1042_v31, 2 }
 0x716   :  { %v1044_v36 = vadd.f32 %v1043_v35, %v1042_v31  ;;  %v1050_v37 = vrot.slane %v1049_v34, 2 }
 0x718   :  { %v1045_v38 = vrot.slane %v1044_v36, 1  ;;  %v1051_v39 = vadd.f32 %v1050_v37, %v1049_v34 }
 0x71a   :  { %v1046_v41 = vadd.f32 %v1045_v38, %v1044_v36  ;;  %v1052_v42 = vrot.slane %v1051_v39, 1  ;;  %v4985_v38 = vld [vmem:[%s6745_s28] ss:$0 sm:$0xff] }
 0x71c   :  { %5036 = vrcp.f32 %v1046_v41  ;;  %v1053_v43 = vadd.f32 %v1052_v42, %v1051_v39 }
 0x71e   :  { %5038 = vrcp.f32 %v1053_v43 }
 0x722   :  { %v5037_v45 = vpop.eup %5036 }
 0x723   :  { %v1056_v47 = vmul.f32 %v5037_v45, %v5033_v26 }
 0x724   :  { %v5039_v48 = vpop.eup %5038 }
 0x725   :  { %1060 = vperm.xlu0 %4958, %v1056_v47   ;;  %v1057_v49 = vmul.f32 %v5039_v48, %v5035_v28  ;;  %v4843_v47 = vld [vmem:[%s6746_s25 + $0x18] sm:$0xff]  ;;  %v4841_v48 = vld [vmem:[%s6746_s25 + $0x8] sm:$0xff] }
 0x726   :  { %1416 = vmatpush.bf16.msrb.mxu3 %v4843_v47 }
 0x727   :  { %1065 = vperm.xlu2 %4957, %v1057_v49   ;;  %v1351_v49 = vld [vmem:[%s6747_s0] sm:$0xff] }
 0x781   :  { %v1066_v51 = vpop.permute.xlu2 %1065 }
 0x782   :  { %v1069_v52 = vmul.f32 %v1066_v51, %v5819_v40  ;;  %v1087_v44 = vperm.slane %v1066_v51, %v5900_v0  ;;  %v1352_v51 = vld [vmem:[%s6747_s0 + $0x8] sm:$0xff] }
 0x784   :  { %v1077_v53 = vsel %vm455_vm3, %v1069_v52, 0.0  ;;  %1091 = vst.msk [vmem:[%s5764_s17 + $0x5] sm:$0x1] %vm836_vm6, %v1087_v44  ;;  %v1363_v52 = vpack.c.bf16 %v1351_v49, %v1351_v49  ;;  %v1364_v44 = vpack.c.bf16 %v1352_v51, %v1352_v51 }
 0x785   :  { %v1078_v54 = vrot.slane %v1077_v53, 4 }
 0x786   :  { %v1376_v56 = vunpack.c.l.b16 %v1364_v44  ;;  %v1431_v44 = vld [vmem:[%s6748_s13] sm:$0xff] }
 0x787   :  { %v1079_v57 = vadd.f32 %v1078_v54, %v1077_v53  ;;  %v4840_v53 = vld [vmem:[%s6746_s25] sm:$0xff]  ;;  %v1375_v54 = vunpack.c.l.b16 %v1363_v52  ;;  %v4987_v52 = vld [vmem:[#allocation13] ss:$0 sm:$0xff] }
 0x789   :  { %v1080_v60 = vrot.slane %v1079_v57, 2 }
 0x78b   :  { %v1081_v63 = vadd.f32 %v1080_v60, %v1079_v57  ;;  %v1379_v57 = vpack.c.b16 %v1376_v56, %v1375_v54  ;;  %v4986_v60 = vld [vmem:[#allocation3] ss:$0 sm:$0xff]  ;;  %v1432_v54 = vld [vmem:[%s6748_s13 + $0x8] sm:$0xff] }
 0x78c   :  { %v4845_v56 = vld [vmem:[%s6749_s11 + $0x8] sm:$0xff] }
 0x78d   :  { %v1082_v1 = vrot.slane %v1081_v63, 1  ;;  %1483 = vmatpush.bf16.msra.mxu0 %v4845_v56 }
 0x78f   :  { %v1083_v4 = vadd.f32 %v1082_v1, %v1081_v63 }
 0x791   :  { %1085 = vst.msk [vmem:[#allocation2 + $0x5] sm:$0x1] %vm827_vm7, %v1083_v4  ;;  %v1137_v14 = vpack.c.bf16 %v1083_v4, %v1083_v4 }
 0x793   :  { %v1141_v17 = vunpack.c.l.b16 %v1137_v14 }
 0x797   :  { %v1061_v5 = vpop.permute.xlu0 %1060 }
 0x798   :  { %v1068_v6 = vmul.f32 %v1061_v5, %v5815_v33  ;;  %v1086_v8 = vperm.slane %v1061_v5, %v5900_v0 }
 0x79a   :  { %v1070_v9 = vsel %vm455_vm3, %v1068_v6, 0.0  ;;  %1090 = vst.msk [vmem:[%s5764_s17 + $0x1] sm:$0x1] %vm836_vm6, %v1086_v8 }
 0x79b   :  { %v1071_v10 = vrot.slane %v1070_v9, 4 }
 0x79d   :  { %v1072_v11 = vadd.f32 %v1071_v10, %v1070_v9 }
 0x79f   :  { %v1073_v12 = vrot.slane %v1072_v11, 2 }
 0x7a1   :  { %v1074_v13 = vadd.f32 %v1073_v12, %v1072_v11 }
 0x7a3   :  { %v1075_v2 = vrot.slane %v1074_v13, 1 }
 0x7a5   :  { %v1076_v15 = vadd.f32 %v1075_v2, %v1074_v13 }
 0x7a7   :  { %1084 = vst.msk [vmem:[#allocation2 + $0x1] sm:$0x1] %vm827_vm7, %v1076_v15  ;;  %v1136_v16 = vpack.c.bf16 %v1076_v15, %v1076_v15 }
 0x7a9   :  { %v1140_v18 = vunpack.c.l.b16 %v1136_v16 }
 0x7ab   :  { %v1142_v61 = vsel %vm591_vm5, %v1141_v17, %v1140_v18  ;;  %v1353_v18 = vld [vmem:[%s6747_s0 + $0x10] sm:$0xff] }
 0x7ac   :  { %v1143_v19 = vpack.c.b16 %v1142_v61, %v1142_v61  ;;  %v1354_v61 = vld [vmem:[%s6747_s0 + $0x18] sm:$0xff]  ;;  %v1365_v20 = vpack.c.bf16 %v1353_v18, %v1353_v18 }
 0x7ad   :  { %v1366_v21 = vpack.c.bf16 %v1354_v61, %v1354_v61 }
 0x7ae   :  { %4474 = vmatmul.msk.bf16.vlgmr.msrb.gmra.mxu0 %vm455_vm3, %v1143_v19 }
 0x82b   :  { %v1168_v23 = vpop.f32.mrf.mxu0 }
 0x82c   :  { %v1197_v24 = vadd.f32 %v5880_v46, %v1168_v23 }
 0x82e   :  { %v1204_v25 = vadd.f32 %v4983_v22, %v1197_v24  ;;  %v1378_v24 = vunpack.c.l.b16 %v1366_v21 }
 0x830   :  { %v1205_v26 = vmax.f32 %v1204_v25, 0.0 }
 0x832   :  { %v1210_v27 = vpack.c.bf16 %v1205_v26, %v1205_v26 }
 0x833   :  { %v1170_v28 = vpop.f32.mrf.mxu0 }
 0x834   :  { %4497 = vmatmul.msk.bf16.vlgmr.msrb.gmra.mxu2 %vm455_vm3, %v1210_v27 }
 0x8b7   :  { %v1239_v30 = vpop.f32.mrf.mxu2 }
 0x8b8   :  { %v1240_v31 = vadd.f32 %v4984_v29, %v1239_v30 }
 0x8ba   :  { %v1244_v32 = vrot.slane %v1240_v31, 1  ;;  %v1245_v34 = vperm.slane %v1240_v31, 0 }
 0x8bc   :  { %v1246_v35 = vperm.slane %v1244_v32, 0  ;;  %v1249_v36 = vadd.f32 %v1245_v34, %v5884_v55 }
 0x8be   :  { %v1250_v37 = vadd.f32 %v1246_v35, %v5886_v58  ;;  %5040 = vtanh.f32 %v1249_v36  ;;  %v4842_v58 = vld [vmem:[%s6746_s25 + $0x10] sm:$0xff] }
 0x8bf   :  { %v1241_v46 = vpop.f32.mrf.mxu2  ;;  %1417 = vmatpush.bf16.msrb.mxu3 %v4842_v58 }
 0x8c0   :  { %5042 = vtanh.f32 %v1250_v37 }
 0x8c3   :  { %1418 = vmatpush.bf16.msrb.mxu3 %v4841_v48 }
 0x8c4   :  { %v5041_v39 = vpop.eup %5040 }
 0x8c5   :  { %v1257_v41 = vmul.f32 %v5041_v39, %v4985_v38 }
 0x8c6   :  { %v5043_v42 = vpop.eup %5042 }
 0x8c7   :  { %v1259_v43 = vsel %vm421_vm2, %v1257_v41, 0.0  ;;  %v1258_v45 = vmul.f32 %v5043_v42, %v4985_v38  ;;  %1419 = vmatpush.bf16.msrb.mxu3 %v4840_v53 }
 0x8c8   :  { %1260 = vadd.xlane.f32.xlu1 %v1259_v43 }
 0x8c9   :  { %v1262_v55 = vsel %vm421_vm2, %v1258_v45, 0.0 }
 0x8ca   :  { %1263 = vadd.xlane.f32.xlu0 %v1262_v55  ;;  %4514 = vmatmul.msk.bf16.vlgmr.msrb.gmra.mxu3 %vm1405_vm8, %v1379_v57 }
 0x93b   :  { %v1261_v62 = vpop.xlane.xlu1 %1260 }
 0x93c   :  { %v1269_v63 = vadd.f32 %v4986_v60, %v1261_v62  ;;  %v4844_v62 = vld [vmem:[%s6749_s11] sm:$0xff] }
 0x93d   :  { %v1264_v1 = vpop.xlane.xlu0 %1263  ;;  %1484 = vmatpush.bf16.msra.mxu0 %v4844_v62 }
 0x93e   :  { %v1271_v4 = vadd.f32 %v1269_v63, %v5828_v50  ;;  %v1270_v5 = vadd.f32 %v4986_v60, %v1264_v1 }
 0x940   :  { %v1273_v6 = vsel %vm470_vm4, %v1271_v4, -inf  ;;  %v1272_v8 = vadd.f32 %v1270_v5, %v5832_v59  ;;  %v1377_v59 = vunpack.c.l.b16 %v1365_v20 }
 0x941   :  { %v1274_v9 = vrot.slane %v1273_v6, 4 }
 0x942   :  { %v1280_v10 = vsel %vm470_vm4, %v1272_v8, -inf  ;;  %v1380_v27 = vpack.c.b16 %v1378_v24, %v1377_v59  ;;  %v4998_v59 = vld [vmem:[%s6751_s8 + $0x1] ss:$0 sm:$0xff] }
 0x943   :  { %v1275_v11 = vmax.f32 %v1273_v6, %v1274_v9  ;;  %v1281_v12 = vrot.slane %v1280_v10, 4 }
 0x944   :  { %4515 = vmatmul.msk.bf16.gmra.mxu3 %vm1405_vm8, %v1380_v27 }
 0x945   :  { %v1276_v13 = vrot.slane %v1275_v11, 2  ;;  %v1282_v2 = vmax.f32 %v1280_v10, %v1281_v12  ;;  %v4848_v10 = vld [vmem:[%s6750_s23] sm:$0xff] }
 0x947   :  { %v1277_v14 = vmax.f32 %v1275_v11, %v1276_v13  ;;  %v1283_v15 = vrot.slane %v1282_v2, 2 }
 0x949   :  { %v1278_v16 = vrot.slane %v1277_v14, 1  ;;  %v1284_v17 = vmax.f32 %v1282_v2, %v1283_v15 }
 0x94b   :  { %v1279_v19 = vmax.f32 %v1277_v14, %v1278_v16  ;;  %v1285_v50 = vrot.slane %v1284_v17, 1 }
 0x94d   :  { %v1287_v22 = vsub.f32 %v1271_v4, %v1279_v19  ;;  %v1286_v23 = vmax.f32 %v1284_v17, %v1285_v50  ;;  %v1421_v51 = vpop.f32.mrf.mxu3  ;;  %v4849_v4 = vld [vmem:[%s6750_s23 + $0x8] sm:$0xff] }
 0x94e   :  { %v1422_v57 = vadd.f32 %v4987_v52, %v1421_v51  ;;  %1808 = vmatpush.bf16.msrb.mxu0 %v4849_v4 }
 0x94f   :  { %v1289_v25 = vmul.f32 1.442695, %v1287_v22  ;;  %v1288_v26 = vsub.f32 %v1272_v8, %v1286_v23 }
 0x950   :  { %v5982_v63 = vadd.f32 %v1431_v44, %v1422_v57 }
 0x951   :  { %5044 = vpow2.f32 %v1289_v25  ;;  %v1291_v28 = vmul.f32 1.442695, %v1288_v26 }
 0x952   :  { %v1437_v5 = vpack.c.bf16 %v5982_v63, %v5982_v63  ;;  %1809 = vmatpush.bf16.msrb.mxu0 %v4848_v10 }
 0x953   :  { %5046 = vpow2.f32 %v1291_v28  ;;  %v4847_v28 = vld [vmem:[%s6749_s11 + $0x18] sm:$0xff] }
 0x954   :  { %v1453_v8 = vunpack.c.l.b16 %v1437_v5  ;;  %1577 = vmatpush.bf16.msra.mxu1 %v4847_v28 }
 0x955   :  { %v1423_v53 = vpop.f32.mrf.mxu3 }
 0x956   :  { %v1424_v60 = vadd.f32 %v4987_v52, %v1423_v53 }
 0x957   :  { %v5045_v29 = vpop.eup %5044 }
 0x958   :  { %v1293_v30 = vsel %vm470_vm4, %v5045_v29, 0.0  ;;  %v5984_v1 = vadd.f32 %v1432_v54, %v1424_v60 }
 0x959   :  { %v5047_v31 = vpop.eup %5046  ;;  %v1294_v32 = vrot.slane %v1293_v30, 4 }
 0x95a   :  { %v1300_v34 = vsel %vm470_vm4, %v5047_v31, 0.0  ;;  %v1438_v6 = vpack.c.bf16 %v5984_v1, %v5984_v1 }
 0x95b   :  { %v1295_v35 = vadd.f32 %v1294_v32, %v1293_v30  ;;  %v1301_v36 = vrot.slane %v1300_v34, 4 }
 0x95c   :  { %v1454_v9 = vunpack.c.l.b16 %v1438_v6 }
 0x95d   :  { %v1302_v37 = vadd.f32 %v1301_v36, %v1300_v34  ;;  %v1296_v46 = vrot.slane %v1295_v35, 2 }
 0x95e   :  { %v1457_v11 = vpack.c.b16 %v1454_v9, %v1453_v8 }
 0x95f   :  { %v1297_v38 = vadd.f32 %v1296_v46, %v1295_v35  ;;  %v1303_v39 = vrot.slane %v1302_v37, 2 }
 0x960   :  { %4524 = vmatmul.msk.bf16.vlgmr.msra.gmra.mxu0 %vm455_vm3, %v1457_v11 }
 0x961   :  { %v1298_v41 = vrot.slane %v1297_v38, 1  ;;  %v1304_v42 = vadd.f32 %v1303_v39, %v1302_v37 }
 0x963   :  { %v1299_v43 = vadd.f32 %v1298_v41, %v1297_v38  ;;  %v1305_v45 = vrot.slane %v1304_v42, 1 }
 0x965   :  { %5048 = vrcp.f32 %v1299_v43  ;;  %v1306_v55 = vadd.f32 %v1305_v45, %v1304_v42  ;;  %v4846_v43 = vld [vmem:[%s6749_s11 + $0x10] sm:$0xff] }
 0x966   :  { %1578 = vmatpush.bf16.msra.mxu1 %v4846_v43 }
 0x967   :  { %5050 = vrcp.f32 %v1306_v55 }
 0x96b   :  { %v5049_v47 = vpop.eup %5048 }
 0x96c   :  { %v1309_v58 = vmul.f32 %v5049_v47, %v5045_v29  ;;  %v5500_v47 = vmov 3.0  }
 0x96d   :  { %v5051_v48 = vpop.eup %5050  ;;  %5052 = vrcp.f32 %v5500_v47 }
 0x96e   :  { %1313 = vperm.xlu1 %4959, %v1309_v58   ;;  %v1310_v49 = vmul.f32 %v5051_v48, %v5047_v31 }
 0x970   :  { %1318 = vperm.xlu2 %4957, %v1310_v49  }
 0x973   :  { %v5053_v57 = vpop.eup %5052 }
 0x974   :  { %v3729_v5 = vmul.f32 3.0, %v5053_v57  ;;  %vm3733_vm12 = vweird.f32 %v5053_v57 }
 0x976   :  { %4960 = vset.pattern.permute.xlu1 %v5800_v3  ;;  %v3730_v8 = vsub.f32 1.0, %v3729_v5 }
 0x978   :  { %4964 = vset.pattern.permute.xlu2 %v5800_v3  ;;  %v3731_v10 = vmul.f32 %v5053_v57, %v3730_v8 }
 0x9c7   :  { %v1426_v61 = vpop.f32.mrf.mxu3 }
 0x9c8   :  { %v1427_v22 = vadd.f32 %v4987_v52, %v1426_v61 }
 0x9ca   :  { %v1319_v12 = vpop.permute.xlu2 %1318  ;;  %v6001_v24 = vadd.f32 %v1431_v44, %v1427_v22 }
 0x9cb   :  { %v1322_v13 = vmul.f32 %v1319_v12, %v5819_v40  ;;  %v1340_v2 = vperm.slane %v1319_v12, %v5900_v0  ;;  %v5499_v40 = vmov 65535  }
 0x9cc   :  { %v1720_v21 = vsel %vm1509_vm9, 4294967295, %v5499_v40  ;;  %v1439_v32 = vpack.c.bf16 %v6001_v24, %v6001_v24 }
 0x9cd   :  { %v1330_v14 = vsel %vm455_vm3, %v1322_v13, 0.0  ;;  %1344 = vst.msk [vmem:[%s5764_s17 + $0x6] sm:$0x1] %vm836_vm6, %v1340_v2  ;;  %v1721_v27 = vsel %vm1719_vm10, %v1720_v21, 0 }
 0x9ce   :  { %v1331_v15 = vrot.slane %v1330_v14, 4  ;;  %v1455_v46 = vunpack.c.l.b16 %v1439_v32 }
 0x9cf   :  { %v1428_v20 = vpop.f32.mrf.mxu3 }
 0x9d0   :  { %v1332_v16 = vadd.f32 %v1331_v15, %v1330_v14  ;;  %v1429_v23 = vadd.f32 %v4987_v52, %v1428_v20 }
 0x9d2   :  { %v1333_v17 = vrot.slane %v1332_v16, 2  ;;  %v6003_v25 = vadd.f32 %v1432_v54, %v1429_v23 }
 0x9d4   :  { %v1334_v18 = vadd.f32 %v1333_v17, %v1332_v16  ;;  %v1440_v34 = vpack.c.bf16 %v6003_v25, %v6003_v25 }
 0x9d6   :  { %v1335_v19 = vrot.slane %v1334_v18, 1  ;;  %v1456_v38 = vunpack.c.l.b16 %v1440_v34 }
 0x9d8   :  { %v1336_v50 = vadd.f32 %v1335_v19, %v1334_v18  ;;  %v1458_v45 = vpack.c.b16 %v1456_v38, %v1455_v46  ;;  %v3732_v18 = vadd.f32 %v5053_v57, %v3731_v10 }
 0x9da   :  { %1338 = vst.msk [vmem:[#allocation2 + $0x6] sm:$0x1] %vm827_vm7, %v1336_v50  ;;  %4525 = vmatmul.msk.bf16.gmra.mxu0 %vm455_vm3, %v1458_v45  ;;  %v3734_v23 = vsel %vm3733_vm12, %v5053_v57, %v3732_v18 }
 0x9dd   :  { %v1486_v43 = vpop.f32.mrf.mxu0 }
 0x9e0   :  { %v1314_v26 = vpop.permute.xlu1 %1313 }
 0x9e1   :  { %v1321_v29 = vmul.f32 %v1314_v26, %v5815_v33  ;;  %v1339_v30 = vperm.slane %v1314_v26, %v5900_v0  ;;  %v6008_v31 = vld [vmem:[#allocation2 + $0x4] sm:$0x7] }
 0x9e2   :  { %v6016_v35 = vpack.c.bf16 %v6008_v31, %v6008_v31  ;;  %v3721_v36 = vsel %vm2400_vm11, %v6008_v31, 0.0  ;;  %v3137_v33 = vmul.f32 %v4998_v59, %v6008_v31 }
 0x9e3   :  { %v1323_v37 = vsel %vm455_vm3, %v1321_v29, 0.0  ;;  %1343 = vst.msk [vmem:[%s5764_s17 + $0x2] sm:$0x1] %vm836_vm6, %v1339_v30  ;;  %v3722_v54 = vrot.slane %v3721_v36, 4  ;;  %s6752_s17 = sld [smem:[#allocation57_spill]] }
 0x9e4   :  { %v1324_v39 = vrot.slane %v1323_v37, 4  ;;  %v1508_v41 = vrot.slane %v6016_v35, 3  ;;  %v6026_v42 = vand.u32 %v1721_v27, %v6016_v35  ;;  %v6030_v55 = vsel %vm2400_vm11, %v3137_v33, 0.0 }
 0x9e5   :  { %v3723_v62 = vadd.f32 %v3722_v54, %v3721_v36  ;;  %v1488_v45 = vpop.f32.mrf.mxu0 }
 0x9e6   :  { %v1325_v58 = vadd.f32 %v1324_v39, %v1323_v37  ;;  %v1519_v48 = vsel %vm1509_vm9, %v6016_v35, %v1508_v41  ;;  %v1521_v49 = vsel %vm591_vm5, %v6016_v35, %v1508_v41  ;;  %1755 = vmatpush.bf16.msra.mxu3 %v6026_v42  ;;  %2245 = vmatpush.bf16.msra.mxu0 %v6026_v42 }
 0x9e7   :  { %v1523_v51 = vrot.slane %v1521_v49, 1  ;;  %v1528_v52 = vunpack.i.h.s16 %v1519_v48  ;;  %v3724_v6 = vrot.slane %v3723_v62, 2 }
 0x9e8   :  { %v1326_v44 = vrot.slane %v1325_v58, 2 }
 0x9e9   :  { %v6039_v53 = vpack.i.b16 %v1523_v51, %v1528_v52  ;;  %v3725_v9 = vadd.f32 %v3724_v6, %v3723_v62  ;;  %v4988_v29 = vld [vmem:[%s6752_s17 + $0x1] ss:$0 sm:$0xff]  ;;  %v4989_v52 = vld [vmem:[%s6752_s17] ss:$0 sm:$0xff] }
 0x9ea   :  { %v1327_v56 = vadd.f32 %v1326_v44, %v1325_v58  ;;  %v1530_v36 = vrot.slane %v4988_v29, 1  ;;  %v1531_v33 = vrot.slane %v4988_v29, 2  ;;  %v1489_v57 = vadd.f32 %v4989_v52, %v1488_v45  ;;  %v1974_v45 = vld [vmem:[%s6754_s15] sm:$0xff] }
 0x9eb   :  { %1542 = vst [vmem:[#allocation1 + $0x2] ss:$9 sm:$0xff] %v6039_v53  ;;  %v3726_v15 = vrot.slane %v3725_v9, 1 }
 0x9ec   :  { %v1328_v60 = vrot.slane %v1327_v56, 1  ;;  %v1591_v6 = vpack.c.bf16 %v1489_v57, %v1489_v57 }
 0x9ed   :  { %v3727_v22 = vadd.f32 %v3726_v15, %v3725_v9 }
 0x9ee   :  { %v1329_v4 = vadd.f32 %v1328_v60, %v1327_v56  ;;  %v1487_v56 = vadd.f32 %v4989_v52, %v1486_v43  ;;  %v4850_v43 = vld [vmem:[%s6753_s30] sm:$0xff] }
 0x9ef   :  { %v3736_v28 = vmul.f32 %v3734_v23, %v3727_v22 }
 0x9f0   :  { %1337 = vst.msk [vmem:[#allocation2 + $0x2] sm:$0x1] %vm827_vm7, %v1329_v4  ;;  %v1590_v5 = vpack.c.bf16 %v1487_v56, %v1487_v56 }
 0x9f1   :  { %v3742_v34 = vpack.c.bf16 %v3736_v28, %v3736_v28 }
 0x9f3   :  { %v3750_v39 = vunpack.c.l.b16 %v3742_v34 }
 0x9f7   :  { %v6043_v11 = vld [vmem:[#allocation2] sm:$0x7] }
 0x9f8   :  { %v6047_v12 = vpack.c.bf16 %v6043_v11, %v6043_v11  ;;  %v3714_v13 = vsel %vm2400_vm11, %v6043_v11, 0.0  ;;  %v3136_v2 = vmul.f32 %v4998_v59, %v6043_v11 }
 0x9f9   :  { %v3715_v14 = vrot.slane %v3714_v13, 4 }
 0x9fa   :  { %v1507_v16 = vrot.slane %v6047_v12, 3  ;;  %v6054_v17 = vand.u32 %v1721_v27, %v6047_v12  ;;  %v6057_v19 = vsel %vm2400_vm11, %v3136_v2, 0.0  ;;  %v1610_v2 = vunpack.c.l.b16 %v1590_v5 }
 0x9fb   :  { %v3716_v61 = vadd.f32 %v3715_v14, %v3714_v13  ;;  %v1611_v14 = vunpack.c.l.b16 %v1591_v6 }
 0x9fc   :  { %v6061_v50 = vsel %vm1509_vm9, %v6047_v12, %v1507_v16  ;;  %v1514_v20 = vsel %vm591_vm5, %v6047_v12, %v1507_v16 }
 0x9fd   :  { %v1516_v40 = vrot.slane %v1514_v20, 1  ;;  %1536 = vst [vmem:[#allocation1] ss:$9 sm:$0xff] %v6061_v50  ;;  %v3717_v21 = vrot.slane %v3716_v61, 2  ;;  %v1612_v18 = vpack.c.b16 %v1611_v14, %v1610_v2 }
 0x9ff   :  { %v6066_v59 = vpack.i.b16 %v1519_v48, %v1516_v40  ;;  %v3718_v26 = vadd.f32 %v3717_v21, %v3716_v61 }
 0xa01   :  { %1539 = vst [vmem:[#allocation1 + $0x1] ss:$9 sm:$0xff] %v6066_v59  ;;  %v3719_v27 = vrot.slane %v3718_v26, 1 }
 0xa03   :  { %v3720_v30 = vadd.f32 %v3719_v27, %v3718_v26 }
 0xa05   :  { %v3735_v32 = vmul.f32 %v3734_v23, %v3720_v30 }
 0xa07   :  { %v3741_v37 = vpack.c.bf16 %v3735_v32, %v3735_v32 }
 0xa08   :  { %v1543_v46 = vld [vmem:[#allocation1] sm:$0xff] }
 0xa09   :  { %1556 = vst [vmem:[#allocation1] ss:$9 sm:$0xff] %v4988_v29  ;;  %4541 = vmatmul.msk.bf16.vlgmr.msra.gmra.mxu1 %vm455_vm3, %v1543_v46  ;;  %v3749_v38 = vunpack.c.l.b16 %v3741_v37 }
 0xa0a   :  { %1558 = vst [vmem:[#allocation1 + $0x1] ss:$9 sm:$0xff] %v1530_v36 }
 0xa0b   :  { %1560 = vst [vmem:[#allocation1 + $0x2] ss:$9 sm:$0xff] %v1531_v33  ;;  %v6072_v41 = vsel %vm591_vm5, %v3750_v39, %v3749_v38  ;;  %v4852_v38 = vld [vmem:[%s6753_s30 + $0x10] sm:$0xff]  ;;  %v4851_v39 = vld [vmem:[%s6753_s30 + $0x8] sm:$0xff] }
 0xa0c   :  { %1562 = vst [vmem:[#allocation1 + $0x3] ss:$9 sm:$0xff] %v4988_v29 }
 0xa0d   :  { %1564 = vst [vmem:[#allocation1 + $0x4] ss:$9 sm:$0xff] %v1530_v36 }
 0xa0e   :  { %1566 = vst [vmem:[#allocation1 + $0x5] ss:$9 sm:$0xff] %v1531_v33 }
 0xa15   :  { %v1567_v47 = vld [vmem:[#allocation1] sm:$0xff] }
 0xa57   :  { %v1491_v44 = vpop.f32.mrf.mxu0 }
 0xa58   :  { %v1492_v15 = vadd.f32 %v4989_v52, %v1491_v44 }
 0xa5a   :  { %v1592_v20 = vpack.c.bf16 %v1492_v15, %v1492_v15 }
 0xa5c   :  { %v1635_v23 = vunpack.c.l.b16 %v1592_v20 }
 0xa5f   :  { %v1493_v13 = vpop.f32.mrf.mxu0 }
 0xa60   :  { %v1494_v16 = vadd.f32 %v4989_v52, %v1493_v13 }
 0xa62   :  { %v1593_v40 = vpack.c.bf16 %v1494_v16, %v1494_v16 }
 0xa64   :  { %v1636_v26 = vunpack.c.l.b16 %v1593_v40 }
 0xa66   :  { %v1637_v27 = vpack.c.b16 %v1636_v26, %v1635_v23  ;;  %v1834_v23 = vsel %vm455_vm3, %v6003_v25, 0.0  ;;  %v5501_v26 = vmov 32.0  }
 0xa86   :  { %v1580_v58 = vpop.f32.mrf.mxu1 }
 0xa87   :  { %v1581_v48 = vadd.f32 %v1580_v58, %v1567_v47  ;;  %v1975_v47 = vld [vmem:[%s6754_s15 + $0x8] sm:$0xff]  ;;  %v1982_v58 = vpack.c.bf16 %v1974_v45, %v1974_v45 }
 0xa89   :  { %v1585_v49 = vrot.slane %v1581_v48, 1  ;;  %v1586_v51 = vrot.slane %v1581_v48, 2  ;;  %1594 = vst [vmem:[#allocation1] ss:$9 sm:$0xff] %v1581_v48  ;;  %v1587_v60 = vrot.slane %v1581_v48, 3  ;;  %v1588_v62 = vrot.slane %v1581_v48, 4 }
 0xa8a   :  { %v1589_v8 = vrot.slane %v1581_v48, 5  ;;  %v1983_v48 = vpack.c.bf16 %v1975_v47, %v1975_v47 }
 0xa8b   :  { %1596 = vst [vmem:[#allocation1 + $0x1] ss:$9 sm:$0xff] %v1585_v49  ;;  %v1990_v49 = vunpack.c.l.b16 %v1982_v58 }
 0xa8c   :  { %1598 = vst [vmem:[#allocation1 + $0x2] ss:$9 sm:$0xff] %v1586_v51  ;;  %v1991_v51 = vunpack.c.l.b16 %v1983_v48 }
 0xa8e   :  { %v1582_v54 = vpop.f32.mrf.mxu1  ;;  %v1992_v52 = vpack.c.b16 %v1991_v51, %v1990_v49 }
 0xa93   :  { %v1599_v4 = vld [vmem:[#allocation1] sm:$0xff] }
 0xa94   :  { %1600 = vst [vmem:[#allocation1] ss:$9 sm:$0xff] %v1587_v60  ;;  %v1606_v9 = vpack.c.bf16 %v1599_v4, %v1599_v4 }
 0xa95   :  { %1601 = vst [vmem:[#allocation1 + $0x1] ss:$9 sm:$0xff] %v1588_v62 }
 0xa96   :  { %1602 = vst [vmem:[#allocation1 + $0x2] ss:$9 sm:$0xff] %v1589_v8  ;;  %v1617_v10 = vsel %vm455_vm3, %v1606_v9, 0 }
 0xa97   :  { %1626 = vmatpush.bf16.xpose.msra.mxu2 %v1617_v10 }
 0xa9d   :  { %v1603_v61 = vld [vmem:[#allocation1] sm:$0xff] }
 0xa9e   :  { %2087 = vst [vmem:[#allocation1] ss:$9 sm:$0xff] %v6061_v50  ;;  %4542 = vmatmul.msk.bf16.vlgmr.msra.gmra.mxu2 %vm455_vm3, %v1612_v18  ;;  %v1607_v21 = vpack.c.bf16 %v1603_v61, %v1603_v61  ;;  %v1828_v18 = vsel %vm455_vm3, %v5984_v1, 0.0 }
 0xa9f   :  { %1731 = vmatpush.bf16.msrb.mxu2 %v6054_v17  ;;  %2089 = vst [vmem:[#allocation1 + $0x1] ss:$9 sm:$0xff] %v6066_v59 }
 0xaa0   :  { %2091 = vst [vmem:[#allocation1 + $0x2] ss:$9 sm:$0xff] %v6039_v53  ;;  %v1642_v22 = vsel %vm455_vm3, %v1607_v21, 0  ;;  %v1831_v21 = vsel %vm455_vm3, %v6001_v24, 0.0 }
 0xaa1   :  { %1651 = vmatpush.bf16.xpose.msrb.mxu1 %v1642_v22  ;;  %v1825_v22 = vsel %vm455_vm3, %v5982_v63, 0.0 }
 0xaa8   :  { %4543 = vmatmul.msk.bf16.vlgmr.msrb.gmra.mxu1 %vm455_vm3, %v1637_v27 }
 0xaa9   :  { %2020 = vmatpush.bf16.msra.mxu1 %v4852_v38 }
 0xaad   :  { %2021 = vmatpush.bf16.msra.mxu1 %v4851_v39 }
 0xab1   :  { %2022 = vmatpush.bf16.msra.mxu1 %v4850_v43 }
 0xab8   :  { %4568 = vmatmul.msk.bf16.vlgmr.msra.gmra.mxu1 %vm2011_vm14, %v1992_v52 }
 0xb21   :  { %v1628_v28 = vpop.f32.mrf.mxu2 }
 0xb22   :  { %v1658_v50 = vmul.f32 0.17677669, %v1628_v28 }
 0xb24   :  { %v1663_v29 = vsel %vm1662_vm13, %v1658_v50, -inf }
 0xb25   :  { %v1653_v30 = vpop.f32.mrf.mxu1  ;;  %1664 = vmax.xlane.f32.xlu0 %v1663_v29 }
 0xb26   :  { %v1660_v59 = vmul.f32 0.17677669, %v1653_v30  ;;  %v4855_v30 = vld [vmem:[%s6755_s18 + $0x10] sm:$0xff] }
 0xb28   :  { %v1669_v53 = vsel %vm1662_vm13, %v1660_v59, -inf }
 0xb29   :  { %1670 = vmax.xlane.f32.xlu2 %v1669_v53  ;;  %v1630_v32 = vpop.f32.mrf.mxu2 }
 0xb2a   :  { %v1659_v34 = vmul.f32 0.17677669, %v1630_v32 }
 0xb2c   :  { %v1666_v36 = vsel %vm1662_vm13, %v1659_v34, -inf }
 0xb2d   :  { %v1655_v33 = vpop.f32.mrf.mxu1  ;;  %1667 = vmax.xlane.f32.xlu0 %v1666_v36  ;;  %v4854_v36 = vld [vmem:[%s6755_s18 + $0x8] sm:$0xff] }
 0xb2e   :  { %v1661_v37 = vmul.f32 0.17677669, %v1655_v33  ;;  %2068 = vmatpush.bf16.msra.mxu2 %v4854_v36 }
 0xb30   :  { %v1672_v46 = vsel %vm1662_vm13, %v1661_v37, -inf }
 0xb31   :  { %1673 = vmax.xlane.f32.xlu1 %v1672_v46  ;;  %v4853_v46 = vld [vmem:[%s6755_s18] sm:$0xff] }
 0xb32   :  { %2069 = vmatpush.bf16.msra.mxu2 %v4853_v46  ;;  %v6147_v46 = vsel %vm455_vm3, %v6016_v35, 0 }
 0xb98   :  { %v1665_v44 = vpop.xlane.xlu0 %1664 }
 0xb99   :  { %v1675_v54 = vsub.f32 %v1658_v50, %v1665_v44  ;;  %v4856_v50 = vld [vmem:[%s6755_s18 + $0x18] sm:$0xff] }
 0xb9a   :  { %2126 = vmatpush.bf16.msrb.mxu3 %v4856_v50 }
 0xb9b   :  { %v1679_v56 = vmul.f32 1.442695, %v1675_v54  ;;  %v4990_v54 = vld [vmem:[#allocation10] ss:$0 sm:$0xff] }
 0xb9c   :  { %v1671_v57 = vpop.xlane.xlu2 %1670 }
 0xb9d   :  { %5054 = vpow2.f32 %v1679_v56  ;;  %v1677_v60 = vsub.f32 %v1660_v59, %v1671_v57 }
 0xb9e   :  { %2127 = vmatpush.bf16.msrb.mxu3 %v4855_v30 }
 0xb9f   :  { %v1683_v62 = vmul.f32 1.442695, %v1677_v60 }
 0xba0   :  { %v1668_v4 = vpop.xlane.xlu0 %1667 }
 0xba1   :  { %5056 = vpow2.f32 %v1683_v62  ;;  %v1676_v5 = vsub.f32 %v1659_v34, %v1668_v4 }
 0xba3   :  { %v5055_v6 = vpop.eup %5054  ;;  %v1681_v8 = vmul.f32 1.442695, %v1676_v5 }
 0xba4   :  { %v1674_v9 = vpop.xlane.xlu1 %1673  ;;  %v1687_v10 = vsel %vm1662_vm13, %v5055_v6, 0.0 }
 0xba5   :  { %5058 = vpow2.f32 %v1681_v8  ;;  %v1678_v13 = vsub.f32 %v1661_v37, %v1674_v9  ;;  %1688 = vadd.xlane.f32.xlu2 %v1687_v10  ;;  %v2024_v37 = vpop.f32.mrf.mxu1 }
 0xba6   :  { %v2025_v5 = vadd.f32 %v4990_v54, %v2024_v37  ;;  %v2092_v37 = vld [vmem:[#allocation1] sm:$0xff] }
 0xba7   :  { %v5057_v2 = vpop.eup %5056  ;;  %v1685_v14 = vmul.f32 1.442695, %v1678_v13 }
 0xba8   :  { %v1693_v15 = vsel %vm1662_vm13, %v5057_v2, 0.0 }
 0xba9   :  { %5060 = vpow2.f32 %v1685_v14  ;;  %1694 = vadd.xlane.f32.xlu0 %v1693_v15 }
 0xbaa   :  { %5062 = vrcp.f32 %v5501_v26 }
 0xbab   :  { %v5059_v16 = vpop.eup %5058 }
 0xbac   :  { %v1690_v61 = vsel %vm1662_vm13, %v5059_v16, 0.0 }
 0xbad   :  { %1829 = vadd.xlane.f32.xlu2 %v1828_v18  ;;  %1691 = vadd.xlane.f32.xlu1 %v1690_v61  ;;  %v2026_v62 = vpop.f32.mrf.mxu1  ;;  %v2029_v18 = vld [vmem:[%s6756_s6] sm:$0xff] }
 0xbaf   :  { %v5061_v20 = vpop.eup %5060 }
 0xbb0   :  { %v1696_v40 = vsel %vm1662_vm13, %v5061_v20, 0.0  ;;  %v5063_v27 = vpop.eup %5062 }
 0xbb1   :  { %1697 = vadd.xlane.f32.xlu0 %v1696_v40  ;;  %v1838_v28 = vmul.f32 32.0, %v5063_v27  ;;  %vm1842_vm15 = vweird.f32 %v5063_v27 }
 0xbb3   :  { %v1839_v29 = vsub.f32 1.0, %v1838_v28 }
 0xbb5   :  { %1832 = vadd.xlane.f32.xlu1 %v1831_v21  ;;  %v1840_v59 = vmul.f32 %v5063_v27, %v1839_v29 }
 0xbb7   :  { %v1841_v32 = vadd.f32 %v5063_v27, %v1840_v59 }
 0xbb9   :  { %1826 = vadd.xlane.f32.xlu0 %v1825_v22  ;;  %v6107_v33 = vsel %vm1842_vm15, %v5063_v27, %v1841_v32  ;;  %v6123_v22 = vadd.f32 %v2029_v18, %v2025_v5 }
 0xbbb   :  { %v2032_v28 = vpack.c.bf16 %v6123_v22, %v6123_v22 }
 0xbbd   :  { %v2044_v59 = vunpack.c.l.b16 %v2032_v28 }
 0xbc1   :  { %1835 = vadd.xlane.f32.xlu0 %v1834_v23 }
 0xc18   :  { %v1689_v53 = vpop.xlane.xlu2 %1688 }
 0xc19   :  { %5064 = vrcp.f32 %v1689_v53 }
 0xc1c   :  { %v1695_v34 = vpop.xlane.xlu0 %1694 }
 0xc1d   :  { %5066 = vrcp.f32 %v1695_v34 }
 0xc1f   :  { %v5065_v43 = vpop.eup %5064 }
 0xc20   :  { %v1830_v38 = vpop.xlane.xlu2 %1829  ;;  %v1692_v39 = vpop.xlane.xlu1 %1691  ;;  %v1703_v58 = vmul.f32 %v5065_v43, %v5055_v6  ;;  %v2027_v6 = vadd.f32 %v4990_v54, %v2026_v62 }
 0xc21   :  { %v1845_v45 = vmul.f32 %v6107_v33, %v1830_v38  ;;  %5068 = vrcp.f32 %v1692_v39 }
 0xc22   :  { %v1707_v56 = vpack.c.bf16 %v1703_v58, %v1703_v58  ;;  %v6125_v23 = vadd.f32 %v2029_v18, %v2027_v6  ;;  %v4992_v18 = vld [vmem:[%s6757_s3] ss:$0 sm:$0xff] }
 0xc23   :  { %v6112_v47 = vsub.f32 %v5984_v1, %v1845_v45  ;;  %v5067_v49 = vpop.eup %5066 }
 0xc24   :  { %v1698_v48 = vpop.xlane.xlu0 %1697  ;;  %v1705_v57 = vmul.f32 %v5067_v49, %v5057_v2  ;;  %v1713_v8 = vunpack.c.l.b16 %v1707_v56  ;;  %v2033_v50 = vpack.c.bf16 %v6125_v23, %v6125_v23 }
 0xc25   :  { %5070 = vrcp.f32 %v1698_v48  ;;  %v1853_v51 = vmul.f32 %v6112_v47, %v6112_v47 }
 0xc26   :  { %v1709_v9 = vpack.c.bf16 %v1705_v57, %v1705_v57  ;;  %v2045_v53 = vunpack.c.l.b16 %v2033_v50 }
 0xc27   :  { %v5069_v52 = vpop.eup %5068  ;;  %v1859_v44 = vsel %vm455_vm3, %v1853_v51, 0.0 }
 0xc28   :  { %v1704_v60 = vmul.f32 %v5069_v52, %v5059_v16  ;;  %1860 = vadd.xlane.f32.xlu0 %v1859_v44  ;;  %v1740_v2 = vunpack.c.l.b16 %v1709_v9  ;;  %v2046_v36 = vpack.c.b16 %v2045_v53, %v2044_v59  ;;  %v6163_v59 = vsel %vm455_vm3, %v6047_v12, 0 }
 0xc29   :  { %v6176_v12 = vadd.s32 8, %v5800_v3 }
 0xc2a   :  { %v1708_v4 = vpack.c.bf16 %v1704_v60, %v1704_v60 }
 0xc2b   :  { %v5071_v1 = vpop.eup %5070  ;;  %4961 = vset.pattern.permute.xlu0 %v6176_v12 }
 0xc2c   :  { %v1714_v10 = vunpack.c.l.b16 %v1708_v4  ;;  %v1706_v13 = vmul.f32 %v5071_v1, %v5061_v20  ;;  %v1827_v14 = vpop.xlane.xlu0 %1826 }
 0xc2d   :  { %v1844_v15 = vmul.f32 %v6107_v33, %v1827_v14 }
 0xc2e   :  { %v1715_v61 = vpack.c.b16 %v1714_v10, %v1713_v8  ;;  %v1710_v40 = vpack.c.bf16 %v1706_v13, %v1706_v13 }
 0xc2f   :  { %v6120_v21 = vsub.f32 %v5982_v63, %v1844_v15 }
 0xc30   :  { %v1741_v16 = vunpack.c.l.b16 %v1710_v40  ;;  %4544 = vmatmul.msk.bf16.vlgmr.msrb.gmra.mxu2 %vm1662_vm13, %v1715_v61  ;;  %v4858_v40 = vld [vmem:[%s6758_s22 + $0x8] sm:$0xff] }
 0xc31   :  { %v1852_v20 = vmul.f32 %v6120_v21, %v6120_v21 }
 0xc32   :  { %v1742_v26 = vpack.c.b16 %v1741_v16, %v1740_v2 }
 0xc33   :  { %v1856_v27 = vsel %vm455_vm3, %v1852_v20, 0.0 }
 0xc34   :  { %4545 = vmatmul.msk.bf16.vlgmr.msra.gmra.mxu3 %vm1662_vm13, %v1742_v26  ;;  %1857 = vadd.xlane.f32.xlu1 %v1856_v27  ;;  %v1836_v63 = vpop.xlane.xlu0 %1835  ;;  %v4857_v26 = vld [vmem:[%s6758_s22] sm:$0xff] }
 0xc35   :  { %2229 = vmatpush.bf16.msra.mxu3 %v6054_v17  ;;  %v1847_v29 = vmul.f32 %v6107_v33, %v1836_v63 }
 0xc37   :  { %v6138_v30 = vsub.f32 %v6003_v25, %v1847_v29  ;;  %v4991_v25 = vld [vmem:[%s6757_s3 + $0x1] ss:$0 sm:$0xff] }
 0xc38   :  { %v2085_v38 = vrot.slane %v4991_v25, 1  ;;  %v2086_v39 = vrot.slane %v4991_v25, 2  ;;  %2105 = vst [vmem:[#allocation1] ss:$9 sm:$0xff] %v4991_v25 }
 0xc39   :  { %v1855_v32 = vmul.f32 %v6138_v30, %v6138_v30  ;;  %2111 = vst [vmem:[#allocation1 + $0x3] ss:$9 sm:$0xff] %v4991_v25 }
 0xc3a   :  { %2107 = vst [vmem:[#allocation1 + $0x1] ss:$9 sm:$0xff] %v2085_v38 }
 0xc3b   :  { %v1865_v34 = vsel %vm455_vm3, %v1855_v32, 0.0  ;;  %2109 = vst [vmem:[#allocation1 + $0x2] ss:$9 sm:$0xff] %v2086_v39 }
 0xc3c   :  { %1866 = vadd.xlane.f32.xlu1 %v1865_v34  ;;  %2113 = vst [vmem:[#allocation1 + $0x4] ss:$9 sm:$0xff] %v2085_v38  ;;  %v6168_v34 = vld [vmem:[%s6759_s26] sm:$0x3] }
 0xc3d   :  { %2115 = vst [vmem:[#allocation1 + $0x5] ss:$9 sm:$0xff] %v2086_v39 }
 0xc40   :  { %4577 = vmatmul.msk.bf16.vlgmr.msra.gmra.mxu2 %vm455_vm3, %v2046_v36  ;;  %v1944_v36 = vperm.slane %v6168_v34, 0 }
 0xc44   :  { %4591 = vmatmul.msk.bf16.vlgmr.msrb.gmra.mxu3 %vm455_vm3, %v2092_v37  ;;  %v2116_v54 = vld [vmem:[#allocation1] sm:$0xff]  ;;  %v4993_v37 = vld [vmem:[#allocation15] ss:$0 sm:$0xff] }
 0xc45   :  { %2461 = vmatpush.bf16.xpose.msrb.mxu3 %v6147_v46 }
 0xc55   :  { %1949 = vperm.xlu1 %4960, %v1944_v36  }
 0xc5d   :  { %4963 = vset.pattern.permute.xlu1 %v6176_v12 }
 0xcb3   :  { %v1733_v43 = vpop.f32.mrf.mxu2 }
 0xcb4   :  { %v1766_v58 = vpack.c.bf16 %v1733_v43, %v1733_v43  ;;  %v1833_v43 = vpop.xlane.xlu1 %1832 }
 0xcb6   :  { %v1778_v51 = vunpack.c.l.b16 %v1766_v58 }
 0xcb7   :  { %v1757_v45 = vpop.f32.mrf.mxu3 }
 0xcb8   :  { %v1768_v62 = vpack.c.bf16 %v1757_v45, %v1757_v45  ;;  %v1846_v45 = vmul.f32 %v6107_v33, %v1833_v43 }
 0xcba   :  { %v1780_v6 = vunpack.c.l.b16 %v1768_v62 }
 0xcbb   :  { %v1735_v48 = vpop.f32.mrf.mxu2 }
 0xcbc   :  { %v1767_v49 = vpack.c.bf16 %v1735_v48, %v1735_v48 }
 0xcbe   :  { %v1779_v52 = vunpack.c.l.b16 %v1767_v49  ;;  %v6183_v49 = vsub.f32 %v6001_v24, %v1846_v45 }
 0xcbf   :  { %v1759_v35 = vpop.f32.mrf.mxu3 }
 0xcc0   :  { %v1782_v44 = vpack.c.b16 %v1779_v52, %v1778_v51  ;;  %v1769_v57 = vpack.c.bf16 %v1759_v35, %v1759_v35  ;;  %v1957_v52 = vperm.slane %v6168_v34, 1  ;;  %v1854_v35 = vmul.f32 %v6183_v49, %v6183_v49 }
 0xcc2   :  { %4554 = vmatmul.msk.bf16.vlgmr.msrb.gmra.mxu0 %vm455_vm3, %v1782_v44  ;;  %v1781_v5 = vunpack.c.l.b16 %v1769_v57 }
 0xcc3   :  { %2652 = vmatpush.bf16.msrb.mxu0 %v6054_v17  ;;  %v2071_v2 = vpop.f32.mrf.mxu2 }
 0xcc4   :  { %v1783_v9 = vpack.c.b16 %v1781_v5, %v1780_v6  ;;  %v2072_v20 = vadd.f32 %v4992_v18, %v2071_v2 }
 0xcc6   :  { %v2139_v27 = vpack.c.bf16 %v2072_v20, %v2072_v20 }
 0xcc7   :  { %v2129_v56 = vpop.f32.mrf.mxu3 }
 0xcc8   :  { %v2130_v60 = vadd.f32 %v2129_v56, %v2116_v54  ;;  %v1862_v54 = vsel %vm455_vm3, %v1854_v35, 0.0 }
 0xcca   :  { %v2134_v4 = vrot.slane %v2130_v60, 1  ;;  %v2135_v1 = vrot.slane %v2130_v60, 2  ;;  %2141 = vst [vmem:[#allocation1] ss:$9 sm:$0xff] %v2130_v60  ;;  %v2136_v10 = vrot.slane %v2130_v60, 3  ;;  %v2137_v13 = vrot.slane %v2130_v60, 4 }
 0xccb   :  { %v2138_v15 = vrot.slane %v2130_v60, 5  ;;  %v2073_v50 = vpop.f32.mrf.mxu2 }
 0xccc   :  { %2143 = vst [vmem:[#allocation1 + $0x1] ss:$9 sm:$0xff] %v2134_v4  ;;  %v2074_v53 = vadd.f32 %v4992_v18, %v2073_v50 }
 0xccd   :  { %2145 = vst [vmem:[#allocation1 + $0x2] ss:$9 sm:$0xff] %v2135_v1 }
 0xcce   :  { %v2140_v32 = vpack.c.bf16 %v2074_v53, %v2074_v53 }
 0xccf   :  { %v2131_v8 = vpop.f32.mrf.mxu3 }
 0xcd2   :  { %4555 = vmatmul.msk.bf16.gmra.mxu0 %vm455_vm3, %v1783_v9 }
 0xcd4   :  { %v2146_v14 = vld [vmem:[#allocation1] sm:$0xff] }
 0xcd5   :  { %2147 = vst [vmem:[#allocation1] ss:$9 sm:$0xff] %v2136_v10  ;;  %v2153_v61 = vpack.c.bf16 %v2146_v14, %v2146_v14  ;;  %v1858_v10 = vpop.xlane.xlu1 %1857  ;;  %v4994_v14 = vld [vmem:[%s6760_s19 + $0x1] ss:$0 sm:$0xff] }
 0xcd6   :  { %2148 = vst [vmem:[#allocation1 + $0x1] ss:$9 sm:$0xff] %v2137_v13  ;;  %v1868_v13 = vmul.f32 %v1858_v10, %v6107_v33  ;;  %v2398_v18 = vmul.f32 %v4994_v14, %v6043_v11  ;;  %v2399_v20 = vmul.f32 %v4994_v14, %v6008_v31 }
 0xcd7   :  { %2149 = vst [vmem:[#allocation1 + $0x2] ss:$9 sm:$0xff] %v2138_v15  ;;  %v2159_v16 = vsel %vm455_vm3, %v2153_v61, 0  ;;  %v1861_v61 = vpop.xlane.xlu0 %1860 }
 0xcd8   :  { %2168 = vmatpush.bf16.xpose.msrb.mxu1 %v2159_v16  ;;  %v1872_v15 = vadd.f32 1e-06, %v1868_v13  ;;  %v2401_v2 = vsel %vm2400_vm11, %v2398_v18, 0.0 }
 0xcda   :  { %vm1882_vm5 = vweird.f32 %v1872_v15 }
 0xcdd   :  { %v6210_v43 = vpop.xlane.xlu1 %1866 }
 0xcde   :  { %v2150_v28 = vld [vmem:[#allocation1] sm:$0xff] }
 0xcdf   :  { %4592 = vmatmul.msk.bf16.vlgmr.msrb.gmra.mxu1 %vm455_vm3, %v2139_v27  ;;  %v2154_v63 = vpack.c.bf16 %v2150_v28, %v2150_v28  ;;  %v2404_v27 = vsel %vm2400_vm11, %v2399_v20, 0.0 }
 0xce0   :  { %2287 = vmatpush.bf16.msra.mxu1 %v4858_v40  ;;  %v1869_v40 = vmul.f32 %v1861_v61, %v6107_v33  ;;  %v6235_v61 = vld [vmem:[%s6760_s19] ss:$0 sm:$0xff] }
 0xce1   :  { %v2178_v29 = vsel %vm455_vm3, %v2154_v63, 0 }
 0xce2   :  { %2187 = vmatpush.bf16.xpose.msrb.mxu2 %v2178_v29  ;;  %v1873_v16 = vadd.f32 1e-06, %v1869_v40 }
 0xce4   :  { %2288 = vmatpush.bf16.msra.mxu1 %v4857_v26  ;;  %vm1892_vm8 = vweird.f32 %v1873_v16 }
 0xce8   :  { %2674 = vmatpush.bf16.msrb.mxu1 %v6026_v42 }
 0xce9   :  { %4593 = vmatmul.msk.bf16.vlgmr.msrb.gmra.mxu2 %vm455_vm3, %v2140_v32 }
 0xcea   :  { %2437 = vmatpush.bf16.xpose.msra.mxu2 %v6163_v59 }
 0xd3f   :  { %v1811_v25 = vpop.f32.mrf.mxu0 }
 0xd40   :  { %v1812_v38 = vadd.f32 %v4993_v37, %v1811_v25 }
 0xd42   :  { %5072 = vtanh.f32 %v1812_v38 }
 0xd47   :  { %v1813_v57 = vpop.f32.mrf.mxu0 }
 0xd48   :  { %v6171_v39 = vpop.eup %5072  ;;  %v1814_v60 = vadd.f32 %v4993_v37, %v1813_v57 }
 0xd49   :  { %1928 = vrot.lane.b32.xlu0 %v6171_v39, %s5502_s7 }
 0xd4a   :  { %5074 = vtanh.f32 %v1814_v60 }
 0xd4f   :  { %v1816_v62 = vpop.f32.mrf.mxu0 }
 0xd50   :  { %v1817_v4 = vadd.f32 %v4993_v37, %v1816_v62  ;;  %v5075_v1 = vpop.eup %5074 }
 0xd51   :  { %1955 = vperm.xlu0 %4961, %v1944_v36  }
 0xd52   :  { %5076 = vtanh.f32 %v1817_v4 }
 0xd57   :  { %v1818_v5 = vpop.f32.mrf.mxu0 }
 0xd58   :  { %v1819_v6 = vadd.f32 %v4993_v37, %v1818_v5  ;;  %v6195_v8 = vpop.eup %5076 }
 0xd59   :  { %4962 = vset.pattern.permute.xlu0 %v5800_v3 }
 0xd5a   :  { %5078 = vtanh.f32 %v1819_v6 }
 0xd5b   :  { %5080 = vrsqrt.f32 %v1872_v15 }
 0xd5c   :  { %v2170_v58 = vpop.f32.mrf.mxu1  ;;  %5082 = vrsqrt.f32 %v1873_v16 }
 0xd5d   :  { %v2193_v48 = vmul.f32 0.17677669, %v2170_v58 }
 0xd5f   :  { %v2195_v51 = vsel %vm1662_vm13, %v2193_v48, -inf }
 0xd60   :  { %2196 = vmax.xlane.f32.xlu2 %v2195_v51  ;;  %v6199_v9 = vpop.eup %5078 }
 0xd61   :  { %1962 = vperm.xlu0 %4962, %v1957_v52   ;;  %v5081_v26 = vpop.eup %5080 }
 0xd62   :  { %v1877_v28 = vmul.f32 %v5081_v26, %v1872_v15  ;;  %v5083_v50 = vpop.eup %5082  ;;  %vm1883_vm4 = vweird.f32 %v5081_v26 }
 0xd63   :  { %v1887_v29 = vmul.f32 %v5083_v50, %v1873_v16  ;;  %vm1884_vm6 = vmor %vm1882_vm5, %vm1883_vm4  ;;  %vm1893_vm7 = vweird.f32 %v5083_v50 }
 0xd64   :  { %v2172_v44 = vpop.f32.mrf.mxu1  ;;  %v1878_v63 = vmul.f32 %v5081_v26, %v1877_v28  ;;  %vm1894_vm9 = vmor %vm1892_vm8, %vm1893_vm7 }
 0xd65   :  { %v1888_v53 = vmul.f32 %v5083_v50, %v1887_v29 }
 0xd66   :  { %v1879_v11 = vmul.f32 0.5, %v1878_v63 }
 0xd67   :  { %v1889_v36 = vmul.f32 0.5, %v1888_v53  ;;  %v6252_v53 = vsub.f32 1.0, %v6168_v34 }
 0xd68   :  { %1863 = vadd.xlane.f32.xlu2 %v1862_v54  ;;  %v1880_v32 = vsub.f32 1.5, %v1879_v11 }
 0xd69   :  { %v1890_v31 = vsub.f32 1.5, %v1889_v36  ;;  %v2545_v36 = vperm.slane %v6252_v53, 0 }
 0xd6a   :  { %v1881_v37 = vmul.f32 %v5081_v26, %v1880_v32 }
 0xd6b   :  { %v1891_v44 = vmul.f32 %v5083_v50, %v1890_v31 }
 0xd6c   :  { %v6192_v56 = vpop.f32.mrf.mxu2  ;;  %v1885_v45 = vsel %vm1884_vm6, %v5081_v26, %v1881_v37 }
 0xd6d   :  { %v1916_v51 = vmul.f32 %v1885_v45, %v6120_v21  ;;  %v1895_v60 = vsel %vm1894_vm9, %v5083_v50, %v1891_v44 }
 0xd6e   :  { %v1917_v5 = vmul.f32 %v1895_v60, %v6112_v47 }
 0xd6f   :  { %v1920_v54 = vmul.f32 %v6171_v39, %v1916_v51  ;;  %v6225_v39 = vld [vmem:[%s6760_s19 + $0x2] ss:$0 sm:$0xff] }
 0xd70   :  { %v1921_v6 = vmul.f32 %v5075_v1, %v1917_v5 }
 0xd74   :  { %v2191_v24 = vpop.f32.mrf.mxu2 }
 0xd80   :  { %1930 = vrot.lane.b32.xlu2 %v5075_v1, %s5502_s7 }
 0xd88   :  { %1932 = vrot.lane.b32.xlu2 %v6195_v8, %s5502_s7 }
 0xd90   :  { %1934 = vrot.lane.b32.xlu2 %v6199_v9, %s5502_s7 }
 0xdb9   :  { %2402 = vadd.xlane.f32.xlu2 %v2401_v2 }
 0xdbb   :  { %v1929_v35 = vpop.permute.xlu0 %1928 }
 0xdbc   :  { %v1940_v24 = vadd.f32 %v1929_v35, %v1920_v54 }
 0xdc1   :  { %2405 = vadd.xlane.f32.xlu2 %v2404_v27  ;;  %v6243_v27 = vmul.f32 0.17677669, %v6192_v56 }
 0xdc3   :  { %v6227_v13 = vpop.permute.xlu0 %1955  ;;  %v2198_v29 = vsel %vm1662_vm13, %v6243_v27, -inf }
 0xdd3   :  { %v2197_v25 = vpop.xlane.xlu2 %2196  ;;  %v6262_v35 = vpop.permute.xlu0 %1962 }
 0xdd4   :  { %v2201_v38 = vsub.f32 %v2193_v48, %v2197_v25  ;;  %v6214_v48 = vpop.permute.xlu1 %1949 }
 0xdd5   :  { %v6221_v4 = vmul.f32 %v6214_v48, %v1940_v24 }
 0xdd6   :  { %v2203_v58 = vmul.f32 1.442695, %v2201_v38 }
 0xdd7   :  { %v2412_v15 = vmul.f32 %v6225_v39, %v6221_v4  ;;  %v2377_v51 = vmul.f32 %v6235_v61, %v6221_v4 }
 0xdd8   :  { %5084 = vpow2.f32 %v2203_v58 }
 0xdd9   :  { %v2416_v2 = vpack.c.bf16 %v2412_v15, %v2412_v15  ;;  %v2381_v54 = vsel %vm455_vm3, %v2377_v51, 0.0 }
 0xddb   :  { %v1864_v57 = vpop.xlane.xlu2 %1863  ;;  %v2422_v20 = vunpack.c.l.b16 %v2416_v2  ;;  %v2558_v2 = vperm.slane %v6252_v53, 1 }
 0xddc   :  { %v1870_v28 = vmul.f32 %v1864_v57, %v6107_v33 }
 0xdde   :  { %v6216_v62 = vpop.eup %5084  ;;  %v1874_v50 = vadd.f32 1e-06, %v1870_v28 }
 0xddf   :  { %v2207_v21 = vsel %vm1662_vm13, %v6216_v62, 0.0 }
 0xde0   :  { %2208 = vadd.xlane.f32.xlu1 %v2207_v21  ;;  %5086 = vrsqrt.f32 %v1874_v50  ;;  %vm1902_vm11 = vweird.f32 %v1874_v50 }
 0xde3   :  { %v1931_v10 = vpop.permute.xlu2 %1930 }
 0xde4   :  { %v1941_v14 = vadd.f32 %v1931_v10, %v1921_v6 }
 0xde6   :  { %v6232_v18 = vmul.f32 %v6227_v13, %v1941_v14  ;;  %v5087_v11 = vpop.eup %5086 }
 0xde7   :  { %v1897_v56 = vmul.f32 %v5087_v11, %v1874_v50  ;;  %vm1903_vm10 = vweird.f32 %v5087_v11 }
 0xde8   :  { %v2378_v40 = vmul.f32 %v6235_v61, %v6232_v18  ;;  %v2413_v47 = vmul.f32 %v6225_v39, %v6232_v18  ;;  %vm1904_vm12 = vmor %vm1902_vm11, %vm1903_vm10 }
 0xde9   :  { %v1898_v32 = vmul.f32 %v5087_v11, %v1897_v56 }
 0xdea   :  { %v2384_v1 = vsel %vm455_vm3, %v2378_v40, 0.0  ;;  %v2417_v16 = vpack.c.bf16 %v2413_v47, %v2413_v47 }
 0xdeb   :  { %2385 = vadd.xlane.f32.xlu0 %v2384_v1  ;;  %v1899_v37 = vmul.f32 0.5, %v1898_v32  ;;  %v1933_v45 = vpop.permute.xlu2 %1932 }
 0xdec   :  { %v2423_v26 = vunpack.c.l.b16 %v2417_v16 }
 0xded   :  { %v1900_v25 = vsub.f32 1.5, %v1899_v37 }
 0xdee   :  { %v2424_v63 = vpack.c.b16 %v2423_v26, %v2422_v20 }
 0xdef   :  { %v1901_v38 = vmul.f32 %v5087_v11, %v1900_v25 }
 0xdf0   :  { %4607 = vmatmul.msk.bf16.vlgmr.msra.gmra.mxu2 %vm455_vm3, %v2424_v63 }
 0xdf3   :  { %2199 = vmax.xlane.f32.xlu0 %v2198_v29  ;;  %v1935_v16 = vpop.permute.xlu2 %1934 }
 0xdf9   :  { %1968 = vperm.xlu1 %4963, %v1957_v52   ;;  %v1905_v52 = vsel %vm1904_vm12, %v5087_v11, %v1901_v38 }
 0xdfa   :  { %v1918_v31 = vmul.f32 %v1905_v52, %v6183_v49 }
 0xdfc   :  { %v1922_v34 = vmul.f32 %v6195_v8, %v1918_v31  ;;  %v1871_v8 = vmul.f32 %v6210_v43, %v6107_v33 }
 0xdfe   :  { %v1942_v58 = vadd.f32 %v1933_v45, %v1922_v34  ;;  %v1875_v57 = vadd.f32 1e-06, %v1871_v8 }
 0xe00   :  { %v6265_v44 = vmul.f32 %v6262_v35, %v1942_v58  ;;  %5088 = vrsqrt.f32 %v1875_v57  ;;  %vm1912_vm15 = vweird.f32 %v1875_v57 }
 0xe02   :  { %v2414_v26 = vmul.f32 %v6225_v39, %v6265_v44 }
 0xe04   :  { %v2418_v29 = vpack.c.bf16 %v2414_v26, %v2414_v26 }
 0xe06   :  { %v5089_v24 = vpop.eup %5088  ;;  %v2446_v56 = vunpack.c.l.b16 %v2418_v29 }
 0xe07   :  { %2550 = vperm.xlu0 %4962, %v2545_v36   ;;  %v1907_v60 = vmul.f32 %v5089_v24, %v1875_v57  ;;  %vm1913_vm14 = vweird.f32 %v5089_v24 }
 0xe08   :  { %vm1914_vm4 = vmor %vm1912_vm15, %vm1913_vm14 }
 0xe09   :  { %v1908_v21 = vmul.f32 %v5089_v24, %v1907_v60 }
 0xe0b   :  { %v1909_v6 = vmul.f32 0.5, %v1908_v21 }
 0xe0d   :  { %v1910_v14 = vsub.f32 1.5, %v1909_v6 }
 0xe0f   :  { %4965 = vset.pattern.permute.xlu0 %v6176_v12  ;;  %v2379_v12 = vmul.f32 %v6235_v61, %v6265_v44  ;;  %v1911_v47 = vmul.f32 %v5089_v24, %v1910_v14 }
 0xe11   :  { %v2387_v49 = vsel %vm455_vm3, %v2379_v12, 0.0  ;;  %v1915_v43 = vsel %vm1914_vm4, %v5089_v24, %v1911_v47 }
 0xe12   :  { %v1919_v1 = vmul.f32 %v1915_v43, %v6138_v30 }
 0xe14   :  { %v1923_v20 = vmul.f32 %v6199_v9, %v1919_v1 }
 0xe17   :  { %2569 = vperm.xlu0 %4965, %v2558_v2  }
 0xe1f   :  { %4966 = vset.pattern.permute.xlu0 %v5800_v3 }
 0xe23   :  { %2382 = vadd.xlane.f32.xlu1 %v2381_v54 }
 0xe2b   :  { %2388 = vadd.xlane.f32.xlu1 %v2387_v49 }
 0xe2c   :  { %v2403_v38 = vpop.xlane.xlu2 %2402 }
 0xe2d   :  { %v2470_v31 = vperm.slane %v2403_v38, %v5900_v0 }
 0xe34   :  { %v2406_v6 = vpop.xlane.xlu2 %2405 }
 0xe53   :  { %v2209_v5 = vpop.xlane.xlu1 %2208 }
 0xe54   :  { %5090 = vrcp.f32 %v2209_v5 }
 0xe5a   :  { %v5091_v10 = vpop.eup %5090 }
 0xe5b   :  { %v2215_v15 = vmul.f32 %v5091_v10, %v6216_v62  ;;  %v1943_v62 = vadd.f32 %v1935_v16, %v1923_v20 }
 0xe5d   :  { %v2217_v40 = vpack.c.bf16 %v2215_v15, %v2215_v15 }
 0xe5e   :  { %v2386_v52 = vpop.xlane.xlu0 %2385 }
 0xe5f   :  { %4594 = vmatmul.msk.bf16.vlgmr.msra.gmra.mxu3 %vm1662_vm13, %v2217_v40  ;;  %v2493_v34 = vadd.f32 %v2470_v31, %v2386_v52 }
 0xe66   :  { %v2200_v49 = vpop.xlane.xlu0 %2199 }
 0xe67   :  { %v2202_v8 = vsub.f32 %v6243_v27, %v2200_v49 }
 0xe69   :  { %v2205_v57 = vmul.f32 1.442695, %v2202_v8 }
 0xe6b   :  { %v6283_v28 = vpop.permute.xlu1 %1968  ;;  %5092 = vpow2.f32 %v2205_v57 }
 0xe6c   :  { %v6286_v63 = vmul.f32 %v6283_v28, %v1943_v62 }
 0xe6e   :  { %v2380_v50 = vmul.f32 %v6235_v61, %v6286_v63  ;;  %v2415_v30 = vmul.f32 %v6225_v39, %v6286_v63 }
 0xe70   :  { %v2390_v9 = vsel %vm455_vm3, %v2380_v50, 0.0  ;;  %v2419_v11 = vpack.c.bf16 %v2415_v30, %v2415_v30 }
 0xe71   :  { %2391 = vadd.xlane.f32.xlu2 %v2390_v9  ;;  %v6301_v24 = vpop.eup %5092  ;;  %v2297_v9 = vsel %vm455_vm3, %v6123_v22, 0.0 }
 0xe72   :  { %v2447_v32 = vunpack.c.l.b16 %v2419_v11  ;;  %v2210_v60 = vsel %vm1662_vm13, %v6301_v24, 0.0 }
 0xe73   :  { %v2439_v37 = vpop.f32.mrf.mxu2 }
 0xe74   :  { %v2448_v25 = vpack.c.b16 %v2447_v32, %v2446_v56 }
 0xe76   :  { %4608 = vmatmul.msk.bf16.vlgmr.msrb.gmra.mxu3 %vm455_vm3, %v2448_v25 }
 0xe79   :  { %v2551_v29 = vpop.permute.xlu0 %2550 }
 0xe7a   :  { %v2571_v11 = vmul.f32 -1e+30, %v2551_v29  ;;  %v2369_v29 = vpack.c.bf16 %v6221_v4, %v6221_v4 }
 0xe7b   :  { %v2441_v61 = vpop.f32.mrf.mxu2 }
 0xe7c   :  { %v2497_v45 = vadd.f32 %v2493_v34, %v2441_v61 }
 0xe7e   :  { %v2503_v39 = vsel %vm1662_vm13, %v2497_v45, -inf }
 0xe7f   :  { %2504 = vmax.xlane.f32.xlu2 %v2503_v39 }
 0xe96   :  { %v2383_v58 = vpop.xlane.xlu1 %2382 }
 0xe97   :  { %v2492_v51 = vadd.f32 %v2470_v31, %v2383_v58 }
 0xe99   :  { %v2496_v54 = vadd.f32 %v2492_v51, %v2439_v37 }
 0xe9b   :  { %v2500_v12 = vsel %vm1662_vm13, %v2496_v54, -inf  ;;  %v2575_v32 = vadd.f32 %v2571_v11, %v2496_v54 }
 0xe9c   :  { %2501 = vmax.xlane.f32.xlu1 %v2500_v12 }
 0xe9d   :  { %v2579_v38 = vsel %vm1662_vm13, %v2575_v32, -inf }
 0xe9e   :  { %v2389_v10 = vpop.xlane.xlu1 %2388 }
 0xeb5   :  { %2556 = vperm.xlu1 %4963, %v2545_v36   ;;  %v2471_v36 = vperm.slane %v2406_v6, %v5900_v0 }
 0xeb7   :  { %v2494_v14 = vadd.f32 %v2471_v36, %v2389_v10 }
 0xebd   :  { %4967 = vset.pattern.permute.xlu1 %v5800_v3 }
 0xedf   :  { %2211 = vadd.xlane.f32.xlu1 %v2210_v60 }
 0xee2   :  { %v6305_v21 = vpop.f32.mrf.mxu3 }
 0xee4   :  { %v2392_v40 = vpop.xlane.xlu2 %2391 }
 0xee5   :  { %v2495_v47 = vadd.f32 %v2471_v36, %v2392_v40 }
 0xeea   :  { %v2233_v5 = vpop.f32.mrf.mxu3 }
 0xef2   :  { %v2505_v61 = vpop.xlane.xlu2 %2504 }
 0xef9   :  { %v2463_v3 = vpop.f32.mrf.mxu3 }
 0xefa   :  { %v6308_v15 = vadd.f32 %v2494_v14, %v2463_v3 }
 0xefc   :  { %v2506_v27 = vsel %vm1662_vm13, %v6308_v15, -inf }
 0xefd   :  { %2507 = vmax.xlane.f32.xlu2 %v2506_v27 }
 0xf01   :  { %v2465_v43 = vpop.f32.mrf.mxu3 }
 0xf02   :  { %v6312_v1 = vadd.f32 %v2495_v47, %v2465_v43 }
 0xf04   :  { %v2509_v16 = vsel %vm1662_vm13, %v6312_v1, -inf }
 0xf05   :  { %2510 = vmax.xlane.f32.xlu2 %v2509_v16 }
 0xf0f   :  { %v2502_v20 = vpop.xlane.xlu1 %2501 }
 0xf10   :  { %v2512_v62 = vsub.f32 %v2496_v54, %v2502_v20 }
 0xf12   :  { %v2516_v26 = vmul.f32 1.442695, %v2512_v62 }
 0xf14   :  { %5094 = vpow2.f32 %v2516_v26 }
 0xf1a   :  { %v6316_v50 = vpop.eup %5094 }
 0xf1b   :  { %v2524_v30 = vsel %vm1662_vm13, %v6316_v50, 0.0 }
 0xf1c   :  { %2525 = vadd.xlane.f32.xlu0 %v2524_v30  ;;  %v2370_v30 = vpack.c.bf16 %v6232_v18, %v6232_v18 }
 0xf1d   :  { %2563 = vperm.xlu2 %4964, %v2558_v2   ;;  %v2513_v2 = vsub.f32 %v2497_v45, %v2505_v61 }
 0xf1e   :  { %v2741_v11 = vunpack.c.l.b16 %v2370_v30 }
 0xf1f   :  { %v2518_v49 = vmul.f32 1.442695, %v2513_v2 }
 0xf21   :  { %5096 = vpow2.f32 %v2518_v49 }
 0xf24   :  { %2298 = vadd.xlane.f32.xlu0 %v2297_v9 }
 0xf27   :  { %v2557_v56 = vpop.permute.xlu1 %2556  ;;  %v6326_v6 = vpop.eup %5096 }
 0xf28   :  { %v2572_v37 = vmul.f32 -1e+30, %v2557_v56  ;;  %v2527_v36 = vsel %vm1662_vm13, %v6326_v6, 0.0 }
 0xf2a   :  { %v2576_v25 = vadd.f32 %v2572_v37, %v2497_v45 }
 0xf2c   :  { %v2580_v52 = vsel %vm1662_vm13, %v2576_v25, -inf }
 0xf2d   :  { %v2581_v31 = vmax.f32 %v2579_v38, %v2580_v52 }
 0xf2f   :  { %v2582_v34 = vrot.slane %v2581_v31, 4 }
 0xf31   :  { %v2583_v39 = vmax.f32 %v2581_v31, %v2582_v34 }
 0xf33   :  { %v2584_v58 = vrot.slane %v2583_v39, 2 }
 0xf35   :  { %v2585_v51 = vmax.f32 %v2583_v39, %v2584_v58 }
 0xf37   :  { %v2586_v12 = vrot.slane %v2585_v51, 1 }
 0xf39   :  { %v2587_v8 = vmax.f32 %v2585_v51, %v2586_v12 }
 0xf3b   :  { %v2597_v57 = vsub.f32 %v2575_v32, %v2587_v8  ;;  %v2598_v60 = vsub.f32 %v2576_v25, %v2587_v8  ;;  %v2740_v32 = vunpack.c.l.b16 %v2369_v29 }
 0xf3d   :  { %v2601_v54 = vmul.f32 1.442695, %v2597_v57  ;;  %v2603_v5 = vmul.f32 1.442695, %v2598_v60  ;;  %v6337_v38 = vpack.c.b16 %v2741_v11, %v2740_v32  ;;  %v2570_v60 = vpop.permute.xlu0 %2569 }
 0xf3f   :  { %5098 = vpow2.f32 %v2601_v54 }
 0xf40   :  { %5100 = vpow2.f32 %v2603_v5 }
 0xf45   :  { %v5099_v10 = vpop.eup %5098 }
 0xf46   :  { %v5101_v14 = vpop.eup %5100  ;;  %v2609_v45 = vsel %vm1662_vm13, %v5099_v10, 0.0  ;;  %2528 = vadd.xlane.f32.xlu2 %v2527_v36  ;;  %v2574_v36 = vmul.f32 -1e+30, %v2570_v60 }
 0xf47   :  { %v2610_v3 = vsel %vm1662_vm13, %v5101_v14, 0.0 }
 0xf48   :  { %v2611_v27 = vadd.f32 %v2610_v3, %v2609_v45  ;;  %v2578_v45 = vadd.f32 %v2574_v36, %v6312_v1 }
 0xf4a   :  { %v2612_v40 = vrot.slane %v2611_v27, 4 }
 0xf4c   :  { %v2613_v47 = vadd.f32 %v2612_v40, %v2611_v27 }
 0xf4e   :  { %v2614_v43 = vrot.slane %v2613_v47, 2 }
 0xf50   :  { %v2615_v16 = vadd.f32 %v2614_v43, %v2613_v47  ;;  %v2589_v43 = vsel %vm1662_vm13, %v2578_v45, -inf }
 0xf52   :  { %v2212_v20 = vpop.xlane.xlu1 %2211  ;;  %v2616_v62 = vrot.slane %v2615_v16, 1 }
 0xf53   :  { %5102 = vrcp.f32 %v2212_v20 }
 0xf54   :  { %v2617_v26 = vadd.f32 %v2616_v62, %v2615_v16 }
 0xf56   :  { %5104 = vrcp.f32 %v2617_v26 }
 0xf59   :  { %v5103_v9 = vpop.eup %5102 }
 0xf5a   :  { %v2216_v56 = vmul.f32 %v5103_v9, %v6301_v24 }
 0xf5c   :  { %v5105_v37 = vpop.eup %5104  ;;  %v2218_v25 = vpack.c.bf16 %v2216_v56, %v2216_v56 }
 0xf5d   :  { %v2629_v52 = vmul.f32 %v5105_v37, %v5099_v10  ;;  %v2630_v31 = vmul.f32 %v5105_v37, %v5101_v14 }
 0xf5e   :  { %4595 = vmatmul.msk.bf16.vlgmr.msra.gmra.mxu0 %vm1662_vm13, %v2218_v25 }
 0xf5f   :  { %2754 = vmatpush.bf16.msra.mxu0 %v6337_v38  ;;  %v2681_v34 = vpack.c.bf16 %v2629_v52, %v2629_v52  ;;  %v2682_v61 = vpack.c.bf16 %v2630_v31, %v2630_v31 }
 0xf61   :  { %v2687_v39 = vunpack.c.l.b16 %v2681_v34  ;;  %v2688_v58 = vunpack.c.l.b16 %v2682_v61 }
 0xf63   :  { %v2689_v2 = vpack.c.b16 %v2688_v58, %v2687_v39 }
 0xf65   :  { %v2691_v51 = vsel %vm1662_vm13, %v2689_v2, 0 }
 0xf66   :  { %2700 = vmatpush.bf16.xpose.msrb.mxu2 %v2691_v51 }
 0xf70   :  { %v2508_v24 = vpop.xlane.xlu2 %2507 }
 0xf71   :  { %v2514_v12 = vsub.f32 %v6308_v15, %v2508_v24 }
 0xf73   :  { %v2520_v49 = vmul.f32 1.442695, %v2514_v12 }
 0xf75   :  { %5106 = vpow2.f32 %v2520_v49 }
 0xf78   :  { %v2511_v8 = vpop.xlane.xlu2 %2510 }
 0xf79   :  { %v2515_v57 = vsub.f32 %v6312_v1, %v2511_v8  ;;  %v2300_v1 = vsel %vm455_vm3, %v6125_v23, 0.0 }
 0xf7b   :  { %v6344_v54 = vpop.eup %5106  ;;  %v2522_v5 = vmul.f32 1.442695, %v2515_v57 }
 0xf7c   :  { %v2530_v10 = vsel %vm1662_vm13, %v6344_v54, 0.0 }
 0xf7d   :  { %5108 = vpow2.f32 %v2522_v5  ;;  %2531 = vadd.xlane.f32.xlu1 %v2530_v10  ;;  %v6368_v10 = vld [vmem:[%s6761_s21] sm:$0x3] }
 0xf7e   :  { %v2353_v36 = vperm.slane %v6368_v10, 0 }
 0xf80   :  { %v2564_v14 = vpop.permute.xlu2 %2563 }
 0xf81   :  { %v2573_v3 = vmul.f32 -1e+30, %v2564_v14 }
 0xf83   :  { %v6349_v27 = vpop.eup %5108  ;;  %v2577_v40 = vadd.f32 %v2573_v3, %v6308_v15 }
 0xf84   :  { %v2533_v47 = vsel %vm1662_vm13, %v6349_v27, 0.0 }
 0xf85   :  { %v2588_v16 = vsel %vm1662_vm13, %v2577_v40, -inf  ;;  %2534 = vadd.xlane.f32.xlu1 %v2533_v47 }
 0xf86   :  { %v2590_v20 = vmax.f32 %v2588_v16, %v2589_v43 }
 0xf88   :  { %v2591_v62 = vrot.slane %v2590_v20, 4 }
 0xf8a   :  { %v2592_v26 = vmax.f32 %v2590_v20, %v2591_v62 }
 0xf8c   :  { %v2593_v30 = vrot.slane %v2592_v26, 2 }
 0xf8d   :  { %2301 = vadd.xlane.f32.xlu1 %v2300_v1 }
 0xf8e   :  { %v2594_v29 = vmax.f32 %v2592_v26, %v2593_v30 }
 0xf8f   :  { %v2526_v9 = vpop.xlane.xlu0 %2525 }
 0xf90   :  { %v2595_v11 = vrot.slane %v2594_v29, 1 }
 0xf92   :  { %v2596_v15 = vmax.f32 %v2594_v29, %v2595_v11 }
 0xf94   :  { %v2599_v56 = vsub.f32 %v2577_v40, %v2596_v15  ;;  %v2600_v32 = vsub.f32 %v2578_v45, %v2596_v15 }
 0xf96   :  { %v2605_v37 = vmul.f32 1.442695, %v2599_v56  ;;  %v2607_v25 = vmul.f32 1.442695, %v2600_v32 }
 0xf97   :  { %v2299_v52 = vpop.xlane.xlu0 %2298 }
 0xf98   :  { %5110 = vpow2.f32 %v2605_v37  ;;  %v2303_v31 = vmul.f32 %v2299_v52, %v6107_v33 }
 0xf99   :  { %5112 = vpow2.f32 %v2607_v25  ;;  %v2372_v25 = vpack.c.bf16 %v6286_v63, %v6286_v63 }
 0xf9a   :  { %v6360_v34 = vsub.f32 %v6123_v22, %v2303_v31 }
 0xf9c   :  { %v2307_v61 = vmul.f32 %v6360_v34, %v6360_v34 }
 0xf9e   :  { %v5111_v39 = vpop.eup %5110  ;;  %v2309_v58 = vsel %vm455_vm3, %v2307_v61, 0.0  ;;  %v2769_v61 = vunpack.c.l.b16 %v2372_v25 }
 0xf9f   :  { %v5113_v2 = vpop.eup %5112  ;;  %v2618_v51 = vsel %vm1662_vm13, %v5111_v39, 0.0  ;;  %2310 = vadd.xlane.f32.xlu2 %v2309_v58 }
 0xfa0   :  { %v2619_v24 = vsel %vm1662_vm13, %v5113_v2, 0.0 }
 0xfa1   :  { %v2620_v12 = vadd.f32 %v2619_v24, %v2618_v51 }
 0xfa3   :  { %v2621_v49 = vrot.slane %v2620_v12, 4 }
 0xfa5   :  { %v2622_v8 = vadd.f32 %v2621_v49, %v2620_v12  ;;  %v4860_v49 = vld [vmem:[%s6762_s20 + $0x8] sm:$0xff] }
 0xfa7   :  { %v2623_v57 = vrot.slane %v2622_v8, 2 }
 0xfa9   :  { %v2624_v60 = vadd.f32 %v2623_v57, %v2622_v8 }
 0xfab   :  { %v2625_v22 = vrot.slane %v2624_v60, 1 }
 0xfad   :  { %v2626_v5 = vadd.f32 %v2625_v22, %v2624_v60 }
 0xfaf   :  { %5114 = vrcp.f32 %v2626_v5 }
 0xfb0   :  { %5116 = vrcp.f32 %v2526_v9 }
 0xfb5   :  { %v5115_v14 = vpop.eup %5114 }
 0xfb6   :  { %v2631_v45 = vmul.f32 %v5115_v14, %v5111_v39  ;;  %v2632_v3 = vmul.f32 %v5115_v14, %v5113_v2  ;;  %v5117_v16 = vpop.eup %5116 }
 0xfb7   :  { %2358 = vperm.xlu2 %4964, %v2353_v36   ;;  %v2540_v30 = vmul.f32 %v5117_v16, %v6316_v50  ;;  %v2255_v50 = vpack.c.bf16 %v6305_v21, %v6305_v21  ;;  %v4859_v21 = vld [vmem:[%s6762_s20] sm:$0xff] }
 0xfb8   :  { %v2683_v40 = vpack.c.bf16 %v2631_v45, %v2631_v45  ;;  %v2684_v47 = vpack.c.bf16 %v2632_v3, %v2632_v3 }
 0xfb9   :  { %v2529_v43 = vpop.xlane.xlu2 %2528  ;;  %v2633_v11 = vpack.c.bf16 %v2540_v30, %v2540_v30  ;;  %v2263_v39 = vunpack.c.l.b16 %v2255_v50  ;;  %v4869_v30 = vld [vmem:[%s6763_s1 + $0x10] sm:$0xff] }
 0xfba   :  { %5118 = vrcp.f32 %v2529_v43  ;;  %v2709_v20 = vunpack.c.l.b16 %v2683_v40  ;;  %v2710_v62 = vunpack.c.l.b16 %v2684_v47 }
 0xfbb   :  { %v2639_v56 = vunpack.c.l.b16 %v2633_v11 }
 0xfbc   :  { %v2711_v26 = vpack.c.b16 %v2710_v62, %v2709_v20 }
 0xfbe   :  { %v2713_v1 = vsel %vm1662_vm13, %v2711_v26, 0  ;;  %v4870_v26 = vld [vmem:[%s6763_s1 + $0x18] sm:$0xff] }
 0xfbf   :  { %2722 = vmatpush.bf16.xpose.msra.mxu3 %v2713_v1  ;;  %v4864_v1 = vld [vmem:[%s6762_s20 + $0x28] sm:$0xff] }
 0xfc0   :  { %v5119_v29 = vpop.eup %5118 }
 0xfc1   :  { %v2541_v9 = vmul.f32 %v5119_v29, %v6326_v6  ;;  %v2371_v6 = vpack.c.bf16 %v6265_v44, %v6265_v44  ;;  %v4863_v29 = vld [vmem:[%s6762_s20 + $0x20] sm:$0xff] }
 0xfc3   :  { %v2634_v15 = vpack.c.bf16 %v2541_v9, %v2541_v9  ;;  %v2768_v2 = vunpack.c.l.b16 %v2371_v6 }
 0xfc5   :  { %v2640_v32 = vunpack.c.l.b16 %v2634_v15  ;;  %v2770_v24 = vpack.c.b16 %v2769_v61, %v2768_v2 }
 0xfc7   :  { %v2641_v37 = vpack.c.b16 %v2640_v32, %v2639_v56  ;;  %2873 = vmatpush.bf16.msrb.mxu3 %v4860_v49 }
 0xfc9   :  { %4609 = vmatmul.msk.bf16.vlgmr.msrb.gmra.mxu0 %vm1662_vm13, %v2641_v37  ;;  %4611 = vmatmul.msk.bf16.vlgmr.msrb.gmra.mxu2 %vm1662_vm13, %v2641_v37 }
 0xfca   :  { %2933 = vmatpush.bf16.msrb.mxu0 %v4864_v1 }
 0xfcb   :  { %2874 = vmatpush.bf16.msrb.mxu3 %v4859_v21 }
 0xfce   :  { %2934 = vmatpush.bf16.msrb.mxu0 %v4863_v29 }
 0xfdb   :  { %v2247_v52 = vpop.f32.mrf.mxu0 }
 0xfdc   :  { %v2256_v31 = vpack.c.bf16 %v2247_v52, %v2247_v52 }
 0xfde   :  { %v2264_v58 = vunpack.c.l.b16 %v2256_v31 }
 0xfe0   :  { %v2265_v51 = vpack.c.b16 %v2264_v58, %v2263_v39  ;;  %v4997_v58 = vld [vmem:[#allocation12] ss:$0 sm:$0xff] }
 0xfe2   :  { %4604 = vmatmul.msk.bf16.vlgmr.msra.gmra.mxu1 %vm455_vm3, %v2265_v51 }
 0xfe3   :  { %2782 = vmatpush.bf16.msra.mxu1 %v2770_v24  ;;  %v2249_v12 = vpop.f32.mrf.mxu0 }
 0xff0   :  { %v2532_v8 = vpop.xlane.xlu1 %2531 }
 0xff1   :  { %5120 = vrcp.f32 %v2532_v8 }
 0xff7   :  { %v5121_v60 = vpop.eup %5120 }
 0xff8   :  { %v2535_v57 = vpop.xlane.xlu1 %2534  ;;  %v2542_v22 = vmul.f32 %v5121_v60, %v6344_v54 }
 0xff9   :  { %5122 = vrcp.f32 %v2535_v57 }
 0xffa   :  { %v2635_v36 = vpack.c.bf16 %v2542_v22, %v2542_v22 }
 0xffc   :  { %v2661_v43 = vunpack.c.l.b16 %v2635_v36  ;;  %v2360_v36 = vperm.slane %v6368_v10, 1 }
 0xfff   :  { %v5123_v5 = vpop.eup %5122 }
0x1000   :  { %v2543_v14 = vmul.f32 %v5123_v5, %v6349_v27  ;;  %v2302_v45 = vpop.xlane.xlu1 %2301  ;;  %v4861_v27 = vld [vmem:[%s6762_s20 + $0x10] sm:$0xff] }
0x1001   :  { %v2304_v3 = vmul.f32 %v2302_v45, %v6107_v33  ;;  %v4865_v45 = vld [vmem:[%s6762_s20 + $0x30] sm:$0xff] }
0x1002   :  { %v2636_v40 = vpack.c.bf16 %v2543_v14, %v2543_v14  ;;  %v4866_v14 = vld [vmem:[%s6762_s20 + $0x38] sm:$0xff] }
0x1003   :  { %v6389_v47 = vsub.f32 %v6125_v23, %v2304_v3  ;;  %v4862_v23 = vld [vmem:[%s6762_s20 + $0x18] sm:$0xff] }
0x1004   :  { %v2662_v16 = vunpack.c.l.b16 %v2636_v40  ;;  %2836 = vmatpush.bf16.msra.mxu2 %v4862_v23 }
0x1005   :  { %v2308_v54 = vmul.f32 %v6389_v47, %v6389_v47 }
0x1006   :  { %v2663_v20 = vpack.c.b16 %v2662_v16, %v2661_v43 }
0x1007   :  { %v2312_v62 = vsel %vm455_vm3, %v2308_v54, 0.0 }
0x1008   :  { %4610 = vmatmul.msk.bf16.vlgmr.msrb.gmra.mxu1 %vm1662_vm13, %v2663_v20  ;;  %4612 = vmatmul.msk.bf16.vlgmr.msra.gmra.mxu3 %vm1662_vm13, %v2663_v20 }
0x1009   :  { %2313 = vadd.xlane.f32.xlu0 %v2312_v62  ;;  %2837 = vmatpush.bf16.msra.mxu2 %v4861_v27 }
0x100a   :  { %2997 = vmatpush.bf16.msrb.mxu1 %v4866_v14 }
0x100d   :  { %3057 = vmatpush.bf16.msrb.mxu2 %v4870_v26 }
0x100e   :  { %2998 = vmatpush.bf16.msrb.mxu1 %v4865_v45 }
0x1011   :  { %3058 = vmatpush.bf16.msrb.mxu2 %v4869_v30 }
0x1018   :  { %4637 = vmatmul.msk.bf16.vlgmr.msrb.gmra.mxu3 %vm455_vm3, %v6337_v38 }
0x1028   :  { %4638 = vmatmul.msk.bf16.gmra.mxu3 %vm455_vm3, %v2770_v24 }
0x1046   :  { %v2654_v11 = vpop.f32.mrf.mxu0 }
0x1047   :  { %v2798_v15 = vpack.c.bf16 %v2654_v11, %v2654_v11  ;;  %v2886_v51 = vmul.f32 %v2654_v11, %v6221_v4 }
0x1049   :  { %v2806_v38 = vunpack.c.l.b16 %v2798_v15  ;;  %v2895_v8 = vpack.c.bf16 %v2886_v51, %v2886_v51 }
0x104b   :  { %v2903_v21 = vunpack.c.l.b16 %v2895_v8 }
0x104c   :  { %v2702_v9 = vpop.f32.mrf.mxu2 }
0x104d   :  { %v2729_v25 = vpack.c.bf16 %v2702_v9, %v2702_v9 }
0x104e   :  { %v2656_v56 = vpop.f32.mrf.mxu0 }
0x104f   :  { %v2799_v32 = vpack.c.bf16 %v2656_v56, %v2656_v56  ;;  %v2735_v31 = vunpack.c.l.b16 %v2729_v25  ;;  %v2887_v2 = vmul.f32 %v2656_v56, %v6232_v18  ;;  %v3229_v25 = vsub.f32 1.0, %v6368_v10 }
0x1051   :  { %v2807_v37 = vunpack.c.l.b16 %v2799_v32  ;;  %v2896_v49 = vpack.c.bf16 %v2887_v2, %v2887_v2  ;;  %v4867_v2 = vld [vmem:[%s6763_s1] sm:$0xff] }
0x1053   :  { %v2810_v50 = vpack.c.b16 %v2807_v37, %v2806_v38 }
0x1054   :  { %v2704_v52 = vpop.f32.mrf.mxu2 }
0x1055   :  { %v2730_v6 = vpack.c.bf16 %v2704_v52, %v2704_v52  ;;  %4627 = vmatmul.msk.bf16.vlgmr.msra.gmra.mxu2 %vm455_vm3, %v2810_v50  ;;  %v3237_v52 = vperm.slane %v3229_v25, 1 }
0x1056   :  { %3298 = vmatpush.bf16.msra.mxu2 %v6054_v17  ;;  %v2904_v17 = vunpack.c.l.b16 %v2896_v49 }
0x1057   :  { %v2736_v61 = vunpack.c.l.b16 %v2730_v6 }
0x1058   :  { %v2907_v5 = vpack.c.b16 %v2904_v17, %v2903_v21 }
0x1059   :  { %v2737_v39 = vpack.c.b16 %v2736_v61, %v2735_v31 }
0x105b   :  { %4613 = vmatmul.msk.bf16.vlgmr.msra.gmra.mxu0 %vm421_vm2, %v2737_v39 }
0x105c   :  { %3163 = vmatpush.bf16.xpose.msra.mxu0 %v6163_v59 }
0x105f   :  { %v2290_v24 = vpop.f32.mrf.mxu1 }
0x1060   :  { %v2291_v12 = vadd.f32 %v4997_v58, %v2290_v24 }
0x1062   :  { %5124 = vtanh.f32 %v2291_v12 }
0x1067   :  { %v2292_v57 = vpop.f32.mrf.mxu1 }
0x1068   :  { %v6411_v60 = vpop.eup %5124  ;;  %v2293_v22 = vadd.f32 %v4997_v58, %v2292_v57 }
0x1069   :  { %2345 = vrot.lane.b32.xlu1 %v6411_v60, %s5502_s7 }
0x106a   :  { %5126 = vtanh.f32 %v2293_v22 }
0x106b   :  { %4651 = vmatmul.msk.bf16.vlgmr.msrb.gmra.mxu0 %vm455_vm3, %v2907_v5 }
0x106c   :  { %3314 = vmatpush.bf16.msrb.mxu0 %v6026_v42 }
0x1070   :  { %v6417_v59 = vpop.eup %5126 }
0x1071   :  { %2347 = vrot.lane.b32.xlu0 %v6417_v59, %s5502_s7 }
0x1079   :  { %2365 = vperm.xlu0 %4966, %v2360_v36  }
0x107c   :  { %v2314_v31 = vpop.xlane.xlu0 %2313 }
0x1085   :  { %v2676_v3 = vpop.f32.mrf.mxu1 }
0x1086   :  { %v2888_v40 = vmul.f32 %v2676_v3, %v6265_v44  ;;  %v2800_v16 = vpack.c.bf16 %v2676_v3, %v2676_v3  ;;  %v6444_v3 = vld [vmem:[%s6751_s8 + $0x2] ss:$0 sm:$0xff] }
0x1088   :  { %v2897_v20 = vpack.c.bf16 %v2888_v40, %v2888_v40  ;;  %v2808_v23 = vunpack.c.l.b16 %v2800_v16 }
0x108a   :  { %v2905_v30 = vunpack.c.l.b16 %v2897_v20 }
0x108b   :  { %v2724_v43 = vpop.f32.mrf.mxu3 }
0x108c   :  { %v2731_v1 = vpack.c.bf16 %v2724_v43, %v2724_v43  ;;  %v5000_v43 = vld [vmem:[%s6751_s8] ss:$0 sm:$0xff] }
0x108d   :  { %v2678_v54 = vpop.f32.mrf.mxu1 }
0x108e   :  { %v2801_v42 = vpack.c.bf16 %v2678_v54, %v2678_v54  ;;  %v2889_v62 = vmul.f32 %v2678_v54, %v6286_v63  ;;  %v2763_v32 = vunpack.c.l.b16 %v2731_v1 }
0x1090   :  { %v2809_v27 = vunpack.c.l.b16 %v2801_v42  ;;  %v2898_v26 = vpack.c.bf16 %v2889_v62, %v2889_v62 }
0x1092   :  { %v2906_v29 = vunpack.c.l.b16 %v2898_v26  ;;  %v2811_v11 = vpack.c.b16 %v2809_v27, %v2808_v23 }
0x1093   :  { %3139 = vadd.xlane.f32.xlu1 %v6057_v19  ;;  %v2726_v9 = vpop.f32.mrf.mxu3  ;;  %v2311_v19 = vpop.xlane.xlu2 %2310 }
0x1094   :  { %v2908_v15 = vpack.c.b16 %v2906_v29, %v2905_v30  ;;  %v2732_v56 = vpack.c.bf16 %v2726_v9, %v2726_v9  ;;  %4628 = vmatmul.msk.bf16.gmra.mxu2 %vm455_vm3, %v2811_v11  ;;  %v2315_v50 = vmul.f32 %v2311_v19, %v6107_v33 }
0x1096   :  { %v2764_v38 = vunpack.c.l.b16 %v2732_v56  ;;  %4652 = vmatmul.msk.bf16.gmra.mxu0 %vm455_vm3, %v2908_v15  ;;  %v2317_v6 = vadd.f32 1e-06, %v2315_v50 }
0x1098   :  { %v2765_v37 = vpack.c.b16 %v2764_v38, %v2763_v32  ;;  %5128 = vrsqrt.f32 %v2317_v6  ;;  %vm2325_vm6 = vweird.f32 %v2317_v6 }
0x109a   :  { %4614 = vmatmul.msk.bf16.vlgmr.msra.gmra.mxu1 %vm421_vm2, %v2765_v37 }
0x109b   :  { %3179 = vmatpush.bf16.xpose.msra.mxu1 %v6147_v46  ;;  %v2316_v46 = vmul.f32 %v2314_v31, %v6107_v33  ;;  %v2359_v16 = vpop.permute.xlu2 %2358 }
0x109d   :  { %v2318_v39 = vadd.f32 1e-06, %v2316_v46 }
0x109e   :  { %v5129_v61 = vpop.eup %5128 }
0x109f   :  { %v2320_v58 = vmul.f32 %v5129_v61, %v2317_v6  ;;  %5130 = vrsqrt.f32 %v2318_v39  ;;  %vm2326_vm5 = vweird.f32 %v5129_v61  ;;  %vm2335_vm9 = vweird.f32 %v2318_v39 }
0x10a0   :  { %vm2327_vm7 = vmor %vm2325_vm6, %vm2326_vm5 }
0x10a1   :  { %v2321_v51 = vmul.f32 %v5129_v61, %v2320_v58 }
0x10a3   :  { %3142 = vadd.xlane.f32.xlu0 %v6030_v55  ;;  %v4868_v55 = vld [vmem:[%s6763_s1 + $0x8] sm:$0xff]  ;;  %v2322_v24 = vmul.f32 0.5, %v2321_v51 }
0x10a4   :  { %4679 = vmatmul.msk.bf16.vlgmr.msrb.gmra.mxu2 %vm455_vm3, %v5851_v7  ;;  %3104 = vmatpush.bf16.msra.mxu3 %v4868_v55  ;;  %v2876_v55 = vpop.f32.mrf.mxu3 }
0x10a5   :  { %v5131_v12 = vpop.eup %5130  ;;  %v2323_v49 = vsub.f32 1.5, %v2322_v24 }
0x10a6   :  { %v2330_v8 = vmul.f32 %v5131_v12, %v2318_v39  ;;  %vm2336_vm8 = vweird.f32 %v5131_v12 }
0x10a7   :  { %v2324_v21 = vmul.f32 %v5129_v61, %v2323_v49  ;;  %vm2337_vm10 = vmor %vm2335_vm9, %vm2336_vm8 }
0x10a8   :  { %3105 = vmatpush.bf16.msra.mxu3 %v4867_v2  ;;  %v2331_v17 = vmul.f32 %v5131_v12, %v2330_v8 }
0x10a9   :  { %v2328_v57 = vsel %vm2327_vm7, %v5129_v61, %v2324_v21 }
0x10aa   :  { %v2332_v33 = vmul.f32 0.5, %v2331_v17  ;;  %v2339_v5 = vmul.f32 %v2328_v57, %v6360_v34 }
0x10ac   :  { %v2333_v36 = vsub.f32 1.5, %v2332_v33  ;;  %v2341_v14 = vmul.f32 %v6411_v60, %v2339_v5  ;;  %v2878_v2 = vpop.f32.mrf.mxu3 }
0x10ae   :  { %v2334_v20 = vmul.f32 %v5131_v12, %v2333_v36 }
0x10b0   :  { %v2338_v30 = vsel %vm2337_vm10, %v5131_v12, %v2334_v20 }
0x10b1   :  { %v2340_v15 = vmul.f32 %v2338_v30, %v6389_v47 }
0x10b3   :  { %v2342_v37 = vmul.f32 %v6417_v59, %v2340_v15 }
0x10b4   :  { %v2881_v12 = vpop.f32.mrf.mxu3 }
0x10b7   :  { %3242 = vperm.xlu0 %4966, %v3237_v52  }
0x10d8   :  { %v2756_v22 = vpop.f32.mrf.mxu0  ;;  %v2839_v58 = vpop.f32.mrf.mxu2 }
0x10d9   :  { %v2950_v54 = vmul.f32 %v2756_v22, %v6221_v4  ;;  %v2883_v22 = vpop.f32.mrf.mxu3 }
0x10db   :  { %v2346_v45 = vpop.permute.xlu1 %2345  ;;  %v2959_v27 = vpack.c.bf16 %v2950_v54, %v2950_v54 }
0x10dc   :  { %v2351_v40 = vadd.f32 %v2346_v45, %v2341_v14 }
0x10dd   :  { %v2967_v56 = vunpack.c.l.b16 %v2959_v27 }
0x10de   :  { %v6448_v42 = vmul.f32 %v2359_v16, %v2351_v40 }
0x10e0   :  { %v3149_v34 = vmul.f32 %v6444_v3, %v6448_v42  ;;  %v2758_v62 = vpop.f32.mrf.mxu0  ;;  %v3123_v60 = vmul.f32 %v5000_v43, %v6448_v42  ;;  %v3117_v23 = vpack.c.bf16 %v6448_v42, %v6448_v42  ;;  %v2841_v24 = vpop.f32.mrf.mxu2 }
0x10e1   :  { %v2951_v26 = vmul.f32 %v2758_v62, %v6232_v18 }
0x10e2   :  { %v3151_v1 = vpack.c.bf16 %v3149_v34, %v3149_v34  ;;  %v3125_v4 = vsel %vm455_vm3, %v3123_v60, 0.0  ;;  %v3360_v29 = vsel %vm392_vm0, %v3117_v23, 0  ;;  %v3441_v31 = vunpack.c.l.b16 %v3117_v23 }
0x10e3   :  { %v2960_v11 = vpack.c.bf16 %v2951_v26, %v2951_v26  ;;  %v2348_v9 = vpop.permute.xlu0 %2347  ;;  %3126 = vadd.xlane.f32.xlu2 %v3125_v4  ;;  %3369 = vmatpush.bf16.msrb.mxu3 %v3360_v29 }
0x10e4   :  { %4692 = vmatmul.msk.bf16.vlgmr.msra.gmra.mxu0 %vm455_vm3, %v3151_v1  ;;  %v2352_v18 = vadd.f32 %v2348_v9, %v2342_v37  ;;  %v2877_v9 = vadd.f32 %v2876_v55, %v2839_v58  ;;  %v2879_v37 = vadd.f32 %v2878_v2, %v2841_v24  ;;  %v3230_v55 = vperm.slane %v3229_v25, 0 }
0x10e5   :  { %v2968_v32 = vunpack.c.l.b16 %v2960_v11 }
0x10e7   :  { %v2971_v38 = vpack.c.b16 %v2968_v32, %v2967_v56 }
0x10e8   :  { %v2936_v39 = vpop.f32.mrf.mxu0 }
0x10e9   :  { %4665 = vmatmul.msk.bf16.vlgmr.msrb.gmra.mxu1 %vm455_vm3, %v2971_v38  ;;  %v2946_v56 = vadd.f32 %v2936_v39, %v2877_v9 }
0x10eb   :  { %v2366_v19 = vpop.permute.xlu0 %2365 }
0x10ec   :  { %v6462_v50 = vmul.f32 %v2366_v19, %v2352_v18 }
0x10ee   :  { %v3118_v52 = vpack.c.bf16 %v6462_v50, %v6462_v50  ;;  %v3124_v6 = vmul.f32 %v5000_v43, %v6462_v50 }
0x10f0   :  { %v3379_v47 = vsel %vm392_vm0, %v3118_v52, 0  ;;  %v3442_v46 = vunpack.c.l.b16 %v3118_v52  ;;  %v3128_v61 = vsel %vm455_vm3, %v3124_v6, 0.0  ;;  %v2938_v51 = vpop.f32.mrf.mxu0 }
0x10f1   :  { %3388 = vmatpush.bf16.msra.mxu0 %v3379_v47  ;;  %3129 = vadd.xlane.f32.xlu2 %v3128_v61  ;;  %v2947_v18 = vadd.f32 %v2938_v51, %v2879_v37 }
0x10f2   :  { %v6469_v59 = vpack.c.b16 %v3442_v46, %v3441_v31 }
0x1113   :  { %v2941_v49 = vpop.f32.mrf.mxu0 }
0x1116   :  { %v3143_v2 = vpop.xlane.xlu0 %3142 }
0x1117   :  { %v2784_v8 = vpop.f32.mrf.mxu1  ;;  %v2844_v17 = vpop.f32.mrf.mxu2 }
0x1118   :  { %v2882_v21 = vadd.f32 %v2881_v12, %v2844_v17  ;;  %v2952_v57 = vmul.f32 %v2784_v8, %v6265_v44  ;;  %v3150_v44 = vmul.f32 %v6444_v3, %v6462_v50  ;;  %v5002_v3 = vld [vmem:[%s6764_s2] ss:$0 sm:$0xff] }
0x111a   :  { %v2948_v33 = vadd.f32 %v2941_v49, %v2882_v21  ;;  %v2961_v14 = vpack.c.bf16 %v2952_v57, %v2952_v57  ;;  %v3152_v27 = vpack.c.bf16 %v3150_v44, %v3150_v44 }
0x111b   :  { %v2943_v43 = vpop.f32.mrf.mxu0 }
0x111c   :  { %v2969_v20 = vunpack.c.l.b16 %v2961_v14 }
0x111f   :  { %v2786_v5 = vpop.f32.mrf.mxu1  ;;  %v2846_v36 = vpop.f32.mrf.mxu2 }
0x1120   :  { %v2953_v45 = vmul.f32 %v2786_v5, %v6286_v63  ;;  %v2884_v40 = vadd.f32 %v2883_v22, %v2846_v36  ;;  %v3140_v63 = vpop.xlane.xlu1 %3139  ;;  %v3188_v22 = vperm.slane %v3143_v2, %v5900_v0 }
0x1121   :  { %v3187_v30 = vperm.slane %v3140_v63, %v5900_v0 }
0x1122   :  { %v2962_v16 = vpack.c.bf16 %v2953_v45, %v2953_v45  ;;  %v2949_v54 = vadd.f32 %v2943_v43, %v2884_v40 }
0x1124   :  { %v2970_v34 = vunpack.c.l.b16 %v2962_v16 }
0x1126   :  { %v2972_v62 = vpack.c.b16 %v2970_v34, %v2969_v20 }
0x1127   :  { %v6473_v60 = vpop.f32.mrf.mxu2 }
0x1128   :  { %4666 = vmatmul.msk.bf16.gmra.mxu1 %vm455_vm3, %v2972_v62 }
0x1129   :  { %v3243_v36 = vpop.permute.xlu0 %3242 }
0x112a   :  { %v3245_v10 = vmul.f32 -1e+30, %v3243_v36 }
0x112f   :  { %v3062_v23 = vpop.f32.mrf.mxu2 }
0x1138   :  { %4693 = vmatmul.msk.bf16.vlgmr.msra.gmra.mxu1 %vm455_vm3, %v3152_v27 }
0x1156   :  { %v3127_v26 = vpop.xlane.xlu2 %3126 }
0x1157   :  { %v3203_v1 = vadd.f32 %v3187_v30, %v3127_v26 }
0x1161   :  { %v3165_v4 = vpop.f32.mrf.mxu0 }
0x1162   :  { %v6480_v29 = vadd.f32 %v3203_v1, %v3165_v4 }
0x1164   :  { %v3207_v11 = vsel %vm1662_vm13, %v6480_v29, -inf  ;;  %v3130_v57 = vpop.xlane.xlu2 %3129 }
0x1165   :  { %3208 = vmax.xlane.f32.xlu1 %v3207_v11  ;;  %v3204_v14 = vadd.f32 %v3188_v22, %v3130_v57 }
0x1166   :  { %v3000_v15 = vpop.f32.mrf.mxu1 }
0x1167   :  { %v3010_v32 = vadd.f32 %v3000_v15, %v2946_v56 }
0x1169   :  { %v3167_v38 = vpop.f32.mrf.mxu0  ;;  %v3018_v19 = vadd.f32 %v5002_v3, %v3010_v32 }
0x116b   :  { %v3026_v31 = vpack.c.bf16 %v3018_v19, %v3018_v19 }
0x116d   :  { %v3074_v61 = vunpack.c.l.b16 %v3026_v31 }
0x116e   :  { %v3002_v52 = vpop.f32.mrf.mxu1 }
0x116f   :  { %v3011_v6 = vadd.f32 %v3002_v52, %v2947_v18 }
0x1171   :  { %v3019_v47 = vadd.f32 %v5002_v3, %v3011_v6 }
0x1173   :  { %v3027_v46 = vpack.c.bf16 %v3019_v47, %v3019_v47 }
0x1175   :  { %v3075_v12 = vunpack.c.l.b16 %v3027_v46 }
0x1177   :  { %v3078_v49 = vpack.c.b16 %v3075_v12, %v3074_v61 }
0x1179   :  { %4688 = vmatmul.msk.bf16.vlgmr.msra.gmra.mxu3 %vm455_vm3, %v3078_v49  ;;  %v5001_v49 = vld [vmem:[%s6765_s10] ss:$0 sm:$0xff] }
0x117e   :  { %3235 = vperm.xlu1 %4967, %v3230_v55  }
0x11a5   :  { %v3005_v39 = vpop.f32.mrf.mxu1 }
0x11a6   :  { %v3012_v58 = vadd.f32 %v3005_v39, %v2948_v33 }
0x11a8   :  { %v3020_v8 = vadd.f32 %v5002_v3, %v3012_v58 }
0x11aa   :  { %v3028_v17 = vpack.c.bf16 %v3020_v8, %v3020_v8  ;;  %v3061_v8 = vadd.f32 %v5001_v49, %v6473_v60 }
0x11ac   :  { %v3076_v45 = vunpack.c.l.b16 %v3028_v17 }
0x11ad   :  { %v3007_v51 = vpop.f32.mrf.mxu1 }
0x11ae   :  { %v3013_v24 = vadd.f32 %v3007_v51, %v2949_v54 }
0x11b0   :  { %v3021_v21 = vadd.f32 %v5002_v3, %v3013_v24  ;;  %v3066_v24 = vperm.slane %v3061_v8, 0 }
0x11b2   :  { %v3029_v5 = vpack.c.bf16 %v3021_v21, %v3021_v21 }
0x11b4   :  { %v3077_v40 = vunpack.c.l.b16 %v3029_v5 }
0x11b5   :  { %v3181_v43 = vpop.f32.mrf.mxu1 }
0x11b6   :  { %v3079_v25 = vpack.c.b16 %v3077_v40, %v3076_v45  ;;  %v6489_v16 = vadd.f32 %v3204_v14, %v3181_v43 }
0x11b8   :  { %v3247_v33 = vadd.f32 %v3245_v10, %v6489_v16  ;;  %4689 = vmatmul.msk.bf16.gmra.mxu3 %vm455_vm3, %v3079_v25  ;;  %v3210_v54 = vsel %vm1662_vm13, %v6489_v16, -inf }
0x11b9   :  { %3211 = vmax.xlane.f32.xlu2 %v3210_v54 }
0x11ba   :  { %v3255_v0 = vsel %vm1662_vm13, %v3247_v33, -inf }
0x11bb   :  { %v3256_v20 = vrot.slane %v3255_v0, 4 }
0x11bd   :  { %v3257_v34 = vmax.f32 %v3255_v0, %v3256_v20  ;;  %v3183_v62 = vpop.f32.mrf.mxu1 }
0x11bf   :  { %v3258_v23 = vrot.slane %v3257_v34, 2 }
0x11c1   :  { %v3259_v44 = vmax.f32 %v3257_v34, %v3258_v23 }
0x11c3   :  { %v3260_v27 = vrot.slane %v3259_v44, 1 }
0x11c5   :  { %v3261_v63 = vmax.f32 %v3259_v44, %v3260_v27 }
0x11c7   :  { %v3263_v26 = vsub.f32 %v3247_v33, %v3261_v63 }
0x11c9   :  { %v3266_v30 = vmul.f32 1.442695, %v3263_v26  ;;  %v3065_v26 = vrot.slane %v3061_v8, 1  ;;  %v4875_v8 = vld [vmem:[%s6766_s4 + $0x20] sm:$0xff] }
0x11cb   :  { %5132 = vpow2.f32 %v3266_v30 }
0x11d1   :  { %v5133_v1 = vpop.eup %5132 }
0x11d2   :  { %v3275_v4 = vsel %vm1662_vm13, %v5133_v1, 0.0 }
0x11d3   :  { %v3276_v11 = vrot.slane %v3275_v4, 4 }
0x11d5   :  { %v3277_v9 = vadd.f32 %v3276_v11, %v3275_v4  ;;  %v3067_v4 = vperm.slane %v3065_v26, 0 }
0x11d7   :  { %v3278_v15 = vrot.slane %v3277_v9, 2 }
0x11d8   :  { %v3209_v56 = vpop.xlane.xlu1 %3208 }
0x11d9   :  { %v3213_v32 = vsub.f32 %v6480_v29, %v3209_v56  ;;  %v3279_v3 = vadd.f32 %v3278_v15, %v3277_v9 }
0x11db   :  { %v3215_v38 = vmul.f32 1.442695, %v3213_v32  ;;  %v3280_v37 = vrot.slane %v3279_v3, 1 }
0x11dd   :  { %5134 = vpow2.f32 %v3215_v38  ;;  %v3281_v18 = vadd.f32 %v3280_v37, %v3279_v3  ;;  %v4872_v37 = vld [vmem:[%s6766_s4 + $0x8] sm:$0xff] }
0x11df   :  { %5136 = vrcp.f32 %v3281_v18  ;;  %v4871_v18 = vld [vmem:[%s6766_s4] sm:$0xff] }
0x11e3   :  { %v5135_v19 = vpop.eup %5134 }
0x11e4   :  { %v3219_v52 = vsel %vm1662_vm13, %v5135_v19, 0.0 }
0x11e5   :  { %v5137_v6 = vpop.eup %5136  ;;  %3220 = vadd.xlane.f32.xlu2 %v3219_v52 }
0x11e6   :  { %v3285_v31 = vmul.f32 %v5137_v6, %v5133_v1 }
0x11e8   :  { %v3321_v47 = vpack.c.bf16 %v3285_v31, %v3285_v31 }
0x11ea   :  { %v3339_v46 = vsel %vm1662_vm13, %v3321_v47, 0 }
0x11eb   :  { %3348 = vmatpush.bf16.xpose.msrb.mxu2 %v3339_v46 }
0x11f0   :  { %v3236_v61 = vpop.permute.xlu1 %3235 }
0x11f1   :  { %v3244_v12 = vmul.f32 -1e+30, %v3236_v61 }
0x11f3   :  { %v3246_v55 = vadd.f32 %v3244_v12, %v6480_v29 }
0x11f5   :  { %v3248_v39 = vsel %vm1662_vm13, %v3246_v55, -inf }
0x11f6   :  { %v3249_v58 = vrot.slane %v3248_v39, 4 }
0x11f8   :  { %v3250_v2 = vmax.f32 %v3248_v39, %v3249_v58  ;;  %v4876_v39 = vld [vmem:[%s6766_s4 + $0x28] sm:$0xff]  ;;  %v4873_v58 = vld [vmem:[%s6766_s4 + $0x10] sm:$0xff] }
0x11f9   :  { %3508 = vmatpush.bf16.msra.mxu3 %v4876_v39 }
0x11fa   :  { %v3251_v51 = vrot.slane %v3250_v2, 2 }
0x11fc   :  { %v3252_v17 = vmax.f32 %v3250_v2, %v3251_v51  ;;  %v3107_v21 = vpop.f32.mrf.mxu3  ;;  %v4882_v2 = vld [vmem:[%s6767_s29 + $0x18] sm:$0xff] }
0x11fd   :  { %v6504_v57 = vadd.f32 %v3107_v21, %v3066_v24  ;;  %3509 = vmatpush.bf16.msra.mxu3 %v4875_v8 }
0x11fe   :  { %v3253_v22 = vrot.slane %v3252_v17, 1 }
0x11ff   :  { %4809 = vst.msk [vmem:[%s5759_s24 + $0x20] sm:$0xff] %vm455_vm3, %v6504_v57 }
0x1200   :  { %v3254_v5 = vmax.f32 %v3252_v17, %v3253_v22 }
0x1202   :  { %v3262_v36 = vsub.f32 %v3246_v55, %v3254_v5  ;;  %v4874_v55 = vld [vmem:[%s6766_s4 + $0x18] sm:$0xff] }
0x1204   :  { %v3264_v29 = vmul.f32 1.442695, %v3262_v36  ;;  %v3109_v14 = vpop.f32.mrf.mxu3 }
0x1205   :  { %v6509_v45 = vadd.f32 %v3109_v14, %v3066_v24 }
0x1206   :  { %5138 = vpow2.f32 %v3264_v29 }
0x1207   :  { %4810 = vst.msk [vmem:[%s5759_s24 + $0x28] sm:$0xff] %vm455_vm3, %v6509_v45 }
0x120c   :  { %v5139_v60 = vpop.eup %5138 }
0x120d   :  { %v3268_v40 = vsel %vm1662_vm13, %v5139_v60, 0.0 }
0x120e   :  { %v3269_v43 = vrot.slane %v3268_v40, 4 }
0x1210   :  { %v3270_v10 = vadd.f32 %v3269_v43, %v3268_v40 }
0x1212   :  { %v3271_v25 = vrot.slane %v3270_v10, 2 }
0x1214   :  { %v3272_v33 = vadd.f32 %v3271_v25, %v3270_v10 }
0x1216   :  { %v3273_v54 = vrot.slane %v3272_v33, 1 }
0x1218   :  { %v3274_v0 = vadd.f32 %v3273_v54, %v3272_v33 }
0x121a   :  { %5140 = vrcp.f32 %v3274_v0 }
0x1220   :  { %v5141_v20 = vpop.eup %5140 }
0x1221   :  { %v3284_v34 = vmul.f32 %v5141_v20, %v5139_v60  ;;  %v4884_v60 = vld [vmem:[%s6768_s16 + $0x8] sm:$0xff]  ;;  %v4883_v20 = vld [vmem:[%s6768_s16] sm:$0xff] }
0x1223   :  { %v3320_v62 = vpack.c.bf16 %v3284_v34, %v3284_v34 }
0x1225   :  { %v3323_v23 = vsel %vm1662_vm13, %v3320_v62, 0  ;;  %v3752_v62 = vpack.c.b16 %v6072_v41, %v6072_v41 }
0x1226   :  { %3332 = vmatpush.bf16.xpose.msrb.mxu1 %v3323_v23 }
0x122c   :  { %v3212_v44 = vpop.xlane.xlu2 %3211 }
0x122d   :  { %v3214_v27 = vsub.f32 %v6489_v16, %v3212_v44 }
0x122e   :  { %3431 = vmatpush.bf16.msra.mxu1 %v4874_v55  ;;  %v5005_v55 = vld [vmem:[%s6769_s5] ss:$0 sm:$0xff] }
0x122f   :  { %v3217_v63 = vmul.f32 1.442695, %v3214_v27  ;;  %v4878_v27 = vld [vmem:[%s6766_s4 + $0x38] sm:$0xff] }
0x1231   :  { %5142 = vpow2.f32 %v3217_v63  ;;  %v4877_v63 = vld [vmem:[%s6766_s4 + $0x30] sm:$0xff] }
0x1232   :  { %3432 = vmatpush.bf16.msra.mxu1 %v4873_v58 }
0x1237   :  { %v5143_v30 = vpop.eup %5142 }
0x1238   :  { %v3222_v1 = vsel %vm1662_vm13, %v5143_v30, 0.0 }
0x1239   :  { %3223 = vadd.xlane.f32.xlu2 %v3222_v1 }
0x123b   :  { %v3112_v11 = vpop.f32.mrf.mxu3 }
0x123c   :  { %v6518_v9 = vadd.f32 %v3112_v11, %v3067_v4 }
0x123e   :  { %4811 = vst.msk [vmem:[%s5759_s24 + $0x30] sm:$0xff] %vm455_vm3, %v6518_v9 }
0x1243   :  { %v3114_v15 = vpop.f32.mrf.mxu3 }
0x1244   :  { %v6523_v56 = vadd.f32 %v3114_v15, %v3067_v4 }
0x1246   :  { %4812 = vst.msk [vmem:[%s5759_s24 + $0x38] sm:$0xff] %vm455_vm3, %v6523_v56 }
0x1258   :  { %v3221_v16 = vpop.xlane.xlu2 %3220 }
0x1259   :  { %5144 = vrcp.f32 %v3221_v16 }
0x125f   :  { %v5145_v32 = vpop.eup %5144 }
0x1260   :  { %v3227_v3 = vmul.f32 %v5145_v32, %v5135_v19 }
0x1262   :  { %v3286_v38 = vpack.c.bf16 %v3227_v3, %v3227_v3 }
0x1264   :  { %4694 = vmatmul.msk.bf16.vlgmr.msra.gmra.mxu2 %vm1662_vm13, %v3286_v38  ;;  %4696 = vmatmul.msk.bf16.vlgmr.msrb.gmra.mxu1 %vm1662_vm13, %v3286_v38 }
0x1265   :  { %3465 = vmatpush.bf16.msra.mxu2 %v4872_v37  ;;  %3602 = vmatpush.bf16.msrb.mxu1 %v4882_v2 }
0x1269   :  { %3466 = vmatpush.bf16.msra.mxu2 %v4871_v18 }
0x12ac   :  { %v3224_v52 = vpop.xlane.xlu2 %3223 }
0x12ad   :  { %5146 = vrcp.f32 %v3224_v52  ;;  %v4880_v52 = vld [vmem:[%s6767_s29 + $0x8] sm:$0xff] }
0x12b3   :  { %v5147_v6 = vpop.eup %5146 }
0x12b4   :  { %v3228_v31 = vmul.f32 %v5147_v6, %v5143_v30  ;;  %v4879_v6 = vld [vmem:[%s6767_s29] sm:$0xff] }
0x12b6   :  { %v3287_v47 = vpack.c.bf16 %v3228_v31, %v3228_v31  ;;  %v4885_v31 = vld [vmem:[%s5754_s12] sm:$0xff] }
0x12b8   :  { %4695 = vmatmul.msk.bf16.vlgmr.msrb.gmra.mxu0 %vm1662_vm13, %v3287_v47  ;;  %4697 = vmatmul.msk.bf16.vlgmr.msrb.gmra.mxu2 %vm1662_vm13, %v3287_v47 }
0x12b9   :  { %3553 = vmatpush.bf16.msrb.mxu0 %v4878_v27  ;;  %3641 = vmatpush.bf16.msrb.mxu2 %v4880_v52 }
0x12bd   :  { %3554 = vmatpush.bf16.msrb.mxu0 %v4877_v63  ;;  %3642 = vmatpush.bf16.msrb.mxu2 %v4879_v6 }
0x12c8   :  { %4721 = vmatmul.msk.bf16.vlgmr.msra.gmra.mxu2 %vm455_vm3, %v6469_v59  ;;  %v4881_v59 = vld [vmem:[%s6767_s29 + $0x10] sm:$0xff] }
0x12c9   :  { %3603 = vmatpush.bf16.msrb.mxu1 %v4881_v59 }
0x12e1   :  { %v3334_v19 = vpop.f32.mrf.mxu1 }
0x12e2   :  { %v3354_v46 = vpack.c.bf16 %v3334_v19, %v3334_v19 }
0x12e4   :  { %4698 = vmatmul.msk.bf16.vlgmr.msrb.gmra.mxu3 %vm388_vm1, %v3354_v46 }
0x12e7   :  { %v3300_v61 = vpop.f32.mrf.mxu2 }
0x12e8   :  { %v3473_v51 = vmul.f32 %v3300_v61, %v6448_v42  ;;  %v3403_v24 = vpack.c.bf16 %v3300_v61, %v3300_v61 }
0x12e9   :  { %v3336_v12 = vpop.f32.mrf.mxu1 }
0x12ea   :  { %v3480_v21 = vpack.c.bf16 %v3473_v51, %v3473_v51  ;;  %v3407_v36 = vunpack.c.l.b16 %v3403_v24 }
0x12ec   :  { %v3484_v40 = vunpack.c.l.b16 %v3480_v21 }
0x12ef   :  { %v3302_v49 = vpop.f32.mrf.mxu2 }
0x1335   :  { %v3316_v17 = vpop.f32.mrf.mxu0 }
0x1336   :  { %v3404_v22 = vpack.c.bf16 %v3316_v17, %v3316_v17  ;;  %v3474_v5 = vmul.f32 %v3316_v17, %v6462_v50 }
0x1338   :  { %v3408_v29 = vunpack.c.l.b16 %v3404_v22  ;;  %v3481_v14 = vpack.c.bf16 %v3474_v5, %v3474_v5 }
0x133a   :  { %v3409_v43 = vpack.c.b16 %v3408_v29, %v3407_v36  ;;  %v3485_v10 = vunpack.c.l.b16 %v3481_v14  ;;  %v3789_v14 = vpack.c.bf16 %v6509_v45, %v6509_v45 }
0x133b   :  { %v3350_v25 = vpop.f32.mrf.mxu2 }
0x133c   :  { %v3486_v33 = vpack.c.b16 %v3485_v10, %v3484_v40  ;;  %v3355_v54 = vpack.c.bf16 %v3350_v25, %v3350_v25  ;;  %4712 = vmatmul.msk.bf16.vlgmr.msra.gmra.mxu1 %vm455_vm3, %v3409_v43  ;;  %v3809_v40 = vunpack.c.l.b16 %v3789_v14  ;;  %v3791_v25 = vpack.c.bf16 %v6523_v56, %v6523_v56 }
0x133d   :  { %v3318_v0 = vpop.f32.mrf.mxu0  ;;  %3774 = vmatpush.bf16.msra.mxu1 %v4884_v60  ;;  %v3788_v60 = vpack.c.bf16 %v6504_v57, %v6504_v57 }
0x133e   :  { %4699 = vmatmul.msk.bf16.vlgmr.msra.gmra.mxu0 %vm388_vm1, %v3355_v54  ;;  %4734 = vmatmul.msk.bf16.vlgmr.msra.gmra.mxu3 %vm455_vm3, %v3486_v33  ;;  %v3790_v33 = vpack.c.bf16 %v6518_v9, %v6518_v9  ;;  %v3811_v54 = vunpack.c.l.b16 %v3791_v25 }
0x133f   :  { %v3808_v43 = vunpack.c.l.b16 %v3788_v60 }
0x1340   :  { %v3810_v0 = vunpack.c.l.b16 %v3790_v33 }
0x1341   :  { %3775 = vmatpush.bf16.msra.mxu1 %v4883_v20  ;;  %v6572_v10 = vpack.c.b16 %v3809_v40, %v3808_v43 }
0x1342   :  { %v6580_v20 = vpack.c.b16 %v3811_v54, %v3810_v0 }
0x1343   :  { %v3352_v34 = vpop.f32.mrf.mxu2 }
0x134b   :  { %v3468_v47 = vpop.f32.mrf.mxu2 }
0x134c   :  { %4760 = vmatmul.msk.bf16.vlgmr.msrb.gmra.mxu1 %vm455_vm3, %v5851_v7 }
0x1353   :  { %v3470_v39 = vpop.f32.mrf.mxu2 }
0x135c   :  { %4780 = vmatmul.msk.bf16.vlgmr.msra.gmra.mxu1 %vm455_vm3, %v3752_v62  ;;  %v3649_v62 = vld [vmem:[%s6771_s9] sm:$0xff] }
0x135d   :  { %v3653_v27 = vpack.c.bf16 %v3649_v62, %v3649_v62 }
0x1367   :  { %v3371_v23 = vpop.f32.mrf.mxu3 }
0x1368   :  { %v3518_v26 = vmul.f32 %v3371_v23, %v6448_v42  ;;  %v3650_v23 = vld [vmem:[%s6771_s9 + $0x8] sm:$0xff] }
0x1369   :  { %v3654_v63 = vpack.c.bf16 %v3650_v23, %v3650_v23 }
0x136a   :  { %v3525_v4 = vpack.c.bf16 %v3518_v26, %v3518_v26 }
0x136c   :  { %v3529_v41 = vunpack.c.l.b16 %v3525_v4  ;;  %v3661_v4 = vunpack.c.l.b16 %v3653_v27  ;;  %v5007_v27 = vld [vmem:[#allocation16] ss:$0 sm:$0xff] }
0x136f   :  { %v3373_v44 = vpop.f32.mrf.mxu3 }
0x13b9   :  { %v3434_v30 = vpop.f32.mrf.mxu1 }
0x13ba   :  { %v3469_v46 = vadd.f32 %v3468_v47, %v3434_v30 }
0x13bb   :  { %v3390_v1 = vpop.f32.mrf.mxu0 }
0x13bc   :  { %v3519_v7 = vmul.f32 %v3390_v1, %v6462_v50  ;;  %v4886_v50 = vld [vmem:[%s5754_s12 + $0x8] sm:$0xff]  ;;  %s6770_s12 = sld [smem:[#allocation35_spill]] }
0x13bd   :  { %3838 = vmatpush.bf16.msra.mxu2 %v4886_v50 }
0x13be   :  { %v3526_v11 = vpack.c.bf16 %v3519_v7, %v3519_v7  ;;  %v3662_v7 = vunpack.c.l.b16 %v3654_v63 }
0x13c0   :  { %v3530_v15 = vunpack.c.l.b16 %v3526_v11  ;;  %v3651_v11 = vld [vmem:[%s6771_s9 + $0x10] sm:$0xff] }
0x13c1   :  { %v3436_v16 = vpop.f32.mrf.mxu1  ;;  %3839 = vmatpush.bf16.msra.mxu2 %v4885_v31  ;;  %v3511_v19 = vpop.f32.mrf.mxu3 }
0x13c2   :  { %v3531_v32 = vpack.c.b16 %v3530_v15, %v3529_v41  ;;  %v3516_v12 = vadd.f32 %v3511_v19, %v3469_v46  ;;  %v3471_v8 = vadd.f32 %v3470_v39, %v3436_v16  ;;  %v5003_v34 = vld [vmem:[%s6770_s12] ss:$0 sm:$0xff]  ;;  %v3652_v41 = vld [vmem:[%s6771_s9 + $0x18] sm:$0xff] }
0x13c3   :  { %v3392_v3 = vpop.f32.mrf.mxu0 }
0x13c4   :  { %4747 = vmatmul.msk.bf16.vlgmr.msrb.gmra.mxu0 %vm455_vm3, %v3531_v32  ;;  %v3663_v3 = vpack.c.b16 %v3662_v7, %v3661_v4 }
0x13c9   :  { %v3605_v38 = vpop.f32.mrf.mxu1  ;;  %v3513_v58 = vpop.f32.mrf.mxu3 }
0x13ca   :  { %v3517_v2 = vadd.f32 %v3513_v58, %v3471_v8  ;;  %v3606_v44 = vadd.f32 %v5003_v34, %v3605_v38 }
0x13cc   :  { %v3611_v26 = vperm.slane %v3606_v44, 0  ;;  %v3610_v15 = vrot.slane %v3606_v44, 1 }
0x13ce   :  { %v3612_v52 = vperm.slane %v3610_v15, 0 }
0x13d1   :  { %v3607_v37 = vpop.f32.mrf.mxu1 }
0x13d2   :  { %v3655_v37 = vpack.c.bf16 %v3651_v11, %v3651_v11 }
0x13d4   :  { %v3686_v50 = vunpack.c.l.b16 %v3655_v37 }
0x13d9   :  { %v6560_v42 = vpop.f32.mrf.mxu1 }
0x13e1   :  { %v3779_v18 = vpop.f32.mrf.mxu1 }
0x13e2   :  { %v3656_v18 = vpack.c.bf16 %v3652_v41, %v3652_v41 }
0x13e4   :  { %v3687_v31 = vunpack.c.l.b16 %v3656_v18 }
0x13e6   :  { %v3688_v46 = vpack.c.b16 %v3687_v31, %v3686_v50 }
0x1441   :  { %v3556_v61 = vpop.f32.mrf.mxu0 }
0x1442   :  { %v3561_v49 = vadd.f32 %v3556_v61, %v3516_v12  ;;  %v5006_v12 = vld [vmem:[#allocation19] ss:$0 sm:$0xff] }
0x1444   :  { %v3567_v59 = vadd.f32 %v5005_v55, %v3561_v49 }
0x1446   :  { %v3573_v17 = vpack.c.bf16 %v3567_v59, %v3567_v59 }
0x1448   :  { %v3617_v5 = vunpack.c.l.b16 %v3573_v17  ;;  %v4887_v17 = vld [vmem:[%s6772_s14] sm:$0xff] }
0x1449   :  { %v3558_v51 = vpop.f32.mrf.mxu0 }
0x144a   :  { %v3562_v24 = vadd.f32 %v3558_v51, %v3517_v2 }
0x144c   :  { %v3568_v21 = vadd.f32 %v5005_v55, %v3562_v24  ;;  %v4888_v24 = vld [vmem:[%s6772_s14 + $0x8] sm:$0xff] }
0x144e   :  { %v3574_v22 = vpack.c.bf16 %v3568_v21, %v3568_v21 }
0x1450   :  { %v3618_v36 = vunpack.c.l.b16 %v3574_v22 }
0x1452   :  { %v3619_v29 = vpack.c.b16 %v3618_v36, %v3617_v5 }
0x1454   :  { %4769 = vmatmul.msk.bf16.vlgmr.msrb.gmra.mxu2 %vm455_vm3, %v3619_v29 }
0x1464   :  { %4789 = vmatmul.msk.bf16.vlgmr.msra.gmra.mxu2 %vm455_vm3, %v6572_v10 }
0x1474   :  { %4790 = vmatmul.msk.bf16.gmra.mxu2 %vm455_vm3, %v6580_v20 }
0x14d7   :  { %v3644_v30 = vpop.f32.mrf.mxu2 }
0x14d8   :  { %v3645_v1 = vadd.f32 %v3644_v30, %v3611_v26 }
0x14da   :  { %v3657_v16 = vpack.c.bf16 %v3645_v1, %v3645_v1 }
0x14dc   :  { %v3668_v32 = vsel %vm392_vm0, %v3657_v16, 0 }
0x14dd   :  { %3677 = vmatpush.bf16.msrb.mxu3 %v3668_v32 }
0x14df   :  { %v3646_v6 = vpop.f32.mrf.mxu2 }
0x14e0   :  { %v3647_v38 = vadd.f32 %v3646_v6, %v3612_v52  ;;  %4770 = vmatmul.msk.bf16.vlgmr.msrb.gmra.mxu3 %vm388_vm1, %v3663_v3 }
0x14e1   :  { %3893 = vmatpush.bf16.msra.mxu3 %v4888_v24 }
0x14e2   :  { %v3658_v47 = vpack.c.bf16 %v3647_v38, %v3647_v38 }
0x14e4   :  { %v3693_v19 = vsel %vm392_vm0, %v3658_v47, 0 }
0x14e5   :  { %3702 = vmatpush.bf16.msra.mxu0 %v3693_v19  ;;  %3894 = vmatpush.bf16.msra.mxu3 %v4887_v17  ;;  %v3712_v17 = vmul.f32 -1e+30, %v6252_v53 }
0x14e7   :  { %v3841_v61 = vpop.f32.mrf.mxu2 }
0x14e8   :  { %4771 = vmatmul.msk.bf16.vlgmr.msra.gmra.mxu0 %vm388_vm1, %v3688_v46  ;;  %v3842_v49 = vadd.f32 %v5006_v12, %v3841_v61 }
0x14ea   :  { %v3906_v39 = vpack.c.bf16 %v3842_v49, %v3842_v49 }
0x14ec   :  { %v3916_v2 = vunpack.c.l.b16 %v3906_v39 }
0x14ef   :  { %v3843_v55 = vpop.f32.mrf.mxu2 }
0x14f0   :  { %v3844_v58 = vadd.f32 %v5006_v12, %v3843_v55 }
0x14f2   :  { %v3907_v8 = vpack.c.bf16 %v3844_v58, %v3844_v58 }
0x14f4   :  { %v3917_v59 = vunpack.c.l.b16 %v3907_v8 }
0x14f6   :  { %v3918_v51 = vpack.c.b16 %v3917_v59, %v3916_v2 }
0x14f7   :  { %v3846_v41 = vpop.f32.mrf.mxu2 }
0x14f8   :  { %4086 = vrot.lane.b32.xlu0 %v3918_v51, %s5502_s7  ;;  %v3847_v50 = vadd.f32 %v5006_v12, %v3846_v41 }
0x14fa   :  { %v3908_v61 = vpack.c.bf16 %v3847_v50, %v3847_v50 }
0x14fc   :  { %v3948_v55 = vunpack.c.l.b16 %v3908_v61 }
0x14ff   :  { %v3848_v3 = vpop.f32.mrf.mxu2 }
0x1500   :  { %v3849_v6 = vadd.f32 %v5006_v12, %v3848_v3 }
0x1502   :  { %v3909_v19 = vpack.c.bf16 %v3849_v6, %v3849_v6 }
0x1504   :  { %v3949_v49 = vunpack.c.l.b16 %v3909_v19 }
0x1506   :  { %v3950_v39 = vpack.c.b16 %v3949_v49, %v3948_v55 }
0x1563   :  { %v6596_v21 = vpop.f32.mrf.mxu3 }
0x1564   :  { %v3792_v22 = vpack.c.bf16 %v6596_v21, %v6596_v21 }
0x1565   :  { %v6603_v14 = vpop.f32.mrf.mxu0 }
0x1566   :  { %v3863_v40 = vunpack.c.l.b16 %v3792_v22  ;;  %v3794_v54 = vpack.c.bf16 %v6603_v14, %v6603_v14  ;;  %v3984_v22 = vperm.slane %v3712_v17, 0 }
0x1568   :  { %v3865_v34 = vunpack.c.l.b16 %v3794_v54 }
0x156a   :  { %v4087_v5 = vpop.permute.xlu0 %4086 }
0x156b   :  { %v4092_v36 = vsel %vm455_vm3, %v4087_v5, 0  ;;  %v6601_v29 = vpop.f32.mrf.mxu3 }
0x156c   :  { %v3793_v60 = vpack.c.bf16 %v6601_v29, %v6601_v29  ;;  %4101 = vmatpush.bf16.xpose.msrb.mxu2 %v4092_v36 }
0x156d   :  { %v6608_v33 = vpop.f32.mrf.mxu0 }
0x156e   :  { %v3864_v43 = vunpack.c.l.b16 %v3793_v60  ;;  %v3795_v0 = vpack.c.bf16 %v6608_v33, %v6608_v33 }
0x1570   :  { %v3867_v25 = vpack.c.b16 %v3864_v43, %v3863_v40  ;;  %v3866_v62 = vunpack.c.l.b16 %v3795_v0 }
0x1572   :  { %4799 = vmatmul.msk.bf16.vlgmr.msra.gmra.mxu3 %vm455_vm3, %v3867_v25  ;;  %v3868_v23 = vpack.c.b16 %v3866_v62, %v3865_v34  ;;  %v3710_v62 = vrot.slane %v6252_v53, 1 }
0x1582   :  { %4800 = vmatmul.msk.bf16.gmra.mxu3 %vm455_vm3, %v3868_v23 }
0x15f5   :  { %v3896_v44 = vpop.f32.mrf.mxu3 }
0x15f6   :  { %v3897_v63 = vadd.f32 %v5007_v27, %v3896_v44 }
0x15f8   :  { %v3910_v30 = vpack.c.bf16 %v3897_v63, %v3897_v63 }
0x15fa   :  { %v3921_v7 = vunpack.c.l.b16 %v3910_v30 }
0x15fd   :  { %v3898_v26 = vpop.f32.mrf.mxu3 }
0x15fe   :  { %v3899_v1 = vadd.f32 %v5007_v27, %v3898_v26 }
0x1600   :  { %v3911_v4 = vpack.c.bf16 %v3899_v1, %v3899_v1 }
0x1602   :  { %v3922_v11 = vunpack.c.l.b16 %v3911_v4 }
0x1604   :  { %v3923_v15 = vpack.c.b16 %v3922_v11, %v3921_v7 }
0x1605   :  { %v3901_v16 = vpop.f32.mrf.mxu3 }
0x1606   :  { %3924 = vrot.lane.b32.xlu2 %v3923_v15, %s5502_s7  ;;  %4805 = vmatmul.msk.bf16.vlgmr.msrb.gmra.mxu2 %vm455_vm3, %v3923_v15  ;;  %v3902_v32 = vadd.f32 %v5007_v27, %v3901_v16 }
0x1608   :  { %v3912_v18 = vpack.c.bf16 %v3902_v32, %v3902_v32 }
0x160a   :  { %v3953_v31 = vunpack.c.l.b16 %v3912_v18 }
0x160d   :  { %v3903_v37 = vpop.f32.mrf.mxu3 }
0x160e   :  { %v3904_v52 = vadd.f32 %v5007_v27, %v3903_v37 }
0x1610   :  { %v3913_v38 = vpack.c.bf16 %v3904_v52, %v3904_v52 }
0x1612   :  { %v3954_v47 = vunpack.c.l.b16 %v3913_v38 }
0x1614   :  { %v3955_v46 = vpack.c.b16 %v3954_v47, %v3953_v31 }
0x1616   :  { %3956 = vrot.lane.b32.xlu1 %v3955_v46, %s5502_s7 }
0x161e   :  { %4108 = vrot.lane.b32.xlu1 %v3950_v39, %s5502_s7 }
0x1660   :  { %v3925_v58 = vpop.permute.xlu2 %3924 }
0x1661   :  { %v3930_v8 = vsel %vm455_vm3, %v3925_v58, 0 }
0x1662   :  { %3939 = vmatpush.bf16.xpose.msrb.mxu0 %v3930_v8 }
0x1669   :  { %4801 = vmatmul.msk.bf16.vlgmr.msrb.gmra.mxu0 %vm455_vm3, %v3918_v51 }
0x166a   :  { %4056 = vmatpush.bf16.msra.mxu0 %v3867_v25 }
0x166e   :  { %4202 = vmatpush.bf16.msrb.mxu0 %v6572_v10 }
0x1688   :  { %v3957_v12 = vpop.permute.xlu1 %3956 }
0x1689   :  { %v3962_v2 = vsel %vm455_vm3, %v3957_v12, 0  ;;  %v4103_v43 = vpop.f32.mrf.mxu2 }
0x168a   :  { %3971 = vmatpush.bf16.xpose.msrb.mxu1 %v3962_v2  ;;  %v4130_v54 = vmul.f32 0.17677669, %v4103_v43 }
0x1690   :  { %v4109_v59 = vpop.permute.xlu1 %4108 }
0x1691   :  { %v4114_v24 = vsel %vm455_vm3, %v4109_v59, 0  ;;  %4802 = vmatmul.msk.bf16.vlgmr.msrb.gmra.mxu1 %vm455_vm3, %v3950_v39  ;;  %v4105_v7 = vpop.f32.mrf.mxu2 }
0x1692   :  { %4079 = vmatpush.bf16.msra.mxu1 %v3868_v23  ;;  %4123 = vmatpush.bf16.xpose.msrb.mxu3 %v4114_v24  ;;  %v3713_v23 = vmul.f32 -1e+30, %v3710_v62  ;;  %v4131_v41 = vmul.f32 0.17677669, %v4105_v7 }
0x1694   :  { %v3985_v44 = vperm.slane %v3713_v23, 0  ;;  %v4135_v3 = vadd.f32 %v4131_v41, %v3984_v22 }
0x1696   :  { %4225 = vmatpush.bf16.msrb.mxu1 %v6580_v20  ;;  %v4134_v20 = vadd.f32 %v4130_v54, %v3984_v22  ;;  %v4141_v18 = vsel %vm421_vm2, %v4135_v3, -inf }
0x1698   :  { %v4138_v34 = vsel %vm421_vm2, %v4134_v20, -inf }
0x1699   :  { %4806 = vmatmul.msk.bf16.vlgmr.msrb.gmra.mxu3 %vm455_vm3, %v3955_v46 }
0x16e6   :  { %v3941_v51 = vpop.f32.mrf.mxu0 }
0x16e7   :  { %v3978_v10 = vmul.f32 0.17677669, %v3941_v51 }
0x16e9   :  { %v3988_v5 = vadd.f32 %v3984_v22, %v3978_v10 }
0x16eb   :  { %v3992_v36 = vsel %vm421_vm2, %v3988_v5, -inf }
0x16ec   :  { %3993 = vmax.xlane.f32.xlu0 %v3992_v36 }
0x16ee   :  { %v3943_v60 = vpop.f32.mrf.mxu0 }
0x16ef   :  { %v3979_v40 = vmul.f32 0.17677669, %v3943_v60 }
0x16f1   :  { %v3989_v25 = vadd.f32 %v3984_v22, %v3979_v40 }
0x16f3   :  { %v3995_v0 = vsel %vm421_vm2, %v3989_v25, -inf }
0x16f4   :  { %3996 = vmax.xlane.f32.xlu1 %v3995_v0 }
0x16fc   :  { %4139 = vmax.xlane.f32.xlu1 %v4138_v34 }
0x170e   :  { %v3973_v27 = vpop.f32.mrf.mxu1 }
0x170f   :  { %v3980_v63 = vmul.f32 0.17677669, %v3973_v27 }
0x1711   :  { %v3990_v26 = vadd.f32 %v3985_v44, %v3980_v63 }
0x1713   :  { %v3998_v30 = vsel %vm421_vm2, %v3990_v26, -inf }
0x1714   :  { %3999 = vmax.xlane.f32.xlu2 %v3998_v30 }
0x1716   :  { %v3975_v1 = vpop.f32.mrf.mxu1 }
0x1717   :  { %v3981_v4 = vmul.f32 0.17677669, %v3975_v1 }
0x1719   :  { %v3991_v11 = vadd.f32 %v3985_v44, %v3981_v4 }
0x171b   :  { %v4001_v15 = vsel %vm421_vm2, %v3991_v11, -inf }
0x171c   :  { %v4125_v16 = vpop.f32.mrf.mxu3  ;;  %4002 = vmax.xlane.f32.xlu0 %v4001_v15 }
0x171d   :  { %v4132_v32 = vmul.f32 0.17677669, %v4125_v16 }
0x171f   :  { %v4136_v53 = vadd.f32 %v4132_v32, %v3985_v44 }
0x1721   :  { %v4144_v37 = vsel %vm421_vm2, %v4136_v53, -inf }
0x1722   :  { %4145 = vmax.xlane.f32.xlu2 %v4144_v37 }
0x1724   :  { %v4127_v52 = vpop.f32.mrf.mxu3  ;;  %4142 = vmax.xlane.f32.xlu0 %v4141_v18 }
0x1725   :  { %v4133_v6 = vmul.f32 0.17677669, %v4127_v52 }
0x1727   :  { %v4137_v38 = vadd.f32 %v4133_v6, %v3985_v44 }
0x1729   :  { %v4147_v50 = vsel %vm421_vm2, %v4137_v38, -inf }
0x172a   :  { %4148 = vmax.xlane.f32.xlu1 %v4147_v50 }
0x175f   :  { %v3994_v31 = vpop.xlane.xlu0 %3993 }
0x1760   :  { %v4004_v47 = vsub.f32 %v3988_v5, %v3994_v31 }
0x1762   :  { %v4008_v19 = vmul.f32 1.442695, %v4004_v47 }
0x1764   :  { %5148 = vpow2.f32 %v4008_v19 }
0x1767   :  { %v3997_v46 = vpop.xlane.xlu1 %3996 }
0x1768   :  { %v4005_v61 = vsub.f32 %v3989_v25, %v3997_v46 }
0x176a   :  { %v5149_v49 = vpop.eup %5148  ;;  %v4010_v55 = vmul.f32 1.442695, %v4005_v61 }
0x176b   :  { %v4016_v39 = vsel %vm421_vm2, %v5149_v49, 0.0 }
0x176c   :  { %5150 = vpow2.f32 %v4010_v55  ;;  %4017 = vadd.xlane.f32.xlu0 %v4016_v39 }
0x176f   :  { %v4140_v58 = vpop.xlane.xlu1 %4139 }
0x1770   :  { %v4150_v8 = vsub.f32 %v4134_v20, %v4140_v58 }
0x1772   :  { %v5151_v12 = vpop.eup %5150  ;;  %v4154_v2 = vmul.f32 1.442695, %v4150_v8 }
0x1773   :  { %v4019_v59 = vsel %vm421_vm2, %v5151_v12, 0.0 }
0x1774   :  { %5152 = vpow2.f32 %v4154_v2  ;;  %4020 = vadd.xlane.f32.xlu2 %v4019_v59 }
0x177a   :  { %v6639_v24 = vpop.eup %5152 }
0x177b   :  { %v4162_v17 = vsel %vm421_vm2, %v6639_v24, 0.0 }
0x177c   :  { %4163 = vadd.xlane.f32.xlu2 %v4162_v17 }
0x1787   :  { %v4000_v51 = vpop.xlane.xlu2 %3999 }
0x1788   :  { %v4006_v22 = vsub.f32 %v3990_v26, %v4000_v51 }
0x178a   :  { %v4012_v10 = vmul.f32 1.442695, %v4006_v22 }
0x178c   :  { %5154 = vpow2.f32 %v4012_v10 }
0x178f   :  { %v4003_v5 = vpop.xlane.xlu0 %4002 }
0x1790   :  { %v4007_v36 = vsub.f32 %v3991_v11, %v4003_v5 }
0x1792   :  { %v5155_v60 = vpop.eup %5154  ;;  %v4014_v40 = vmul.f32 1.442695, %v4007_v36 }
0x1793   :  { %v4022_v43 = vsel %vm421_vm2, %v5155_v60, 0.0 }
0x1794   :  { %5156 = vpow2.f32 %v4014_v40  ;;  %4023 = vadd.xlane.f32.xlu1 %v4022_v43 }
0x1795   :  { %v4146_v25 = vpop.xlane.xlu2 %4145 }
0x1796   :  { %v4152_v54 = vsub.f32 %v4136_v53, %v4146_v25 }
0x1797   :  { %v4143_v0 = vpop.xlane.xlu0 %4142 }
0x1798   :  { %v4158_v20 = vmul.f32 1.442695, %v4152_v54  ;;  %v4151_v34 = vsub.f32 %v4135_v3, %v4143_v0 }
0x179a   :  { %v5157_v62 = vpop.eup %5156  ;;  %5158 = vpow2.f32 %v4158_v20  ;;  %v4156_v23 = vmul.f32 1.442695, %v4151_v34 }
0x179b   :  { %v4025_v44 = vsel %vm421_vm2, %v5157_v62, 0.0 }
0x179c   :  { %5160 = vpow2.f32 %v4156_v23  ;;  %4026 = vadd.xlane.f32.xlu0 %v4025_v44 }
0x179d   :  { %v4149_v27 = vpop.xlane.xlu1 %4148 }
0x179e   :  { %v4153_v63 = vsub.f32 %v4137_v38, %v4149_v27 }
0x17a0   :  { %v5159_v26 = vpop.eup %5158  ;;  %v4160_v30 = vmul.f32 1.442695, %v4153_v63 }
0x17a1   :  { %v4168_v4 = vsel %vm421_vm2, %v5159_v26, 0.0 }
0x17a2   :  { %v5161_v1 = vpop.eup %5160  ;;  %5162 = vpow2.f32 %v4160_v30  ;;  %v5004_v30 = vld [vmem:[#allocation18] ss:$0 sm:$0xff] }
0x17a3   :  { %v4165_v7 = vsel %vm421_vm2, %v5161_v1, 0.0 }
0x17a4   :  { %4169 = vadd.xlane.f32.xlu0 %v4168_v4  ;;  %4166 = vadd.xlane.f32.xlu1 %v4165_v7 }
0x17a8   :  { %v5163_v11 = vpop.eup %5162 }
0x17a9   :  { %v4171_v41 = vsel %vm421_vm2, %v5163_v11, 0.0 }
0x17aa   :  { %4172 = vadd.xlane.f32.xlu2 %v4171_v41 }
0x17df   :  { %v4018_v15 = vpop.xlane.xlu0 %4017 }
0x17e0   :  { %5164 = vrcp.f32 %v4018_v15 }
0x17e6   :  { %v5165_v32 = vpop.eup %5164 }
0x17e7   :  { %v4021_v16 = vpop.xlane.xlu2 %4020  ;;  %v4032_v3 = vmul.f32 %v5165_v32, %v5149_v49 }
0x17e8   :  { %5166 = vrcp.f32 %v4021_v16 }
0x17e9   :  { %v4036_v37 = vpack.c.bf16 %v4032_v3, %v4032_v3 }
0x17eb   :  { %v4042_v6 = vunpack.c.l.b16 %v4036_v37 }
0x17ee   :  { %v5167_v53 = vpop.eup %5166 }
0x17ef   :  { %v4033_v18 = vmul.f32 %v5167_v53, %v5151_v12  ;;  %v4164_v47 = vpop.xlane.xlu2 %4163 }
0x17f1   :  { %v4037_v52 = vpack.c.bf16 %v4033_v18, %v4033_v18 }
0x17f3   :  { %v4043_v38 = vunpack.c.l.b16 %v4037_v52 }
0x17f5   :  { %v4044_v50 = vpack.c.b16 %v4043_v38, %v4042_v6 }
0x17f7   :  { %4803 = vmatmul.msk.bf16.vlgmr.msra.gmra.mxu0 %vm421_vm2, %v4044_v50 }
0x1807   :  { %v4024_v31 = vpop.xlane.xlu1 %4023 }
0x1808   :  { %5168 = vrcp.f32 %v4024_v31 }
0x180e   :  { %v5169_v46 = vpop.eup %5168 }
0x180f   :  { %v4027_v19 = vpop.xlane.xlu0 %4026  ;;  %v4034_v61 = vmul.f32 %v5169_v46, %v5155_v60 }
0x1810   :  { %5170 = vrcp.f32 %v4027_v19 }
0x1811   :  { %5172 = vrcp.f32 %v4164_v47  ;;  %v4038_v39 = vpack.c.bf16 %v4034_v61, %v4034_v61 }
0x1813   :  { %v4065_v17 = vunpack.c.l.b16 %v4038_v39 }
0x1816   :  { %v5171_v55 = vpop.eup %5170 }
0x1817   :  { %v4035_v49 = vmul.f32 %v5171_v55, %v5157_v62  ;;  %v4167_v58 = vpop.xlane.xlu1 %4166  ;;  %v4170_v8 = vpop.xlane.xlu0 %4169 }
0x1818   :  { %v5173_v12 = vpop.eup %5172  ;;  %5174 = vrcp.f32 %v4167_v58 }
0x1819   :  { %v4039_v2 = vpack.c.bf16 %v4035_v49, %v4035_v49  ;;  %5176 = vrcp.f32 %v4170_v8  ;;  %v4178_v59 = vmul.f32 %v5173_v12, %v6639_v24 }
0x181b   :  { %v4066_v51 = vunpack.c.l.b16 %v4039_v2  ;;  %v4182_v36 = vpack.c.bf16 %v4178_v59, %v4178_v59 }
0x181d   :  { %v4067_v22 = vpack.c.b16 %v4066_v51, %v4065_v17  ;;  %v4173_v10 = vpop.xlane.xlu2 %4172  ;;  %v4188_v25 = vunpack.c.l.b16 %v4182_v36 }
0x181e   :  { %v5175_v5 = vpop.eup %5174  ;;  %5178 = vrcp.f32 %v4173_v10 }
0x181f   :  { %v4179_v40 = vmul.f32 %v5175_v5, %v5161_v1  ;;  %4804 = vmatmul.msk.bf16.vlgmr.msra.gmra.mxu1 %vm421_vm2, %v4067_v22  ;;  %v5177_v60 = vpop.eup %5176  ;;  %v3778_v1 = vadd.f32 %v5004_v30, %v6560_v42 }
0x1820   :  { %v4180_v0 = vmul.f32 %v5177_v60, %v5159_v26 }
0x1821   :  { %v4183_v43 = vpack.c.bf16 %v4179_v40, %v4179_v40  ;;  %v3781_v4 = vsub.f32 0.0, %v3778_v1 }
0x1822   :  { %v4184_v23 = vpack.c.bf16 %v4180_v0, %v4180_v0 }
0x1823   :  { %v4189_v54 = vunpack.c.l.b16 %v4183_v43  ;;  %v3782_v7 = vmul.f32 1.442695, %v3781_v4 }
0x1824   :  { %v5179_v20 = vpop.eup %5178  ;;  %v4211_v27 = vunpack.c.l.b16 %v4184_v23 }
0x1825   :  { %v4190_v34 = vpack.c.b16 %v4189_v54, %v4188_v25  ;;  %v4181_v62 = vmul.f32 %v5179_v20, %v5163_v11  ;;  %5180 = vpow2.f32 %v3782_v7 }
0x1827   :  { %v4185_v24 = vpack.c.bf16 %v4181_v62, %v4181_v62  ;;  %4807 = vmatmul.msk.bf16.vlgmr.msrb.gmra.mxu0 %vm421_vm2, %v4190_v34 }
0x1829   :  { %v4212_v44 = vunpack.c.l.b16 %v4185_v24 }
0x182b   :  { %v4213_v63 = vpack.c.b16 %v4212_v44, %v4211_v27  ;;  %v5181_v41 = vpop.eup %5180 }
0x182c   :  { %v3784_v26 = vadd.f32 1.0, %v5181_v41 }
0x182e   :  { %5182 = vrcp.f32 %v3784_v26 }
0x182f   :  { %4808 = vmatmul.msk.bf16.vlgmr.msrb.gmra.mxu1 %vm421_vm2, %v4213_v63 }
0x1834   :  { %v5183_v11 = vpop.eup %5182 }
0x1835   :  { %v4232_v3 = vperm.slane %v5183_v11, 0  ;;  %v3787_v37 = vrot.slane %v5183_v11, 1 }
0x1837   :  { %v4233_v42 = vperm.slane %v3787_v37, 0 }
0x1874   :  { %v4058_v15 = vpop.f32.mrf.mxu0 }
0x1875   :  { %v4236_v53 = vmul.f32 %v4232_v3, %v4058_v15 }
0x1877   :  { %v4240_v6 = vadd.f32 %v4236_v53, %v6504_v57 }
0x1879   :  { %v4244_v47 = vmul.f32 %v4240_v6, %v6214_v48 }
0x187c   :  { %v4060_v16 = vpop.f32.mrf.mxu0 }
0x187d   :  { %v4237_v31 = vmul.f32 %v4232_v3, %v4060_v16 }
0x187f   :  { %v4241_v55 = vadd.f32 %v4237_v31, %v6509_v45 }
0x1881   :  { %v4245_v2 = vmul.f32 %v4241_v55, %v6227_v13 }
0x189c   :  { %v4081_v32 = vpop.f32.mrf.mxu1 }
0x189d   :  { %v4238_v19 = vmul.f32 %v4233_v42, %v4081_v32 }
0x189f   :  { %v4242_v58 = vadd.f32 %v4238_v19, %v6518_v9 }
0x18a4   :  { %v4083_v18 = vpop.f32.mrf.mxu1  ;;  %v4204_v52 = vpop.f32.mrf.mxu0 }
0x18a5   :  { %v4248_v38 = vmul.f32 %v4232_v3, %v4204_v52  ;;  %v4239_v45 = vmul.f32 %v4233_v42, %v4083_v18 }
0x18a7   :  { %v4252_v50 = vadd.f32 %v4248_v38, %v6596_v21  ;;  %v4243_v10 = vadd.f32 %v4239_v45, %v6523_v56 }
0x18a9   :  { %v4256_v46 = vmul.f32 %v4252_v50, %v6214_v48  ;;  %v4246_v48 = vmul.f32 %v4242_v58, %v6262_v35  ;;  %v4247_v5 = vmul.f32 %v4243_v10, %v6283_v28 }
0x18ab   :  { %v4260_v61 = vadd.f32 %v4256_v46, %v4244_v47 }
0x18ac   :  { %v4206_v39 = vpop.f32.mrf.mxu0  ;;  %v4227_v49 = vpop.f32.mrf.mxu1 }
0x18ad   :  { %4264 = vst.msk [vmem:[%s5759_s24] sm:$0xff] %vm455_vm3, %v4260_v61  ;;  %v4249_v57 = vmul.f32 %v4232_v3, %v4206_v39  ;;  %v4250_v8 = vmul.f32 %v4233_v42, %v4227_v49 }
0x18af   :  { %v4253_v21 = vadd.f32 %v4249_v57, %v6601_v29  ;;  %v4254_v12 = vadd.f32 %v4250_v8, %v6603_v14 }
0x18b1   :  { %v4257_v59 = vmul.f32 %v4253_v21, %v6227_v13  ;;  %v4258_v17 = vmul.f32 %v4254_v12, %v6262_v35 }
0x18b3   :  { %v4261_v9 = vadd.f32 %v4257_v59, %v4245_v2  ;;  %v4262_v51 = vadd.f32 %v4258_v17, %v4246_v48 }
0x18b4   :  { %v4229_v22 = vpop.f32.mrf.mxu1 }
0x18b5   :  { %4265 = vst.msk [vmem:[%s5759_s24 + $0x8] sm:$0xff] %vm455_vm3, %v4261_v9  ;;  %v4251_v29 = vmul.f32 %v4233_v42, %v4229_v22 }
0x18b6   :  { %4266 = vst.msk [vmem:[%s5759_s24 + $0x10] sm:$0xff] %vm455_vm3, %v4262_v51 }
0x18b7   :  { %v4255_v14 = vadd.f32 %v4251_v29, %v6608_v33 }
0x18b9   :  { %v4259_v36 = vmul.f32 %v4255_v14, %v6283_v28 }
0x18bb   :  { %v4263_v40 = vadd.f32 %v4259_v36, %v4247_v5 }
0x18bd   :  { %4267 = vst.msk [vmem:[%s5759_s24 + $0x18] sm:$0xff] %vm455_vm3, %v4263_v40 }
0x18be   :  { %4281 = vsyncpa [#allocation6], 1 }
0x18bf   :  { %4282 = vsyncpa [#allocation8], 1 }
0x18c0   :  { %4283 = vsyncpa [#allocation11], 1 }
0x18c1   :  { %4284 = vsyncpa [#allocation14], 1 }
0x18c2   :  { %4285 = vsyncpa [#allocation17], 1 }
0x18c3   :  { %4286 = vsyncpa [#allocation20], 1 }

</bundles_post_ra>
